<compile_context>
chip_gen: v6e
topology: v6e:2x2x1
jax: 0.10.0
libtpu: 0.0.40
codegen_flags: <defaults>
</compile_context>

<pallas_src>
import functools

import numpy as np
import jax
import jax.numpy as jnp
from jax.experimental import pallas as pl
from jax.experimental.pallas import tpu as pltpu

LRELU_SLOPE = 0.1

_HALO = 32           # sublane halo rows per time tile (>= max taps - 1 = 14)
_T_TILE_MAX = 512    # time-tile cap (footprint-sized: ~15 MiB worst case/step)
_CO_TILE_MAX = 512   # output-channel tile cap for dense layers

# DiscriminatorS conv configs: (in_ch, out_ch, kernel, stride, groups, padding)
_DISC_S_CONVS = [
    (1,    16,   15, 1, 1,   7),
    (16,   64,   41, 4, 4,   20),
    (64,   256,  41, 4, 16,  20),
    (256,  1024, 41, 4, 64,  20),
    (1024, 1024, 41, 4, 256, 20),
    (1024, 1024, 5,  1, 1,   2),
]
_DISC_S_POST = (1024, 1, 3, 1, 1, 1)


def _round_up(x, m):
    return ((x + m - 1) // m) * m


def _cdiv(a, b):
    return -(-a // b)


def _tpu_vmem_capacity():
    try:
        info = pltpu.get_tpu_info()
        cap = getattr(info, "vmem_capacity_bytes", None)
        if cap:
            return int(cap)
    except Exception:
        pass
    return None


_VMEM_CAP = _tpu_vmem_capacity()
# Scoped-VMEM budget: generous on 128 MiB chips, safe fallback elsewhere (v7x: 64 MiB).
_VMEM_LIMIT = min(96 * 2**20, (_VMEM_CAP * 3) // 4) if _VMEM_CAP else 48 * 2**20


# --------------------------- Pallas kernel ---------------------------------- #

def _conv_tap_kernel(w_ref, x_ref, h_ref, b_ref, o_ref, acc_ref, *, taps, lrelu):
    """Stride-folded conv tile: one (channel-block/group-block, batch, time-tile) step.

    w_ref  : (Q, CI, CO)   bf16  tap-major weight slab (resident across b/j steps)
    x_ref  : (t_tile, CI)  bf16  main time tile (time on sublanes, channels on lanes)
    h_ref  : (_HALO, CI)   bf16  next rows (halo) of the same batch element
    b_ref  : (1, CO)       f32   bias
    o_ref  : (t_tile, CO)        output tile (lane-dense)
    acc_ref: (t_tile, CO)  f32   scratch accumulator
    """
    t_tile = o_ref.shape[0]
    # tap 0 initializes the accumulator with the bias folded in
    acc_ref[...] = (
        jnp.dot(x_ref[...], w_ref[0], preferred_element_type=jnp.float32)
        + b_ref[...])
    for q in range(1, taps):                       # static unroll (<= 14)
        wq = w_ref[q]
        # rows [q, t_tile) of the window come from the main tile
        acc_ref[pl.ds(0, t_tile - q), :] += jnp.dot(
            x_ref[pl.ds(q, t_tile - q), :], wq, preferred_element_type=jnp.float32)
        # the last q output rows need the first q halo rows
        acc_ref[pl.ds(t_tile - q, q), :] += jnp.dot(
            h_ref[pl.ds(0, q), :], wq, preferred_element_type=jnp.float32)
    acc = acc_ref[...]
    if lrelu:
        acc = jnp.where(acc >= 0.0, acc, LRELU_SLOPE * acc)
    o_ref[...] = acc.astype(o_ref.dtype)


# ------------------------------ wrappers ------------------------------------ #

def conv_dense(x, w_eff, bias, *, stride, padding, K, lrelu,
               out_dtype=jnp.bfloat16):
    """Dense (or small-group densified) conv1d.  x: (B, T, C_in) time-on-sublane."""
    B, T, C_in = x.shape
    Q, C_in_eff, C_out = w_eff.shape
    s = stride
    assert C_in_eff == s * C_in
    T_out = (T + 2 * padding - K) // s + 1

    t_tile = min(_round_up(T_out, _HALO), _T_TILE_MAX)
    n_t = _cdiv(T_out, t_tile)
    T_ph = n_t * t_tile + _HALO
    back = s * T_ph - T - padding
    assert back >= 0
    # pad once; folding stride phases into lanes is a pure (free) reshape
    x_ph = jnp.pad(x.astype(jnp.bfloat16), ((0, 0), (padding, back), (0, 0)))
    x_ph = x_ph.reshape(B, T_ph, C_in_eff)

    co_tile = C_out if C_out <= _CO_TILE_MAX else _CO_TILE_MAX
    assert C_out % co_tile == 0
    n_co = C_out // co_tile

    kernel = functools.partial(_conv_tap_kernel, taps=Q, lrelu=lrelu)
    out = pl.pallas_call(
        kernel,
        out_shape=jax.ShapeDtypeStruct((B, n_t * t_tile, C_out), out_dtype),
        grid_spec=pltpu.PrefetchScalarGridSpec(
            num_scalar_prefetch=0,
            grid=(n_co, B, n_t),                     # co outermost: weights fetched once/co
            in_specs=[
                pl.BlockSpec((Q, C_in_eff, co_tile), lambda co, b, j: (0, 0, co)),
                pl.BlockSpec((None, t_tile, C_in_eff), lambda co, b, j: (b, j, 0)),
                pl.BlockSpec((None, _HALO, C_in_eff),
                             lambda co, b, j: (b, (j + 1) * (t_tile // _HALO), 0)),
                pl.BlockSpec((1, co_tile), lambda co, b, j: (0, co)),
            ],
            out_specs=pl.BlockSpec((None, t_tile, co_tile),
                                   lambda co, b, j: (b, j, co)),
            scratch_shapes=[pltpu.VMEM((t_tile, co_tile), jnp.float32)],
        ),
        compiler_params=pltpu.CompilerParams(
            dimension_semantics=("parallel", "parallel", "parallel"),
            vmem_limit_bytes=_VMEM_LIMIT),
    )(w_eff, x_ph, x_ph, bias)
    return out[:, :T_out, :]


def conv_grouped(x, w_bd, bias, *, stride, padding, K, groups, gb, lrelu,
                 out_dtype=jnp.bfloat16):
    """Grouped conv1d (groups > 4): grid over block-diagonal group-blocks."""
    B, T, C_in = x.shape
    G, s = groups, stride
    Cg_in = C_in // G
    n_g, Q, CI_b, CO_b = w_bd.shape
    assert n_g == G // gb and CI_b == gb * Cg_in * s
    Cg_out = CO_b // gb
    C_out = G * Cg_out
    T_out = (T + 2 * padding - K) // s + 1

    t_tile = min(_round_up(T_out, _HALO), _T_TILE_MAX)
    n_t = _cdiv(T_out, t_tile)
    T_ph = n_t * t_tile + _HALO
    back = s * T_ph - T - padding
    assert back >= 0
    x_ph = jnp.pad(x.astype(jnp.bfloat16), ((0, 0), (padding, back), (0, 0)))
    # group-major lane order (g, phase, cg) so each group-block is a contiguous
    # 128/512-lane slice -- the only data-movement glue on this path.
    x_ph = (x_ph.reshape(B, T_ph, s, G, Cg_in)
                .transpose(0, 1, 3, 2, 4)
                .reshape(B, T_ph, C_in * s))

    kernel = functools.partial(_conv_tap_kernel, taps=Q, lrelu=lrelu)
    out = pl.pallas_call(
        kernel,
        out_shape=jax.ShapeDtypeStruct((B, n_t * t_tile, C_out), out_dtype),
        grid_spec=pltpu.PrefetchScalarGridSpec(
            num_scalar_prefetch=0,
            grid=(n_g, B, n_t),                      # group-block outermost
            in_specs=[
                pl.BlockSpec((None, Q, CI_b, CO_b), lambda g, b, j: (g, 0, 0, 0)),
                pl.BlockSpec((None, t_tile, CI_b), lambda g, b, j: (b, j, g)),
                pl.BlockSpec((None, _HALO, CI_b),
                             lambda g, b, j: (b, (j + 1) * (t_tile // _HALO), g)),
                pl.BlockSpec((1, CO_b), lambda g, b, j: (0, g)),
            ],
            out_specs=pl.BlockSpec((None, t_tile, CO_b),
                                   lambda g, b, j: (b, j, g)),
            scratch_shapes=[pltpu.VMEM((t_tile, CO_b), jnp.float32)],
        ),
        compiler_params=pltpu.CompilerParams(
            dimension_semantics=("parallel", "parallel", "parallel"),
            vmem_limit_bytes=_VMEM_LIMIT),
    )(w_bd, x_ph, x_ph, bias)
    return out[:, :T_out, :]


def apply_conv(p, x, *, lrelu, out_dtype=jnp.bfloat16):
    if p["kind"] == "dense":
        return conv_dense(x, p["w"], p["b"], stride=p["stride"],
                          padding=p["padding"], K=p["K"], lrelu=lrelu,
                          out_dtype=out_dtype)
    return conv_grouped(x, p["w"], p["b"], stride=p["stride"],
                        padding=p["padding"], K=p["K"], groups=p["groups"],
                        gb=p["gb"], lrelu=lrelu, out_dtype=out_dtype)


# ------------------------------ param setup --------------------------------- #

def make_dense_conv_params(w, b, *, stride, padding, groups):
    """Dense path (groups <= 4): small block-diag densify + stride/tap folding.

    Produces w_eff[q, p*C_in + ci, co] = w[co, ci_local, q*s + p]  (zero elsewhere).
    """
    C_out, Cg_in, K = w.shape
    C_in = Cg_in * groups
    Cg_out = C_out // groups
    s = stride
    Q = -(-K // s)
    wnp = np.asarray(w, np.float32)
    w_eff = np.zeros((Q, s * C_in, C_out), np.float32)
    for k in range(K):
        q, p = divmod(k, s)
        for g in range(groups):
            rows = slice(p * C_in + g * Cg_in, p * C_in + (g + 1) * Cg_in)
            cols = slice(g * Cg_out, (g + 1) * Cg_out)
            w_eff[q, rows, cols] = wnp[cols, :, k].T
    return dict(kind="dense",
                w=jnp.asarray(w_eff, jnp.bfloat16),
                b=jnp.asarray(np.asarray(b, np.float32).reshape(1, C_out)),
                stride=s, padding=padding, K=K)


def make_grouped_conv_params(w, b, *, stride, padding, groups):
    """Grouped path (groups > 4): block-diagonal weights over gb-group blocks.

    gb is chosen so the per-step input / output lane blocks are 128-lane dense
    (legal, unmasked stores) while keeping the weight blocks small.
    """
    C_out, Cg_in, K = w.shape
    G, s = groups, stride
    Cg_out = C_out // G
    Q = -(-K // s)
    gb = min(G, max(128 // Cg_out, 128 // (Cg_in * s), 1))
    assert G % gb == 0
    n_g = G // gb
    CI_b = gb * Cg_in * s
    CO_b = gb * Cg_out
    assert CO_b % 128 == 0 or CO_b == C_out
    assert CI_b % 128 == 0 or CI_b == C_in_total(s, Cg_in, G)

    wnp = np.asarray(w, np.float32)
    w_bd = np.zeros((n_g, Q, CI_b, CO_b), np.float32)
    for gi in range(n_g):
        for gl in range(gb):
            g = gi * gb + gl
            for k in range(K):
                q, p = divmod(k, s)
                rows = slice(gl * s * Cg_in + p * Cg_in,
                             gl * s * Cg_in + (p + 1) * Cg_in)
                cols = slice(gl * Cg_out, (gl + 1) * Cg_out)
                w_bd[gi, q, rows, cols] = wnp[g * Cg_out:(g + 1) * Cg_out, :, k].T
    return dict(kind="grouped",
                w=jnp.asarray(w_bd, jnp.bfloat16),
                b=jnp.asarray(np.asarray(b, np.float32).reshape(1, C_out)),
                stride=s, padding=padding, K=K, groups=G, gb=gb)


def C_in_total(s, Cg_in, G):
    return s * Cg_in * G


def init_discriminator_s(key):
    """Deterministic synthetic weights (weight_norm at init == plain weight)."""
    specs = _DISC_S_CONVS + [_DISC_S_POST]
    keys = jax.random.split(key, len(specs))
    layers = []
    for kk, (cin, cout, ksz, stride, groups, pad) in zip(keys, specs):
        kw, kb = jax.random.split(kk)
        fan_in = (cin // groups) * ksz
        bound = 1.0 / np.sqrt(fan_in)
        w = jax.random.uniform(kw, (cout, cin // groups, ksz),
                               jnp.float32, -bound, bound)
        b = jax.random.uniform(kb, (cout,), jnp.float32, -bound, bound)
        if groups > 4:
            layers.append(make_grouped_conv_params(w, b, stride=stride,
                                                   padding=pad, groups=groups))
        else:
            layers.append(make_dense_conv_params(w, b, stride=stride,
                                                 padding=pad, groups=groups))
    return {"convs": layers[:-1], "post": layers[-1]}


# -------------------------------- forward ----------------------------------- #

def avg_pool_4_2_2(wav):
    """AvgPool1d(kernel=4, stride=2, padding=2), count_include_pad=True.

    Memory-bound shift-and-add over the raw waveform; left to XLA (single
    fused pass) rather than an (under-utilized) MXU kernel.
    """
    B, T = wav.shape
    T1 = T // 2 + 1
    xp = jnp.pad(wav, ((0, 0), (2, 2)))
    return 0.25 * (xp[:, 0::2][:, :T1] + xp[:, 1::2][:, :T1]
                   + xp[:, 2::2][:, :T1] + xp[:, 3::2][:, :T1])


def discriminator_s_forward(params, x):
    # x: (B, T, 1) bf16 -- time on sublanes, channels on lanes
    fmap = []
    for p in params["convs"]:
        x = apply_conv(p, x, lrelu=True)
        fmap.append(x)
    x = apply_conv(params["post"], x, lrelu=False, out_dtype=jnp.float32)
    fmap.append(x)
    return x.reshape(x.shape[0], -1), fmap          # torch.flatten(x, 1, -1)


def multi_scale_discriminator_forward(disc_params, y, y_hat):
    B = y.shape[0]
    # real + generated share every layer's weight fetch (one pallas_call per layer)
    wav = jnp.concatenate([y, y_hat], axis=0)[:, 0, :]     # (2B, T) f32
    y_d_rs, y_d_gs, fmap_rs, fmap_gs = [], [], [], []
    for i, p in enumerate(disc_params):
        if i != 0:
            wav = avg_pool_4_2_2(wav)                      # AvgPool1d(4, 2, 2)
        x = wav[:, :, None].astype(jnp.bfloat16)           # (2B, T_i, 1)
        score, fmap = discriminator_s_forward(p, x)
        y_d_rs.append(score[:B])
        y_d_gs.append(score[B:])
        # present fmaps in the reference (B, C, T) layout
        fmap_rs.append([jnp.transpose(f[:B], (0, 2, 1)) for f in fmap])
        fmap_gs.append([jnp.transpose(f[B:], (0, 2, 1)) for f in fmap])
    return y_d_rs, y_d_gs, fmap_rs, fmap_gs


# ---------------------------------- main ------------------------------------ #

if __name__ == "__main__":
    key = jax.random.PRNGKey(0)
    k_y, k_yh, k_p = jax.random.split(key, 3)

    B, T = 2, 256
    y = jax.random.normal(k_y, (B, 1, T), jnp.float32)
    y_hat = jax.random.normal(k_yh, (B, 1, T), jnp.float32)

    disc_params = [init_discriminator_s(k) for k in jax.random.split(k_p, 3)]

    outs = multi_scale_discriminator_forward(disc_params, y, y_hat)
    jax.block_until_ready(outs)

    y_d_rs, y_d_gs, fmap_rs, fmap_gs = outs
    assert len(y_d_rs) == 3 and len(y_d_gs) == 3
    assert all(len(f) == 7 for f in fmap_rs) and all(len(f) == 7 for f in fmap_gs)
    assert all(bool(jnp.all(jnp.isfinite(s.astype(jnp.float32))))
               for s in y_d_rs + y_d_gs)
    assert all(bool(jnp.all(jnp.isfinite(f.astype(jnp.float32))))
               for fl in fmap_rs + fmap_gs for f in fl)
    print("KERNEL_OK")
</pallas_src>

<mosaic_0001>
module attributes {stable_mosaic.version = 11 : i64} {
  func.func @_conv_tap_kernel(%arg0: i32, %arg1: i32, %arg2: i32, %arg3: memref<15x1x16xbf16, #tpu.memory_space<vmem>>, %arg4: memref<1x256x1xbf16, #tpu.memory_space<vmem>>, %arg5: memref<1x32x1xbf16, #tpu.memory_space<vmem>>, %arg6: memref<1x16xf32, #tpu.memory_space<vmem>>, %arg7: memref<1x256x16xbf16, #tpu.memory_space<vmem>>, %arg8: memref<256x16xf32, #tpu.memory_space<vmem>>) attributes {dimension_semantics = [#tpu.dimension_semantics<parallel>, #tpu.dimension_semantics<parallel>, #tpu.dimension_semantics<parallel>], iteration_bounds = array<i64: 1, 4, 1>, scalar_prefetch = 0 : i64, scratch_operands = 1 : i64, tpu.core_type = #tpu.core_type<tc>, window_params = [{transform_indices = @transform_0, window_bounds = array<i64: 15, 1, 16>}, {transform_indices = @transform_1, window_bounds = array<i64: 1, 256, 1>}, {transform_indices = @transform_2, window_bounds = array<i64: 1, 32, 1>}, {transform_indices = @transform_3, window_bounds = array<i64: 1, 16>}, {transform_indices = @transform_4, window_bounds = array<i64: 1, 256, 16>}]} {
    %c0 = arith.constant 0 : index
    %c0_0 = arith.constant 0 : index
    %c0_1 = arith.constant 0 : index
    %0 = vector.load %arg4[%c0, %c0_0, %c0_1] : memref<1x256x1xbf16, #tpu.memory_space<vmem>>, vector<1x256x1xbf16>
    %1 = vector.shape_cast %0 : vector<1x256x1xbf16> to vector<256x1xbf16>
    %c0_2 = arith.constant 0 : index
    %c0_3 = arith.constant 0 : index
    %c0_4 = arith.constant 0 : index
    %2 = vector.load %arg3[%c0_2, %c0_3, %c0_4] : memref<15x1x16xbf16, #tpu.memory_space<vmem>>, vector<1x1x16xbf16>
    %3 = vector.shape_cast %2 : vector<1x1x16xbf16> to vector<1x16xbf16>
    %cst = arith.constant dense<0.000000e+00> : vector<256x16xf32>
    %4 = tpu.matmul %1, %3, %cst {dimension_numbers = #tpu.dot_dimension_numbers<[1], [0], [0], [1], [0, 0, 1, 1], [], []>} : vector<256x1xbf16>, vector<1x16xbf16>, vector<256x16xf32> -> vector<256x16xf32>
    %c0_5 = arith.constant 0 : index
    %c0_6 = arith.constant 0 : index
    %5 = vector.load %arg6[%c0_5, %c0_6] : memref<1x16xf32, #tpu.memory_space<vmem>>, vector<1x16xf32>
    %6 = vector.broadcast %5 : vector<1x16xf32> to vector<256x16xf32>
    %7 = arith.addf %4, %6 : vector<256x16xf32>
    %c0_7 = arith.constant 0 : index
    %c0_8 = arith.constant 0 : index
    %8 = vector.load %arg8[%c0_7, %c0_8] : memref<256x16xf32, #tpu.memory_space<vmem>>, vector<256x16xf32>
    tpu.vector_store %arg8[%c0_7, %c0_8], %7 {strides = array<i32>} : memref<256x16xf32, #tpu.memory_space<vmem>>, vector<256x16xf32>,
    %c1 = arith.constant 1 : index
    %c0_9 = arith.constant 0 : index
    %c0_10 = arith.constant 0 : index
    %9 = vector.load %arg3[%c1, %c0_9, %c0_10] : memref<15x1x16xbf16, #tpu.memory_space<vmem>>, vector<1x1x16xbf16>
    %10 = vector.shape_cast %9 : vector<1x1x16xbf16> to vector<1x16xbf16>
    %c0_11 = arith.constant 0 : index
    %c0_12 = arith.constant 0 : index
    %11 = vector.load %arg8[%c0_11, %c0_12] : memref<256x16xf32, #tpu.memory_space<vmem>>, vector<255x16xf32>
    %c0_13 = arith.constant 0 : index
    %c1_14 = arith.constant 1 : index
    %c0_15 = arith.constant 0 : index
    %12 = vector.load %arg4[%c0_13, %c1_14, %c0_15] : memref<1x256x1xbf16, #tpu.memory_space<vmem>>, vector<1x255x1xbf16>
    %13 = vector.shape_cast %12 : vector<1x255x1xbf16> to vector<255x1xbf16>
    %cst_16 = arith.constant dense<0.000000e+00> : vector<255x16xf32>
    %14 = tpu.matmul %13, %10, %cst_16 {dimension_numbers = #tpu.dot_dimension_numbers<[1], [0], [0], [1], [0, 0, 1, 1], [], []>} : vector<255x1xbf16>, vector<1x16xbf16>, vector<255x16xf32> -> vector<255x16xf32>
    %15 = arith.addf %11, %14 : vector<255x16xf32>
    %c0_17 = arith.constant 0 : index
    %c0_18 = arith.constant 0 : index
    %16 = vector.load %arg8[%c0_17, %c0_18] : memref<256x16xf32, #tpu.memory_space<vmem>>, vector<255x16xf32>
    tpu.vector_store %arg8[%c0_17, %c0_18], %15 {strides = array<i32>} : memref<256x16xf32, #tpu.memory_space<vmem>>, vector<255x16xf32>,
    %c255 = arith.constant 255 : index
    %c0_19 = arith.constant 0 : index
    %17 = vector.load %arg8[%c255, %c0_19] : memref<256x16xf32, #tpu.memory_space<vmem>>, vector<1x16xf32>
    %c0_20 = arith.constant 0 : index
    %c0_21 = arith.constant 0 : index
    %c0_22 = arith.constant 0 : index
    %18 = vector.load %arg5[%c0_20, %c0_21, %c0_22] : memref<1x32x1xbf16, #tpu.memory_space<vmem>>, vector<1x1x1xbf16>
    %19 = vector.shape_cast %18 : vector<1x1x1xbf16> to vector<1x1xbf16>
    %cst_23 = arith.constant dense<0.000000e+00> : vector<1x16xf32>
    %20 = tpu.matmul %19, %10, %cst_23 {dimension_numbers = #tpu.dot_dimension_numbers<[1], [0], [0], [1], [0, 0, 1, 1], [], []>} : vector<1x1xbf16>, vector<1x16xbf16>, vector<1x16xf32> -> vector<1x16xf32>
    %21 = arith.addf %17, %20 : vector<1x16xf32>
    %c255_24 = arith.constant 255 : index
    %c0_25 = arith.constant 0 : index
    %22 = vector.load %arg8[%c255_24, %c0_25] : memref<256x16xf32, #tpu.memory_space<vmem>>, vector<1x16xf32>
    tpu.vector_store %arg8[%c255_24, %c0_25], %21 {strides = array<i32>} : memref<256x16xf32, #tpu.memory_space<vmem>>, vector<1x16xf32>,
    %c2 = arith.constant 2 : index
    %c0_26 = arith.constant 0 : index
    %c0_27 = arith.constant 0 : index
    %23 = vector.load %arg3[%c2, %c0_26, %c0_27] : memref<15x1x16xbf16, #tpu.memory_space<vmem>>, vector<1x1x16xbf16>
    %24 = vector.shape_cast %23 : vector<1x1x16xbf16> to vector<1x16xbf16>
    %c0_28 = arith.constant 0 : index
    %c0_29 = arith.constant 0 : index
    %25 = vector.load %arg8[%c0_28, %c0_29] : memref<256x16xf32, #tpu.memory_space<vmem>>, vector<254x16xf32>
    %c0_30 = arith.constant 0 : index
    %c2_31 = arith.constant 2 : index
    %c0_32 = arith.constant 0 : index
    %26 = vector.load %arg4[%c0_30, %c2_31, %c0_32] : memref<1x256x1xbf16, #tpu.memory_space<vmem>>, vector<1x254x1xbf16>
    %27 = vector.shape_cast %26 : vector<1x254x1xbf16> to vector<254x1xbf16>
    %cst_33 = arith.constant dense<0.000000e+00> : vector<254x16xf32>
    %28 = tpu.matmul %27, %24, %cst_33 {dimension_numbers = #tpu.dot_dimension_numbers<[1], [0], [0], [1], [0, 0, 1, 1], [], []>} : vector<254x1xbf16>, vector<1x16xbf16>, vector<254x16xf32> -> vector<254x16xf32>
    %29 = arith.addf %25, %28 : vector<254x16xf32>
    %c0_34 = arith.constant 0 : index
    %c0_35 = arith.constant 0 : index
    %30 = vector.load %arg8[%c0_34, %c0_35] : memref<256x16xf32, #tpu.memory_space<vmem>>, vector<254x16xf32>
    tpu.vector_store %arg8[%c0_34, %c0_35], %29 {strides = array<i32>} : memref<256x16xf32, #tpu.memory_space<vmem>>, vector<254x16xf32>,
    %c254 = arith.constant 254 : index
    %c0_36 = arith.constant 0 : index
    %31 = vector.load %arg8[%c254, %c0_36] : memref<256x16xf32, #tpu.memory_space<vmem>>, vector<2x16xf32>
    %c0_37 = arith.constant 0 : index
    %c0_38 = arith.constant 0 : index
    %c0_39 = arith.constant 0 : index
    %32 = vector.load %arg5[%c0_37, %c0_38, %c0_39] : memref<1x32x1xbf16, #tpu.memory_space<vmem>>, vector<1x2x1xbf16>
    %33 = vector.shape_cast %32 : vector<1x2x1xbf16> to vector<2x1xbf16>
    %cst_40 = arith.constant dense<0.000000e+00> : vector<2x16xf32>
    %34 = tpu.matmul %33, %24, %cst_40 {dimension_numbers = #tpu.dot_dimension_numbers<[1], [0], [0], [1], [0, 0, 1, 1], [], []>} : vector<2x1xbf16>, vector<1x16xbf16>, vector<2x16xf32> -> vector<2x16xf32>
    %35 = arith.addf %31, %34 : vector<2x16xf32>
    %c254_41 = arith.constant 254 : index
    %c0_42 = arith.constant 0 : index
    %36 = vector.load %arg8[%c254_41, %c0_42] : memref<256x16xf32, #tpu.memory_space<vmem>>, vector<2x16xf32>
    tpu.vector_store %arg8[%c254_41, %c0_42], %35 {strides = array<i32>} : memref<256x16xf32, #tpu.memory_space<vmem>>, vector<2x16xf32>,
    %c3 = arith.constant 3 : index
    %c0_43 = arith.constant 0 : index
    %c0_44 = arith.constant 0 : index
    %37 = vector.load %arg3[%c3, %c0_43, %c0_44] : memref<15x1x16xbf16, #tpu.memory_space<vmem>>, vector<1x1x16xbf16>
    %38 = vector.shape_cast %37 : vector<1x1x16xbf16> to vector<1x16xbf16>
    %c0_45 = arith.constant 0 : index
    %c0_46 = arith.constant 0 : index
    %39 = vector.load %arg8[%c0_45, %c0_46] : memref<256x16xf32, #tpu.memory_space<vmem>>, vector<253x16xf32>
    %c0_47 = arith.constant 0 : index
    %c3_48 = arith.constant 3 : index
    %c0_49 = arith.constant 0 : index
    %40 = vector.load %arg4[%c0_47, %c3_48, %c0_49] : memref<1x256x1xbf16, #tpu.memory_space<vmem>>, vector<1x253x1xbf16>
    %41 = vector.shape_cast %40 : vector<1x253x1xbf16> to vector<253x1xbf16>
    %cst_50 = arith.constant dense<0.000000e+00> : vector<253x16xf32>
    %42 = tpu.matmul %41, %38, %cst_50 {dimension_numbers = #tpu.dot_dimension_numbers<[1], [0], [0], [1], [0, 0, 1, 1], [], []>} : vector<253x1xbf16>, vector<1x16xbf16>, vector<253x16xf32> -> vector<253x16xf32>
    %43 = arith.addf %39, %42 : vector<253x16xf32>
    %c0_51 = arith.constant 0 : index
    %c0_52 = arith.constant 0 : index
    %44 = vector.load %arg8[%c0_51, %c0_52] : memref<256x16xf32, #tpu.memory_space<vmem>>, vector<253x16xf32>
    tpu.vector_store %arg8[%c0_51, %c0_52], %43 {strides = array<i32>} : memref<256x16xf32, #tpu.memory_space<vmem>>, vector<253x16xf32>,
    %c253 = arith.constant 253 : index
    %c0_53 = arith.constant 0 : index
    %45 = vector.load %arg8[%c253, %c0_53] : memref<256x16xf32, #tpu.memory_space<vmem>>, vector<3x16xf32>
    %c0_54 = arith.constant 0 : index
    %c0_55 = arith.constant 0 : index
    %c0_56 = arith.constant 0 : index
    %46 = vector.load %arg5[%c0_54, %c0_55, %c0_56] : memref<1x32x1xbf16, #tpu.memory_space<vmem>>, vector<1x3x1xbf16>
    %47 = vector.shape_cast %46 : vector<1x3x1xbf16> to vector<3x1xbf16>
    %cst_57 = arith.constant dense<0.000000e+00> : vector<3x16xf32>
    %48 = tpu.matmul %47, %38, %cst_57 {dimension_numbers = #tpu.dot_dimension_numbers<[1], [0], [0], [1], [0, 0, 1, 1], [], []>} : vector<3x1xbf16>, vector<1x16xbf16>, vector<3x16xf32> -> vector<3x16xf32>
    %49 = arith.addf %45, %48 : vector<3x16xf32>
    %c253_58 = arith.constant 253 : index
    %c0_59 = arith.constant 0 : index
    %50 = vector.load %arg8[%c253_58, %c0_59] : memref<256x16xf32, #tpu.memory_space<vmem>>, vector<3x16xf32>
    tpu.vector_store %arg8[%c253_58, %c0_59], %49 {strides = array<i32>} : memref<256x16xf32, #tpu.memory_space<vmem>>, vector<3x16xf32>,
    %c4 = arith.constant 4 : index
    %c0_60 = arith.constant 0 : index
    %c0_61 = arith.constant 0 : index
    %51 = vector.load %arg3[%c4, %c0_60, %c0_61] : memref<15x1x16xbf16, #tpu.memory_space<vmem>>, vector<1x1x16xbf16>
    %52 = vector.shape_cast %51 : vector<1x1x16xbf16> to vector<1x16xbf16>
    %c0_62 = arith.constant 0 : index
    %c0_63 = arith.constant 0 : index
    %53 = vector.load %arg8[%c0_62, %c0_63] : memref<256x16xf32, #tpu.memory_space<vmem>>, vector<252x16xf32>
    %c0_64 = arith.constant 0 : index
    %c4_65 = arith.constant 4 : index
    %c0_66 = arith.constant 0 : index
    %54 = vector.load %arg4[%c0_64, %c4_65, %c0_66] : memref<1x256x1xbf16, #tpu.memory_space<vmem>>, vector<1x252x1xbf16>
    %55 = vector.shape_cast %54 : vector<1x252x1xbf16> to vector<252x1xbf16>
    %cst_67 = arith.constant dense<0.000000e+00> : vector<252x16xf32>
    %56 = tpu.matmul %55, %52, %cst_67 {dimension_numbers = #tpu.dot_dimension_numbers<[1], [0], [0], [1], [0, 0, 1, 1], [], []>} : vector<252x1xbf16>, vector<1x16xbf16>, vector<252x16xf32> -> vector<252x16xf32>
    %57 = arith.addf %53, %56 : vector<252x16xf32>
    %c0_68 = arith.constant 0 : index
    %c0_69 = arith.constant 0 : index
    %58 = vector.load %arg8[%c0_68, %c0_69] : memref<256x16xf32, #tpu.memory_space<vmem>>, vector<252x16xf32>
    tpu.vector_store %arg8[%c0_68, %c0_69], %57 {strides = array<i32>} : memref<256x16xf32, #tpu.memory_space<vmem>>, vector<252x16xf32>,
    %c252 = arith.constant 252 : index
    %c0_70 = arith.constant 0 : index
    %59 = vector.load %arg8[%c252, %c0_70] : memref<256x16xf32, #tpu.memory_space<vmem>>, vector<4x16xf32>
    %c0_71 = arith.constant 0 : index
    %c0_72 = arith.constant 0 : index
    %c0_73 = arith.constant 0 : index
    %60 = vector.load %arg5[%c0_71, %c0_72, %c0_73] : memref<1x32x1xbf16, #tpu.memory_space<vmem>>, vector<1x4x1xbf16>
    %61 = vector.shape_cast %60 : vector<1x4x1xbf16> to vector<4x1xbf16>
    %cst_74 = arith.constant dense<0.000000e+00> : vector<4x16xf32>
    %62 = tpu.matmul %61, %52, %cst_74 {dimension_numbers = #tpu.dot_dimension_numbers<[1], [0], [0], [1], [0, 0, 1, 1], [], []>} : vector<4x1xbf16>, vector<1x16xbf16>, vector<4x16xf32> -> vector<4x16xf32>
    %63 = arith.addf %59, %62 : vector<4x16xf32>
    %c252_75 = arith.constant 252 : index
    %c0_76 = arith.constant 0 : index
    %64 = vector.load %arg8[%c252_75, %c0_76] : memref<256x16xf32, #tpu.memory_space<vmem>>, vector<4x16xf32>
    tpu.vector_store %arg8[%c252_75, %c0_76], %63 {strides = array<i32>} : memref<256x16xf32, #tpu.memory_space<vmem>>, vector<4x16xf32>,
    %c5 = arith.constant 5 : index
    %c0_77 = arith.constant 0 : index
    %c0_78 = arith.constant 0 : index
    %65 = vector.load %arg3[%c5, %c0_77, %c0_78] : memref<15x1x16xbf16, #tpu.memory_space<vmem>>, vector<1x1x16xbf16>
    %66 = vector.shape_cast %65 : vector<1x1x16xbf16> to vector<1x16xbf16>
    %c0_79 = arith.constant 0 : index
    %c0_80 = arith.constant 0 : index
    %67 = vector.load %arg8[%c0_79, %c0_80] : memref<256x16xf32, #tpu.memory_space<vmem>>, vector<251x16xf32>
    %c0_81 = arith.constant 0 : index
    %c5_82 = arith.constant 5 : index
    %c0_83 = arith.constant 0 : index
    %68 = vector.load %arg4[%c0_81, %c5_82, %c0_83] : memref<1x256x1xbf16, #tpu.memory_space<vmem>>, vector<1x251x1xbf16>
    %69 = vector.shape_cast %68 : vector<1x251x1xbf16> to vector<251x1xbf16>
    %cst_84 = arith.constant dense<0.000000e+00> : vector<251x16xf32>
    %70 = tpu.matmul %69, %66, %cst_84 {dimension_numbers = #tpu.dot_dimension_numbers<[1], [0], [0], [1], [0, 0, 1, 1], [], []>} : vector<251x1xbf16>, vector<1x16xbf16>, vector<251x16xf32> -> vector<251x16xf32>
    %71 = arith.addf %67, %70 : vector<251x16xf32>
    %c0_85 = arith.constant 0 : index
    %c0_86 = arith.constant 0 : index
    %72 = vector.load %arg8[%c0_85, %c0_86] : memref<256x16xf32, #tpu.memory_space<vmem>>, vector<251x16xf32>
    tpu.vector_store %arg8[%c0_85, %c0_86], %71 {strides = array<i32>} : memref<256x16xf32, #tpu.memory_space<vmem>>, vector<251x16xf32>,
    %c251 = arith.constant 251 : index
    %c0_87 = arith.constant 0 : index
    %73 = vector.load %arg8[%c251, %c0_87] : memref<256x16xf32, #tpu.memory_space<vmem>>, vector<5x16xf32>
    %c0_88 = arith.constant 0 : index
    %c0_89 = arith.constant 0 : index
    %c0_90 = arith.constant 0 : index
    %74 = vector.load %arg5[%c0_88, %c0_89, %c0_90] : memref<1x32x1xbf16, #tpu.memory_space<vmem>>, vector<1x5x1xbf16>
    %75 = vector.shape_cast %74 : vector<1x5x1xbf16> to vector<5x1xbf16>
    %cst_91 = arith.constant dense<0.000000e+00> : vector<5x16xf32>
    %76 = tpu.matmul %75, %66, %cst_91 {dimension_numbers = #tpu.dot_dimension_numbers<[1], [0], [0], [1], [0, 0, 1, 1], [], []>} : vector<5x1xbf16>, vector<1x16xbf16>, vector<5x16xf32> -> vector<5x16xf32>
    %77 = arith.addf %73, %76 : vector<5x16xf32>
    %c251_92 = arith.constant 251 : index
    %c0_93 = arith.constant 0 : index
    %78 = vector.load %arg8[%c251_92, %c0_93] : memref<256x16xf32, #tpu.memory_space<vmem>>, vector<5x16xf32>
    tpu.vector_store %arg8[%c251_92, %c0_93], %77 {strides = array<i32>} : memref<256x16xf32, #tpu.memory_space<vmem>>, vector<5x16xf32>,
    %c6 = arith.constant 6 : index
    %c0_94 = arith.constant 0 : index
    %c0_95 = arith.constant 0 : index
    %79 = vector.load %arg3[%c6, %c0_94, %c0_95] : memref<15x1x16xbf16, #tpu.memory_space<vmem>>, vector<1x1x16xbf16>
    %80 = vector.shape_cast %79 : vector<1x1x16xbf16> to vector<1x16xbf16>
    %c0_96 = arith.constant 0 : index
    %c0_97 = arith.constant 0 : index
    %81 = vector.load %arg8[%c0_96, %c0_97] : memref<256x16xf32, #tpu.memory_space<vmem>>, vector<250x16xf32>
    %c0_98 = arith.constant 0 : index
    %c6_99 = arith.constant 6 : index
    %c0_100 = arith.constant 0 : index
    %82 = vector.load %arg4[%c0_98, %c6_99, %c0_100] : memref<1x256x1xbf16, #tpu.memory_space<vmem>>, vector<1x250x1xbf16>
    %83 = vector.shape_cast %82 : vector<1x250x1xbf16> to vector<250x1xbf16>
    %cst_101 = arith.constant dense<0.000000e+00> : vector<250x16xf32>
    %84 = tpu.matmul %83, %80, %cst_101 {dimension_numbers = #tpu.dot_dimension_numbers<[1], [0], [0], [1], [0, 0, 1, 1], [], []>} : vector<250x1xbf16>, vector<1x16xbf16>, vector<250x16xf32> -> vector<250x16xf32>
    %85 = arith.addf %81, %84 : vector<250x16xf32>
    %c0_102 = arith.constant 0 : index
    %c0_103 = arith.constant 0 : index
    %86 = vector.load %arg8[%c0_102, %c0_103] : memref<256x16xf32, #tpu.memory_space<vmem>>, vector<250x16xf32>
    tpu.vector_store %arg8[%c0_102, %c0_103], %85 {strides = array<i32>} : memref<256x16xf32, #tpu.memory_space<vmem>>, vector<250x16xf32>,
    %c250 = arith.constant 250 : index
    %c0_104 = arith.constant 0 : index
    %87 = vector.load %arg8[%c250, %c0_104] : memref<256x16xf32, #tpu.memory_space<vmem>>, vector<6x16xf32>
    %c0_105 = arith.constant 0 : index
    %c0_106 = arith.constant 0 : index
    %c0_107 = arith.constant 0 : index
    %88 = vector.load %arg5[%c0_105, %c0_106, %c0_107] : memref<1x32x1xbf16, #tpu.memory_space<vmem>>, vector<1x6x1xbf16>
    %89 = vector.shape_cast %88 : vector<1x6x1xbf16> to vector<6x1xbf16>
    %cst_108 = arith.constant dense<0.000000e+00> : vector<6x16xf32>
    %90 = tpu.matmul %89, %80, %cst_108 {dimension_numbers = #tpu.dot_dimension_numbers<[1], [0], [0], [1], [0, 0, 1, 1], [], []>} : vector<6x1xbf16>, vector<1x16xbf16>, vector<6x16xf32> -> vector<6x16xf32>
    %91 = arith.addf %87, %90 : vector<6x16xf32>
    %c250_109 = arith.constant 250 : index
    %c0_110 = arith.constant 0 : index
    %92 = vector.load %arg8[%c250_109, %c0_110] : memref<256x16xf32, #tpu.memory_space<vmem>>, vector<6x16xf32>
    tpu.vector_store %arg8[%c250_109, %c0_110], %91 {strides = array<i32>} : memref<256x16xf32, #tpu.memory_space<vmem>>, vector<6x16xf32>,
    %c7 = arith.constant 7 : index
    %c0_111 = arith.constant 0 : index
    %c0_112 = arith.constant 0 : index
    %93 = vector.load %arg3[%c7, %c0_111, %c0_112] : memref<15x1x16xbf16, #tpu.memory_space<vmem>>, vector<1x1x16xbf16>
    %94 = vector.shape_cast %93 : vector<1x1x16xbf16> to vector<1x16xbf16>
    %c0_113 = arith.constant 0 : index
    %c0_114 = arith.constant 0 : index
    %95 = vector.load %arg8[%c0_113, %c0_114] : memref<256x16xf32, #tpu.memory_space<vmem>>, vector<249x16xf32>
    %c0_115 = arith.constant 0 : index
    %c7_116 = arith.constant 7 : index
    %c0_117 = arith.constant 0 : index
    %96 = vector.load %arg4[%c0_115, %c7_116, %c0_117] : memref<1x256x1xbf16, #tpu.memory_space<vmem>>, vector<1x249x1xbf16>
    %97 = vector.shape_cast %96 : vector<1x249x1xbf16> to vector<249x1xbf16>
    %cst_118 = arith.constant dense<0.000000e+00> : vector<249x16xf32>
    %98 = tpu.matmul %97, %94, %cst_118 {dimension_numbers = #tpu.dot_dimension_numbers<[1], [0], [0], [1], [0, 0, 1, 1], [], []>} : vector<249x1xbf16>, vector<1x16xbf16>, vector<249x16xf32> -> vector<249x16xf32>
    %99 = arith.addf %95, %98 : vector<249x16xf32>
    %c0_119 = arith.constant 0 : index
    %c0_120 = arith.constant 0 : index
    %100 = vector.load %arg8[%c0_119, %c0_120] : memref<256x16xf32, #tpu.memory_space<vmem>>, vector<249x16xf32>
    tpu.vector_store %arg8[%c0_119, %c0_120], %99 {strides = array<i32>} : memref<256x16xf32, #tpu.memory_space<vmem>>, vector<249x16xf32>,
    %c249 = arith.constant 249 : index
    %c0_121 = arith.constant 0 : index
    %101 = vector.load %arg8[%c249, %c0_121] : memref<256x16xf32, #tpu.memory_space<vmem>>, vector<7x16xf32>
    %c0_122 = arith.constant 0 : index
    %c0_123 = arith.constant 0 : index
    %c0_124 = arith.constant 0 : index
    %102 = vector.load %arg5[%c0_122, %c0_123, %c0_124] : memref<1x32x1xbf16, #tpu.memory_space<vmem>>, vector<1x7x1xbf16>
    %103 = vector.shape_cast %102 : vector<1x7x1xbf16> to vector<7x1xbf16>
    %cst_125 = arith.constant dense<0.000000e+00> : vector<7x16xf32>
    %104 = tpu.matmul %103, %94, %cst_125 {dimension_numbers = #tpu.dot_dimension_numbers<[1], [0], [0], [1], [0, 0, 1, 1], [], []>} : vector<7x1xbf16>, vector<1x16xbf16>, vector<7x16xf32> -> vector<7x16xf32>
    %105 = arith.addf %101, %104 : vector<7x16xf32>
    %c249_126 = arith.constant 249 : index
    %c0_127 = arith.constant 0 : index
    %106 = vector.load %arg8[%c249_126, %c0_127] : memref<256x16xf32, #tpu.memory_space<vmem>>, vector<7x16xf32>
    tpu.vector_store %arg8[%c249_126, %c0_127], %105 {strides = array<i32>} : memref<256x16xf32, #tpu.memory_space<vmem>>, vector<7x16xf32>,
    %c8 = arith.constant 8 : index
    %c0_128 = arith.constant 0 : index
    %c0_129 = arith.constant 0 : index
    %107 = vector.load %arg3[%c8, %c0_128, %c0_129] : memref<15x1x16xbf16, #tpu.memory_space<vmem>>, vector<1x1x16xbf16>
    %108 = vector.shape_cast %107 : vector<1x1x16xbf16> to vector<1x16xbf16>
    %c0_130 = arith.constant 0 : index
    %c0_131 = arith.constant 0 : index
    %109 = vector.load %arg8[%c0_130, %c0_131] : memref<256x16xf32, #tpu.memory_space<vmem>>, vector<248x16xf32>
    %c0_132 = arith.constant 0 : index
    %c8_133 = arith.constant 8 : index
    %c0_134 = arith.constant 0 : index
    %110 = vector.load %arg4[%c0_132, %c8_133, %c0_134] : memref<1x256x1xbf16, #tpu.memory_space<vmem>>, vector<1x248x1xbf16>
    %111 = vector.shape_cast %110 : vector<1x248x1xbf16> to vector<248x1xbf16>
    %cst_135 = arith.constant dense<0.000000e+00> : vector<248x16xf32>
    %112 = tpu.matmul %111, %108, %cst_135 {dimension_numbers = #tpu.dot_dimension_numbers<[1], [0], [0], [1], [0, 0, 1, 1], [], []>} : vector<248x1xbf16>, vector<1x16xbf16>, vector<248x16xf32> -> vector<248x16xf32>
    %113 = arith.addf %109, %112 : vector<248x16xf32>
    %c0_136 = arith.constant 0 : index
    %c0_137 = arith.constant 0 : index
    %114 = vector.load %arg8[%c0_136, %c0_137] : memref<256x16xf32, #tpu.memory_space<vmem>>, vector<248x16xf32>
    tpu.vector_store %arg8[%c0_136, %c0_137], %113 {strides = array<i32>} : memref<256x16xf32, #tpu.memory_space<vmem>>, vector<248x16xf32>,
    %c248 = arith.constant 248 : index
    %c0_138 = arith.constant 0 : index
    %115 = vector.load %arg8[%c248, %c0_138] : memref<256x16xf32, #tpu.memory_space<vmem>>, vector<8x16xf32>
    %c0_139 = arith.constant 0 : index
    %c0_140 = arith.constant 0 : index
    %c0_141 = arith.constant 0 : index
    %116 = vector.load %arg5[%c0_139, %c0_140, %c0_141] : memref<1x32x1xbf16, #tpu.memory_space<vmem>>, vector<1x8x1xbf16>
    %117 = vector.shape_cast %116 : vector<1x8x1xbf16> to vector<8x1xbf16>
    %cst_142 = arith.constant dense<0.000000e+00> : vector<8x16xf32>
    %118 = tpu.matmul %117, %108, %cst_142 {dimension_numbers = #tpu.dot_dimension_numbers<[1], [0], [0], [1], [0, 0, 1, 1], [], []>} : vector<8x1xbf16>, vector<1x16xbf16>, vector<8x16xf32> -> vector<8x16xf32>
    %119 = arith.addf %115, %118 : vector<8x16xf32>
    %c248_143 = arith.constant 248 : index
    %c0_144 = arith.constant 0 : index
    %120 = vector.load %arg8[%c248_143, %c0_144] : memref<256x16xf32, #tpu.memory_space<vmem>>, vector<8x16xf32>
    tpu.vector_store %arg8[%c248_143, %c0_144], %119 {strides = array<i32>} : memref<256x16xf32, #tpu.memory_space<vmem>>, vector<8x16xf32>,
    %c9 = arith.constant 9 : index
    %c0_145 = arith.constant 0 : index
    %c0_146 = arith.constant 0 : index
    %121 = vector.load %arg3[%c9, %c0_145, %c0_146] : memref<15x1x16xbf16, #tpu.memory_space<vmem>>, vector<1x1x16xbf16>
    %122 = vector.shape_cast %121 : vector<1x1x16xbf16> to vector<1x16xbf16>
    %c0_147 = arith.constant 0 : index
    %c0_148 = arith.constant 0 : index
    %123 = vector.load %arg8[%c0_147, %c0_148] : memref<256x16xf32, #tpu.memory_space<vmem>>, vector<247x16xf32>
    %c0_149 = arith.constant 0 : index
    %c9_150 = arith.constant 9 : index
    %c0_151 = arith.constant 0 : index
    %124 = vector.load %arg4[%c0_149, %c9_150, %c0_151] : memref<1x256x1xbf16, #tpu.memory_space<vmem>>, vector<1x247x1xbf16>
    %125 = vector.shape_cast %124 : vector<1x247x1xbf16> to vector<247x1xbf16>
    %cst_152 = arith.constant dense<0.000000e+00> : vector<247x16xf32>
    %126 = tpu.matmul %125, %122, %cst_152 {dimension_numbers = #tpu.dot_dimension_numbers<[1], [0], [0], [1], [0, 0, 1, 1], [], []>} : vector<247x1xbf16>, vector<1x16xbf16>, vector<247x16xf32> -> vector<247x16xf32>
    %127 = arith.addf %123, %126 : vector<247x16xf32>
    %c0_153 = arith.constant 0 : index
    %c0_154 = arith.constant 0 : index
    %128 = vector.load %arg8[%c0_153, %c0_154] : memref<256x16xf32, #tpu.memory_space<vmem>>, vector<247x16xf32>
    tpu.vector_store %arg8[%c0_153, %c0_154], %127 {strides = array<i32>} : memref<256x16xf32, #tpu.memory_space<vmem>>, vector<247x16xf32>,
    %c247 = arith.constant 247 : index
    %c0_155 = arith.constant 0 : index
    %129 = vector.load %arg8[%c247, %c0_155] : memref<256x16xf32, #tpu.memory_space<vmem>>, vector<9x16xf32>
    %c0_156 = arith.constant 0 : index
    %c0_157 = arith.constant 0 : index
    %c0_158 = arith.constant 0 : index
    %130 = vector.load %arg5[%c0_156, %c0_157, %c0_158] : memref<1x32x1xbf16, #tpu.memory_space<vmem>>, vector<1x9x1xbf16>
    %131 = vector.shape_cast %130 : vector<1x9x1xbf16> to vector<9x1xbf16>
    %cst_159 = arith.constant dense<0.000000e+00> : vector<9x16xf32>
    %132 = tpu.matmul %131, %122, %cst_159 {dimension_numbers = #tpu.dot_dimension_numbers<[1], [0], [0], [1], [0, 0, 1, 1], [], []>} : vector<9x1xbf16>, vector<1x16xbf16>, vector<9x16xf32> -> vector<9x16xf32>
    %133 = arith.addf %129, %132 : vector<9x16xf32>
    %c247_160 = arith.constant 247 : index
    %c0_161 = arith.constant 0 : index
    %134 = vector.load %arg8[%c247_160, %c0_161] : memref<256x16xf32, #tpu.memory_space<vmem>>, vector<9x16xf32>
    tpu.vector_store %arg8[%c247_160, %c0_161], %133 {strides = array<i32>} : memref<256x16xf32, #tpu.memory_space<vmem>>, vector<9x16xf32>,
    %c10 = arith.constant 10 : index
    %c0_162 = arith.constant 0 : index
    %c0_163 = arith.constant 0 : index
    %135 = vector.load %arg3[%c10, %c0_162, %c0_163] : memref<15x1x16xbf16, #tpu.memory_space<vmem>>, vector<1x1x16xbf16>
    %136 = vector.shape_cast %135 : vector<1x1x16xbf16> to vector<1x16xbf16>
    %c0_164 = arith.constant 0 : index
    %c0_165 = arith.constant 0 : index
    %137 = vector.load %arg8[%c0_164, %c0_165] : memref<256x16xf32, #tpu.memory_space<vmem>>, vector<246x16xf32>
    %c0_166 = arith.constant 0 : index
    %c10_167 = arith.constant 10 : index
    %c0_168 = arith.constant 0 : index
    %138 = vector.load %arg4[%c0_166, %c10_167, %c0_168] : memref<1x256x1xbf16, #tpu.memory_space<vmem>>, vector<1x246x1xbf16>
    %139 = vector.shape_cast %138 : vector<1x246x1xbf16> to vector<246x1xbf16>
    %cst_169 = arith.constant dense<0.000000e+00> : vector<246x16xf32>
    %140 = tpu.matmul %139, %136, %cst_169 {dimension_numbers = #tpu.dot_dimension_numbers<[1], [0], [0], [1], [0, 0, 1, 1], [], []>} : vector<246x1xbf16>, vector<1x16xbf16>, vector<246x16xf32> -> vector<246x16xf32>
    %141 = arith.addf %137, %140 : vector<246x16xf32>
    %c0_170 = arith.constant 0 : index
    %c0_171 = arith.constant 0 : index
    %142 = vector.load %arg8[%c0_170, %c0_171] : memref<256x16xf32, #tpu.memory_space<vmem>>, vector<246x16xf32>
    tpu.vector_store %arg8[%c0_170, %c0_171], %141 {strides = array<i32>} : memref<256x16xf32, #tpu.memory_space<vmem>>, vector<246x16xf32>,
    %c246 = arith.constant 246 : index
    %c0_172 = arith.constant 0 : index
    %143 = vector.load %arg8[%c246, %c0_172] : memref<256x16xf32, #tpu.memory_space<vmem>>, vector<10x16xf32>
    %c0_173 = arith.constant 0 : index
    %c0_174 = arith.constant 0 : index
    %c0_175 = arith.constant 0 : index
    %144 = vector.load %arg5[%c0_173, %c0_174, %c0_175] : memref<1x32x1xbf16, #tpu.memory_space<vmem>>, vector<1x10x1xbf16>
    %145 = vector.shape_cast %144 : vector<1x10x1xbf16> to vector<10x1xbf16>
    %cst_176 = arith.constant dense<0.000000e+00> : vector<10x16xf32>
    %146 = tpu.matmul %145, %136, %cst_176 {dimension_numbers = #tpu.dot_dimension_numbers<[1], [0], [0], [1], [0, 0, 1, 1], [], []>} : vector<10x1xbf16>, vector<1x16xbf16>, vector<10x16xf32> -> vector<10x16xf32>
    %147 = arith.addf %143, %146 : vector<10x16xf32>
    %c246_177 = arith.constant 246 : index
    %c0_178 = arith.constant 0 : index
    %148 = vector.load %arg8[%c246_177, %c0_178] : memref<256x16xf32, #tpu.memory_space<vmem>>, vector<10x16xf32>
    tpu.vector_store %arg8[%c246_177, %c0_178], %147 {strides = array<i32>} : memref<256x16xf32, #tpu.memory_space<vmem>>, vector<10x16xf32>,
    %c11 = arith.constant 11 : index
    %c0_179 = arith.constant 0 : index
    %c0_180 = arith.constant 0 : index
    %149 = vector.load %arg3[%c11, %c0_179, %c0_180] : memref<15x1x16xbf16, #tpu.memory_space<vmem>>, vector<1x1x16xbf16>
    %150 = vector.shape_cast %149 : vector<1x1x16xbf16> to vector<1x16xbf16>
    %c0_181 = arith.constant 0 : index
    %c0_182 = arith.constant 0 : index
    %151 = vector.load %arg8[%c0_181, %c0_182] : memref<256x16xf32, #tpu.memory_space<vmem>>, vector<245x16xf32>
    %c0_183 = arith.constant 0 : index
    %c11_184 = arith.constant 11 : index
    %c0_185 = arith.constant 0 : index
    %152 = vector.load %arg4[%c0_183, %c11_184, %c0_185] : memref<1x256x1xbf16, #tpu.memory_space<vmem>>, vector<1x245x1xbf16>
    %153 = vector.shape_cast %152 : vector<1x245x1xbf16> to vector<245x1xbf16>
    %cst_186 = arith.constant dense<0.000000e+00> : vector<245x16xf32>
    %154 = tpu.matmul %153, %150, %cst_186 {dimension_numbers = #tpu.dot_dimension_numbers<[1], [0], [0], [1], [0, 0, 1, 1], [], []>} : vector<245x1xbf16>, vector<1x16xbf16>, vector<245x16xf32> -> vector<245x16xf32>
    %155 = arith.addf %151, %154 : vector<245x16xf32>
    %c0_187 = arith.constant 0 : index
    %c0_188 = arith.constant 0 : index
    %156 = vector.load %arg8[%c0_187, %c0_188] : memref<256x16xf32, #tpu.memory_space<vmem>>, vector<245x16xf32>
    tpu.vector_store %arg8[%c0_187, %c0_188], %155 {strides = array<i32>} : memref<256x16xf32, #tpu.memory_space<vmem>>, vector<245x16xf32>,
    %c245 = arith.constant 245 : index
    %c0_189 = arith.constant 0 : index
    %157 = vector.load %arg8[%c245, %c0_189] : memref<256x16xf32, #tpu.memory_space<vmem>>, vector<11x16xf32>
    %c0_190 = arith.constant 0 : index
    %c0_191 = arith.constant 0 : index
    %c0_192 = arith.constant 0 : index
    %158 = vector.load %arg5[%c0_190, %c0_191, %c0_192] : memref<1x32x1xbf16, #tpu.memory_space<vmem>>, vector<1x11x1xbf16>
    %159 = vector.shape_cast %158 : vector<1x11x1xbf16> to vector<11x1xbf16>
    %cst_193 = arith.constant dense<0.000000e+00> : vector<11x16xf32>
    %160 = tpu.matmul %159, %150, %cst_193 {dimension_numbers = #tpu.dot_dimension_numbers<[1], [0], [0], [1], [0, 0, 1, 1], [], []>} : vector<11x1xbf16>, vector<1x16xbf16>, vector<11x16xf32> -> vector<11x16xf32>
    %161 = arith.addf %157, %160 : vector<11x16xf32>
    %c245_194 = arith.constant 245 : index
    %c0_195 = arith.constant 0 : index
    %162 = vector.load %arg8[%c245_194, %c0_195] : memref<256x16xf32, #tpu.memory_space<vmem>>, vector<11x16xf32>
    tpu.vector_store %arg8[%c245_194, %c0_195], %161 {strides = array<i32>} : memref<256x16xf32, #tpu.memory_space<vmem>>, vector<11x16xf32>,
    %c12 = arith.constant 12 : index
    %c0_196 = arith.constant 0 : index
    %c0_197 = arith.constant 0 : index
    %163 = vector.load %arg3[%c12, %c0_196, %c0_197] : memref<15x1x16xbf16, #tpu.memory_space<vmem>>, vector<1x1x16xbf16>
    %164 = vector.shape_cast %163 : vector<1x1x16xbf16> to vector<1x16xbf16>
    %c0_198 = arith.constant 0 : index
    %c0_199 = arith.constant 0 : index
    %165 = vector.load %arg8[%c0_198, %c0_199] : memref<256x16xf32, #tpu.memory_space<vmem>>, vector<244x16xf32>
    %c0_200 = arith.constant 0 : index
    %c12_201 = arith.constant 12 : index
    %c0_202 = arith.constant 0 : index
    %166 = vector.load %arg4[%c0_200, %c12_201, %c0_202] : memref<1x256x1xbf16, #tpu.memory_space<vmem>>, vector<1x244x1xbf16>
    %167 = vector.shape_cast %166 : vector<1x244x1xbf16> to vector<244x1xbf16>
    %cst_203 = arith.constant dense<0.000000e+00> : vector<244x16xf32>
    %168 = tpu.matmul %167, %164, %cst_203 {dimension_numbers = #tpu.dot_dimension_numbers<[1], [0], [0], [1], [0, 0, 1, 1], [], []>} : vector<244x1xbf16>, vector<1x16xbf16>, vector<244x16xf32> -> vector<244x16xf32>
    %169 = arith.addf %165, %168 : vector<244x16xf32>
    %c0_204 = arith.constant 0 : index
    %c0_205 = arith.constant 0 : index
    %170 = vector.load %arg8[%c0_204, %c0_205] : memref<256x16xf32, #tpu.memory_space<vmem>>, vector<244x16xf32>
    tpu.vector_store %arg8[%c0_204, %c0_205], %169 {strides = array<i32>} : memref<256x16xf32, #tpu.memory_space<vmem>>, vector<244x16xf32>,
    %c244 = arith.constant 244 : index
    %c0_206 = arith.constant 0 : index
    %171 = vector.load %arg8[%c244, %c0_206] : memref<256x16xf32, #tpu.memory_space<vmem>>, vector<12x16xf32>
    %c0_207 = arith.constant 0 : index
    %c0_208 = arith.constant 0 : index
    %c0_209 = arith.constant 0 : index
    %172 = vector.load %arg5[%c0_207, %c0_208, %c0_209] : memref<1x32x1xbf16, #tpu.memory_space<vmem>>, vector<1x12x1xbf16>
    %173 = vector.shape_cast %172 : vector<1x12x1xbf16> to vector<12x1xbf16>
    %cst_210 = arith.constant dense<0.000000e+00> : vector<12x16xf32>
    %174 = tpu.matmul %173, %164, %cst_210 {dimension_numbers = #tpu.dot_dimension_numbers<[1], [0], [0], [1], [0, 0, 1, 1], [], []>} : vector<12x1xbf16>, vector<1x16xbf16>, vector<12x16xf32> -> vector<12x16xf32>
    %175 = arith.addf %171, %174 : vector<12x16xf32>
    %c244_211 = arith.constant 244 : index
    %c0_212 = arith.constant 0 : index
    %176 = vector.load %arg8[%c244_211, %c0_212] : memref<256x16xf32, #tpu.memory_space<vmem>>, vector<12x16xf32>
    tpu.vector_store %arg8[%c244_211, %c0_212], %175 {strides = array<i32>} : memref<256x16xf32, #tpu.memory_space<vmem>>, vector<12x16xf32>,
    %c13 = arith.constant 13 : index
    %c0_213 = arith.constant 0 : index
    %c0_214 = arith.constant 0 : index
    %177 = vector.load %arg3[%c13, %c0_213, %c0_214] : memref<15x1x16xbf16, #tpu.memory_space<vmem>>, vector<1x1x16xbf16>
    %178 = vector.shape_cast %177 : vector<1x1x16xbf16> to vector<1x16xbf16>
    %c0_215 = arith.constant 0 : index
    %c0_216 = arith.constant 0 : index
    %179 = vector.load %arg8[%c0_215, %c0_216] : memref<256x16xf32, #tpu.memory_space<vmem>>, vector<243x16xf32>
    %c0_217 = arith.constant 0 : index
    %c13_218 = arith.constant 13 : index
    %c0_219 = arith.constant 0 : index
    %180 = vector.load %arg4[%c0_217, %c13_218, %c0_219] : memref<1x256x1xbf16, #tpu.memory_space<vmem>>, vector<1x243x1xbf16>
    %181 = vector.shape_cast %180 : vector<1x243x1xbf16> to vector<243x1xbf16>
    %cst_220 = arith.constant dense<0.000000e+00> : vector<243x16xf32>
    %182 = tpu.matmul %181, %178, %cst_220 {dimension_numbers = #tpu.dot_dimension_numbers<[1], [0], [0], [1], [0, 0, 1, 1], [], []>} : vector<243x1xbf16>, vector<1x16xbf16>, vector<243x16xf32> -> vector<243x16xf32>
    %183 = arith.addf %179, %182 : vector<243x16xf32>
    %c0_221 = arith.constant 0 : index
    %c0_222 = arith.constant 0 : index
    %184 = vector.load %arg8[%c0_221, %c0_222] : memref<256x16xf32, #tpu.memory_space<vmem>>, vector<243x16xf32>
    tpu.vector_store %arg8[%c0_221, %c0_222], %183 {strides = array<i32>} : memref<256x16xf32, #tpu.memory_space<vmem>>, vector<243x16xf32>,
    %c243 = arith.constant 243 : index
    %c0_223 = arith.constant 0 : index
    %185 = vector.load %arg8[%c243, %c0_223] : memref<256x16xf32, #tpu.memory_space<vmem>>, vector<13x16xf32>
    %c0_224 = arith.constant 0 : index
    %c0_225 = arith.constant 0 : index
    %c0_226 = arith.constant 0 : index
    %186 = vector.load %arg5[%c0_224, %c0_225, %c0_226] : memref<1x32x1xbf16, #tpu.memory_space<vmem>>, vector<1x13x1xbf16>
    %187 = vector.shape_cast %186 : vector<1x13x1xbf16> to vector<13x1xbf16>
    %cst_227 = arith.constant dense<0.000000e+00> : vector<13x16xf32>
    %188 = tpu.matmul %187, %178, %cst_227 {dimension_numbers = #tpu.dot_dimension_numbers<[1], [0], [0], [1], [0, 0, 1, 1], [], []>} : vector<13x1xbf16>, vector<1x16xbf16>, vector<13x16xf32> -> vector<13x16xf32>
    %189 = arith.addf %185, %188 : vector<13x16xf32>
    %c243_228 = arith.constant 243 : index
    %c0_229 = arith.constant 0 : index
    %190 = vector.load %arg8[%c243_228, %c0_229] : memref<256x16xf32, #tpu.memory_space<vmem>>, vector<13x16xf32>
    tpu.vector_store %arg8[%c243_228, %c0_229], %189 {strides = array<i32>} : memref<256x16xf32, #tpu.memory_space<vmem>>, vector<13x16xf32>,
    %c14 = arith.constant 14 : index
    %c0_230 = arith.constant 0 : index
    %c0_231 = arith.constant 0 : index
    %191 = vector.load %arg3[%c14, %c0_230, %c0_231] : memref<15x1x16xbf16, #tpu.memory_space<vmem>>, vector<1x1x16xbf16>
    %192 = vector.shape_cast %191 : vector<1x1x16xbf16> to vector<1x16xbf16>
    %c0_232 = arith.constant 0 : index
    %c0_233 = arith.constant 0 : index
    %193 = vector.load %arg8[%c0_232, %c0_233] : memref<256x16xf32, #tpu.memory_space<vmem>>, vector<242x16xf32>
    %c0_234 = arith.constant 0 : index
    %c14_235 = arith.constant 14 : index
    %c0_236 = arith.constant 0 : index
    %194 = vector.load %arg4[%c0_234, %c14_235, %c0_236] : memref<1x256x1xbf16, #tpu.memory_space<vmem>>, vector<1x242x1xbf16>
    %195 = vector.shape_cast %194 : vector<1x242x1xbf16> to vector<242x1xbf16>
    %cst_237 = arith.constant dense<0.000000e+00> : vector<242x16xf32>
    %196 = tpu.matmul %195, %192, %cst_237 {dimension_numbers = #tpu.dot_dimension_numbers<[1], [0], [0], [1], [0, 0, 1, 1], [], []>} : vector<242x1xbf16>, vector<1x16xbf16>, vector<242x16xf32> -> vector<242x16xf32>
    %197 = arith.addf %193, %196 : vector<242x16xf32>
    %c0_238 = arith.constant 0 : index
    %c0_239 = arith.constant 0 : index
    %198 = vector.load %arg8[%c0_238, %c0_239] : memref<256x16xf32, #tpu.memory_space<vmem>>, vector<242x16xf32>
    tpu.vector_store %arg8[%c0_238, %c0_239], %197 {strides = array<i32>} : memref<256x16xf32, #tpu.memory_space<vmem>>, vector<242x16xf32>,
    %c242 = arith.constant 242 : index
    %c0_240 = arith.constant 0 : index
    %199 = vector.load %arg8[%c242, %c0_240] : memref<256x16xf32, #tpu.memory_space<vmem>>, vector<14x16xf32>
    %c0_241 = arith.constant 0 : index
    %c0_242 = arith.constant 0 : index
    %c0_243 = arith.constant 0 : index
    %200 = vector.load %arg5[%c0_241, %c0_242, %c0_243] : memref<1x32x1xbf16, #tpu.memory_space<vmem>>, vector<1x14x1xbf16>
    %201 = vector.shape_cast %200 : vector<1x14x1xbf16> to vector<14x1xbf16>
    %cst_244 = arith.constant dense<0.000000e+00> : vector<14x16xf32>
    %202 = tpu.matmul %201, %192, %cst_244 {dimension_numbers = #tpu.dot_dimension_numbers<[1], [0], [0], [1], [0, 0, 1, 1], [], []>} : vector<14x1xbf16>, vector<1x16xbf16>, vector<14x16xf32> -> vector<14x16xf32>
    %203 = arith.addf %199, %202 : vector<14x16xf32>
    %c242_245 = arith.constant 242 : index
    %c0_246 = arith.constant 0 : index
    %204 = vector.load %arg8[%c242_245, %c0_246] : memref<256x16xf32, #tpu.memory_space<vmem>>, vector<14x16xf32>
    tpu.vector_store %arg8[%c242_245, %c0_246], %203 {strides = array<i32>} : memref<256x16xf32, #tpu.memory_space<vmem>>, vector<14x16xf32>,
    %c0_247 = arith.constant 0 : index
    %c0_248 = arith.constant 0 : index
    %205 = vector.load %arg8[%c0_247, %c0_248] : memref<256x16xf32, #tpu.memory_space<vmem>>, vector<256x16xf32>
    %cst_249 = arith.constant 0.000000e+00 : f32
    %206 = vector.broadcast %cst_249 : f32 to vector<256x16xf32>
    %207 = arith.cmpf oge, %205, %206 : vector<256x16xf32>
    %cst_250 = arith.constant 1.000000e-01 : f32
    %208 = vector.broadcast %cst_250 : f32 to vector<256x16xf32>
    %209 = arith.mulf %208, %205 : vector<256x16xf32>
    %210 = arith.select %207, %205, %209 : vector<256x16xi1>, vector<256x16xf32>
    %211 = arith.truncf %210 : vector<256x16xf32> to vector<256x16xbf16>
    %c0_251 = arith.constant 0 : index
    %c0_252 = arith.constant 0 : index
    %c0_253 = arith.constant 0 : index
    %212 = vector.load %arg7[%c0_251, %c0_252, %c0_253] : memref<1x256x16xbf16, #tpu.memory_space<vmem>>, vector<1x256x16xbf16>
    %213 = vector.shape_cast %212 : vector<1x256x16xbf16> to vector<256x16xbf16>
    %214 = vector.shape_cast %211 : vector<256x16xbf16> to vector<1x256x16xbf16>
    tpu.vector_store %arg7[%c0_251, %c0_252, %c0_253], %214 {strides = array<i32>} : memref<1x256x16xbf16, #tpu.memory_space<vmem>>, vector<1x256x16xbf16>,
    return
  }
  func.func @transform_0(%arg0: i32, %arg1: i32, %arg2: i32) -> (i32, i32, i32) {
    %c0_i32 = arith.constant 0 : i32
    %c0_i32_0 = arith.constant 0 : i32
    %c0_i32_1 = arith.constant 0 : i32
    return %c0_i32, %c0_i32_0, %arg0 : i32, i32, i32
  }
  func.func @transform_1(%arg0: i32, %arg1: i32, %arg2: i32) -> (i32, i32, i32) {
    %c0_i32 = arith.constant 0 : i32
    %c0_i32_0 = arith.constant 0 : i32
    return %arg1, %arg2, %c0_i32 : i32, i32, i32
  }
  func.func @transform_2(%arg0: i32, %arg1: i32, %arg2: i32) -> (i32, i32, i32) {
    %c1_i32 = arith.constant 1 : i32
    %0 = arith.addi %arg2, %c1_i32 : i32
    %c8_i32 = arith.constant 8 : i32
    %1 = arith.muli %0, %c8_i32 : i32
    %c0_i32 = arith.constant 0 : i32
    %c0_i32_0 = arith.constant 0 : i32
    return %arg1, %1, %c0_i32 : i32, i32, i32
  }
  func.func @transform_3(%arg0: i32, %arg1: i32, %arg2: i32) -> (i32, i32) {
    %c0_i32 = arith.constant 0 : i32
    %c0_i32_0 = arith.constant 0 : i32
    return %c0_i32, %arg0 : i32, i32
  }
  func.func @transform_4(%arg0: i32, %arg1: i32, %arg2: i32) -> (i32, i32, i32) {
    %c0_i32 = arith.constant 0 : i32
    return %arg1, %arg2, %arg0 : i32, i32, i32
  }
}

</mosaic_0001>

<bundles_post_ra>
// kernel: tpu_custom_call.1
= control target key start
LH: loop header
LB: loop body
LE: loop exit
PB: predicated region body
PF: predicated region fallthrough
CT: control target
= control target key end

     0   :  { %s10698_s15 = smov 0   ;;  %s10700_s16 = smov 0   ;;  %s12718_s0 = inlined_call_operand.vmem [shape: bf16[15,1,16], index: 0, kind: input, shape index: {}]   ;;  %s12719_s1 = inlined_call_operand.vmem [shape: bf16[4,288,1], index: 1, kind: input, shape index: {}]   ;;  %s12720_s2 = inlined_call_operand.vmem [shape: bf16[4,288,1], index: 2, kind: input, shape index: {}]   ;;  %s12721_s3 = inlined_call_operand.vmem [shape: f32[1,16], index: 3, kind: input, shape index: {}]   ;;  %s12722_s4 = inlined_call_operand.vmem [shape: bf16[4,256,16], index: 4, kind: output, shape index: {}]  }
   0x1   :  { %s10702_s17 = smov 0  }
   0x2 LB: > { %s29_s18 = sadd.s32 1, %s10664_s16  ;;  %p8902_p0 = scmp.ge.s32.totalorder %s10668_s17, 1  ;;  %s10668_s17 = sphi %s10702_s17, %s14_s17   ;;  %s10664_s16 = sphi %s10700_s16, %s12724_s16   ;;  %s10660_s15 = sphi %s10698_s15, %s12723_s15  }
   0x3   : > { %p31_p1 = scmp.ge.s32.totalorder %s29_s18, 4  ;;  %p241_p2 = scmp.lt.s32.totalorder %s10668_s17, 5 }
   0x5   : > { %s12726_s18 = smov (%p31_p1, %s29_s18), 0  ;;  %p242_p3 = pnand %p8902_p0, %p241_p2 }
   0x6   : > { %p307_p4 = scmp.lt.s32.totalorder (!%p242_p3), %s10660_s15, 3 }
   0x7   : > { %245 = sbr.rel (%p242_p3) target bundleno = 771 (0x303), region = 36 }
   0xc   : > { %v383_v0 = vld [vmem:[%s12718_s0] sm:$0x1]  ;;  %vm520_vm0 = vcmask 1040384   ;;  %v10670_v1 = vmov 0   ;;  %v8940_v3 = vld [vmem:[%s12718_s0 + $0x1] sm:$0x1] }
   0xd   : > { %v10719_v2 = vsel %vm520_vm0, 65535, %v10670_v1  ;;  %s12728_s15 = smov (!%p307_p4, %s10660_s15), 3  ;;  %v8974_v6 = vld [vmem:[%s12718_s0 + $0x2] sm:$0x1]  ;;  %vm471_vm1 = vcmask 7168   ;;  %v10671_v17 = vmov 0.0  }
   0xe   : > { %v524_v4 = vand.u32 %v10719_v2, %v383_v0  ;;  %v10728_v5 = vand.u32 %v8940_v3, %v10719_v2  ;;  %v10734_v7 = vand.u32 %v8974_v6, %v10719_v2  ;;  %s10370_s25 = smul.u32 144, %s12728_s15  ;;  %vm866_vm2 = vsmask.f32 7424 }
   0xf   : > { %vm1465_vm3 = vcmask 1046528   ;;  %vm10672_vm4 = vmmov 0   ;;  %vm1968_vm5 = vsmask.f32 6400  ;;  %vm2583_vm6 = vcmask 1045504  }
  0x10   : > { %9774 = vmatprep.subr.bf16.mxu0 %v524_v4  ;;  %10368 = vmatprep.subr.bf16.mxu1 %v10728_v5  ;;  %s10744_s28 = scalar_lea.vmem %s12719_s1, %s10370_s25  ;;  %s9457_s7 = sadd.s32 128, %s10370_s25  ;;  %vm3085_vm7 = vsmask.f32 5376  ;;  %vm3698_vm8 = vcmask 1044480   ;;  %vm687_vm9 = vcmask 130048   ;;  %vm1269_vm11 = vcmask 129024  }
  0x11   : > { %9775 = vmatpush3.bf16.msra.mxu0 %v524_v4  ;;  %10369 = vmatpush3.bf16.msra.mxu1 %v10728_v5  ;;  %v10400_v8 = vld [vmem:[%s10744_s28] sm:$0xff]   ;;  %v10401_v9 = vld [vmem:[%s10744_s28 + $0x8] sm:$0xff]   ;;  %v10402_v10 = vld [vmem:[%s10744_s28 + $0x30] sm:$0xff]   ;;  %s10894_s10 = scalar_lea.vmem %s12720_s2, %s9457_s7  ;;  %vm4199_vm10 = vsmask.f32 4352  ;;  %vm1317_vm12 = vcmask 122880  }
  0x12   : > { %9808 = vmatprep.subr.bf16.mxu0 %v10728_v5  ;;  %9848 = vmatprep.subr.bf16.mxu1 %v10734_v7  ;;  %v10403_v11 = vld [vmem:[%s10744_s28 + $0x38] sm:$0xff]   ;;  %v10404_v12 = vld [vmem:[%s10744_s28 + $0x10] sm:$0xff]   ;;  %v915_v13 = vshll.u32 %v10402_v10, 16  ;;  %v919_v14 = vshrl.u32 %v10402_v10, 16  ;;  %v10405_v18 = vld [vmem:[%s10744_s28 + $0x40] sm:$0xff]   ;;  %vm1820_vm13 = vcmask 123904  }
  0x13   : > { %9776 = vmatprep.mubr.msk.bf16.mxu0 %vm471_vm1, %v10400_v8  ;;  %v923_v15 = vshll.u32 %v10403_v11, 16  ;;  %v927_v16 = vshrl.u32 %v10403_v11, 16  ;;  %v10406_v21 = vld [vmem:[%s10744_s28 + $0x18] sm:$0xff]   ;;  %v10407_v22 = vld [vmem:[%s10744_s28 + $0x48] sm:$0xff]   ;;  %v931_v23 = vshll.u32 %v10405_v18, 16  ;;  %v935_v24 = vshrl.u32 %v10405_v18, 16 }
  0x14   : > { %9777 = vmatmul.mubr.msk.bf16.vlgmr.msra.gmra.mxu0 %vm471_vm1, %v10401_v9  ;;  %v10759_v19 = vrot.slane %v915_v13, 1  ;;  %v939_v27 = vshll.u32 %v10407_v22, 16  ;;  %v10408_v28 = vld [vmem:[%s10744_s28 + $0x20] sm:$0xff]   ;;  %v10409_v30 = vld [vmem:[%s10744_s28 + $0x50] sm:$0xff]   ;;  %v943_v33 = vshrl.u32 %v10407_v22, 16  ;;  %v10411_v37 = vld [vmem:[%s10744_s28 + $0x58] sm:$0xff]  }
  0x15   : > { %9809 = vmatpush3.bf16.msra.mxu0 %v10728_v5  ;;  %9780 = vmatprep.mubr.msk.bf16.mxu0 %vm471_vm1, %v10404_v12  ;;  %v925_v20 = vrot.slane %v923_v15, 1  ;;  %v933_v29 = vrot.slane %v931_v23, 1  ;;  %v947_v36 = vshll.u32 %v10409_v30, 16  ;;  %v951_v38 = vshrl.u32 %v10409_v30, 16  ;;  %v10410_v42 = vld [vmem:[%s10744_s28 + $0x28] sm:$0xff]   ;;  %v10412_v44 = vld [vmem:[%s10744_s28 + $0x30] sm:$0xff]  }
  0x16   : > { %9842 = vmatprep.subr.bf16.mxu0 %v10671_v17  ;;  %v921_v25 = vor.u32 %v919_v14, %v10759_v19  ;;  %v941_v32 = vrot.slane %v939_v27, 1  ;;  %v955_v43 = vshll.u32 %v10411_v37, 16  ;;  %v10413_v45 = vld [vmem:[%s10744_s28 + $0x60] sm:$0xff]   ;;  %v10415_v49 = vld [vmem:[%s10744_s28 + $0x68] sm:$0xff]   ;;  %v959_v51 = vshrl.u32 %v10411_v37, 16  ;;  %v10417_v55 = vld [vmem:[%s10744_s28 + $0x70] sm:$0xff]  }
  0x17   : > { %v929_v26 = vor.u32 %v927_v16, %v925_v20  ;;  %v937_v35 = vor.u32 %v935_v24, %v933_v29  ;;  %v949_v41 = vrot.slane %v947_v36, 1  ;;  %v963_v48 = vshll.u32 %v10413_v45, 16  ;;  %v10419_v58 = vld [vmem:[%s10744_s28 + $0x78] sm:$0xff]   ;;  %v10416_v62 = vld [vmem:[%s10744_s28 + $0x40] sm:$0xff]   ;;  %v10418_v10 = vld [vmem:[%s10744_s28 + $0x48] sm:$0xff]  }
  0x18   : > { %v926_v31 = vsel %vm866_vm2, %v921_v25, %v925_v20  ;;  %v945_v40 = vor.u32 %v943_v33, %v941_v32  ;;  %v957_v47 = vrot.slane %v955_v43, 1  ;;  %v967_v53 = vshrl.u32 %v10413_v45, 16  ;;  %v10414_v59 = vld [vmem:[%s10744_s28 + $0x38] sm:$0xff]   ;;  %v10420_v13 = vld [vmem:[%s10744_s28 + $0x50] sm:$0xff]   ;;  %v10423_v15 = vld [vmem:[%s10744_s28 + $0x8] sm:$0xff]  }
  0x19   : > { %9822 = vmatprep.mubr.msk.bf16.mxu1 %vm471_vm1, %v926_v31  ;;  %v934_v34 = vsel %vm866_vm2, %v929_v26, %v933_v29  ;;  %v942_v39 = vsel %vm866_vm2, %v937_v35, %v941_v32  ;;  %v953_v46 = vor.u32 %v951_v38, %v949_v41  ;;  %v971_v54 = vshll.u32 %v10415_v49, 16  ;;  %v10422_v18 = vld [vmem:[%s10744_s28] sm:$0xfe]   ;;  %v10425_v27 = vld [vmem:[%s10744_s28 + $0x10] sm:$0xff]   ;;  %v10427_v29 = vld [vmem:[%s10744_s28 + $0x18] sm:$0xff]  }
  0x1a   : > { %9823 = vmatmul.mubr.msk.bf16.vlgmr.msra.gmra.mxu1 %vm471_vm1, %v934_v34  ;;  %v950_v50 = vsel %vm866_vm2, %v945_v40, %v949_v41  ;;  %v965_v56 = vrot.slane %v963_v48, 1  ;;  %v961_v57 = vor.u32 %v959_v51, %v957_v47  ;;  %v979_v63 = vshll.u32 %v10417_v55, 16  ;;  %v10424_v24 = vld [vmem:[%s10744_s28 + $0x60] sm:$0xff]   ;;  %v10433_v30 = vld [vmem:[%s10744_s28 + $0x8] sm:$0xff]   ;;  %v10428_v37 = vld [vmem:[%s10744_s28 + $0x70] sm:$0xff]  }
  0x1b   : > { %9849 = vmatpush3.bf16.msra.mxu1 %v10734_v7  ;;  %9826 = vmatprep.mubr.msk.bf16.mxu1 %vm471_vm1, %v942_v39  ;;  %v958_v52 = vsel %vm866_vm2, %v953_v46, %v957_v47  ;;  %v973_v61 = vrot.slane %v971_v54, 1  ;;  %v975_v1 = vshrl.u32 %v10415_v49, 16  ;;  %v983_v3 = vshrl.u32 %v10417_v55, 16  ;;  %v10432_v26 = vld [vmem:[%s10744_s28] sm:$0xff]   ;;  %v10426_v34 = vld [vmem:[%s10744_s28 + $0x68] sm:$0xff]   ;;  %v10435_v45 = vld [vmem:[%s10744_s28 + $0x10] sm:$0xff]  }
  0x1c   : > { %9781 = vmatmul.mubr.msk.bf16.gmra.mxu0 %vm471_vm1, %v10406_v21  ;;  %9922 = vmatprep.subr.bf16.mxu1 %v10671_v17  ;;  %v969_v60 = vor.u32 %v967_v53, %v965_v56  ;;  %v966_v0 = vsel %vm866_vm2, %v961_v57, %v965_v56  ;;  %v987_v4 = vshll.u32 %v10419_v58, 16  ;;  %v981_v8 = vrot.slane %v979_v63, 1  ;;  %v10421_v21 = vld [vmem:[%s10744_s28 + $0x58] sm:$0xff]   ;;  %v9008_v33 = vld [vmem:[%s12718_s0 + $0x3] sm:$0x1]  ;;  %v10431_v43 = vld [vmem:[%s10744_s28 + $0x28] sm:$0xff]  }
  0x1d   : > { %9784 = vmatprep.mubr.msk.bf16.mxu0 %vm471_vm1, %v10408_v28  ;;  %v977_v9 = vor.u32 %v975_v1, %v973_v61  ;;  %v991_v20 = vshrl.u32 %v10419_v58, 16  ;;  %v1466_v22 = vrot.slane %v10422_v18, 1  ;;  %v1467_v23 = vrot.slane %v10423_v15, 1  ;;  %v9042_v36 = vld [vmem:[%s12718_s0 + $0x4] sm:$0x1]  ;;  %v10436_v63 = vld [vmem:[%s10744_s28 + $0x38] sm:$0xff]  }
  0x1e   : > { %v974_v6 = vsel %vm866_vm2, %v969_v60, %v973_v61  ;;  %v985_v11 = vor.u32 %v983_v3, %v981_v8  ;;  %v989_v12 = vrot.slane %v987_v4, 1  ;;  %v870_v31 = vshll.u32 %v10432_v26, 16  ;;  %v10429_v38 = vld [vmem:[%s10744_s28 + $0x20] sm:$0xff]   ;;  %v10434_v60 = vld [vmem:[%s10744_s28 + $0x30] sm:$0xff]  }
  0x1f   : > { %v982_v14 = vsel %vm866_vm2, %v977_v9, %v981_v8  ;;  %v1468_v28 = vsel %vm1465_vm3, %v1466_v22, %v1467_v23  ;;  %v1469_v32 = vrot.slane %v10425_v27, 1  ;;  %v1471_v35 = vrot.slane %v10427_v29, 1  ;;  %v10438_v18 = vld [vmem:[%s10744_s28 + $0x40] sm:$0xff]   ;;  %v10440_v22 = vld [vmem:[%s10744_s28 + $0x48] sm:$0xff]  }
  0x20   : > { %v990_v16 = vsel %vm866_vm2, %v985_v11, %v989_v12  ;;  %v993_v25 = vor.u32 %v991_v20, %v989_v12  ;;  %v868_v39 = vshrl.u32 %v10432_v26, 16  ;;  %v872_v40 = vrot.slane %v870_v31, 1  ;;  %v10442_v31 = vld [vmem:[%s10744_s28 + $0x50] sm:$0xff]  }
  0x21   : > { %v875_v41 = vshll.u32 %v10433_v30, 16  ;;  %v10833_v46 = vand.u32 %v9042_v36, %v10719_v2  ;;  %v10836_v47 = vand.u32 %v9008_v33, %v10719_v2  ;;  %v1473_v51 = vrot.slane %v10429_v38, 1  ;;  %v10443_v33 = vld [vmem:[%s10744_s28 + $0x58] sm:$0xff]   ;;  %v10449_v38 = vld [vmem:[%s10744_s28 + $0x8] sm:$0xff]  }
  0x22   : > { %9827 = vmatmul.mubr.msk.bf16.gmra.mxu1 %vm471_vm1, %v950_v50  ;;  %v873_v48 = vor.u32 %v872_v40, %v868_v39  ;;  %v10437_v50 = vld [vmem:[%s10744_s28 + $0x18] sm:$0xff]   ;;  %v1475_v53 = vrot.slane %v10431_v43, 1  ;;  %v883_v54 = vshll.u32 %v10435_v45, 16  ;;  %v879_v55 = vshrl.u32 %v10433_v30, 16  ;;  %v10448_v39 = vld [vmem:[%s10744_s28] sm:$0xfe]  }
  0x23   : > { %9830 = vmatprep.mubr.msk.bf16.mxu1 %vm471_vm1, %v958_v52  ;;  %v877_v49 = vrot.slane %v875_v41, 1  ;;  %v10430_v52 = vld [vmem:[%s10744_s28 + $0x78] sm:$0xff]   ;;  %v887_v57 = vshrl.u32 %v10435_v45, 16  ;;  %v891_v58 = vshll.u32 %v10437_v50, 16  ;;  %v1477_v8 = vrot.slane %v10434_v60, 1  ;;  %v10444_v41 = vld [vmem:[%s10744_s28 + $0x60] sm:$0xff]  }
  0x24   : > { %9785 = vmatmul.mubr.msk.bf16.gmra.mxu0 %vm471_vm1, %v10410_v42  ;;  %v1470_v42 = vsel %vm1465_vm3, %v1467_v23, %v1469_v32  ;;  %v1476_v61 = vsel %vm1465_vm3, %v1473_v51, %v1475_v53  ;;  %v1479_v9 = vrot.slane %v10436_v63, 1  ;;  %v895_v12 = vshrl.u32 %v10437_v50, 16  ;;  %v10445_v43 = vld [vmem:[%s10744_s28 + $0x68] sm:$0xff]   ;;  %v1272_v50 = vld [vmem:[%s10894_s10] sm:$0x1]  ;;  %v10447_v60 = vld [vmem:[%s10744_s28 + $0x78] sm:$0xff]  }
  0x25   : > { %9788 = vmatprep.mubr.msk.bf16.mxu0 %vm471_vm1, %v10412_v44  ;;  %v1472_v44 = vsel %vm1465_vm3, %v1469_v32, %v1471_v35  ;;  %v878_v56 = vsel %vm866_vm2, %v873_v48, %v877_v49  ;;  %v881_v1 = vor.u32 %v879_v55, %v877_v49  ;;  %v893_v4 = vrot.slane %v891_v58, 1  ;;  %v10451_v58 = vld [vmem:[%s10744_s28 + $0x18] sm:$0xff]  }
  0x26   : > { %v1480_v20 = vsel %vm1465_vm3, %v1477_v8, %v1479_v9  ;;  %v1481_v26 = vrot.slane %v10438_v18, 1  ;;  %v1483_v27 = vrot.slane %v10440_v22, 1  ;;  %v1487_v36 = vrot.slane %v10443_v33, 1 }
  0x27   : > { %v897_v23 = vor.u32 %v895_v12, %v893_v4  ;;  %v1970_v45 = vshrl.u32 %v10448_v39, 16  ;;  %v1973_v48 = vshll.u32 %v10448_v39, 16  ;;  %v1489_v49 = vrot.slane %v10444_v41, 1 }
  0x28   : > { %v1482_v30 = vsel %vm1465_vm3, %v1479_v9, %v1481_v26  ;;  %v1484_v32 = vsel %vm1465_vm3, %v1481_v26, %v1483_v27  ;;  %v10452_v9 = vld [vmem:[%s10744_s28 + $0x20] sm:$0xff]   ;;  %vm1772_vm14 = vcmask 128000   ;;  %vm2435_vm15 = vcmask 124928  }
  0x29   : > { %v1972_v55 = vrot.slane %v1970_v45, 1  ;;  %v2008_v22 = vshll.u32 %v10452_v9, 16  ;;  %v2390_v45 = vld [vmem:[%s10894_s10] sm:$0x3]  ;;  %vm2387_vm0 = vcmask 126976  }
  0x2a   : > { %9831 = vmatmul.mubr.msk.bf16.gmra.mxu1 %vm471_vm1, %v966_v0  ;;  %v10439_v0 = vld [vmem:[%s10744_s28 + $0x20] sm:$0xff]  }
  0x2b   : > { %9834 = vmatprep.mubr.msk.bf16.mxu1 %vm471_vm1, %v974_v6  ;;  %v10441_v6 = vld [vmem:[%s10744_s28 + $0x28] sm:$0xff]  }
  0x2c   : > { %9789 = vmatmul.mubr.msk.bf16.gmra.mxu0 %vm471_vm1, %v10414_v59  ;;  %v1474_v59 = vsel %vm1465_vm3, %v1471_v35, %v1473_v51  ;;  %v907_v15 = vshll.u32 %v10441_v6, 16  ;;  %v911_v29 = vshrl.u32 %v10441_v6, 16  ;;  %v1485_v35 = vrot.slane %v10442_v31, 1  ;;  %v10454_v31 = vld [vmem:[%s10744_s28 + $0x8] sm:$0xff]  }
  0x2d   : > { %9792 = vmatprep.mubr.msk.bf16.mxu0 %vm471_vm1, %v10416_v62  ;;  %v885_v62 = vrot.slane %v883_v54, 1  ;;  %v1491_v51 = vrot.slane %v10445_v43, 1  ;;  %v10450_v54 = vld [vmem:[%s10744_s28 + $0x10] sm:$0xff]   ;;  %v2585_v43 = vrot.slane %v10454_v31, 2 }
  0x2e   : > { %v1486_v40 = vsel %vm1465_vm3, %v1483_v27, %v1485_v35  ;;  %v1990_v63 = vshll.u32 %v10450_v54, 16 }
  0x2f   : > { %v889_v3 = vor.u32 %v887_v57, %v885_v62  ;;  %v886_v11 = vsel %vm866_vm2, %v881_v1, %v885_v62  ;;  %v1987_v62 = vshrl.u32 %v10450_v54, 16 }
  0x32   : > { %9835 = vmatmul.mubr.msk.bf16.gmra.mxu1 %vm471_vm1, %v982_v14  ;;  %v903_v14 = vshrl.u32 %v10439_v0, 16 }
  0x33   : > { %9838 = vmatprep.mubr.msk.bf16.mxu1 %vm471_vm1, %v990_v16  ;;  %v1478_v16 = vsel %vm1465_vm3, %v1475_v53, %v1477_v8  ;;  %v1775_v8 = vld [vmem:[%s10894_s10] sm:$0x1] }
  0x34   : > { %9793 = vmatmul.mubr.msk.bf16.gmra.mxu0 %vm471_vm1, %v10418_v10  ;;  %v899_v10 = vshll.u32 %v10439_v0, 16 }
  0x35   : > { %9796 = vmatprep.mubr.msk.bf16.mxu0 %vm471_vm1, %v10420_v13  ;;  %v894_v13 = vsel %vm866_vm2, %v889_v3, %v893_v4  ;;  %v1996_v3 = vshrl.u32 %v10451_v58, 16  ;;  %v1999_v4 = vshll.u32 %v10451_v58, 16 }
  0x3a   : > { %9839 = vmatmul.mubr.msk.bf16.gmra.mxu1 %vm471_vm1, %v993_v25  ;;  %v909_v25 = vrot.slane %v907_v15, 1  ;;  %v10455_v15 = vld [vmem:[%s10744_s28 + $0x28] sm:$0xff]  }
  0x3b   : > { %9850 = vmatprep.mubr.msk.bf16.mxu1 %vm471_vm1, %v1468_v28 }
  0x3c   : > { %9797 = vmatmul.mubr.msk.bf16.gmra.mxu0 %vm471_vm1, %v10421_v21  ;;  %v901_v21 = vrot.slane %v899_v10, 1  ;;  %v1989_v10 = vrot.slane %v1987_v62, 1 }
  0x3d   : > { %9800 = vmatprep.mubr.msk.bf16.mxu0 %vm471_vm1, %v10424_v24 }
  0x3e   : > { %v905_v24 = vor.u32 %v903_v14, %v901_v21  ;;  %v902_v28 = vsel %vm866_vm2, %v897_v23, %v901_v21  ;;  %v2001_v14 = vrot.slane %v1999_v4, 2 }
  0x42   : > { %9851 = vmatmul.mubr.msk.bf16.vlgmr.msra.gmra.mxu1 %vm471_vm1, %v1470_v42  ;;  %v1488_v42 = vsel %vm1465_vm3, %v1485_v35, %v1487_v36  ;;  %v10459_v35 = vld [vmem:[%s10744_s28 + $0x38] sm:$0xff]  }
  0x43   : > { %9923 = vmatpush3.bf16.msra.mxu1 %v10836_v47  ;;  %9854 = vmatprep.mubr.msk.bf16.mxu1 %vm471_vm1, %v1472_v44  ;;  %v1981_v44 = vshll.u32 %v10449_v38, 16  ;;  %v2035_v41 = vshll.u32 %v10459_v35, 16 }
  0x44   : > { %9801 = vmatmul.mubr.msk.bf16.gmra.mxu0 %vm471_vm1, %v10426_v34  ;;  %9928 = vmatprep.subr.bf16.mxu1 %v10833_v46  ;;  %v913_v34 = vor.u32 %v911_v29, %v909_v25  ;;  %v10457_v29 = vld [vmem:[%s10744_s28 + $0x30] sm:$0xff]  }
  0x45   : > { %9804 = vmatprep.mubr.msk.bf16.mxu0 %vm471_vm1, %v10428_v37  ;;  %v1983_v57 = vrot.slane %v1981_v44, 2  ;;  %v10463_v44 = vld [vmem:[%s10744_s28 + $0x48] sm:$0xff]  }
  0x46   : > { %v918_v37 = vsel %vm866_vm2, %v913_v34, %v10759_v19  ;;  %v1978_v19 = vshrl.u32 %v10449_v38, 16  ;;  %v2026_v38 = vshll.u32 %v10457_v29, 16  ;;  %v2053_v62 = vshll.u32 %v10463_v44, 16 }
  0x48   : > { %v1980_v53 = vrot.slane %v1978_v19, 1  ;;  %v10461_v19 = vld [vmem:[%s10744_s28 + $0x40] sm:$0xff]  }
  0x4a   : > { %9855 = vmatmul.mubr.msk.bf16.gmra.mxu1 %vm471_vm1, %v1474_v59  ;;  %v1490_v59 = vsel %vm1465_vm3, %v1487_v36, %v1489_v49  ;;  %v1984_v1 = vor.u32 %v1983_v57, %v1980_v53  ;;  %v2044_v57 = vshll.u32 %v10461_v19, 16 }
  0x4b   : > { %9858 = vmatprep.mubr.msk.bf16.mxu1 %vm471_vm1, %v1476_v61  ;;  %v1492_v61 = vsel %vm1465_vm3, %v1489_v49, %v1491_v51  ;;  %v10456_v49 = vld [vmem:[%s10744_s28 + $0x10] sm:$0xff]  }
  0x4c   : > { %9805 = vmatmul.mubr.msk.bf16.gmra.mxu0 %vm471_vm1, %v10430_v52  ;;  %v10446_v52 = vld [vmem:[%s10744_s28 + $0x70] sm:$0xff]  }
  0x4d   : > { %9810 = vmatprep.mubr.msk.bf16.mxu0 %vm471_vm1, %v878_v56  ;;  %v1975_v56 = vrot.slane %v1973_v48, 2  ;;  %v1493_v6 = vrot.slane %v10446_v52, 1  ;;  %v10458_v52 = vld [vmem:[%s10744_s28 + $0x18] sm:$0xff]  }
  0x4f   : > { %v1976_v0 = vor.u32 %v1975_v56, %v1972_v55  ;;  %v2037_v55 = vrot.slane %v2035_v41, 2  ;;  %v2041_v56 = vshrl.u32 %v10461_v19, 16 }
  0x51   : > { %v1985_v12 = vsel %vm1968_vm5, %v1976_v0, %v1984_v1  ;;  %v2589_v0 = vrot.slane %v10458_v52, 2 }
  0x52   : > { %9859 = vmatmul.mubr.msk.bf16.gmra.mxu1 %vm471_vm1, %v1478_v16  ;;  %v1494_v16 = vsel %vm1465_vm3, %v1491_v51, %v1493_v6  ;;  %v2028_v51 = vrot.slane %v2026_v38, 2 }
  0x53   : > { %9862 = vmatprep.mubr.msk.bf16.mxu1 %vm471_vm1, %v1480_v20  ;;  %v2005_v20 = vshrl.u32 %v10452_v9, 16 }
  0x54   : > { %9811 = vmatmul.mubr.msk.bf16.vlgmr.msra.gmra.mxu0 %vm471_vm1, %v886_v11  ;;  %v1992_v11 = vrot.slane %v1990_v63, 2  ;;  %v2587_v63 = vrot.slane %v10456_v49, 2 }
  0x55   : > { %9843 = vmatpush3.bf16.msra.mxu0 %v10728_v5  ;;  %9814 = vmatprep.mubr.msk.bf16.mxu0 %vm471_vm1, %v894_v13  ;;  %v910_v5 = vsel %vm866_vm2, %v905_v24, %v909_v25  ;;  %v1998_v13 = vrot.slane %v1996_v3, 1  ;;  %v2014_v24 = vshrl.u32 %v10455_v15, 16  ;;  %v2017_v25 = vshll.u32 %v10455_v15, 16 }
  0x56   : > { %9882 = vmatprep.subr.bf16.mxu0 %v10671_v17  ;;  %v1993_v21 = vor.u32 %v1992_v11, %v1989_v10  ;;  %v2007_v26 = vrot.slane %v2005_v20, 1  ;;  %v2046_v3 = vrot.slane %v2044_v57, 2  ;;  %v10467_v10 = vld [vmem:[%s10744_s28 + $0x58] sm:$0xff]   ;;  %v2588_v11 = vsel %vm2583_vm6, %v2585_v43, %v2587_v63  ;;  %v10470_v57 = vld [vmem:[%s10744_s28 + $0x48] sm:$0xff]  }
  0x57   : > { %v2002_v23 = vor.u32 %v2001_v14, %v1998_v13  ;;  %v2019_v33 = vrot.slane %v2017_v25, 2  ;;  %v2590_v13 = vsel %vm2583_vm6, %v2587_v63, %v2589_v0  ;;  %v10462_v14 = vld [vmem:[%s10744_s28 + $0x28] sm:$0xff]  }
  0x58   : > { %v1994_v27 = vsel %vm1968_vm5, %v1984_v1, %v1993_v21  ;;  %v2043_v1 = vrot.slane %v2041_v56, 1  ;;  %v2593_v25 = vrot.slane %v10462_v14, 2 }
  0x5a   : > { %9863 = vmatmul.mubr.msk.bf16.gmra.mxu1 %vm471_vm1, %v1482_v30  ;;  %v10453_v30 = vld [vmem:[%s10744_s28] sm:$0xfc]  }
  0x5b   : > { %9866 = vmatprep.mubr.msk.bf16.mxu1 %vm471_vm1, %v1484_v32  ;;  %v2016_v32 = vrot.slane %v2014_v24, 1 }
  0x5c   : > { %9815 = vmatmul.mubr.msk.bf16.gmra.mxu0 %vm471_vm1, %v902_v28  ;;  %v2010_v28 = vrot.slane %v2008_v22, 2  ;;  %v2068_v22 = vshrl.u32 %v10467_v10, 16 }
  0x5d   : > { %9818 = vmatprep.mubr.msk.bf16.mxu0 %vm471_vm1, %v910_v5  ;;  %v2003_v5 = vsel %vm1968_vm5, %v1993_v21, %v2002_v23  ;;  %v2020_v39 = vor.u32 %v2019_v33, %v2016_v32  ;;  %v10464_v33 = vld [vmem:[%s10744_s28 + $0x30] sm:$0xff]  }
  0x5e   : > { %v2011_v36 = vor.u32 %v2010_v28, %v2007_v26  ;;  %v10469_v26 = vld [vmem:[%s10744_s28 + $0x60] sm:$0xff]  }
  0x60   : > { %v2012_v48 = vsel %vm1968_vm5, %v2002_v23, %v2011_v36  ;;  %v2021_v53 = vsel %vm1968_vm5, %v2011_v36, %v2020_v39  ;;  %v2071_v23 = vshll.u32 %v10467_v10, 16  ;;  %v10466_v36 = vld [vmem:[%s10744_s28 + $0x38] sm:$0xff]   ;;  %v10472_v10 = vld [vmem:[%s10744_s28 + $0x50] sm:$0xff]  }
  0x61   : > { %v2597_v19 = vrot.slane %v10466_v36, 2 }
  0x62   : > { %9867 = vmatmul.mubr.msk.bf16.gmra.mxu1 %vm471_vm1, %v1486_v40  ;;  %v2032_v40 = vshrl.u32 %v10459_v35, 16  ;;  %v2073_v31 = vrot.slane %v2071_v23, 2  ;;  %v10481_v23 = vld [vmem:[%s10744_s28 + $0x8] sm:$0xff]  }
  0x63   : > { %9870 = vmatprep.mubr.msk.bf16.mxu1 %vm471_vm1, %v1488_v42  ;;  %v2584_v42 = vrot.slane %v10453_v30, 2  ;;  %v2070_v30 = vrot.slane %v2068_v22, 1 }
  0x64   : > { %9819 = vmatmul.mubr.msk.bf16.gmra.mxu0 %vm471_vm1, %v918_v37  ;;  %v2023_v37 = vshrl.u32 %v10457_v29, 16  ;;  %v2034_v54 = vrot.slane %v2032_v40, 1  ;;  %v10471_v29 = vld [vmem:[%s10744_s28 + $0x68] sm:$0xff]  }
  0x65   : > { %9844 = vmatprep.mubr.msk.bf16.mxu0 %vm10672_vm4, %v10671_v17  ;;  %v2586_v58 = vsel %vm2583_vm6, %v2584_v42, %v2585_v43  ;;  %v2086_v40 = vshrl.u32 %v10471_v29, 16  ;;  %v2074_v41 = vor.u32 %v2073_v31, %v2070_v30  ;;  %v2089_v42 = vshll.u32 %v10471_v29, 16 }
  0x66   : > { %v2595_v43 = vrot.slane %v10464_v33, 2  ;;  %v3098_v30 = vshll.u32 %v10481_v23, 16 }
  0x67   : > { %v2088_v49 = vrot.slane %v2086_v40, 1  ;;  %v2091_v52 = vrot.slane %v2089_v42, 2 }
  0x68   : > { %v2598_v56 = vsel %vm2583_vm6, %v2595_v43, %v2597_v19 }
  0x6a   : > { %9871 = vmatmul.mubr.msk.bf16.gmra.mxu1 %vm471_vm1, %v1490_v59  ;;  %v2050_v59 = vshrl.u32 %v10463_v44, 16 }
  0x6b   : > { %9874 = vmatprep.mubr.msk.bf16.mxu1 %vm471_vm1, %v1492_v61  ;;  %v2038_v61 = vor.u32 %v2037_v55, %v2034_v54  ;;  %v2596_v54 = vsel %vm2583_vm6, %v2593_v25, %v2595_v43  ;;  %v10468_v55 = vld [vmem:[%s10744_s28 + $0x40] sm:$0xff]  }
  0x6c   : > { %9845 = vmatmul.mubr.msk.bf16.vlgmr.msra.gmra.mxu0 %vm471_vm1, %v1272_v50  ;;  %v2025_v50 = vrot.slane %v2023_v37, 1  ;;  %v2052_v4 = vrot.slane %v2050_v59, 1  ;;  %v2077_v37 = vshrl.u32 %v10469_v26, 16 }
  0x6d   : > { %9883 = vmatpush3.bf16.msra.mxu0 %v10734_v7  ;;  %9884 = vmatprep.mubr.msk.bf16.mxu0 %vm10672_vm4, %v10671_v17  ;;  %v1495_v7 = vrot.slane %v10447_v60, 1 }
  0x6e   : > { %9888 = vmatprep.subr.bf16.mxu0 %v10836_v47  ;;  %v2029_v60 = vor.u32 %v2028_v51, %v2025_v50  ;;  %v10473_v50 = vld [vmem:[%s10744_s28 + $0x70] sm:$0xff]  }
  0x6f   : > { %v1496_v18 = vsel %vm1465_vm3, %v1493_v6, %v1495_v7  ;;  %v10465_v6 = vld [vmem:[%s10744_s28 + $0x50] sm:$0xff]   ;;  %v2095_v59 = vshrl.u32 %v10473_v50, 16 }
  0x70   : > { %v2039_v9 = vsel %vm1968_vm5, %v2029_v60, %v2038_v61  ;;  %v2059_v15 = vshrl.u32 %v10465_v6, 16  ;;  %v2062_v20 = vshll.u32 %v10465_v6, 16 }
  0x72   : > { %9875 = vmatmul.mubr.msk.bf16.gmra.mxu1 %vm471_vm1, %v1494_v16  ;;  %v2064_v28 = vrot.slane %v2062_v20, 2 }
  0x73   : > { %9878 = vmatprep.mubr.msk.bf16.mxu1 %vm471_vm1, %v1496_v18  ;;  %v2047_v18 = vor.u32 %v2046_v3, %v2043_v1  ;;  %v2601_v1 = vrot.slane %v10470_v57, 2  ;;  %v10487_v57 = vld [vmem:[%s10744_s28 + $0x28] sm:$0xff]  }
  0x74   : > { %9885 = vmatmul.mubr.msk.bf16.vlgmr.msra.gmra.mxu0 %vm471_vm1, %v1775_v8  ;;  %v2030_v8 = vsel %vm1968_vm5, %v2020_v39, %v2029_v60  ;;  %v2080_v39 = vshll.u32 %v10469_v26, 16  ;;  %v2098_v60 = vshll.u32 %v10473_v50, 16  ;;  %v10477_v26 = vld [vmem:[%s10744_s28 + $0x68] sm:$0xff]  }
  0x75   : > { %9889 = vmatpush3.bf16.msra.mxu0 %v10836_v47  ;;  %9890 = vmatprep.mubr.msk.bf16.mxu0 %vm471_vm1, %v1985_v12  ;;  %v9076_v47 = vld [vmem:[%s12718_s0 + $0x5] sm:$0x1]  ;;  %v2609_v33 = vrot.slane %v10477_v26, 2 }
  0x76   : > { %9962 = vmatprep.subr.bf16.mxu0 %v10671_v17  ;;  %v10933_v34 = vand.u32 %v9076_v47, %v10719_v2  ;;  %v10460_v12 = vld [vmem:[%s10744_s28 + $0x20] sm:$0xff]   ;;  %v2061_v47 = vrot.slane %v2059_v15, 1  ;;  %v2100_v6 = vrot.slane %v2098_v60, 2  ;;  %v2603_v15 = vrot.slane %v10472_v10, 2  ;;  %v10491_v10 = vld [vmem:[%s10744_s28 + $0x38] sm:$0xff]  }
  0x77   : > { %v2591_v24 = vrot.slane %v10460_v12, 2  ;;  %v10474_v12 = vld [vmem:[%s10744_s28 + $0x58] sm:$0xff]  }
  0x78   : > { %v2065_v38 = vor.u32 %v2064_v28, %v2061_v47 }
  0x79   : > { %v2592_v32 = vsel %vm2583_vm6, %v2589_v0, %v2591_v24  ;;  %v2594_v35 = vsel %vm2583_vm6, %v2591_v24, %v2593_v25  ;;  %v2599_v0 = vrot.slane %v10468_v55, 2  ;;  %v2604_v24 = vsel %vm2583_vm6, %v2601_v1, %v2603_v15  ;;  %v10476_v25 = vld [vmem:[%s10744_s28 + $0x60] sm:$0xff]  }
  0x7a   : > { %9879 = vmatmul.mubr.msk.bf16.gmra.mxu1 %vm471_vm1, %v1495_v7  ;;  %v9110_v7 = vld [vmem:[%s12718_s0 + $0x6] sm:$0x1]  ;;  %v2075_v51 = vsel %vm1968_vm5, %v2065_v38, %v2074_v41  ;;  %v2607_v31 = vrot.slane %v10476_v25, 2 }
  0x7b   : > { %9924 = vmatprep.mubr.msk.bf16.mxu1 %vm10672_vm4, %v10671_v17  ;;  %v10970_v16 = vand.u32 %v9110_v7, %v10719_v2 }
  0x7c   : > { %9891 = vmatmul.mubr.msk.bf16.vlgmr.msra.gmra.mxu0 %vm471_vm1, %v1994_v27  ;;  %v2048_v27 = vsel %vm1968_vm5, %v2038_v61, %v2047_v18  ;;  %v2092_v61 = vor.u32 %v2091_v52, %v2088_v49  ;;  %v2610_v43 = vsel %vm2583_vm6, %v2607_v31, %v2609_v33 }
  0x7d   : > { %9963 = vmatpush3.bf16.msra.mxu0 %v10833_v46  ;;  %9894 = vmatprep.mubr.msk.bf16.mxu0 %vm471_vm1, %v2003_v5 }
  0x7e   : > { %9968 = vmatprep.subr.bf16.mxu0 %v10933_v34 }
  0x82   : > { %9925 = vmatmul.mubr.msk.bf16.vlgmr.msra.gmra.mxu1 %vm471_vm1, %v2390_v45  ;;  %v2079_v45 = vrot.slane %v2077_v37, 1  ;;  %v10484_v37 = vld [vmem:[%s10744_s28 + $0x20] sm:$0xff]  }
  0x83   : > { %9929 = vmatpush3.bf16.msra.mxu1 %v10833_v46  ;;  %9930 = vmatprep.mubr.msk.bf16.mxu1 %vm471_vm1, %v2586_v58  ;;  %v2055_v46 = vrot.slane %v2053_v62, 2  ;;  %v3122_v50 = vshrl.u32 %v10484_v37, 16  ;;  %v3125_v55 = vshll.u32 %v10484_v37, 16 }
  0x84   : > { %9895 = vmatmul.mubr.msk.bf16.gmra.mxu0 %vm471_vm1, %v2012_v48  ;;  %10002 = vmatprep.subr.bf16.mxu1 %v10671_v17  ;;  %v2082_v48 = vrot.slane %v2080_v39, 2 }
  0x85   : > { %9898 = vmatprep.mubr.msk.bf16.mxu0 %vm471_vm1, %v2021_v53  ;;  %v2056_v21 = vor.u32 %v2055_v46, %v2052_v4  ;;  %v10475_v53 = vld [vmem:[%s10744_s28 + $0x78] sm:$0xff]   ;;  %v2097_v4 = vrot.slane %v2095_v59, 1  ;;  %v2600_v46 = vsel %vm2583_vm6, %v2597_v19, %v2599_v0 }
  0x86   : > { %v2083_v58 = vor.u32 %v2082_v48, %v2079_v45  ;;  %v2104_v62 = vshrl.u32 %v10475_v53, 16  ;;  %v2107_v63 = vshll.u32 %v10475_v53, 16  ;;  %v10479_v19 = vld [vmem:[%s10744_s28 + $0x78] sm:$0xff]   ;;  %v11035_v53 = vld [vmem:[%s10744_s28] sm:$0xf8]  }
  0x87   : > { %v2057_v5 = vsel %vm1968_vm5, %v2047_v18, %v2056_v21  ;;  %v2066_v44 = vsel %vm1968_vm5, %v2056_v21, %v2065_v38  ;;  %v2605_v18 = vrot.slane %v10474_v12, 2  ;;  %v10480_v21 = vld [vmem:[%s10744_s28] sm:$0xfc]  }
  0x88   : > { %v2084_v3 = vsel %vm1968_vm5, %v2074_v41, %v2083_v58  ;;  %v2106_v7 = vrot.slane %v2104_v62, 1  ;;  %v3087_v28 = vshrl.u32 %v10480_v21, 16  ;;  %v3090_v29 = vshll.u32 %v10480_v21, 16  ;;  %v9144_v12 = vld [vmem:[%s12718_s0 + $0x7] sm:$0x1] }
  0x89   : > { %v2606_v47 = vsel %vm2583_vm6, %v2603_v15, %v2605_v18  ;;  %v3100_v41 = vrot.slane %v3098_v30, 3  ;;  %v2608_v42 = vsel %vm2583_vm6, %v2605_v18, %v2607_v31  ;;  %v3149_v18 = vshrl.u32 %v10491_v10, 16  ;;  %v10488_v30 = vld [vmem:[%s10744_s28 + $0x10] sm:$0xff]   ;;  %v10495_v31 = vld [vmem:[%s10744_s28 + $0x48] sm:$0xff]  }
  0x8a   : > { %9931 = vmatmul.mubr.msk.bf16.vlgmr.msra.gmra.mxu1 %vm471_vm1, %v2588_v11  ;;  %v2602_v11 = vsel %vm2583_vm6, %v2599_v0, %v2601_v1  ;;  %v3089_v38 = vrot.slane %v3087_v28, 2  ;;  %v3092_v39 = vrot.slane %v3090_v29, 3  ;;  %v3124_v1 = vrot.slane %v3122_v50, 2 }
  0x8b   : > { %10003 = vmatpush3.bf16.msra.mxu1 %v10933_v34  ;;  %9934 = vmatprep.mubr.msk.bf16.mxu1 %vm471_vm1, %v2590_v13  ;;  %v2101_v13 = vor.u32 %v2100_v6, %v2097_v4  ;;  %v3127_v4 = vrot.slane %v3125_v55, 3  ;;  %v3699_v6 = vrot.slane %v11035_v53, 3  ;;  %v3151_v26 = vrot.slane %v3149_v18, 2 }
  0x8c   : > { %9899 = vmatmul.mubr.msk.bf16.gmra.mxu0 %vm471_vm1, %v2030_v8  ;;  %10008 = vmatprep.subr.bf16.mxu1 %v10970_v16  ;;  %v2093_v8 = vsel %vm1968_vm5, %v2083_v58, %v2092_v61  ;;  %v2613_v58 = vrot.slane %v10479_v19, 2  ;;  %v3167_v19 = vshrl.u32 %v10495_v31, 16 }
  0x8d   : > { %9902 = vmatprep.mubr.msk.bf16.mxu0 %vm471_vm1, %v2039_v9  ;;  %v2109_v9 = vrot.slane %v2107_v63, 2  ;;  %v2102_v20 = vsel %vm1968_vm5, %v2092_v61, %v2101_v13  ;;  %v3128_v28 = vor.u32 %v3127_v4, %v3124_v1 }
  0x8f   : > { %v2110_v14 = vor.u32 %v2109_v9, %v2106_v7  ;;  %v3131_v7 = vshrl.u32 %v10487_v57, 16 }
  0x91   : > { %v2111_v22 = vsel %vm1968_vm5, %v2101_v13, %v2110_v14 }
  0x92   : > { %9935 = vmatmul.mubr.msk.bf16.gmra.mxu1 %vm471_vm1, %v2592_v32  ;;  %v10482_v32 = vld [vmem:[%s10744_s28 + $0x10] sm:$0xff]  }
  0x93   : > { %9938 = vmatprep.mubr.msk.bf16.mxu1 %vm471_vm1, %v2594_v35  ;;  %v10483_v35 = vld [vmem:[%s10744_s28 + $0x18] sm:$0xff]   ;;  %v3107_v45 = vshll.u32 %v10482_v32, 16 }
  0x94   : > { %9903 = vmatmul.mubr.msk.bf16.gmra.mxu0 %vm471_vm1, %v2048_v27  ;;  %v10478_v27 = vld [vmem:[%s10744_s28 + $0x70] sm:$0xff]   ;;  %v3113_v48 = vshrl.u32 %v10483_v35, 16  ;;  %v3116_v49 = vshll.u32 %v10483_v35, 16 }
  0x95   : > { %9906 = vmatprep.mubr.msk.bf16.mxu0 %vm471_vm1, %v2057_v5  ;;  %v3095_v5 = vshrl.u32 %v10481_v23, 16  ;;  %v2611_v36 = vrot.slane %v10478_v27, 2  ;;  %v3109_v60 = vrot.slane %v3107_v45, 3 }
  0x96   : > { %v3115_v61 = vrot.slane %v3113_v48, 2  ;;  %v3118_v62 = vrot.slane %v3116_v49, 3  ;;  %v10497_v48 = vld [vmem:[%s10744_s28 + $0x50] sm:$0xff]   ;;  %v11095_v49 = vld [vmem:[%s12721_s3] ss:$0 sm:$0xff] }
  0x97   : > { %v3097_v40 = vrot.slane %v3095_v5, 2  ;;  %v2612_v63 = vsel %vm2583_vm6, %v2609_v33, %v2611_v36  ;;  %v2614_v9 = vsel %vm2583_vm6, %v2611_v36, %v2613_v58  ;;  %v10493_v5 = vld [vmem:[%s10744_s28 + $0x40] sm:$0xff]   ;;  %v11078_v36 = vld [vmem:[%s10744_s28 + $0x18] sm:$0xff]  }
  0x98   : > { %v3119_v13 = vor.u32 %v3118_v62, %v3115_v61  ;;  %v3704_v45 = vrot.slane %v11078_v36, 3  ;;  %v11109_v62 = vld [vmem:[%s10744_s28 + $0x28] sm:$0xff]  }
  0x99   : > { %v3101_v52 = vor.u32 %v3100_v41, %v3097_v40  ;;  %v3702_v41 = vrot.slane %v10488_v30, 3 }
  0x9a   : > { %9939 = vmatmul.mubr.msk.bf16.gmra.mxu1 %vm471_vm1, %v2596_v54  ;;  %v2893_v54 = vld [vmem:[%s10894_s10] sm:$0x3]  ;;  %v3129_v33 = vsel %vm3085_vm7, %v3119_v13, %v3128_v28 }
  0x9b   : > { %9942 = vmatprep.mubr.msk.bf16.mxu1 %vm471_vm1, %v2598_v56  ;;  %v11040_v56 = vld [vmem:[%s10744_s28 + $0x8] sm:$0xff]  }
  0x9c   : > { %9907 = vmatmul.mubr.msk.bf16.gmra.mxu0 %vm471_vm1, %v2066_v44  ;;  %v3104_v44 = vshrl.u32 %v10482_v32, 16  ;;  %v3506_v32 = vld [vmem:[%s10894_s10] sm:$0x7] }
  0x9d   : > { %9910 = vmatprep.mubr.msk.bf16.mxu0 %vm471_vm1, %v2075_v51  ;;  %v3093_v51 = vor.u32 %v3092_v39, %v3089_v38  ;;  %v3158_v38 = vshrl.u32 %v10493_v5, 16  ;;  %v3161_v39 = vshll.u32 %v10493_v5, 16 }
  0x9e   : > { %v3106_v59 = vrot.slane %v3104_v44, 2  ;;  %v3170_v44 = vshll.u32 %v10495_v31, 16 }
  0x9f   : > { %v3102_v0 = vsel %vm3085_vm7, %v3093_v51, %v3101_v52  ;;  %v3160_v50 = vrot.slane %v3158_v38, 2  ;;  %v3163_v51 = vrot.slane %v3161_v39, 3 }
  0xa0   : > { %v3172_v55 = vrot.slane %v3170_v44, 3 }
  0xa2   : > { %9943 = vmatmul.mubr.msk.bf16.gmra.mxu1 %vm471_vm1, %v2600_v46  ;;  %v3134_v46 = vshll.u32 %v10487_v57, 16  ;;  %v10499_v57 = vld [vmem:[%s10744_s28 + $0x58] sm:$0xff]  }
  0xa3   : > { %9946 = vmatprep.mubr.msk.bf16.mxu1 %vm471_vm1, %v2602_v11  ;;  %v3110_v11 = vor.u32 %v3109_v60, %v3106_v59  ;;  %v3705_v59 = vsel %vm3698_vm8, %v3702_v41, %v3704_v45 }
  0xa4   : > { %9911 = vmatmul.mubr.msk.bf16.gmra.mxu0 %vm471_vm1, %v2084_v3  ;;  %v10489_v3 = vld [vmem:[%s10744_s28 + $0x30] sm:$0xff]   ;;  %v3136_v23 = vrot.slane %v3134_v46, 3 }
  0xa5   : > { %9914 = vmatprep.mubr.msk.bf16.mxu0 %vm471_vm1, %v2093_v8  ;;  %v3700_v8 = vrot.slane %v11040_v56, 3  ;;  %v3143_v15 = vshll.u32 %v10489_v3, 16  ;;  %v3120_v21 = vsel %vm3085_vm7, %v3110_v11, %v3119_v13  ;;  %v3164_v56 = vor.u32 %v3163_v51, %v3160_v50 }
  0xa7   : > { %v3701_v37 = vsel %vm3698_vm8, %v3699_v6, %v3700_v8 }
  0xaa   : > { %9947 = vmatmul.mubr.msk.bf16.gmra.mxu1 %vm471_vm1, %v2604_v24  ;;  %v11062_v24 = vand.u32 %v9144_v12, %v10719_v2 }
  0xab   : > { %9950 = vmatprep.mubr.msk.bf16.mxu1 %vm471_vm1, %v2606_v47  ;;  %v3145_v47 = vrot.slane %v3143_v15, 3 }
  0xac   : > { %9915 = vmatmul.mubr.msk.bf16.gmra.mxu0 %vm471_vm1, %v2102_v20  ;;  %v3152_v20 = vshll.u32 %v10491_v10, 16  ;;  %v3708_v10 = vrot.slane %v11109_v62, 3  ;;  %v11167_v62 = vld [vmem:[%s10744_s28 + $0x48] sm:$0xff]  }
  0xad   : > { %9918 = vmatprep.mubr.msk.bf16.mxu0 %vm471_vm1, %v2111_v22  ;;  %v3133_v22 = vrot.slane %v3131_v7, 2  ;;  %v3188_v7 = vshll.u32 %v10499_v57, 16 }
  0xae   : > { %v3154_v27 = vrot.slane %v3152_v20, 3 }
  0xaf   : > { %v3137_v29 = vor.u32 %v3136_v23, %v3133_v22  ;;  %v3190_v22 = vrot.slane %v3188_v7, 3  ;;  %v10503_v23 = vld [vmem:[%s10744_s28 + $0x68] sm:$0xff]  }
  0xb0   : > { %v3203_v36 = vshrl.u32 %v10503_v23, 16 }
  0xb1   : > { %v3138_v35 = vsel %vm3085_vm7, %v3128_v28, %v3137_v29  ;;  %v11136_v28 = vld [vmem:[%s10744_s28 + $0x38] sm:$0xff]  }
  0xb2   : > { %9951 = vmatmul.mubr.msk.bf16.gmra.mxu1 %vm471_vm1, %v2608_v42  ;;  %v3155_v42 = vor.u32 %v3154_v27, %v3151_v26 }
  0xb3   : > { %9954 = vmatprep.mubr.msk.bf16.mxu1 %vm471_vm1, %v2610_v43  ;;  %v10492_v43 = vld [vmem:[%s10744_s28 + $0x20] sm:$0xff]  }
  0xb4   : > { %9919 = vmatmul.mubr.msk.bf16.gmra.mxu0 %vm471_vm1, %v2110_v14  ;;  %v3140_v14 = vshrl.u32 %v10489_v3, 16  ;;  %v3706_v61 = vrot.slane %v10492_v43, 3  ;;  %v3165_v13 = vsel %vm3085_vm7, %v3155_v42, %v3164_v56 }
  0xb5   : > { %9964 = vmatprep.mubr.msk.bf16.mxu0 %vm10672_vm4, %v10671_v17 }
  0xb6   : > { %v3142_v25 = vrot.slane %v3140_v14, 2  ;;  %v3709_v27 = vsel %vm3698_vm8, %v3706_v61, %v3708_v10 }
  0xb8   : > { %v3146_v40 = vor.u32 %v3145_v47, %v3142_v25  ;;  %v3707_v47 = vsel %vm3698_vm8, %v3704_v45, %v3706_v61 }
  0xba   : > { %9955 = vmatmul.mubr.msk.bf16.gmra.mxu1 %vm471_vm1, %v2612_v63  ;;  %v3156_v53 = vsel %vm3085_vm7, %v3146_v40, %v3155_v42  ;;  %v3176_v63 = vshrl.u32 %v10497_v48, 16  ;;  %v3712_v42 = vrot.slane %v11136_v28, 3 }
  0xbb   : > { %9958 = vmatprep.mubr.msk.bf16.mxu1 %vm471_vm1, %v2614_v9 }
  0xbc   : > { %9965 = vmatmul.mubr.msk.bf16.vlgmr.msra.gmra.mxu0 %vm471_vm1, %v2893_v54  ;;  %v3169_v54 = vrot.slane %v3167_v19, 2  ;;  %v3178_v14 = vrot.slane %v3176_v63, 2 }
  0xbd   : > { %9969 = vmatpush3.bf16.msra.mxu0 %v10933_v34  ;;  %9970 = vmatprep.mubr.msk.bf16.mxu0 %vm471_vm1, %v3102_v0  ;;  %v3111_v34 = vsel %vm3085_vm7, %v3101_v52, %v3110_v11  ;;  %v3147_v52 = vsel %vm3085_vm7, %v3137_v29, %v3146_v40  ;;  %v3179_v0 = vshll.u32 %v10497_v48, 16  ;;  %v10501_v11 = vld [vmem:[%s10744_s28 + $0x60] sm:$0xff]   ;;  %v10505_v48 = vld [vmem:[%s10744_s28 + $0x70] sm:$0xff]  }
  0xbe   : > { %10042 = vmatprep.subr.bf16.mxu0 %v10671_v17  ;;  %v3173_v6 = vor.u32 %v3172_v55, %v3169_v54  ;;  %v3194_v29 = vshrl.u32 %v10501_v11, 16  ;;  %v3197_v5 = vshll.u32 %v10501_v11, 16  ;;  %v10507_v55 = vld [vmem:[%s10744_s28 + $0x78] sm:$0xff]  }
  0xbf   : > { %v3181_v15 = vrot.slane %v3179_v0, 3 }
  0xc0   : > { %v3174_v20 = vsel %vm3085_vm7, %v3164_v56, %v3173_v6  ;;  %v3196_v44 = vrot.slane %v3194_v29, 2  ;;  %v3199_v45 = vrot.slane %v3197_v5, 3  ;;  %v3215_v56 = vshll.u32 %v10505_v48, 16 }
  0xc1   : > { %v3182_v31 = vor.u32 %v3181_v15, %v3178_v14 }
  0xc2   : > { %9959 = vmatmul.mubr.msk.bf16.gmra.mxu1 %vm471_vm1, %v2613_v58  ;;  %v3703_v58 = vsel %vm3698_vm8, %v3700_v8, %v3702_v41  ;;  %v3185_v8 = vshrl.u32 %v10499_v57, 16  ;;  %v3200_v0 = vor.u32 %v3199_v45, %v3196_v44  ;;  %v10513_v44 = vld [vmem:[%s10744_s28 + $0x8] sm:$0xff]  }
  0xc3   : > { %10004 = vmatprep.mubr.msk.bf16.mxu1 %vm10672_vm4, %v10671_v17  ;;  %v3183_v19 = vsel %vm3085_vm7, %v3173_v6, %v3182_v31 }
  0xc4   : > { %9971 = vmatmul.mubr.msk.bf16.vlgmr.msra.gmra.mxu0 %vm471_vm1, %v3111_v34  ;;  %v10496_v34 = vld [vmem:[%s10744_s28 + $0x30] sm:$0xff]  }
  0xc5   : > { %10043 = vmatpush3.bf16.msra.mxu0 %v10970_v16  ;;  %9974 = vmatprep.mubr.msk.bf16.mxu0 %vm471_vm1, %v3120_v21  ;;  %v3187_v21 = vrot.slane %v3185_v8, 2  ;;  %v3710_v39 = vrot.slane %v10496_v34, 3 }
  0xc6   : > { %10048 = vmatprep.subr.bf16.mxu0 %v11062_v24 }
  0xc7   : > { %v3713_v61 = vsel %vm3698_vm8, %v3710_v39, %v3712_v42 }
  0xca   : > { %10005 = vmatmul.mubr.msk.bf16.vlgmr.msra.gmra.mxu1 %vm471_vm1, %v3506_v32 }
  0xcb   : > { %10009 = vmatpush3.bf16.msra.mxu1 %v10970_v16  ;;  %10010 = vmatprep.mubr.msk.bf16.mxu1 %vm471_vm1, %v3701_v37  ;;  %v9178_v16 = vld [vmem:[%s12718_s0 + $0x8] sm:$0x1]  ;;  %v3206_v37 = vshll.u32 %v10503_v23, 16  ;;  %v10504_v23 = vld [vmem:[%s10744_s28 + $0x50] sm:$0xff]  }
  0xcc   : > { %9975 = vmatmul.mubr.msk.bf16.gmra.mxu0 %vm471_vm1, %v3129_v33  ;;  %10082 = vmatprep.subr.bf16.mxu1 %v10671_v17  ;;  %v11112_v1 = vand.u32 %v9178_v16, %v10719_v2  ;;  %v10500_v16 = vld [vmem:[%s10744_s28 + $0x40] sm:$0xff]  }
  0xcd   : > { %9978 = vmatprep.mubr.msk.bf16.mxu0 %vm471_vm1, %v3138_v35  ;;  %v3191_v35 = vor.u32 %v3190_v22, %v3187_v21  ;;  %v3208_v54 = vrot.slane %v3206_v37, 3  ;;  %v3714_v8 = vrot.slane %v10500_v16, 3  ;;  %v3718_v37 = vrot.slane %v10504_v23, 3 }
  0xcf   : > { %v3201_v15 = vsel %vm3085_vm7, %v3191_v35, %v3200_v0 }
  0xd2   : > { %10011 = vmatmul.mubr.msk.bf16.vlgmr.msra.gmra.mxu1 %vm471_vm1, %v3703_v58  ;;  %v3711_v58 = vsel %vm3698_vm8, %v3708_v10, %v3710_v39  ;;  %v11207_v39 = vld [vmem:[%s10744_s28 + $0x60] sm:$0xff]  }
  0xd3   : > { %10083 = vmatpush3.bf16.msra.mxu1 %v11062_v24  ;;  %10014 = vmatprep.mubr.msk.bf16.mxu1 %vm471_vm1, %v3705_v59 }
  0xd4   : > { %v9778_v60 = vpop.f32.mrf.mxu0  ;;  %9979 = vmatmul.mubr.msk.bf16.gmra.mxu0 %vm471_vm1, %v3147_v52  ;;  %10088 = vmatprep.subr.bf16.mxu1 %v11112_v1  ;;  %v3192_v52 = vsel %vm3085_vm7, %v3182_v31, %v3191_v35 }
  0xd5   : > { %v569_v3 = vadd.f32 %v9778_v60, %v11095_v49  ;;  %9982 = vmatprep.mubr.msk.bf16.mxu0 %vm471_vm1, %v3156_v53  ;;  %v3205_v53 = vrot.slane %v3203_v36, 2 }
  0xd6   : > { %v560_v4 = vpop.f32.mrf.mxu0 }
  0xd7   : > { %690 = vst.msk [vmem:[#allocation2 + $0x10] sm:$0xff] %vm687_vm9, %v569_v3  ;;  %v561_v9 = vadd.f32 %v11095_v49, %v560_v4  ;;  %v3212_v3 = vshrl.u32 %v10505_v48, 16  ;;  %v3209_v7 = vor.u32 %v3208_v54, %v3205_v53  ;;  %v10512_v53 = vld [vmem:[%s10744_s28] sm:$0xf8]  }
  0xd8   : > { %v9779_v46 = vpop.f32.mrf.mxu0 }
  0xd9   : > { %688 = vst.msk [vmem:[#allocation2] sm:$0xff] %vm687_vm9, %v561_v9  ;;  %v572_v12 = vadd.f32 %v9779_v46, %v11095_v49  ;;  %v3221_v9 = vshrl.u32 %v10507_v55, 16  ;;  %v3224_v46 = vshll.u32 %v10507_v55, 16  ;;  %v3210_v22 = vsel %vm3085_vm7, %v3200_v0, %v3209_v7 }
  0xda   : > { %v563_v18 = vpop.f32.mrf.mxu0  ;;  %v11141_v32 = vpop.f32.mrf.mxu1  ;;  %10015 = vmatmul.mubr.msk.bf16.gmra.mxu1 %vm471_vm1, %v3707_v47 }
  0xdb   : > { %691 = vst.msk [vmem:[#allocation2 + $0x18] sm:$0xff] %vm687_vm9, %v572_v12  ;;  %v564_v25 = vadd.f32 %v11095_v49, %v563_v18  ;;  %10018 = vmatprep.mubr.msk.bf16.mxu1 %vm471_vm1, %v3709_v27  ;;  %v3214_v18 = vrot.slane %v3212_v3, 2  ;;  %v3226_v47 = vrot.slane %v3224_v46, 3  ;;  %v3715_v27 = vsel %vm3698_vm8, %v3712_v42, %v3714_v8 }
  0xdc   : > { %v9782_v26 = vpop.f32.mrf.mxu0  ;;  %9983 = vmatmul.mubr.msk.bf16.gmra.mxu0 %vm471_vm1, %v3165_v13  ;;  %v11147_v40 = vpop.f32.mrf.mxu1  ;;  %v3716_v13 = vrot.slane %v11167_v62, 3  ;;  %v11233_v62 = vld [vmem:[%s10744_s28 + $0x68] sm:$0xff]  }
  0xdd   : > { %689 = vst.msk [vmem:[#allocation2 + $0x8] sm:$0xff] %vm687_vm9, %v564_v25  ;;  %v585_v30 = vadd.f32 %v9782_v26, %v11095_v49  ;;  %9986 = vmatprep.mubr.msk.bf16.mxu0 %vm471_vm1, %v3174_v20  ;;  %v3217_v20 = vrot.slane %v3215_v56, 3  ;;  %v3223_v25 = vrot.slane %v3221_v9, 2  ;;  %v4212_v9 = vshll.u32 %v10513_v44, 16 }
  0xde   : > { %v576_v33 = vpop.f32.mrf.mxu0  ;;  %v11154_v50 = vpop.f32.mrf.mxu1  ;;  %v3717_v5 = vsel %vm3698_vm8, %v3714_v8, %v3716_v13  ;;  %v3719_v55 = vsel %vm3698_vm8, %v3716_v13, %v3718_v37  ;;  %v4201_v8 = vshrl.u32 %v10512_v53, 16 }
  0xdf   : > { %694 = vst.msk [vmem:[#allocation2 + $0x30] sm:$0xff] %vm687_vm9, %v585_v30  ;;  %v577_v38 = vadd.f32 %v11095_v49, %v576_v33  ;;  %v11196_v30 = vld [vmem:[%s10744_s28 + $0x58] sm:$0xff]   ;;  %v3218_v33 = vor.u32 %v3217_v20, %v3214_v18  ;;  %v11249_v18 = vld [vmem:[%s10744_s28 + $0x70] sm:$0xff]  }
  0xe0   : > { %v9783_v41 = vpop.f32.mrf.mxu0  ;;  %v11162_v59 = vpop.f32.mrf.mxu1 }
  0xe1   : > { %692 = vst.msk [vmem:[#allocation2 + $0x20] sm:$0xff] %vm687_vm9, %v577_v38  ;;  %v588_v43 = vadd.f32 %v9783_v41, %v11095_v49  ;;  %v11204_v38 = vor.u32 %v3226_v47, %v3223_v25  ;;  %v3219_v48 = vsel %vm3085_vm7, %v3209_v7, %v3218_v33  ;;  %v4204_v7 = vshll.u32 %v10512_v53, 16  ;;  %v11259_v47 = vld [vmem:[%s10744_s28 + $0x78] sm:$0xff]  }
  0xe2   : > { %v579_v51 = vpop.f32.mrf.mxu0  ;;  %v11172_v4 = vpop.f32.mrf.mxu1  ;;  %10019 = vmatmul.mubr.msk.bf16.gmra.mxu1 %vm471_vm1, %v3711_v58 }
  0xe3   : > { %695 = vst.msk [vmem:[#allocation2 + $0x38] sm:$0xff] %vm687_vm9, %v588_v43  ;;  %v580_v57 = vadd.f32 %v11095_v49, %v579_v51  ;;  %10022 = vmatprep.mubr.msk.bf16.mxu1 %vm471_vm1, %v3713_v61  ;;  %v3228_v16 = vsel %vm3085_vm7, %v3218_v33, %v11204_v38 }
  0xe4   : > { %v9786_v60 = vpop.f32.mrf.mxu0  ;;  %9987 = vmatmul.mubr.msk.bf16.gmra.mxu0 %vm471_vm1, %v3183_v19  ;;  %v11178_v11 = vpop.f32.mrf.mxu1  ;;  %v3720_v19 = vrot.slane %v11196_v30, 3  ;;  %v10515_v30 = vld [vmem:[%s10744_s28 + $0x18] sm:$0xff]  }
  0xe5   : > { %693 = vst.msk [vmem:[#allocation2 + $0x28] sm:$0xff] %vm687_vm9, %v580_v57  ;;  %v601_v63 = vadd.f32 %v9786_v60, %v11095_v49  ;;  %9990 = vmatprep.mubr.msk.bf16.mxu0 %vm471_vm1, %v3192_v52  ;;  %v3722_v57 = vrot.slane %v11207_v39, 3 }
  0xe6   : > { %v592_v6 = vpop.f32.mrf.mxu0  ;;  %v11184_v34 = vpop.f32.mrf.mxu1  ;;  %v3721_v61 = vsel %vm3698_vm8, %v3718_v37, %v3720_v19 }
  0xe7   : > { %698 = vst.msk [vmem:[#allocation2 + $0x50] sm:$0xff] %vm687_vm9, %v601_v63  ;;  %v593_v10 = vadd.f32 %v11095_v49, %v592_v6  ;;  %v4209_v63 = vshrl.u32 %v10513_v44, 16  ;;  %v3723_v33 = vsel %vm3698_vm8, %v3720_v19, %v3722_v57 }
  0xe8   : > { %v9787_v12 = vpop.f32.mrf.mxu0  ;;  %v11191_v28 = vpop.f32.mrf.mxu1 }
  0xe9   : > { %696 = vst.msk [vmem:[#allocation2 + $0x40] sm:$0xff] %vm687_vm9, %v593_v10  ;;  %v604_v14 = vadd.f32 %v9787_v12, %v11095_v49 }
  0xea   : > { %v595_v21 = vpop.f32.mrf.mxu0  ;;  %v11201_v35 = vpop.f32.mrf.mxu1  ;;  %10023 = vmatmul.mubr.msk.bf16.gmra.mxu1 %vm471_vm1, %v3715_v27  ;;  %v4206_v27 = vrot.slane %v4204_v7, 4 }
  0xeb   : > { %699 = vst.msk [vmem:[#allocation2 + $0x58] sm:$0xff] %vm687_vm9, %v604_v14  ;;  %v596_v26 = vadd.f32 %v11095_v49, %v595_v21  ;;  %10026 = vmatprep.mubr.msk.bf16.mxu1 %vm471_vm1, %v3717_v5  ;;  %v10514_v21 = vld [vmem:[%s10744_s28 + $0x10] sm:$0xff]   ;;  %v4214_v5 = vrot.slane %v4212_v9, 4 }
  0xec   : > { %v9790_v29 = vpop.f32.mrf.mxu0  ;;  %9991 = vmatmul.mubr.msk.bf16.gmra.mxu0 %vm471_vm1, %v3201_v15  ;;  %v11212_v42 = vpop.f32.mrf.mxu1  ;;  %v3724_v15 = vrot.slane %v11233_v62, 3  ;;  %v4218_v44 = vshrl.u32 %v10514_v21, 16 }
  0xed   : > { %697 = vst.msk [vmem:[#allocation2 + $0x48] sm:$0xff] %vm687_vm9, %v596_v26  ;;  %v617_v31 = vadd.f32 %v9790_v29, %v11095_v49  ;;  %9994 = vmatprep.mubr.msk.bf16.mxu0 %vm471_vm1, %v3210_v22  ;;  %v4203_v26 = vrot.slane %v4201_v8, 3  ;;  %v4211_v29 = vrot.slane %v4209_v63, 3  ;;  %v4007_v8 = vld [vmem:[%s10894_s10] sm:$0x7] }
  0xee   : > { %v608_v36 = vpop.f32.mrf.mxu0  ;;  %v11219_v51 = vpop.f32.mrf.mxu1  ;;  %v4220_v7 = vrot.slane %v4218_v44, 3 }
  0xef   : > { %702 = vst.msk [vmem:[#allocation2 + $0x70] sm:$0xff] %vm687_vm9, %v617_v31  ;;  %v609_v41 = vadd.f32 %v11095_v49, %v608_v36  ;;  %v11284_v53 = vor.u32 %v4214_v5, %v4211_v29 }
  0xf0   : > { %v9791_v43 = vpop.f32.mrf.mxu0  ;;  %v11228_v58 = vpop.f32.mrf.mxu1 }
  0xf1   : > { %700 = vst.msk [vmem:[#allocation2 + $0x60] sm:$0xff] %vm687_vm9, %v609_v41  ;;  %v620_v45 = vadd.f32 %v9791_v43, %v11095_v49  ;;  %v3725_v41 = vsel %vm3698_vm8, %v3722_v57, %v3724_v15 }
  0xf2   : > { %v611_v52 = vpop.f32.mrf.mxu0  ;;  %v11238_v56 = vpop.f32.mrf.mxu1  ;;  %10027 = vmatmul.mubr.msk.bf16.gmra.mxu1 %vm471_vm1, %v3719_v55 }
  0xf3   : > { %703 = vst.msk [vmem:[#allocation2 + $0x78] sm:$0xff] %vm687_vm9, %v620_v45  ;;  %v612_v54 = vadd.f32 %v11095_v49, %v611_v52  ;;  %10030 = vmatprep.mubr.msk.bf16.mxu1 %vm471_vm1, %v3721_v61  ;;  %v4221_v45 = vshll.u32 %v10514_v21, 16 }
  0xf4   : > { %v9794_v60 = vpop.f32.mrf.mxu0  ;;  %9995 = vmatmul.mubr.msk.bf16.gmra.mxu0 %vm471_vm1, %v3219_v48  ;;  %v11245_v13 = vpop.f32.mrf.mxu1 }
  0xf5   : > { %701 = vst.msk [vmem:[#allocation2 + $0x68] sm:$0xff] %vm687_vm9, %v612_v54  ;;  %v633_v0 = vadd.f32 %v9794_v60, %v11095_v49  ;;  %9998 = vmatprep.mubr.msk.bf16.mxu0 %vm471_vm1, %v3228_v16  ;;  %v4207_v16 = vor.u32 %v4206_v27, %v4203_v26  ;;  %v4230_v54 = vshll.u32 %v10515_v30, 16  ;;  %v4223_v9 = vrot.slane %v4221_v45, 4 }
  0xf6   : > { %v736_v3 = vld [vmem:[#allocation2 + $0x70] sm:$0xff]  ;;  %v624_v6 = vpop.f32.mrf.mxu0  ;;  %v11256_v23 = vpop.f32.mrf.mxu1 }
  0xf7   : > { %v1220_v46 = vadd.f32 %v11141_v32, %v736_v3  ;;  %706 = vst.msk [vmem:[#allocation2 + $0x90] sm:$0xff] %vm687_vm9, %v633_v0  ;;  %v625_v10 = vadd.f32 %v11095_v49, %v624_v6  ;;  %v3728_v0 = vrot.slane %v11259_v47, 3  ;;  %v10516_v3 = vld [vmem:[%s10744_s28 + $0x20] sm:$0xff]  }
  0xf8   : > { %v734_v12 = vld [vmem:[#allocation2 + $0x60] sm:$0xff]  ;;  %v9795_v14 = vpop.f32.mrf.mxu0  ;;  %v11267_v37 = vpop.f32.mrf.mxu1  ;;  %v4236_v5 = vshrl.u32 %v10516_v3, 16 }
  0xf9   : > { %1252 = vst.msk [vmem:[#allocation2 + $0x70] sm:$0xff] %vm687_vm9, %v1220_v46  ;;  %v1218_v32 = vadd.f32 %v11147_v40, %v734_v12  ;;  %704 = vst.msk [vmem:[#allocation2 + $0x80] sm:$0xff] %vm687_vm9, %v625_v10  ;;  %v636_v20 = vadd.f32 %v9795_v14, %v11095_v49  ;;  %v4216_v14 = vsel %vm4199_vm10, %v4207_v16, %v11284_v53 }
  0xfa   : > { %v737_v22 = vld [vmem:[#allocation2 + $0x78] sm:$0xff]  ;;  %v627_v25 = vpop.f32.mrf.mxu0  ;;  %v11281_v48 = vpop.f32.mrf.mxu1  ;;  %10031 = vmatmul.mubr.msk.bf16.gmra.mxu1 %vm471_vm1, %v3723_v33  ;;  %v4238_v45 = vrot.slane %v4236_v5, 3 }
  0xfb   : > { %1250 = vst.msk [vmem:[#allocation2 + $0x60] sm:$0xff] %vm687_vm9, %v1218_v32  ;;  %v1221_v40 = vadd.f32 %v11154_v50, %v737_v22  ;;  %707 = vst.msk [vmem:[#allocation2 + $0x98] sm:$0xff] %vm687_vm9, %v636_v20  ;;  %v628_v31 = vadd.f32 %v11095_v49, %v627_v25  ;;  %v3726_v50 = vrot.slane %v11249_v18, 3  ;;  %10034 = vmatprep.mubr.msk.bf16.mxu1 %vm471_vm1, %v3725_v41  ;;  %v4232_v32 = vrot.slane %v4230_v54, 4  ;;  %v10518_v20 = vld [vmem:[%s10744_s28 + $0x28] sm:$0xff]  }
  0xfc   : > { %v735_v36 = vld [vmem:[#allocation2 + $0x68] sm:$0xff]  ;;  %v9798_v39 = vpop.f32.mrf.mxu0  ;;  %9999 = vmatmul.mubr.msk.bf16.gmra.mxu0 %vm471_vm1, %v11204_v38  ;;  %v11291_v61 = vpop.f32.mrf.mxu1 }
  0xfd   : > { %1253 = vst.msk [vmem:[#allocation2 + $0x78] sm:$0xff] %vm687_vm9, %v1221_v40  ;;  %v1219_v43 = vadd.f32 %v11162_v59, %v735_v36  ;;  %705 = vst.msk [vmem:[#allocation2 + $0x88] sm:$0xff] %vm687_vm9, %v628_v31  ;;  %v649_v19 = vadd.f32 %v9798_v39, %v11095_v49  ;;  %10044 = vmatprep.mubr.msk.bf16.mxu0 %vm10672_vm4, %v10671_v17  ;;  %v4227_v59 = vshrl.u32 %v10515_v30, 16  ;;  %v4248_v39 = vshll.u32 %v10518_v20, 16 }
  0xfe   : > { %v740_v38 = vld [vmem:[#allocation2 + $0x90] sm:$0xff]  ;;  %v640_v52 = vpop.f32.mrf.mxu0  ;;  %v11300_v10 = vpop.f32.mrf.mxu1  ;;  %v3727_v22 = vsel %vm3698_vm8, %v3724_v15, %v3726_v50  ;;  %v3729_v29 = vsel %vm3698_vm8, %v3726_v50, %v3728_v0  ;;  %v4224_v15 = vor.u32 %v4223_v9, %v4220_v7  ;;  %v9212_v50 = vld [vmem:[%s12718_s0 + $0x9] sm:$0x1] }
  0xff   : > { %1251 = vst.msk [vmem:[#allocation2 + $0x68] sm:$0xff] %vm687_vm9, %v1219_v43  ;;  %v1224_v55 = vadd.f32 %v11172_v4, %v740_v38  ;;  %710 = vst.msk [vmem:[#allocation2 + $0xb0] sm:$0xff] %vm687_vm9, %v649_v19  ;;  %v641_v57 = vadd.f32 %v11095_v49, %v640_v52  ;;  %v4229_v18 = vrot.slane %v4227_v59, 3  ;;  %v10520_v52 = vld [vmem:[%s10744_s28 + $0x30] sm:$0xff]  }
 0x100   : > { %v738_v60 = vld [vmem:[#allocation2 + $0x80] sm:$0xff]  ;;  %v9799_v63 = vpop.f32.mrf.mxu0  ;;  %v11312_v26 = vpop.f32.mrf.mxu1  ;;  %v4225_v59 = vsel %vm4199_vm10, %v11284_v53, %v4224_v15 }
 0x101   : > { %1256 = vst.msk [vmem:[#allocation2 + $0x90] sm:$0xff] %vm687_vm9, %v1224_v55  ;;  %v1222_v6 = vadd.f32 %v11178_v11, %v738_v60  ;;  %708 = vst.msk [vmem:[#allocation2 + $0xa0] sm:$0xff] %vm687_vm9, %v641_v57  ;;  %v652_v4 = vadd.f32 %v9799_v63, %v11095_v49  ;;  %v4233_v36 = vor.u32 %v4232_v32, %v4229_v18 }
 0x102   : > { %v741_v46 = vld [vmem:[#allocation2 + $0x98] sm:$0xff]  ;;  %v643_v12 = vpop.f32.mrf.mxu0  ;;  %v11324_v31 = vpop.f32.mrf.mxu1  ;;  %10035 = vmatmul.mubr.msk.bf16.gmra.mxu1 %vm471_vm1, %v3727_v22 }
 0x103   : > { %1254 = vst.msk [vmem:[#allocation2 + $0x80] sm:$0xff] %vm687_vm9, %v1222_v6  ;;  %v1225_v11 = vadd.f32 %v11184_v34, %v741_v46  ;;  %711 = vst.msk [vmem:[#allocation2 + $0xb8] sm:$0xff] %vm687_vm9, %v652_v4  ;;  %v644_v21 = vadd.f32 %v11095_v49, %v643_v12  ;;  %v4239_v34 = vshll.u32 %v10516_v3, 16  ;;  %10038 = vmatprep.mubr.msk.bf16.mxu1 %vm471_vm1, %v3729_v29  ;;  %v4250_v3 = vrot.slane %v4248_v39, 4  ;;  %v10522_v4 = vld [vmem:[%s10744_s28 + $0x38] sm:$0xff]  }
 0x104   : > { %v739_v25 = vld [vmem:[#allocation2 + $0x88] sm:$0xff]  ;;  %v9802_v27 = vpop.f32.mrf.mxu0  ;;  %10045 = vmatmul.mubr.msk.bf16.vlgmr.msra.gmra.mxu0 %vm471_vm1, %v4007_v8  ;;  %v11336_v19 = vpop.f32.mrf.mxu1  ;;  %v4234_v60 = vsel %vm4199_vm10, %v4224_v15, %v4233_v36  ;;  %v11349_v6 = vand.u32 %v9212_v50, %v10719_v2  ;;  %v4254_v12 = vshrl.u32 %v10520_v52, 16  ;;  %v4266_v22 = vshll.u32 %v10522_v4, 16 }
 0x105   : > { %1257 = vst.msk [vmem:[#allocation2 + $0x98] sm:$0xff] %vm687_vm9, %v1225_v11  ;;  %v1223_v30 = vadd.f32 %v11191_v28, %v739_v25  ;;  %709 = vst.msk [vmem:[#allocation2 + $0xa8] sm:$0xff] %vm687_vm9, %v644_v21  ;;  %v665_v62 = vadd.f32 %v9802_v27, %v11095_v49  ;;  %10049 = vmatpush3.bf16.msra.mxu0 %v11062_v24  ;;  %10050 = vmatprep.mubr.msk.bf16.mxu0 %vm471_vm1, %v4216_v14  ;;  %v4245_v28 = vshrl.u32 %v10518_v20, 16  ;;  %v10526_v50 = vld [vmem:[%s10744_s28 + $0x48] sm:$0xff]  }
 0x106   : > { %v744_v40 = vld [vmem:[#allocation2 + $0xb0] sm:$0xff]  ;;  %v656_v33 = vpop.f32.mrf.mxu0  ;;  %10122 = vmatprep.subr.bf16.mxu0 %v10671_v17  ;;  %v4241_v38 = vrot.slane %v4239_v34, 4  ;;  %v11345_v55 = vpop.f32.mrf.mxu1  ;;  %v4257_v14 = vshll.u32 %v10520_v52, 16  ;;  %v10524_v34 = vld [vmem:[%s10744_s28 + $0x40] sm:$0xff]   ;;  %v4256_v15 = vrot.slane %v4254_v12, 3  ;;  %v725_v12 = vld [vmem:[#allocation2 + $0x18] sm:$0xff] }
 0x107   : > { %1255 = vst.msk [vmem:[#allocation2 + $0x88] sm:$0xff] %vm687_vm9, %v1223_v30  ;;  %v1228_v41 = vadd.f32 %v11201_v35, %v744_v40  ;;  %714 = vst.msk [vmem:[#allocation2 + $0xd0] sm:$0xff] %vm687_vm9, %v665_v62  ;;  %v657_v24 = vadd.f32 %v11095_v49, %v656_v33  ;;  %v4247_v63 = vrot.slane %v4245_v28, 3  ;;  %v10517_v62 = vld [vmem:[%s10744_s28 + $0x4] sm:$0xff]   ;;  %v724_v52 = vld [vmem:[#allocation2 + $0x10] sm:$0xff] }
 0x108   : > { %v742_v43 = vld [vmem:[#allocation2 + $0xa0] sm:$0xff]  ;;  %v9803_v44 = vpop.f32.mrf.mxu0  ;;  %v11356_v7 = vpop.f32.mrf.mxu1  ;;  %v4242_v46 = vor.u32 %v4241_v38, %v4238_v45  ;;  %v4259_v40 = vrot.slane %v4257_v14, 4 }
 0x109   : > { %1260 = vst.msk [vmem:[#allocation2 + $0xb0] sm:$0xff] %vm687_vm9, %v1228_v41  ;;  %v1226_v35 = vadd.f32 %v11212_v42, %v742_v43  ;;  %712 = vst.msk [vmem:[#allocation2 + $0xc0] sm:$0xff] %vm687_vm9, %v657_v24  ;;  %v668_v16 = vadd.f32 %v9803_v44, %v11095_v49  ;;  %v11370_v21 = vor.u32 %v4250_v3, %v4247_v63  ;;  %v4268_v24 = vrot.slane %v4266_v22, 4  ;;  %v4620_v44 = vld [vmem:[%s10894_s10] sm:$0xf] }
 0x10a   : > { %v745_v54 = vld [vmem:[#allocation2 + $0xb8] sm:$0xff]  ;;  %v659_v57 = vpop.f32.mrf.mxu0  ;;  %v11365_v20 = vpop.f32.mrf.mxu1  ;;  %10039 = vmatmul.mubr.msk.bf16.gmra.mxu1 %vm471_vm1, %v3728_v0  ;;  %v4243_v5 = vsel %vm4199_vm10, %v4233_v36, %v4242_v46  ;;  %v722_v63 = vld [vmem:[#allocation2] sm:$0xff]  ;;  %v9247_v22 = vld [vmem:[%s12718_s0 + $0xa] sm:$0x1] }
 0x10b   : > { %1258 = vst.msk [vmem:[#allocation2 + $0xa0] sm:$0xff] %vm687_vm9, %v1226_v35  ;;  %v1229_v42 = vadd.f32 %v11219_v51, %v745_v54  ;;  %715 = vst.msk [vmem:[#allocation2 + $0xd8] sm:$0xff] %vm687_vm9, %v668_v16  ;;  %v660_v53 = vadd.f32 %v11095_v49, %v659_v57  ;;  %10084 = vmatprep.mubr.msk.bf16.mxu1 %vm10672_vm4, %v10671_v17  ;;  %v4252_v36 = vsel %vm4199_vm10, %v4242_v46, %v11370_v21 }
 0x10c   : > { %v743_v8 = vld [vmem:[#allocation2 + $0xa8] sm:$0xff]  ;;  %v9806_v9 = vpop.f32.mrf.mxu0  ;;  %10051 = vmatmul.mubr.msk.bf16.vlgmr.msra.gmra.mxu0 %vm471_vm1, %v4225_v59  ;;  %v11379_v0 = vpop.f32.mrf.mxu1  ;;  %v4272_v16 = vshrl.u32 %v10524_v34, 16  ;;  %v4275_v59 = vshll.u32 %v10524_v34, 16 }
 0x10d   : > { %1261 = vst.msk [vmem:[#allocation2 + $0xb8] sm:$0xff] %vm687_vm9, %v1229_v42  ;;  %v1227_v18 = vadd.f32 %v11228_v58, %v743_v8  ;;  %713 = vst.msk [vmem:[#allocation2 + $0xc8] sm:$0xff] %vm687_vm9, %v660_v53  ;;  %v681_v51 = vadd.f32 %v9806_v9, %v11095_v49  ;;  %10123 = vmatpush3.bf16.msra.mxu0 %v11112_v1  ;;  %10054 = vmatprep.mubr.msk.bf16.mxu0 %vm471_vm1, %v4234_v60  ;;  %v4263_v58 = vshrl.u32 %v10522_v4, 16 }
 0x10e   : > { %v748_v32 = vld [vmem:[#allocation2 + $0xd0] sm:$0xff]  ;;  %v672_v11 = vpop.f32.mrf.mxu0  ;;  %10128 = vmatprep.subr.bf16.mxu0 %v11349_v6  ;;  %v11388_v28 = vpop.f32.mrf.mxu1  ;;  %v4281_v42 = vshrl.u32 %v10526_v50, 16  ;;  %v4284_v53 = vshll.u32 %v10526_v50, 16 }
 0x10f   : > { %1259 = vst.msk [vmem:[#allocation2 + $0xa8] sm:$0xff] %vm687_vm9, %v1227_v18  ;;  %v1232_v25 = vadd.f32 %v11238_v56, %v748_v32  ;;  %718 = vst.msk [vmem:[#allocation2 + $0xf0] sm:$0xff] %vm687_vm9, %v681_v51  ;;  %v673_v27 = vadd.f32 %v11095_v49, %v672_v11  ;;  %v4265_v41 = vrot.slane %v4263_v58, 3  ;;  %v10519_v18 = vld [vmem:[%s10744_s28 + $0xc] sm:$0xff]   ;;  %v4274_v51 = vrot.slane %v4272_v16, 3 }
 0x110   : > { %v746_v47 = vld [vmem:[#allocation2 + $0xc0] sm:$0xff]  ;;  %v9807_v29 = vpop.f32.mrf.mxu0  ;;  %v11398_v38 = vpop.f32.mrf.mxu1  ;;  %v4277_v32 = vrot.slane %v4275_v59, 4  ;;  %v4286_v34 = vrot.slane %v4284_v53, 4 }
 0x111   : > { %1264 = vst.msk [vmem:[#allocation2 + $0xd0] sm:$0xff] %vm687_vm9, %v1232_v25  ;;  %v1230_v30 = vadd.f32 %v11245_v13, %v746_v47  ;;  %716 = vst.msk [vmem:[#allocation2 + $0xe0] sm:$0xff] %vm687_vm9, %v673_v27  ;;  %v684_v56 = vadd.f32 %v9807_v29, %v11095_v49  ;;  %v11408_v4 = vor.u32 %v4268_v24, %v4265_v41  ;;  %v723_v47 = vld [vmem:[#allocation2 + $0x8] sm:$0xff] }
 0x112   : > { %v749_v33 = vld [vmem:[#allocation2 + $0xd8] sm:$0xff]  ;;  %v675_v39 = vpop.f32.mrf.mxu0  ;;  %v11405_v60 = vpop.f32.mrf.mxu1  ;;  %10085 = vmatmul.mubr.msk.bf16.vlgmr.msra.gmra.mxu1 %vm471_vm1, %v4620_v44  ;;  %v11444_v24 = vand.u32 %v9247_v22, %v10719_v2 }
 0x113   : > { %1262 = vst.msk [vmem:[#allocation2 + $0xc0] sm:$0xff] %vm687_vm9, %v1230_v30  ;;  %v1233_v13 = vadd.f32 %v11256_v23, %v749_v33  ;;  %719 = vst.msk [vmem:[#allocation2 + $0xf8] sm:$0xff] %vm687_vm9, %v684_v56  ;;  %v676_v43 = vadd.f32 %v11095_v49, %v675_v39  ;;  %v4260_v49 = vor.u32 %v4259_v40, %v4256_v15  ;;  %10089 = vmatpush3.bf16.msra.mxu1 %v11112_v1  ;;  %v10530_v30 = vld [vmem:[%s10744_s28 + $0x58] sm:$0xff]   ;;  %v728_v33 = vld [vmem:[#allocation2 + $0x30] sm:$0xff] }
 0x114   : > { %v747_v45 = vld [vmem:[#allocation2 + $0xc8] sm:$0xff]  ;;  %v9812_v35 = vpop.f32.mrf.mxu0  ;;  %10055 = vmatmul.mubr.msk.bf16.gmra.mxu0 %vm471_vm1, %v4243_v5  ;;  %10090 = vmatprep.mubr.msk.bf16.mxu1 %vm471_vm1, %v10517_v62  ;;  %v11415_v46 = vpop.f32.mrf.mxu1  ;;  %v10521_v62 = vld [vmem:[%s10744_s28 + $0x14] sm:$0xff]   ;;  %v4299_v16 = vshrl.u32 %v10530_v30, 16  ;;  %v4302_v59 = vshll.u32 %v10530_v30, 16 }
 0x115   : > { %1265 = vst.msk [vmem:[#allocation2 + $0xd8] sm:$0xff] %vm687_vm9, %v1233_v13  ;;  %v1231_v54 = vadd.f32 %v11267_v37, %v747_v45  ;;  %717 = vst.msk [vmem:[#allocation2 + $0xe8] sm:$0xff] %vm687_vm9, %v676_v43  ;;  %v1208_v23 = vadd.f32 %v9812_v35, %v724_v52  ;;  %10058 = vmatprep.mubr.msk.bf16.mxu0 %vm471_vm1, %v4252_v36  ;;  %10162 = vmatprep.subr.bf16.mxu1 %v10671_v17  ;;  %v1335_v43 = vld [vmem:[#allocation2 + $0x70] sm:$0xff]  ;;  %v726_v45 = vld [vmem:[#allocation2 + $0x20] sm:$0xff] }
 0x116   : > { %v752_v57 = vld [vmem:[#allocation2 + $0xf0] sm:$0xff]  ;;  %v1079_v3 = vpop.f32.mrf.mxu0  ;;  %v4261_v58 = vsel %vm4199_vm10, %v11370_v21, %v4260_v49  ;;  %v11430_v27 = vpop.f32.mrf.mxu1  ;;  %v4270_v5 = vsel %vm4199_vm10, %v4260_v49, %v11408_v4  ;;  %v4278_v36 = vor.u32 %v4277_v32, %v4274_v51  ;;  %v10525_v51 = vld [vmem:[%s10744_s28 + $0x24] sm:$0xff]  }
 0x117   : > { %1263 = vst.msk [vmem:[#allocation2 + $0xc8] sm:$0xff] %vm687_vm9, %v1231_v54  ;;  %v1236_v37 = vadd.f32 %v11281_v48, %v752_v57  ;;  %1240 = vst.msk [vmem:[#allocation2 + $0x10] sm:$0xff] %vm687_vm9, %v1208_v23  ;;  %v1206_v8 = vadd.f32 %v1079_v3, %v722_v63  ;;  %v11420_v48 = vld [vmem:[%s10744_s28 + $0x50] sm:$0xff]   ;;  %v11455_v54 = vld [vmem:[%s10744_s28 + $0x60] sm:$0xff]  }
 0x118   : > { %v750_v9 = vld [vmem:[#allocation2 + $0xe0] sm:$0xff]  ;;  %v9813_v14 = vpop.f32.mrf.mxu0  ;;  %v11439_v40 = vpop.f32.mrf.mxu1  ;;  %v4290_v41 = vshrl.u32 %v11420_v48, 16  ;;  %v4293_v13 = vshll.u32 %v11420_v48, 16  ;;  %v729_v57 = vld [vmem:[#allocation2 + $0x38] sm:$0xff] }
 0x119   : > { %1268 = vst.msk [vmem:[#allocation2 + $0xf0] sm:$0xff] %vm687_vm9, %v1236_v37  ;;  %v1234_v1 = vadd.f32 %v11291_v61, %v750_v9  ;;  %1238 = vst.msk [vmem:[#allocation2] sm:$0xff] %vm687_vm9, %v1206_v8  ;;  %v1209_v11 = vadd.f32 %v9813_v14, %v725_v12  ;;  %v4283_v61 = vrot.slane %v4281_v42, 3  ;;  %v1333_v3 = vld [vmem:[#allocation2 + $0x60] sm:$0xff]  ;;  %v4279_v8 = vsel %vm4199_vm10, %v11408_v4, %v4278_v36 }
 0x11a   : > { %v753_v25 = vld [vmem:[#allocation2 + $0xf8] sm:$0x7f]  ;;  %v1082_v29 = vpop.f32.mrf.mxu0  ;;  %v9864_v44 = vpop.f32.mrf.mxu1  ;;  %10091 = vmatmul.mubr.msk.bf16.vlgmr.msra.gmra.mxu1 %vm471_vm1, %v10519_v18  ;;  %v4292_v9 = vrot.slane %v4290_v41, 3  ;;  %v4295_v32 = vrot.slane %v4293_v13, 4  ;;  %v730_v13 = vld [vmem:[#allocation2 + $0x40] sm:$0xff] }
 0x11b   : > { %1266 = vst.msk [vmem:[#allocation2 + $0xe0] sm:$0xff] %vm687_vm9, %v1234_v1  ;;  %v1237_v56 = vadd.f32 %v11300_v10, %v753_v25  ;;  %1241 = vst.msk [vmem:[#allocation2 + $0x18] sm:$0xff] %vm687_vm9, %v1209_v11  ;;  %v1207_v21 = vadd.f32 %v1082_v29, %v723_v47  ;;  %v11452_v35 = vor.u32 %v4286_v34, %v4283_v61  ;;  %10163 = vmatpush3.bf16.msra.mxu1 %v11349_v6  ;;  %v10523_v37 = vld [vmem:[%s10744_s28 + $0x1c] sm:$0xff]   ;;  %v727_v11 = vld [vmem:[#allocation2 + $0x28] sm:$0xff] }
 0x11c   : > { %v751_v15 = vld [vmem:[#allocation2 + $0xe8] sm:$0xff]  ;;  %v9816_v39 = vpop.f32.mrf.mxu0  ;;  %10059 = vmatmul.mubr.msk.bf16.gmra.mxu0 %vm471_vm1, %v4261_v58  ;;  %v1723_v23 = vadd.f32 %v9864_v44, %v1335_v43  ;;  %10094 = vmatprep.mubr.msk.bf16.mxu1 %vm471_vm1, %v10521_v62  ;;  %v1630_v42 = vpop.f32.mrf.mxu1  ;;  %v1336_v1 = vld [vmem:[#allocation2 + $0x78] sm:$0xff]  ;;  %v4301_v25 = vrot.slane %v4299_v16, 3  ;;  %v4304_v47 = vrot.slane %v4302_v59, 4  ;;  %v4308_v62 = vshrl.u32 %v11455_v54, 16 }
 0x11d   : > { %1270 = vst.msk [vmem:[#allocation2 + $0xf8] sm:$0x7f] %vm1269_vm11, %v1237_v56  ;;  %v1235_v10 = vadd.f32 %v11312_v26, %v751_v15  ;;  %v1212_v50 = vadd.f32 %v9816_v39, %v728_v33  ;;  %10062 = vmatprep.mubr.msk.bf16.mxu0 %vm471_vm1, %v4270_v5  ;;  %10168 = vmatprep.subr.bf16.mxu1 %v11444_v24  ;;  %v1334_v34 = vld [vmem:[#allocation2 + $0x68] sm:$0xff]  ;;  %v732_v56 = vld [vmem:[#allocation2 + $0x50] sm:$0xff]  ;;  %v4311_v15 = vshll.u32 %v11455_v54, 16 }
 0x11e   : > { %1239 = vst.msk [vmem:[#allocation2 + $0x8] sm:$0xff] %vm687_vm9, %v1207_v21  ;;  %v1095_v52 = vpop.f32.mrf.mxu0  ;;  %v1323_v26 = vld [vmem:[#allocation2 + $0x10] sm:$0xff]  ;;  %1755 = vst.msk [vmem:[#allocation2 + $0x70] sm:$0xff] %vm687_vm9, %v1723_v23  ;;  %v1721_v14 = vadd.f32 %v1630_v42, %v1333_v3  ;;  %v9865_v4 = vpop.f32.mrf.mxu1  ;;  %v4288_v22 = vsel %vm4199_vm10, %v4278_v36, %v11452_v35  ;;  %v11489_v44 = vor.u32 %v4304_v47, %v4301_v25  ;;  %v1337_v23 = vld [vmem:[#allocation2 + $0x80] sm:$0xff]  ;;  %v4310_v3 = vrot.slane %v4308_v62, 3 }
 0x11f   : > { %1267 = vst.msk [vmem:[#allocation2 + $0xe8] sm:$0xff] %vm687_vm9, %v1235_v10  ;;  %1244 = vst.msk [vmem:[#allocation2 + $0x30] sm:$0xff] %vm687_vm9, %v1212_v50  ;;  %v1210_v49 = vadd.f32 %v1095_v52, %v726_v45  ;;  %v1711_v63 = vadd.f32 %v11324_v31, %v1323_v26  ;;  %v11470_v31 = vld [vmem:[%s10744_s28 + $0x68] sm:$0xff]   ;;  %v1724_v5 = vadd.f32 %v9865_v4, %v1336_v1  ;;  %v1339_v10 = vld [vmem:[#allocation2 + $0x90] sm:$0xff]  ;;  %v4313_v42 = vrot.slane %v4311_v15, 4 }
 0x120   : > { %v9817_v53 = vpop.f32.mrf.mxu0  ;;  %v1321_v12 = vld [vmem:[#allocation2] sm:$0xff]  ;;  %1753 = vst.msk [vmem:[#allocation2 + $0x60] sm:$0xff] %vm687_vm9, %v1721_v14  ;;  %v1633_v30 = vpop.f32.mrf.mxu1  ;;  %v4317_v45 = vshrl.u32 %v11470_v31, 16  ;;  %v4320_v52 = vshll.u32 %v11470_v31, 16  ;;  %v11507_v14 = vld [vmem:[%s10744_s28 + $0x78] sm:$0xff]   ;;  %v1338_v47 = vld [vmem:[#allocation2 + $0x88] sm:$0xff] }
 0x121   : > { %1242 = vst.msk [vmem:[#allocation2 + $0x20] sm:$0xff] %vm687_vm9, %v1210_v49  ;;  %v1213_v18 = vadd.f32 %v9817_v53, %v729_v57  ;;  %1743 = vst.msk [vmem:[#allocation2 + $0x10] sm:$0xff] %vm687_vm9, %v1711_v63  ;;  %v1709_v48 = vadd.f32 %v11336_v19, %v1321_v12  ;;  %v1722_v39 = vadd.f32 %v1633_v30, %v1334_v34  ;;  %v733_v57 = vld [vmem:[#allocation2 + $0x58] sm:$0xff]  ;;  %v1343_v62 = vld [vmem:[#allocation2 + $0xb0] sm:$0xff] }
 0x122   : > { %v1098_v58 = vpop.f32.mrf.mxu0  ;;  %v1324_v29 = vld [vmem:[#allocation2 + $0x18] sm:$0xff]  ;;  %1756 = vst.msk [vmem:[#allocation2 + $0x78] sm:$0xff] %vm687_vm9, %v1724_v5  ;;  %v9868_v50 = vpop.f32.mrf.mxu1  ;;  %10095 = vmatmul.mubr.msk.bf16.gmra.mxu1 %vm471_vm1, %v10523_v37  ;;  %v4319_v1 = vrot.slane %v4317_v45, 3  ;;  %v4322_v4 = vrot.slane %v4320_v52, 4 }
 0x123   : > { %1245 = vst.msk [vmem:[#allocation2 + $0x38] sm:$0xff] %vm687_vm9, %v1213_v18  ;;  %v1211_v61 = vadd.f32 %v1098_v58, %v727_v11  ;;  %1741 = vst.msk [vmem:[#allocation2] sm:$0xff] %vm687_vm9, %v1709_v48  ;;  %v1712_v19 = vadd.f32 %v11345_v55, %v1324_v29  ;;  %v4296_v55 = vor.u32 %v4295_v32, %v4292_v9  ;;  %10098 = vmatprep.mubr.msk.bf16.mxu1 %vm471_vm1, %v10525_v51  ;;  %v10527_v9 = vld [vmem:[%s10744_s28 + $0x2c] sm:$0xff]   ;;  %v1340_v18 = vld [vmem:[#allocation2 + $0x98] sm:$0xff] }
 0x124   : > { %v9820_v21 = vpop.f32.mrf.mxu0  ;;  %10063 = vmatmul.mubr.msk.bf16.gmra.mxu0 %vm471_vm1, %v4279_v8  ;;  %1754 = vst.msk [vmem:[#allocation2 + $0x68] sm:$0xff] %vm687_vm9, %v1722_v39  ;;  %v1727_v59 = vadd.f32 %v9868_v50, %v1339_v10  ;;  %v1646_v49 = vpop.f32.mrf.mxu1  ;;  %v731_v32 = vld [vmem:[#allocation2 + $0x48] sm:$0xff]  ;;  %v1271_v25 = vld [vmem:[#allocation2 + $0xff] sm:$0x1]  ;;  %v11527_v39 = vor.u32 %v4322_v4, %v4319_v1  ;;  %v1341_v50 = vld [vmem:[#allocation2 + $0xa0] sm:$0xff] }
 0x125   : > { %v1322_v33 = vld [vmem:[#allocation2 + $0x8] sm:$0xff]  ;;  %1243 = vst.msk [vmem:[#allocation2 + $0x28] sm:$0xff] %vm687_vm9, %v1211_v61  ;;  %v1216_v36 = vadd.f32 %v9820_v21, %v732_v56  ;;  %10066 = vmatprep.mubr.msk.bf16.mxu0 %vm471_vm1, %v4288_v22  ;;  %1744 = vst.msk [vmem:[#allocation2 + $0x18] sm:$0xff] %vm687_vm9, %v1712_v19  ;;  %v1725_v37 = vadd.f32 %v1646_v49, %v1337_v23  ;;  %v4297_v12 = vsel %vm4199_vm10, %v11452_v35, %v4296_v55  ;;  %v10529_v22 = vld [vmem:[%s10744_s28 + $0x34] sm:$0xff]  }
 0x126   : > { %v1710_v41 = vadd.f32 %v11356_v7, %v1322_v33  ;;  %v1111_v43 = vpop.f32.mrf.mxu0  ;;  %v1327_v16 = vld [vmem:[#allocation2 + $0x30] sm:$0xff]  ;;  %1759 = vst.msk [vmem:[#allocation2 + $0x90] sm:$0xff] %vm687_vm9, %v1727_v59  ;;  %v9869_v51 = vpop.f32.mrf.mxu1  ;;  %v4306_v48 = vsel %vm4199_vm10, %v4296_v55, %v11489_v44  ;;  %v4314_v61 = vor.u32 %v4313_v42, %v4310_v3  ;;  %v4338_v55 = vshll.u32 %v11507_v14, 16  ;;  %v10531_v49 = vld [vmem:[%s10744_s28 + $0x3c] sm:$0xff]  }
 0x127   : > { %1248 = vst.msk [vmem:[#allocation2 + $0x50] sm:$0xff] %vm687_vm9, %v1216_v36  ;;  %v1214_v54 = vadd.f32 %v1111_v43, %v730_v13  ;;  %v11497_v7 = vld [vmem:[%s10744_s28 + $0x70] sm:$0xff]   ;;  %v1715_v26 = vadd.f32 %v11365_v20, %v1327_v16  ;;  %1757 = vst.msk [vmem:[#allocation2 + $0x80] sm:$0xff] %vm687_vm9, %v1725_v37  ;;  %v1728_v35 = vadd.f32 %v9869_v51, %v1340_v18  ;;  %v4335_v36 = vshrl.u32 %v11507_v14, 16 }
 0x128   : > { %1742 = vst.msk [vmem:[#allocation2 + $0x8] sm:$0xff] %vm687_vm9, %v1710_v41  ;;  %v9821_v63 = vpop.f32.mrf.mxu0  ;;  %v1325_v53 = vld [vmem:[#allocation2 + $0x20] sm:$0xff]  ;;  %v1649_v29 = vpop.f32.mrf.mxu1  ;;  %v4326_v19 = vshrl.u32 %v11497_v7, 16  ;;  %v4315_v45 = vsel %vm4199_vm10, %v11489_v44, %v4314_v61  ;;  %v4340_v44 = vrot.slane %v4338_v55, 4 }
 0x129   : > { %1246 = vst.msk [vmem:[#allocation2 + $0x40] sm:$0xff] %vm687_vm9, %v1214_v54  ;;  %v1217_v8 = vadd.f32 %v9821_v63, %v733_v57  ;;  %1747 = vst.msk [vmem:[#allocation2 + $0x30] sm:$0xff] %vm687_vm9, %v1715_v26  ;;  %v1713_v20 = vadd.f32 %v11379_v0, %v1325_v53  ;;  %v1726_v30 = vadd.f32 %v1649_v29, %v1338_v47  ;;  %v1344_v26 = vld [vmem:[#allocation2 + $0xb8] sm:$0xff]  ;;  %v4337_v63 = vrot.slane %v4335_v36, 3  ;;  %v10533_v53 = vld [vmem:[%s10744_s28 + $0x44] sm:$0xff]  }
 0x12a   : > { %v1114_v31 = vpop.f32.mrf.mxu0  ;;  %v1328_v11 = vld [vmem:[#allocation2 + $0x38] sm:$0xff]  ;;  %1760 = vst.msk [vmem:[#allocation2 + $0x98] sm:$0xff] %vm687_vm9, %v1728_v35  ;;  %v9872_v15 = vpop.f32.mrf.mxu1  ;;  %10099 = vmatmul.mubr.msk.bf16.gmra.mxu1 %vm471_vm1, %v10527_v9  ;;  %v4328_v59 = vrot.slane %v4326_v19, 3  ;;  %v4324_v57 = vsel %vm4199_vm10, %v4314_v61, %v11527_v39  ;;  %v11567_v61 = vld [vmem:[%s10744_s28 + $0x4] sm:$0xff]  }
 0x12b   : > { %1249 = vst.msk [vmem:[#allocation2 + $0x58] sm:$0xff] %vm687_vm9, %v1217_v8  ;;  %v1215_v58 = vadd.f32 %v1114_v31, %v731_v32  ;;  %1745 = vst.msk [vmem:[#allocation2 + $0x20] sm:$0xff] %vm687_vm9, %v1713_v20  ;;  %v1716_v0 = vadd.f32 %v11388_v28, %v1328_v11  ;;  %v4329_v28 = vshll.u32 %v11497_v7, 16  ;;  %v1731_v10 = vadd.f32 %v9872_v15, %v1343_v62  ;;  %v1342_v8 = vld [vmem:[#allocation2 + $0xa8] sm:$0xff]  ;;  %v1347_v32 = vld [vmem:[#allocation2 + $0xd0] sm:$0xff] }
 0x12c   : > { %v1310_v5 = vpop.f32.mrf.mxu0  ;;  %10067 = vmatmul.mubr.msk.bf16.gmra.mxu0 %vm471_vm1, %v4297_v12  ;;  %v1326_v34 = vld [vmem:[#allocation2 + $0x28] sm:$0xff]  ;;  %1758 = vst.msk [vmem:[#allocation2 + $0x88] sm:$0xff] %vm687_vm9, %v1726_v30  ;;  %10102 = vmatprep.mubr.msk.bf16.mxu1 %vm471_vm1, %v10529_v22  ;;  %v1662_v13 = vpop.f32.mrf.mxu1  ;;  %v1824_v55 = vld [vmem:[#allocation2] sm:$0xff] }
 0x12d   : > { %1247 = vst.msk [vmem:[#allocation2 + $0x48] sm:$0xff] %vm687_vm9, %v1215_v58  ;;  %v1316_v56 = vadd.f32 %v1310_v5, %v1271_v25  ;;  %10070 = vmatprep.mubr.msk.bf16.mxu0 %vm471_vm1, %v4306_v48  ;;  %1748 = vst.msk [vmem:[#allocation2 + $0x38] sm:$0xff] %vm687_vm9, %v1716_v0  ;;  %v1714_v21 = vadd.f32 %v11398_v38, %v1326_v34  ;;  %v1729_v16 = vadd.f32 %v1662_v13, %v1341_v50  ;;  %v10535_v22 = vld [vmem:[%s10744_s28 + $0x4c] sm:$0xff]   ;;  %v1348_v25 = vld [vmem:[#allocation2 + $0xd8] sm:$0xff] }
 0x12e   : > { %v9846_v33 = vpop.f32.mrf.mxu0  ;;  %v1331_v41 = vld [vmem:[#allocation2 + $0x50] sm:$0xff]  ;;  %1763 = vst.msk [vmem:[#allocation2 + $0xb0] sm:$0xff] %vm687_vm9, %v1731_v10  ;;  %v4331_v54 = vrot.slane %v4329_v28, 4  ;;  %v9873_v23 = vpop.f32.mrf.mxu1  ;;  %v11554_v48 = vor.u32 %v4340_v44, %v4337_v63  ;;  %v1346_v30 = vld [vmem:[#allocation2 + $0xc8] sm:$0xff]  ;;  %v5273_v10 = vshll.u32 %v11567_v61, 16  ;;  %v1349_v13 = vld [vmem:[#allocation2 + $0xe0] sm:$0xff] }
 0x12f   : > { %1318 = vst.msk [vmem:[#allocation2 + $0xff] sm:$0x1] %vm1317_vm12, %v1316_v56  ;;  %v1719_v38 = vadd.f32 %v11405_v60, %v1331_v41  ;;  %v1732_v42 = vadd.f32 %v9873_v23, %v1344_v26  ;;  %v10537_v34 = vld [vmem:[%s10744_s28 + $0x54] sm:$0xff]   ;;  %v11575_v33 = vld [vmem:[%s10744_s28 + $0xc] sm:$0xff]   ;;  %v5271_v26 = vshrl.u32 %v11567_v61, 16 }
 0x130   : > { %1746 = vst.msk [vmem:[#allocation2 + $0x28] sm:$0xff] %vm687_vm9, %v1714_v21  ;;  %v1313_v43 = vpop.f32.mrf.mxu0  ;;  %v1329_v52 = vld [vmem:[#allocation2 + $0x40] sm:$0xff]  ;;  %1761 = vst.msk [vmem:[#allocation2 + $0xa0] sm:$0xff] %vm687_vm9, %v1729_v16  ;;  %v4332_v20 = vor.u32 %v4331_v54, %v4328_v59  ;;  %v1826_v28 = vld [vmem:[#allocation2 + $0x10] sm:$0xff]  ;;  %v5278_v23 = vshll.u32 %v11575_v33, 16  ;;  %v5275_v44 = vrot.slane %v5273_v10, 1 }
 0x131   : > { %1751 = vst.msk [vmem:[#allocation2 + $0x50] sm:$0xff] %vm687_vm9, %v1719_v38  ;;  %v1717_v7 = vadd.f32 %v11415_v46, %v1329_v52  ;;  %v1665_v46 = vpop.f32.mrf.mxu1  ;;  %1764 = vst.msk [vmem:[#allocation2 + $0xb8] sm:$0xff] %vm687_vm9, %v1732_v42  ;;  %v10539_v54 = vld [vmem:[%s10744_s28 + $0x5c] sm:$0xff]  }
 0x132   : > { %v9847_v60 = vpop.f32.mrf.mxu0  ;;  %v1332_v3 = vld [vmem:[#allocation2 + $0x58] sm:$0xff]  ;;  %v1730_v14 = vadd.f32 %v1665_v46, %v1342_v8  ;;  %10103 = vmatmul.mubr.msk.bf16.gmra.mxu1 %vm471_vm1, %v10531_v49  ;;  %v4333_v0 = vsel %vm4199_vm10, %v11527_v39, %v4332_v20  ;;  %v4342_v5 = vsel %vm4199_vm10, %v4332_v20, %v11554_v48  ;;  %v1351_v39 = vld [vmem:[#allocation2 + $0xf0] sm:$0xff]  ;;  %vm2890_vm10 = vcmask 125952  }
 0x133   : > { %1749 = vst.msk [vmem:[#allocation2 + $0x40] sm:$0xff] %vm687_vm9, %v1717_v7  ;;  %v1720_v37 = vadd.f32 %v11430_v27, %v1332_v3  ;;  %v9876_v31 = vpop.f32.mrf.mxu1  ;;  %10106 = vmatprep.mubr.msk.bf16.mxu1 %vm471_vm1, %v10533_v53  ;;  %v10540_v7 = vld [vmem:[%s10744_s28 + $0x64] sm:$0xff]   ;;  %v1352_v60 = vld [vmem:[#allocation2 + $0xf8] sm:$0x3f]  ;;  %v1830_v46 = vld [vmem:[#allocation2 + $0x30] sm:$0xff] }
 0x134   : > { %v1813_v9 = vpop.f32.mrf.mxu0  ;;  %10071 = vmatmul.mubr.msk.bf16.gmra.mxu0 %vm471_vm1, %v4315_v45  ;;  %v1330_v12 = vld [vmem:[#allocation2 + $0x48] sm:$0xff]  ;;  %1762 = vst.msk [vmem:[#allocation2 + $0xa8] sm:$0xff] %vm687_vm9, %v1730_v14  ;;  %v1735_v1 = vadd.f32 %v9876_v31, %v1347_v32  ;;  %v1827_v45 = vld [vmem:[#allocation2 + $0x18] sm:$0xff]  ;;  %v5276_v32 = vor.u32 %v5275_v44, %v5271_v26  ;;  %v5280_v31 = vrot.slane %v5278_v23, 1 }
 0x135   : > { %10074 = vmatprep.mubr.msk.bf16.mxu0 %vm471_vm1, %v4324_v57  ;;  %1752 = vst.msk [vmem:[#allocation2 + $0x58] sm:$0xff] %vm687_vm9, %v1720_v37  ;;  %v1718_v18 = vadd.f32 %v11439_v40, %v1330_v12  ;;  %v1345_v40 = vld [vmem:[#allocation2 + $0xc0] sm:$0xff]  ;;  %v1678_v11 = vpop.f32.mrf.mxu1  ;;  %v1825_v57 = vld [vmem:[#allocation2 + $0x8] sm:$0xff]  ;;  %v11589_v3 = vld [vmem:[%s10744_s28 + $0x14] sm:$0xff]  }
 0x136   : > { %v1774_v51 = vld [vmem:[#allocation2 + $0xfe] sm:$0x3]  ;;  %v9886_v27 = vpop.f32.mrf.mxu0  ;;  %1767 = vst.msk [vmem:[#allocation2 + $0xd0] sm:$0xff] %vm687_vm9, %v1735_v1  ;;  %v1733_v58 = vadd.f32 %v1678_v11, %v1345_v40  ;;  %v1350_v53 = vld [vmem:[#allocation2 + $0xe8] sm:$0xff]  ;;  %v5286_v11 = vshll.u32 %v11589_v3, 16  ;;  %v5290_v61 = vshrl.u32 %v11589_v3, 16 }
 0x137   : > { %v1819_v4 = vadd.f32 %v1813_v9, %v1774_v51  ;;  %1750 = vst.msk [vmem:[#allocation2 + $0x48] sm:$0xff] %vm687_vm9, %v1718_v18  ;;  %v9877_v47 = vpop.f32.mrf.mxu1  ;;  %v1828_v18 = vld [vmem:[#allocation2 + $0x20] sm:$0xff] }
 0x138   : > { %v1816_v35 = vpop.f32.mrf.mxu0  ;;  %1765 = vst.msk [vmem:[#allocation2 + $0xc0] sm:$0xff] %vm687_vm9, %v1733_v58  ;;  %v1736_v19 = vadd.f32 %v9877_v47, %v1348_v25  ;;  %v11601_v27 = vld [vmem:[%s10744_s28 + $0x1c] sm:$0xff]   ;;  %v1829_v25 = vld [vmem:[#allocation2 + $0x28] sm:$0xff] }
 0x139   : > { %1821 = vst.msk [vmem:[#allocation2 + $0xfe] sm:$0x3] %vm1820_vm13, %v1819_v4  ;;  %v1681_v56 = vpop.f32.mrf.mxu1  ;;  %v1831_v4 = vld [vmem:[#allocation2 + $0x38] sm:$0xff]  ;;  %v5082_v58 = vld [vmem:[%s10894_s10] sm:$0xf] }
 0x13a   : > { %v9887_v29 = vpop.f32.mrf.mxu0  ;;  %1768 = vst.msk [vmem:[#allocation2 + $0xd8] sm:$0xff] %vm687_vm9, %v1736_v19  ;;  %v1734_v62 = vadd.f32 %v1681_v56, %v1346_v30  ;;  %10107 = vmatmul.mubr.msk.bf16.gmra.mxu1 %vm471_vm1, %v10535_v22  ;;  %v5282_v22 = vshrl.u32 %v11575_v33, 16  ;;  %v5294_v19 = vshll.u32 %v11601_v27, 16  ;;  %v10542_v30 = vld [vmem:[%s10744_s28 + $0x74] sm:$0xff]   ;;  %v11618_v33 = vld [vmem:[%s10744_s28 + $0x24] sm:$0xff]  }
 0x13b   : > { %v9880_v36 = vpop.f32.mrf.mxu1  ;;  %10110 = vmatprep.mubr.msk.bf16.mxu1 %vm471_vm1, %v10537_v34  ;;  %v10541_v29 = vld [vmem:[%s10744_s28 + $0x6c] sm:$0xff]   ;;  %v5302_v23 = vshll.u32 %v11618_v33, 16 }
 0x13c   : > { %v9892_v21 = vpop.f32.mrf.mxu0  ;;  %10075 = vmatmul.mubr.msk.bf16.gmra.mxu0 %vm471_vm1, %v4333_v0  ;;  %1766 = vst.msk [vmem:[#allocation2 + $0xc8] sm:$0xff] %vm687_vm9, %v1734_v62  ;;  %v1739_v38 = vadd.f32 %v9880_v36, %v1351_v39 }
 0x13d   : > { %v2326_v15 = vadd.f32 %v9892_v21, %v1826_v28  ;;  %10078 = vmatprep.mubr.msk.bf16.mxu0 %vm471_vm1, %v4342_v5  ;;  %v1694_v43 = vpop.f32.mrf.mxu1  ;;  %v5281_v5 = vsel %vm866_vm2, %v5276_v32, %v5280_v31  ;;  %v1834_v21 = vld [vmem:[#allocation2 + $0x50] sm:$0xff] }
 0x13e   : > { %v2197_v41 = vpop.f32.mrf.mxu0  ;;  %1771 = vst.msk [vmem:[#allocation2 + $0xf0] sm:$0xff] %vm687_vm9, %v1739_v38  ;;  %v1737_v16 = vadd.f32 %v1694_v43, %v1349_v13 }
 0x13f   : > { %2358 = vst.msk [vmem:[#allocation2 + $0x10] sm:$0xff] %vm687_vm9, %v2326_v15  ;;  %v2324_v50 = vadd.f32 %v2197_v41, %v1824_v55  ;;  %v9881_v49 = vpop.f32.mrf.mxu1  ;;  %v5288_v15 = vrot.slane %v5286_v11, 1  ;;  %v5284_v55 = vor.u32 %v5282_v22, %v5280_v31  ;;  %v11624_v41 = vld [vmem:[%s10744_s28 + $0x2c] sm:$0xff]  }
 0x140   : > { %v9893_v52 = vpop.f32.mrf.mxu0  ;;  %1769 = vst.msk [vmem:[#allocation2 + $0xe0] sm:$0xff] %vm687_vm9, %v1737_v16  ;;  %v1740_v42 = vadd.f32 %v9881_v49, %v1352_v60  ;;  %v9282_v16 = vld [vmem:[%s12718_s0 + $0xb] sm:$0x1] }
 0x141   : > { %2356 = vst.msk [vmem:[#allocation2] sm:$0xff] %vm687_vm9, %v2324_v50  ;;  %v2327_v59 = vadd.f32 %v9893_v52, %v1827_v45  ;;  %v1697_v8 = vpop.f32.mrf.mxu1  ;;  %v1832_v50 = vld [vmem:[#allocation2 + $0x40] sm:$0xff]  ;;  %v5292_v43 = vor.u32 %v5290_v61, %v5288_v15  ;;  %v5296_v45 = vrot.slane %v5294_v19, 1 }
 0x142   : > { %v2200_v63 = vpop.f32.mrf.mxu0  ;;  %1773 = vst.msk [vmem:[#allocation2 + $0xf8] sm:$0x3f] %vm1772_vm14, %v1740_v42  ;;  %v1738_v12 = vadd.f32 %v1697_v8, %v1350_v53  ;;  %10111 = vmatmul.mubr.msk.bf16.gmra.mxu1 %vm471_vm1, %v10539_v54  ;;  %v1833_v42 = vld [vmem:[#allocation2 + $0x48] sm:$0xff] }
 0x143   : > { %2359 = vst.msk [vmem:[#allocation2 + $0x18] sm:$0xff] %vm687_vm9, %v2327_v59  ;;  %v2325_v37 = vadd.f32 %v2200_v63, %v1825_v57  ;;  %v2428_v20 = vpop.f32.mrf.mxu1  ;;  %10114 = vmatprep.mubr.msk.bf16.mxu1 %vm471_vm1, %v10540_v7  ;;  %v1835_v7 = vld [vmem:[#allocation2 + $0x58] sm:$0xff]  ;;  %v5289_v57 = vsel %vm866_vm2, %v5284_v55, %v5288_v15  ;;  %v5298_v63 = vshrl.u32 %v11601_v27, 16  ;;  %v5297_v8 = vsel %vm866_vm2, %v5292_v43, %v5296_v45  ;;  %v1838_v27 = vld [vmem:[#allocation2 + $0x70] sm:$0xff]  ;;  %v10548_v43 = vld [vmem:[%s10894_s10] sm:$0x1f]  }
 0x144   : > { %v9896_v9 = vpop.f32.mrf.mxu0  ;;  %10079 = vmatmul.mubr.msk.bf16.gmra.mxu0 %vm471_vm1, %v11554_v48  ;;  %1770 = vst.msk [vmem:[#allocation2 + $0xe8] sm:$0xff] %vm687_vm9, %v1738_v12  ;;  %v11644_v12 = vand.u32 %v9282_v16, %v10719_v2  ;;  %v5314_v55 = vshrl.u32 %v11624_v41, 16 }
 0x145   : > { %2357 = vst.msk [vmem:[#allocation2 + $0x8] sm:$0xff] %vm687_vm9, %v2325_v37  ;;  %v2330_v14 = vadd.f32 %v9896_v9, %v1830_v46  ;;  %10124 = vmatprep.mubr.msk.bf16.mxu0 %vm10672_vm4, %v10671_v17  ;;  %v9926_v1 = vpop.f32.mrf.mxu1  ;;  %v10543_v37 = vld [vmem:[%s10744_s28 + $0x7c] ss:$0 sps:$4 sm:$0xff]   ;;  %v5306_v46 = vshrl.u32 %v11618_v33, 16  ;;  %v5310_v9 = vshll.u32 %v11624_v41, 16 }
 0x146   : > { %v2213_v51 = vpop.f32.mrf.mxu0  ;;  %v2441_v10 = vld [vmem:[#allocation2 + $0x10] sm:$0xff]  ;;  %v5304_v1 = vrot.slane %v5302_v23, 1  ;;  %v11688_v41 = vld [vmem:[%s10744_s28 + $0x1c] sm:$0xff]  }
 0x147   : > { %2362 = vst.msk [vmem:[#allocation2 + $0x30] sm:$0xff] %vm687_vm9, %v2330_v14  ;;  %v2328_v48 = vadd.f32 %v2213_v51, %v1828_v18  ;;  %v2431_v0 = vpop.f32.mrf.mxu1  ;;  %v11649_v18 = vld [vmem:[%s10744_s28 + $0x4] sm:$0xfe]   ;;  %v11652_v51 = vld [vmem:[%s10744_s28 + $0xc] sm:$0xff]  }
 0x148   : > { %v9897_v40 = vpop.f32.mrf.mxu0  ;;  %v2439_v59 = vld [vmem:[#allocation2] sm:$0xff]  ;;  %v1842_v23 = vld [vmem:[#allocation2 + $0x90] sm:$0xff] }
 0x149   : > { %2360 = vst.msk [vmem:[#allocation2 + $0x20] sm:$0xff] %vm687_vm9, %v2328_v48  ;;  %v2331_v35 = vadd.f32 %v9897_v40, %v1831_v4  ;;  %v2389_v56 = vld [vmem:[#allocation2 + $0xfd] sm:$0x7]  ;;  %v9927_v28 = vpop.f32.mrf.mxu1  ;;  %v11656_v4 = vld [vmem:[%s10744_s28 + $0x34] sm:$0xff]   ;;  %v1836_v0 = vld [vmem:[#allocation2 + $0x60] sm:$0xff] }
 0x14a   : > { %v2216_v47 = vpop.f32.mrf.mxu0  ;;  %v2434_v39 = vadd.f32 %v2428_v20, %v2389_v56  ;;  %10115 = vmatmul.mubr.msk.bf16.gmra.mxu1 %vm471_vm1, %v10541_v29  ;;  %v2442_v44 = vld [vmem:[#allocation2 + $0x18] sm:$0xff]  ;;  %v5312_v29 = vrot.slane %v5310_v9, 1  ;;  %v5318_v15 = vshll.u32 %v11656_v4, 16 }
 0x14b   : > { %2363 = vst.msk [vmem:[#allocation2 + $0x38] sm:$0xff] %vm687_vm9, %v2331_v35  ;;  %v2329_v34 = vadd.f32 %v2216_v47, %v1829_v25  ;;  %v9932_v38 = vpop.f32.mrf.mxu1  ;;  %10118 = vmatprep.mubr.msk.bf16.mxu1 %vm471_vm1, %v10542_v30  ;;  %v5300_v35 = vor.u32 %v5298_v63, %v5296_v45  ;;  %v5308_v47 = vor.u32 %v5306_v46, %v5304_v1  ;;  %v1839_v56 = vld [vmem:[#allocation2 + $0x78] sm:$0xff]  ;;  %v11695_v63 = vld [vmem:[%s10744_s28 + $0x44] sm:$0xff]  }
 0x14c   : > { %v9900_v62 = vpop.f32.mrf.mxu0  ;;  %10125 = vmatmul.mubr.msk.bf16.vlgmr.msra.gmra.mxu0 %vm471_vm1, %v5082_v58  ;;  %2436 = vst.msk [vmem:[#allocation2 + $0xfd] sm:$0x7] %vm2435_vm15, %v2434_v39  ;;  %v2829_v52 = vadd.f32 %v9932_v38, %v2441_v10  ;;  %v2440_v32 = vld [vmem:[#allocation2 + $0x8] sm:$0xff] }
 0x14d   : > { %2361 = vst.msk [vmem:[#allocation2 + $0x28] sm:$0xff] %vm687_vm9, %v2329_v34  ;;  %v2334_v36 = vadd.f32 %v9900_v62, %v1834_v21  ;;  %10129 = vmatpush3.bf16.msra.mxu0 %v11349_v6  ;;  %10130 = vmatprep.mubr.msk.bf16.mxu0 %vm471_vm1, %v5281_v5  ;;  %v2700_v54 = vpop.f32.mrf.mxu1  ;;  %v11664_v5 = vld [vmem:[%s10744_s28 + $0x3c] sm:$0xff]   ;;  %v5869_v21 = vrot.slane %v11649_v18, 1  ;;  %v5870_v62 = vrot.slane %v11652_v51, 1  ;;  %v5313_v45 = vsel %vm866_vm2, %v5308_v47, %v5312_v29 }
 0x14e   : > { %v2229_v13 = vpop.f32.mrf.mxu0  ;;  %10202 = vmatprep.subr.bf16.mxu0 %v10671_v17  ;;  %2861 = vst.msk [vmem:[#allocation2 + $0x10] sm:$0xff] %vm687_vm9, %v2829_v52  ;;  %v2827_v60 = vadd.f32 %v2700_v54, %v2439_v59  ;;  %v2445_v58 = vld [vmem:[#allocation2 + $0x30] sm:$0xff]  ;;  %v5322_v52 = vshrl.u32 %v11656_v4, 16 }
 0x14f   : > { %2366 = vst.msk [vmem:[#allocation2 + $0x50] sm:$0xff] %vm687_vm9, %v2334_v36  ;;  %v2332_v6 = vadd.f32 %v2229_v13, %v1832_v50  ;;  %v9933_v3 = vpop.f32.mrf.mxu1  ;;  %v5305_v36 = vsel %vm866_vm2, %v5300_v35, %v5304_v1  ;;  %v1837_v50 = vld [vmem:[#allocation2 + $0x68] sm:$0xff]  ;;  %v11685_v54 = vld [vmem:[%s10744_s28 + $0x14] sm:$0xff]  }
 0x150   : > { %v9901_v26 = vpop.f32.mrf.mxu0  ;;  %2859 = vst.msk [vmem:[#allocation2] sm:$0xff] %vm687_vm9, %v2827_v60  ;;  %v2830_v14 = vadd.f32 %v9933_v3, %v2442_v44  ;;  %v2443_v34 = vld [vmem:[#allocation2 + $0x20] sm:$0xff]  ;;  %v1843_v1 = vld [vmem:[#allocation2 + $0x98] sm:$0xff] }
 0x151   : > { %2364 = vst.msk [vmem:[#allocation2 + $0x40] sm:$0xff] %vm687_vm9, %v2332_v6  ;;  %v2335_v49 = vadd.f32 %v9901_v26, %v1835_v7  ;;  %v2703_v31 = vpop.f32.mrf.mxu1  ;;  %v5326_v6 = vshll.u32 %v11664_v5, 16 }
 0x152   : > { %v2232_v53 = vpop.f32.mrf.mxu0  ;;  %2862 = vst.msk [vmem:[#allocation2 + $0x18] sm:$0xff] %vm687_vm9, %v2830_v14  ;;  %v2828_v40 = vadd.f32 %v2703_v31, %v2440_v32  ;;  %10119 = vmatmul.mubr.msk.bf16.gmra.mxu1 %vm471_vm1, %v10543_v37  ;;  %v2446_v10 = vld [vmem:[#allocation2 + $0x38] sm:$0xff]  ;;  %v5872_v31 = vrot.slane %v11685_v54, 1 }
 0x153   : > { %2367 = vst.msk [vmem:[#allocation2 + $0x58] sm:$0xff] %vm687_vm9, %v2335_v49  ;;  %v2333_v20 = vadd.f32 %v2232_v53, %v1833_v42  ;;  %v9936_v22 = vpop.f32.mrf.mxu1  ;;  %10164 = vmatprep.mubr.msk.bf16.mxu1 %vm10672_vm4, %v10671_v17  ;;  %v5871_v49 = vsel %vm1465_vm3, %v5869_v21, %v5870_v62  ;;  %v5316_v42 = vor.u32 %v5314_v55, %v5312_v29  ;;  %v5328_v14 = vrot.slane %v5326_v6, 1  ;;  %v1841_v29 = vld [vmem:[#allocation2 + $0x88] sm:$0xff]  ;;  %v1844_v6 = vld [vmem:[#allocation2 + $0xa0] sm:$0xff] }
 0x154   : > { %v9904_v48 = vpop.f32.mrf.mxu0  ;;  %10131 = vmatmul.mubr.msk.bf16.vlgmr.msra.gmra.mxu0 %vm471_vm1, %v5289_v57  ;;  %2860 = vst.msk [vmem:[#allocation2 + $0x8] sm:$0xff] %vm687_vm9, %v2828_v40  ;;  %v2833_v61 = vadd.f32 %v9936_v22, %v2445_v58  ;;  %v2444_v7 = vld [vmem:[#allocation2 + $0x28] sm:$0xff]  ;;  %v5320_v57 = vrot.slane %v5318_v15, 1  ;;  %v5874_v40 = vrot.slane %v11688_v41, 1  ;;  %v5330_v22 = vshrl.u32 %v11664_v5, 16 }
 0x155   : > { %2365 = vst.msk [vmem:[#allocation2 + $0x48] sm:$0xff] %vm687_vm9, %v2333_v20  ;;  %v2338_v11 = vadd.f32 %v9904_v48, %v1838_v27  ;;  %10203 = vmatpush3.bf16.msra.mxu0 %v11444_v24  ;;  %10134 = vmatprep.mubr.msk.bf16.mxu0 %vm471_vm1, %v5297_v8  ;;  %v2716_v30 = vpop.f32.mrf.mxu1  ;;  %v1840_v8 = vld [vmem:[#allocation2 + $0x80] sm:$0xff]  ;;  %v11702_v20 = vld [vmem:[%s10744_s28 + $0x4c] sm:$0xff]  }
 0x156   : > { %v2245_v25 = vpop.f32.mrf.mxu0  ;;  %10208 = vmatprep.subr.bf16.mxu0 %v11644_v12  ;;  %2865 = vst.msk [vmem:[#allocation2 + $0x30] sm:$0xff] %vm687_vm9, %v2833_v61  ;;  %v2831_v33 = vadd.f32 %v2716_v30, %v2443_v34  ;;  %v2449_v53 = vld [vmem:[#allocation2 + $0x50] sm:$0xff]  ;;  %v5324_v9 = vor.u32 %v5322_v52, %v5320_v57  ;;  %v5321_v58 = vsel %vm866_vm2, %v5316_v42, %v5320_v57  ;;  %v5338_v34 = vshrl.u32 %v11695_v63, 16  ;;  %v11728_v21 = vld [vmem:[%s10744_s28 + $0x24] sm:$0xff]  }
 0x157   : > { %2370 = vst.msk [vmem:[#allocation2 + $0x70] sm:$0xff] %vm687_vm9, %v2338_v11  ;;  %v2336_v19 = vadd.f32 %v2245_v25, %v1836_v0  ;;  %v9937_v38 = vpop.f32.mrf.mxu1  ;;  %v5334_v11 = vshll.u32 %v11695_v63, 16  ;;  %v9317_v0 = vld [vmem:[%s12718_s0 + $0xc] sm:$0x1]  ;;  %v5342_v30 = vshll.u32 %v11702_v20, 16  ;;  %v1847_v63 = vld [vmem:[#allocation2 + $0xb8] sm:$0xff] }
 0x158   : > { %v9905_v28 = vpop.f32.mrf.mxu0  ;;  %2863 = vst.msk [vmem:[#allocation2 + $0x20] sm:$0xff] %vm687_vm9, %v2831_v33  ;;  %v2834_v16 = vadd.f32 %v9937_v38, %v2446_v10  ;;  %v2447_v27 = vld [vmem:[#allocation2 + $0x40] sm:$0xff]  ;;  %v11731_v15 = vld [vmem:[%s10744_s28 + $0x2c] sm:$0xff]   ;;  %v5875_v10 = vsel %vm1465_vm3, %v5872_v31, %v5874_v40  ;;  %v11741_v51 = vand.u32 %v9317_v0, %v10719_v2 }
 0x159   : > { %2368 = vst.msk [vmem:[#allocation2 + $0x60] sm:$0xff] %vm687_vm9, %v2336_v19  ;;  %v2339_v39 = vadd.f32 %v9905_v28, %v1839_v56  ;;  %v2719_v26 = vpop.f32.mrf.mxu1  ;;  %v5329_v19 = vsel %vm866_vm2, %v5324_v9, %v5328_v14  ;;  %v5873_v28 = vsel %vm1465_vm3, %v5870_v62, %v5872_v31  ;;  %v5336_v38 = vrot.slane %v5334_v11, 1  ;;  %v11771_v11 = vld [vmem:[%s10744_s28 + $0x34] sm:$0xff]  }
 0x15a   : > { %v2248_v13 = vpop.f32.mrf.mxu0  ;;  %2866 = vst.msk [vmem:[#allocation2 + $0x38] sm:$0xff] %vm687_vm9, %v2834_v16  ;;  %v2832_v44 = vadd.f32 %v2719_v26, %v2444_v7  ;;  %10165 = vmatmul.mubr.msk.bf16.vlgmr.msra.gmra.mxu1 %vm471_vm1, %v10548_v43  ;;  %v2450_v25 = vld [vmem:[#allocation2 + $0x58] sm:$0xff]  ;;  %v5332_v43 = vor.u32 %v5330_v22, %v5328_v14  ;;  %v5344_v54 = vrot.slane %v5342_v30, 1  ;;  %v1850_v22 = vld [vmem:[#allocation2 + $0xd0] sm:$0xff]  ;;  %v1848_v30 = vld [vmem:[#allocation2 + $0xc0] sm:$0xff] }
 0x15b   : > { %2371 = vst.msk [vmem:[#allocation2 + $0x78] sm:$0xff] %vm687_vm9, %v2339_v39  ;;  %v2337_v59 = vadd.f32 %v2248_v13, %v1837_v50  ;;  %v9940_v37 = vpop.f32.mrf.mxu1  ;;  %10169 = vmatpush3.bf16.msra.mxu1 %v11444_v24  ;;  %10170 = vmatprep.mubr.msk.bf16.mxu1 %vm471_vm1, %v5871_v49  ;;  %v11738_v50 = vld [vmem:[%s10744_s28 + $0x54] sm:$0xff]   ;;  %v11748_v7 = vld [vmem:[%s10744_s28 + $0x5c] sm:$0xff]  }
 0x15c   : > { %v9908_v60 = vpop.f32.mrf.mxu0  ;;  %10135 = vmatmul.mubr.msk.bf16.gmra.mxu0 %vm471_vm1, %v5305_v36  ;;  %2864 = vst.msk [vmem:[#allocation2 + $0x28] sm:$0xff] %vm687_vm9, %v2832_v44  ;;  %v2837_v18 = vadd.f32 %v9940_v37, %v2449_v53  ;;  %10242 = vmatprep.subr.bf16.mxu1 %v10671_v17  ;;  %v2448_v33 = vld [vmem:[#allocation2 + $0x48] sm:$0xff]  ;;  %v1846_v36 = vld [vmem:[#allocation2 + $0xb0] sm:$0xff]  ;;  %v5350_v42 = vshll.u32 %v11738_v50, 16 }
 0x15d   : > { %2369 = vst.msk [vmem:[#allocation2 + $0x68] sm:$0xff] %vm687_vm9, %v2337_v59  ;;  %v2342_v3 = vadd.f32 %v9908_v60, %v1842_v23  ;;  %10138 = vmatprep.mubr.msk.bf16.mxu0 %vm471_vm1, %v5313_v45  ;;  %v2732_v48 = vpop.f32.mrf.mxu1  ;;  %v5340_v59 = vor.u32 %v5338_v34, %v5336_v38  ;;  %v5876_v60 = vrot.slane %v11728_v21, 1  ;;  %v11788_v21 = vld [vmem:[%s10744_s28 + $0x6c] sm:$0xff]  }
 0x15e   : > { %v2261_v46 = vpop.f32.mrf.mxu0  ;;  %2869 = vst.msk [vmem:[#allocation2 + $0x50] sm:$0xff] %vm687_vm9, %v2837_v18  ;;  %v2835_v24 = vadd.f32 %v2732_v48, %v2447_v27  ;;  %v2453_v45 = vld [vmem:[#allocation2 + $0x70] sm:$0xff]  ;;  %v1845_v18 = vld [vmem:[#allocation2 + $0xa8] sm:$0xff]  ;;  %v5354_v27 = vshrl.u32 %v11738_v50, 16  ;;  %v5358_v48 = vshll.u32 %v11748_v7, 16 }
 0x15f   : > { %2374 = vst.msk [vmem:[#allocation2 + $0x90] sm:$0xff] %vm687_vm9, %v2342_v3  ;;  %v2340_v32 = vadd.f32 %v2261_v46, %v1840_v8  ;;  %v9941_v47 = vpop.f32.mrf.mxu1  ;;  %v5878_v3 = vrot.slane %v11731_v15, 1  ;;  %v5337_v8 = vsel %vm866_vm2, %v5332_v43, %v5336_v38  ;;  %v5346_v46 = vshrl.u32 %v11702_v20, 16  ;;  %v1851_v38 = vld [vmem:[#allocation2 + $0xd8] sm:$0xff] }
 0x160   : > { %v9909_v4 = vpop.f32.mrf.mxu0  ;;  %2867 = vst.msk [vmem:[#allocation2 + $0x40] sm:$0xff] %vm687_vm9, %v2835_v24  ;;  %v2838_v56 = vadd.f32 %v9941_v47, %v2450_v25  ;;  %v2451_v49 = vld [vmem:[#allocation2 + $0x60] sm:$0xff]  ;;  %v5345_v31 = vsel %vm866_vm2, %v5340_v59, %v5344_v54  ;;  %v5877_v20 = vsel %vm1465_vm3, %v5874_v40, %v5876_v60  ;;  %v5352_v47 = vrot.slane %v5350_v42, 1  ;;  %v11810_v42 = vld [vmem:[%s10744_s28 + $0x4c] sm:$0xff]  }
 0x161   : > { %2372 = vst.msk [vmem:[#allocation2 + $0x80] sm:$0xff] %vm687_vm9, %v2340_v32  ;;  %v2343_v35 = vadd.f32 %v9909_v4, %v1843_v1  ;;  %v2735_v39 = vpop.f32.mrf.mxu1  ;;  %v11774_v24 = vld [vmem:[%s10744_s28 + $0x3c] sm:$0xff]   ;;  %v5879_v25 = vsel %vm1465_vm3, %v5876_v60, %v5878_v3 }
 0x162   : > { %v2264_v61 = vpop.f32.mrf.mxu0  ;;  %2870 = vst.msk [vmem:[#allocation2 + $0x58] sm:$0xff] %vm687_vm9, %v2838_v56  ;;  %v2836_v62 = vadd.f32 %v2735_v39, %v2448_v33  ;;  %10171 = vmatmul.mubr.msk.bf16.vlgmr.msra.gmra.mxu1 %vm471_vm1, %v5873_v28  ;;  %v2454_v9 = vld [vmem:[#allocation2 + $0x78] sm:$0xff]  ;;  %v5360_v28 = vrot.slane %v5358_v48, 1  ;;  %v1852_v48 = vld [vmem:[#allocation2 + $0xe0] sm:$0xff] }
 0x163   : > { %2375 = vst.msk [vmem:[#allocation2 + $0x98] sm:$0xff] %vm687_vm9, %v2343_v35  ;;  %v2341_v5 = vadd.f32 %v2264_v61, %v1841_v29  ;;  %v9944_v52 = vpop.f32.mrf.mxu1  ;;  %10243 = vmatpush3.bf16.msra.mxu1 %v11644_v12  ;;  %10174 = vmatprep.mubr.msk.bf16.mxu1 %vm471_vm1, %v5875_v10  ;;  %v11781_v29 = vld [vmem:[%s10744_s28 + $0x64] sm:$0xff]   ;;  %v5348_v61 = vor.u32 %v5346_v46, %v5344_v54 }
 0x164   : > { %v9912_v55 = vpop.f32.mrf.mxu0  ;;  %10139 = vmatmul.mubr.msk.bf16.gmra.mxu0 %vm471_vm1, %v5321_v58  ;;  %2868 = vst.msk [vmem:[#allocation2 + $0x48] sm:$0xff] %vm687_vm9, %v2836_v62  ;;  %v2841_v26 = vadd.f32 %v9944_v52, %v2453_v45  ;;  %10248 = vmatprep.subr.bf16.mxu1 %v11741_v51  ;;  %v2452_v35 = vld [vmem:[#allocation2 + $0x68] sm:$0xff]  ;;  %v5882_v62 = vrot.slane %v11774_v24, 1  ;;  %v5370_v60 = vshrl.u32 %v11781_v29, 16 }
 0x165   : > { %2373 = vst.msk [vmem:[#allocation2 + $0x88] sm:$0xff] %vm687_vm9, %v2341_v5  ;;  %v2346_v13 = vadd.f32 %v9912_v55, %v1846_v36  ;;  %10142 = vmatprep.mubr.msk.bf16.mxu0 %vm471_vm1, %v5329_v19  ;;  %v2748_v57 = vpop.f32.mrf.mxu1  ;;  %v5356_v5 = vor.u32 %v5354_v27, %v5352_v47  ;;  %v5880_v36 = vrot.slane %v11771_v11, 1  ;;  %v5353_v52 = vsel %vm866_vm2, %v5348_v61, %v5352_v47  ;;  %v1849_v54 = vld [vmem:[#allocation2 + $0xc8] sm:$0xff]  ;;  %v11824_v11 = vld [vmem:[%s10744_s28 + $0x7c] ss:$0 sps:$4 sm:$0xff]  }
 0x166   : > { %v2277_v16 = vpop.f32.mrf.mxu0  ;;  %2873 = vst.msk [vmem:[#allocation2 + $0x70] sm:$0xff] %vm687_vm9, %v2841_v26  ;;  %v2839_v53 = vadd.f32 %v2748_v57, %v2451_v49  ;;  %v2457_v19 = vld [vmem:[#allocation2 + $0x90] sm:$0xff]  ;;  %v5374_v49 = vshll.u32 %v11788_v21, 16  ;;  %v1855_v47 = vld [vmem:[#allocation2 + $0xf8] sm:$0x1f] }
 0x167   : > { %2378 = vst.msk [vmem:[#allocation2 + $0xb0] sm:$0xff] %vm687_vm9, %v2346_v13  ;;  %v2344_v23 = vadd.f32 %v2277_v16, %v1844_v6  ;;  %v9945_v14 = vpop.f32.mrf.mxu1  ;;  %v5366_v13 = vshll.u32 %v11781_v29, 16  ;;  %v5362_v6 = vshrl.u32 %v11748_v7, 16  ;;  %v5881_v7 = vsel %vm1465_vm3, %v5878_v3, %v5880_v36 }
 0x168   : > { %v9913_v44 = vpop.f32.mrf.mxu0  ;;  %2871 = vst.msk [vmem:[#allocation2 + $0x60] sm:$0xff] %vm687_vm9, %v2839_v53  ;;  %v2842_v1 = vadd.f32 %v9945_v14, %v2454_v9  ;;  %v2455_v55 = vld [vmem:[#allocation2 + $0x80] sm:$0xff]  ;;  %v5883_v9 = vsel %vm1465_vm3, %v5880_v36, %v5882_v62 }
 0x169   : > { %2376 = vst.msk [vmem:[#allocation2 + $0xa0] sm:$0xff] %vm687_vm9, %v2344_v23  ;;  %v2347_v37 = vadd.f32 %v9913_v44, %v1847_v63  ;;  %v2751_v58 = vpop.f32.mrf.mxu1  ;;  %v5361_v23 = vsel %vm866_vm2, %v5356_v5, %v5360_v28  ;;  %v10565_v44 = vld [vmem:[%s10744_s28 + $0x44] sm:$0xff]   ;;  %v5368_v14 = vrot.slane %v5366_v13, 1 }
 0x16a   : > { %v2280_v32 = vpop.f32.mrf.mxu0  ;;  %2874 = vst.msk [vmem:[#allocation2 + $0x78] sm:$0xff] %vm687_vm9, %v2842_v1  ;;  %v2840_v41 = vadd.f32 %v2751_v58, %v2452_v35  ;;  %10175 = vmatmul.mubr.msk.bf16.gmra.mxu1 %vm471_vm1, %v5877_v20  ;;  %v2458_v16 = vld [vmem:[#allocation2 + $0x98] sm:$0xff]  ;;  %v5376_v20 = vrot.slane %v5374_v49, 1 }
 0x16b   : > { %2379 = vst.msk [vmem:[#allocation2 + $0xb8] sm:$0xff] %vm687_vm9, %v2347_v37  ;;  %v2345_v4 = vadd.f32 %v2280_v32, %v1845_v18  ;;  %v9948_v34 = vpop.f32.mrf.mxu1  ;;  %10178 = vmatprep.mubr.msk.bf16.mxu1 %vm471_vm1, %v5879_v25  ;;  %v11817_v18 = vld [vmem:[%s10744_s28 + $0x74] sm:$0xff]   ;;  %v5364_v32 = vor.u32 %v5362_v6, %v5360_v28  ;;  %v1853_v28 = vld [vmem:[#allocation2 + $0xe8] sm:$0xff] }
 0x16c   : > { %v9916_v0 = vpop.f32.mrf.mxu0  ;;  %10143 = vmatmul.mubr.msk.bf16.gmra.mxu0 %vm471_vm1, %v5337_v8  ;;  %2872 = vst.msk [vmem:[#allocation2 + $0x68] sm:$0xff] %vm687_vm9, %v2840_v41  ;;  %v2845_v33 = vadd.f32 %v9948_v34, %v2457_v19  ;;  %v2456_v53 = vld [vmem:[#allocation2 + $0x88] sm:$0xff]  ;;  %v1854_v8 = vld [vmem:[#allocation2 + $0xf0] sm:$0xff]  ;;  %v5886_v41 = vrot.slane %v11810_v42, 1  ;;  %v5386_v36 = vshrl.u32 %v11817_v18, 16 }
 0x16d   : > { %2377 = vst.msk [vmem:[#allocation2 + $0xa8] sm:$0xff] %vm687_vm9, %v2345_v4  ;;  %v2350_v40 = vadd.f32 %v9916_v0, %v1850_v22  ;;  %10146 = vmatprep.mubr.msk.bf16.mxu0 %vm471_vm1, %v5345_v31  ;;  %v2764_v10 = vpop.f32.mrf.mxu1  ;;  %v5372_v4 = vor.u32 %v5370_v60, %v5368_v14  ;;  %v5884_v22 = vrot.slane %v10565_v44, 1  ;;  %v5369_v34 = vsel %vm866_vm2, %v5364_v32, %v5368_v14 }
 0x16e   : > { %v2293_v56 = vpop.f32.mrf.mxu0  ;;  %2877 = vst.msk [vmem:[#allocation2 + $0x90] sm:$0xff] %vm687_vm9, %v2845_v33  ;;  %v2843_v43 = vadd.f32 %v2764_v10, %v2455_v55  ;;  %v2461_v31 = vld [vmem:[#allocation2 + $0xb0] sm:$0xff]  ;;  %v5390_v55 = vshll.u32 %v11824_v11, 16 }
 0x16f   : > { %2382 = vst.msk [vmem:[#allocation2 + $0xd0] sm:$0xff] %vm687_vm9, %v2350_v40  ;;  %v2348_v39 = vadd.f32 %v2293_v56, %v1848_v30  ;;  %v9949_v59 = vpop.f32.mrf.mxu1  ;;  %v5382_v40 = vshll.u32 %v11817_v18, 16  ;;  %v5378_v30 = vshrl.u32 %v11788_v21, 16  ;;  %v5885_v21 = vsel %vm1465_vm3, %v5882_v62, %v5884_v22 }
 0x170   : > { %v9917_v50 = vpop.f32.mrf.mxu0  ;;  %2875 = vst.msk [vmem:[#allocation2 + $0x80] sm:$0xff] %vm687_vm9, %v2843_v43  ;;  %v2846_v57 = vadd.f32 %v9949_v59, %v2458_v16  ;;  %v2459_v0 = vld [vmem:[#allocation2 + $0xa0] sm:$0xff]  ;;  %v5392_v60 = vrot.slane %v5390_v55, 1 }
 0x171   : > { %2380 = vst.msk [vmem:[#allocation2 + $0xc0] sm:$0xff] %vm687_vm9, %v2348_v39  ;;  %v2351_v45 = vadd.f32 %v9917_v50, %v1851_v38  ;;  %v2767_v37 = vpop.f32.mrf.mxu1  ;;  %v5377_v39 = vsel %vm866_vm2, %v5372_v4, %v5376_v20  ;;  %v10569_v50 = vld [vmem:[%s10744_s28 + $0x54] sm:$0xff]   ;;  %v5384_v6 = vrot.slane %v5382_v40, 1  ;;  %v11847_v16 = vld [vmem:[%s10744_s28 + $0x5c] sm:$0xff]  }
 0x172   : > { %v2296_v26 = vpop.f32.mrf.mxu0  ;;  %2878 = vst.msk [vmem:[#allocation2 + $0x98] sm:$0xff] %vm687_vm9, %v2846_v57  ;;  %v2844_v15 = vadd.f32 %v2767_v37, %v2456_v53  ;;  %10179 = vmatmul.mubr.msk.bf16.gmra.mxu1 %vm471_vm1, %v5881_v7  ;;  %v2462_v56 = vld [vmem:[#allocation2 + $0xb8] sm:$0xff]  ;;  %v5888_v57 = vrot.slane %v10569_v50, 1  ;;  %v5890_v42 = vrot.slane %v11847_v16, 1 }
 0x173   : > { %2383 = vst.msk [vmem:[#allocation2 + $0xd8] sm:$0xff] %vm687_vm9, %v2351_v45  ;;  %v2349_v63 = vadd.f32 %v2296_v26, %v1849_v54  ;;  %v9952_v27 = vpop.f32.mrf.mxu1  ;;  %10182 = vmatprep.mubr.msk.bf16.mxu1 %vm471_vm1, %v5883_v9  ;;  %v5380_v54 = vor.u32 %v5378_v30, %v5376_v20  ;;  %v2943_v20 = vld [vmem:[#allocation2 + $0x10] sm:$0xff] }
 0x174   : > { %v9920_v46 = vpop.f32.mrf.mxu0  ;;  %10147 = vmatmul.mubr.msk.bf16.gmra.mxu0 %vm471_vm1, %v5353_v52  ;;  %2876 = vst.msk [vmem:[#allocation2 + $0x88] sm:$0xff] %vm687_vm9, %v2844_v15  ;;  %v2849_v35 = vadd.f32 %v9952_v27, %v2461_v31  ;;  %v2460_v13 = vld [vmem:[#allocation2 + $0xa8] sm:$0xff]  ;;  %v5887_v52 = vsel %vm1465_vm3, %v5884_v22, %v5886_v41  ;;  %v5889_v27 = vsel %vm1465_vm3, %v5886_v41, %v5888_v57  ;;  %v5394_v22 = vshrl.u32 %v11824_v11, 16 }
 0x175   : > { %2381 = vst.msk [vmem:[#allocation2 + $0xc8] sm:$0xff] %vm687_vm9, %v2349_v63  ;;  %v2354_v3 = vadd.f32 %v9920_v46, %v1854_v8  ;;  %10150 = vmatprep.mubr.msk.bf16.mxu0 %vm471_vm1, %v5361_v23  ;;  %v2780_v25 = vpop.f32.mrf.mxu1  ;;  %v5388_v23 = vor.u32 %v5386_v36, %v5384_v6  ;;  %v5385_v37 = vsel %vm866_vm2, %v5380_v54, %v5384_v6  ;;  %v10578_v8 = vld [vmem:[%s10744_s28 + $0x4] sm:$0xfe]   ;;  %v2944_v36 = vld [vmem:[#allocation2 + $0x18] sm:$0xff] }
 0x176   : > { %v2309_v1 = vpop.f32.mrf.mxu0  ;;  %2881 = vst.msk [vmem:[#allocation2 + $0xb0] sm:$0xff] %vm687_vm9, %v2849_v35  ;;  %v2847_v61 = vadd.f32 %v2780_v25, %v2459_v0  ;;  %v2465_v24 = vld [vmem:[#allocation2 + $0xd0] sm:$0xff]  ;;  %v6376_v41 = vshll.u32 %v10578_v8, 16 }
 0x177   : > { %2386 = vst.msk [vmem:[#allocation2 + $0xf0] sm:$0xff] %vm687_vm9, %v2354_v3  ;;  %v2352_v58 = vadd.f32 %v2309_v1, %v1852_v48  ;;  %v9953_v5 = vpop.f32.mrf.mxu1  ;;  %v5393_v15 = vsel %vm866_vm2, %v5388_v23, %v5392_v60  ;;  %v10579_v3 = vld [vmem:[%s10744_s28 + $0xc] sm:$0xff]   ;;  %v10573_v48 = vld [vmem:[%s10744_s28 + $0x64] sm:$0xff]  }
 0x178   : > { %v9921_v29 = vpop.f32.mrf.mxu0  ;;  %2879 = vst.msk [vmem:[#allocation2 + $0xa0] sm:$0xff] %vm687_vm9, %v2847_v61  ;;  %v2850_v10 = vadd.f32 %v9953_v5, %v2462_v56  ;;  %v2463_v63 = vld [vmem:[#allocation2 + $0xc0] sm:$0xff]  ;;  %v11870_v0 = vld [vmem:[%s10744_s28 + $0x6c] sm:$0xff]   ;;  %v6381_v30 = vshrl.u32 %v10579_v3, 16  ;;  %v6384_v11 = vshll.u32 %v10579_v3, 16 }
 0x179   : > { %2384 = vst.msk [vmem:[#allocation2 + $0xe0] sm:$0xff] %vm687_vm9, %v2352_v58  ;;  %v2355_v19 = vadd.f32 %v9921_v29, %v1855_v47  ;;  %v2783_v43 = vpop.f32.mrf.mxu1  ;;  %v5891_v58 = vsel %vm1465_vm3, %v5888_v57, %v5890_v42  ;;  %v6373_v29 = vshrl.u32 %v10578_v8, 16  ;;  %v10575_v57 = vld [vmem:[%s10744_s28 + $0x74] sm:$0xff]   ;;  %v11895_v8 = vld [vmem:[%s10744_s28 + $0x7c] ss:$0 sps:$4 sm:$0xff]  }
 0x17a   : > { %v2312_v33 = vpop.f32.mrf.mxu0  ;;  %2882 = vst.msk [vmem:[#allocation2 + $0xb8] sm:$0xff] %vm687_vm9, %v2850_v10  ;;  %v2848_v59 = vadd.f32 %v2783_v43, %v2460_v13  ;;  %10183 = vmatmul.mubr.msk.bf16.gmra.mxu1 %vm471_vm1, %v5885_v21  ;;  %v2466_v9 = vld [vmem:[#allocation2 + $0xd8] sm:$0xff]  ;;  %v5396_v10 = vor.u32 %v5394_v22, %v5392_v60  ;;  %v6378_v43 = vrot.slane %v6376_v41, 2  ;;  %v5898_v22 = vrot.slane %v11895_v8, 1 }
 0x17b   : > { %2388 = vst.msk [vmem:[#allocation2 + $0xf8] sm:$0x1f] %vm2387_vm0, %v2355_v19  ;;  %v2353_v38 = vadd.f32 %v2312_v33, %v1853_v28  ;;  %v9956_v62 = vpop.f32.mrf.mxu1  ;;  %10186 = vmatprep.mubr.msk.bf16.mxu1 %vm471_vm1, %v5887_v52  ;;  %v2941_v19 = vld [vmem:[#allocation2] sm:$0xff]  ;;  %v5892_v28 = vrot.slane %v10573_v48, 1  ;;  %v6375_v13 = vrot.slane %v6373_v29, 1 }
 0x17c   : > { %v2931_v45 = vpop.f32.mrf.mxu0  ;;  %10151 = vmatmul.mubr.msk.bf16.gmra.mxu0 %vm471_vm1, %v5369_v34  ;;  %2880 = vst.msk [vmem:[#allocation2 + $0xa8] sm:$0xff] %vm687_vm9, %v2848_v59  ;;  %v2853_v49 = vadd.f32 %v9956_v62, %v2465_v24  ;;  %v2464_v1 = vld [vmem:[#allocation2 + $0xc8] sm:$0xff]  ;;  %v6383_v24 = vrot.slane %v6381_v30, 1  ;;  %v6386_v62 = vrot.slane %v6384_v11, 2 }
 0x17d   : > { %2385 = vst.msk [vmem:[#allocation2 + $0xe8] sm:$0xff] %vm687_vm9, %v2353_v38  ;;  %10154 = vmatprep.mubr.msk.bf16.mxu0 %vm471_vm1, %v5377_v39  ;;  %v2796_v7 = vpop.f32.mrf.mxu1  ;;  %v5894_v38 = vrot.slane %v11870_v0, 1  ;;  %v2942_v59 = vld [vmem:[#allocation2 + $0x8] sm:$0xff]  ;;  %v6379_v3 = vor.u32 %v6378_v43, %v6375_v13 }
 0x17e   : > { %v9966_v26 = vpop.f32.mrf.mxu0  ;;  %2885 = vst.msk [vmem:[#allocation2 + $0xd0] sm:$0xff] %vm687_vm9, %v2853_v49  ;;  %v2851_v53 = vadd.f32 %v2796_v7, %v2463_v63  ;;  %v2469_v40 = vld [vmem:[#allocation2 + $0xf0] sm:$0xff]  ;;  %v5893_v49 = vsel %vm1465_vm3, %v5890_v42, %v5892_v28 }
 0x17f   : > { %v9957_v14 = vpop.f32.mrf.mxu1  ;;  %v10581_v26 = vld [vmem:[%s10744_s28 + $0x1c] sm:$0xff]  }
 0x180   : > { %v2934_v44 = vpop.f32.mrf.mxu0  ;;  %2883 = vst.msk [vmem:[#allocation2 + $0xc0] sm:$0xff] %vm687_vm9, %v2851_v53  ;;  %v2854_v31 = vadd.f32 %v9957_v14, %v2466_v9  ;;  %v2467_v33 = vld [vmem:[#allocation2 + $0xe0] sm:$0xff] }
 0x181   : > { %v2799_v4 = vpop.f32.mrf.mxu1  ;;  %v2947_v44 = vld [vmem:[#allocation2 + $0x30] sm:$0xff] }
 0x182   : > { %v2892_v46 = vld [vmem:[#allocation2 + $0xfc] sm:$0xf]  ;;  %v9967_v18 = vpop.f32.mrf.mxu0  ;;  %2886 = vst.msk [vmem:[#allocation2 + $0xd8] sm:$0xff] %vm687_vm9, %v2854_v31  ;;  %v2852_v25 = vadd.f32 %v2799_v4, %v2464_v1  ;;  %10187 = vmatmul.mubr.msk.bf16.gmra.mxu1 %vm471_vm1, %v5889_v27  ;;  %v2470_v52 = vld [vmem:[#allocation2 + $0xf8] sm:$0xf]  ;;  %v6399_v31 = vshrl.u32 %v10581_v26, 16 }
 0x183   : > { %v2937_v32 = vadd.f32 %v2931_v45, %v2892_v46  ;;  %v9960_v61 = vpop.f32.mrf.mxu1  ;;  %10190 = vmatprep.mubr.msk.bf16.mxu1 %vm471_vm1, %v5891_v58  ;;  %v10580_v45 = vld [vmem:[%s10744_s28 + $0x14] sm:$0xff]   ;;  %v2945_v18 = vld [vmem:[#allocation2 + $0x20] sm:$0xff]  ;;  %v6402_v27 = vshll.u32 %v10581_v26, 16  ;;  %v5896_v1 = vrot.slane %v10575_v57, 1  ;;  %v9352_v26 = vld [vmem:[%s12718_s0 + $0xd] sm:$0x1] }
 0x184   : > { %v9972_v35 = vpop.f32.mrf.mxu0  ;;  %10155 = vmatmul.mubr.msk.bf16.gmra.mxu0 %vm471_vm1, %v5385_v37  ;;  %2884 = vst.msk [vmem:[#allocation2 + $0xc8] sm:$0xff] %vm687_vm9, %v2852_v25  ;;  %v2857_v56 = vadd.f32 %v9960_v61, %v2469_v40  ;;  %v2468_v63 = vld [vmem:[#allocation2 + $0xe8] sm:$0xff]  ;;  %v5895_v37 = vsel %vm1465_vm3, %v5892_v28, %v5894_v38  ;;  %v6390_v42 = vshrl.u32 %v10580_v45, 16  ;;  %v6393_v9 = vshll.u32 %v10580_v45, 16  ;;  %v10576_v58 = vld [vmem:[%s10894_s10] sm:$0x1f]  }
 0x185   : > { %2938 = vst.msk [vmem:[#allocation2 + $0xfc] sm:$0xf] %vm2890_vm10, %v2937_v32  ;;  %v3443_v47 = vadd.f32 %v9972_v35, %v2943_v20  ;;  %10158 = vmatprep.mubr.msk.bf16.mxu0 %vm471_vm1, %v5393_v15  ;;  %v2812_v39 = vpop.f32.mrf.mxu1  ;;  %v11902_v32 = vor.u32 %v6386_v62, %v6383_v24  ;;  %v2948_v20 = vld [vmem:[#allocation2 + $0x38] sm:$0xff]  ;;  %v10583_v25 = vld [vmem:[%s10744_s28 + $0x24] sm:$0xff]   ;;  %v6401_v30 = vrot.slane %v6399_v31, 1  ;;  %v6404_v11 = vrot.slane %v6402_v27, 2 }
 0x186   : > { %v3314_v34 = vpop.f32.mrf.mxu0  ;;  %2889 = vst.msk [vmem:[#allocation2 + $0xf0] sm:$0xff] %vm687_vm9, %v2857_v56  ;;  %v2855_v21 = vadd.f32 %v2812_v39, %v2467_v33  ;;  %v6392_v29 = vrot.slane %v6390_v42, 1  ;;  %v6395_v41 = vrot.slane %v6393_v9, 2  ;;  %v2946_v61 = vld [vmem:[#allocation2 + $0x28] sm:$0xff]  ;;  %v5897_v28 = vsel %vm1465_vm3, %v5894_v38, %v5896_v1  ;;  %v10590_v27 = vld [vmem:[%s10744_s28 + $0x3c] sm:$0xff]  }
 0x187   : > { %3475 = vst.msk [vmem:[#allocation2 + $0x10] sm:$0xff] %vm687_vm9, %v3443_v47  ;;  %v3441_v5 = vadd.f32 %v3314_v34, %v2941_v19  ;;  %v9961_v6 = vpop.f32.mrf.mxu1  ;;  %v6388_v34 = vsel %vm1968_vm5, %v6379_v3, %v11902_v32  ;;  %v10586_v56 = vld [vmem:[%s10744_s28 + $0x2c] sm:$0xff]   ;;  %v11943_v31 = vand.u32 %v9352_v26, %v10719_v2 }
 0x188   : > { %v9973_v55 = vpop.f32.mrf.mxu0  ;;  %2887 = vst.msk [vmem:[#allocation2 + $0xe0] sm:$0xff] %vm687_vm9, %v2855_v21  ;;  %v2858_v23 = vadd.f32 %v9961_v6, %v2470_v52  ;;  %v6408_v21 = vshrl.u32 %v10583_v25, 16  ;;  %v6396_v0 = vor.u32 %v6395_v41, %v6392_v29  ;;  %v2949_v52 = vld [vmem:[#allocation2 + $0x40] sm:$0xff]  ;;  %v6420_v24 = vshll.u32 %v10586_v56, 16  ;;  %v2950_v9 = vld [vmem:[#allocation2 + $0x48] sm:$0xff] }
 0x189   : > { %3473 = vst.msk [vmem:[#allocation2] sm:$0xff] %vm687_vm9, %v3441_v5  ;;  %v3444_v50 = vadd.f32 %v9973_v55, %v2944_v36  ;;  %v2815_v7 = vpop.f32.mrf.mxu1  ;;  %v2951_v36 = vld [vmem:[#allocation2 + $0x50] sm:$0xff] }
 0x18a   : > { %v3317_v54 = vpop.f32.mrf.mxu0  ;;  %2891 = vst.msk [vmem:[#allocation2 + $0xf8] sm:$0xf] %vm2890_vm10, %v2858_v23  ;;  %v2856_v46 = vadd.f32 %v2815_v7, %v2468_v63  ;;  %10191 = vmatmul.mubr.msk.bf16.gmra.mxu1 %vm471_vm1, %v5893_v49  ;;  %v2952_v49 = vld [vmem:[#allocation2 + $0x58] sm:$0xff]  ;;  %v6410_v63 = vrot.slane %v6408_v21, 1  ;;  %v6422_v3 = vrot.slane %v6420_v24, 2  ;;  %v2954_v24 = vld [vmem:[#allocation2 + $0x68] sm:$0xff] }
 0x18b   : > { %3476 = vst.msk [vmem:[#allocation2 + $0x18] sm:$0xff] %vm687_vm9, %v3444_v50  ;;  %v3442_v60 = vadd.f32 %v3317_v54, %v2942_v59  ;;  %v3544_v14 = vpop.f32.mrf.mxu1  ;;  %10194 = vmatprep.mubr.msk.bf16.mxu1 %vm471_vm1, %v5895_v37  ;;  %v6411_v50 = vshll.u32 %v10583_v25, 16  ;;  %v11927_v59 = vor.u32 %v6404_v11, %v6401_v30  ;;  %v6417_v54 = vshrl.u32 %v10586_v56, 16  ;;  %v2953_v30 = vld [vmem:[#allocation2 + $0x60] sm:$0xff] }
 0x18c   : > { %v9976_v53 = vpop.f32.mrf.mxu0  ;;  %10159 = vmatmul.mubr.msk.bf16.gmra.mxu0 %vm471_vm1, %v5396_v10  ;;  %2888 = vst.msk [vmem:[#allocation2 + $0xe8] sm:$0xff] %vm687_vm9, %v2856_v46  ;;  %v5899_v10 = vsel %vm1465_vm3, %v5896_v1, %v5898_v22  ;;  %v6397_v37 = vsel %vm1968_vm5, %v11902_v32, %v6396_v0  ;;  %v10588_v46 = vld [vmem:[%s10744_s28 + $0x34] sm:$0xff]   ;;  %v11949_v1 = vld [vmem:[%s10744_s28 + $0x4] sm:$0xfc]  }
 0x18d   : > { %3474 = vst.msk [vmem:[#allocation2 + $0x8] sm:$0xff] %vm687_vm9, %v3442_v60  ;;  %v3447_v16 = vadd.f32 %v9976_v53, %v2947_v44  ;;  %10204 = vmatprep.mubr.msk.bf16.mxu0 %vm10672_vm4, %v10671_v17  ;;  %v10006_v4 = vpop.f32.mrf.mxu1  ;;  %v6413_v7 = vrot.slane %v6411_v50, 2  ;;  %v6987_v21 = vrot.slane %v11949_v1, 2 }
 0x18e   : > { %v3330_v15 = vpop.f32.mrf.mxu0  ;;  %v3556_v38 = vld [vmem:[#allocation2 + $0x10] sm:$0xff] }
 0x18f   : > { %3479 = vst.msk [vmem:[#allocation2 + $0x30] sm:$0xff] %vm687_vm9, %v3447_v16  ;;  %v3445_v48 = vadd.f32 %v3330_v15, %v2945_v18  ;;  %v3547_v40 = vpop.f32.mrf.mxu1  ;;  %v6406_v18 = vsel %vm1968_vm5, %v6396_v0, %v11927_v59  ;;  %v6419_v15 = vrot.slane %v6417_v54, 1  ;;  %v6414_v25 = vor.u32 %v6413_v7, %v6410_v63 }
 0x190   : > { %v9977_v35 = vpop.f32.mrf.mxu0  ;;  %v3554_v23 = vld [vmem:[#allocation2] sm:$0xff]  ;;  %v6426_v40 = vshrl.u32 %v10588_v46, 16 }
 0x191   : > { %3477 = vst.msk [vmem:[#allocation2 + $0x20] sm:$0xff] %vm687_vm9, %v3445_v48  ;;  %v3448_v47 = vadd.f32 %v9977_v35, %v2948_v20  ;;  %v3505_v33 = vld [vmem:[#allocation2 + $0xfb] sm:$0x1f]  ;;  %v10007_v39 = vpop.f32.mrf.mxu1  ;;  %v2955_v35 = vld [vmem:[#allocation2 + $0x70] sm:$0xff]  ;;  %v11962_v56 = vor.u32 %v6422_v3, %v6419_v15 }
 0x192   : > { %v3333_v19 = vpop.f32.mrf.mxu0  ;;  %v3550_v13 = vadd.f32 %v3544_v14, %v3505_v33  ;;  %10195 = vmatmul.mubr.msk.bf16.gmra.mxu1 %vm471_vm1, %v5897_v28  ;;  %v3557_v16 = vld [vmem:[#allocation2 + $0x18] sm:$0xff]  ;;  %v6438_v28 = vshll.u32 %v10590_v27, 16 }
 0x193   : > { %3480 = vst.msk [vmem:[#allocation2 + $0x38] sm:$0xff] %vm687_vm9, %v3448_v47  ;;  %v3446_v5 = vadd.f32 %v3333_v19, %v2946_v61  ;;  %v10012_v45 = vpop.f32.mrf.mxu1  ;;  %10198 = vmatprep.mubr.msk.bf16.mxu1 %vm471_vm1, %v5899_v10  ;;  %v11953_v47 = vld [vmem:[%s10744_s28 + $0xc] sm:$0xff]   ;;  %v6429_v61 = vshll.u32 %v10588_v46, 16  ;;  %v6415_v10 = vsel %vm1968_vm5, %v11927_v59, %v6414_v25  ;;  %v11990_v46 = vld [vmem:[%s10744_s28 + $0x1c] sm:$0xff]  }
 0x194   : > { %v9980_v55 = vpop.f32.mrf.mxu0  ;;  %10205 = vmatmul.mubr.msk.bf16.vlgmr.msra.gmra.mxu0 %vm471_vm1, %v10576_v58  ;;  %3551 = vst.msk [vmem:[#allocation2 + $0xfb] sm:$0x1f] %vm2387_vm0, %v3550_v13  ;;  %v3944_v62 = vadd.f32 %v10012_v45, %v3556_v38  ;;  %v3555_v4 = vld [vmem:[#allocation2 + $0x8] sm:$0xff]  ;;  %v6988_v50 = vrot.slane %v11953_v47, 2  ;;  %v10582_v38 = vld [vmem:[%s10894_s10] sm:$0x3f]  }
 0x195   : > { %3478 = vst.msk [vmem:[#allocation2 + $0x28] sm:$0xff] %vm687_vm9, %v3446_v5  ;;  %v3451_v43 = vadd.f32 %v9980_v55, %v2951_v36  ;;  %10209 = vmatpush3.bf16.msra.mxu0 %v11644_v12  ;;  %10210 = vmatprep.mubr.msk.bf16.mxu0 %vm471_vm1, %v6388_v34  ;;  %v3815_v60 = vpop.f32.mrf.mxu1  ;;  %v6435_v5 = vshrl.u32 %v10590_v27, 16  ;;  %v2956_v36 = vld [vmem:[#allocation2 + $0x78] sm:$0xff]  ;;  %v10592_v13 = vld [vmem:[%s10744_s28 + $0x44] sm:$0xff]   ;;  %v6428_v45 = vrot.slane %v6426_v40, 1  ;;  %v6440_v26 = vrot.slane %v6438_v28, 2 }
 0x196   : > { %v3346_v6 = vpop.f32.mrf.mxu0  ;;  %10282 = vmatprep.subr.bf16.mxu0 %v10671_v17  ;;  %3976 = vst.msk [vmem:[#allocation2 + $0x10] sm:$0xff] %vm687_vm9, %v3944_v62  ;;  %v3942_v44 = vadd.f32 %v3815_v60, %v3554_v23  ;;  %v3560_v19 = vld [vmem:[#allocation2 + $0x30] sm:$0xff]  ;;  %v6424_v62 = vsel %vm1968_vm5, %v6414_v25, %v11962_v56  ;;  %v2957_v27 = vld [vmem:[#allocation2 + $0x80] sm:$0xff]  ;;  %v9387_v28 = vld [vmem:[%s12718_s0 + $0xe] sm:$0x1] }
 0x197   : > { %3483 = vst.msk [vmem:[#allocation2 + $0x50] sm:$0xff] %vm687_vm9, %v3451_v43  ;;  %v3449_v12 = vadd.f32 %v3346_v6, %v2949_v52  ;;  %v10013_v42 = vpop.f32.mrf.mxu1  ;;  %v6431_v52 = vrot.slane %v6429_v61, 2  ;;  %v10594_v23 = vld [vmem:[%s10744_s28 + $0x4c] sm:$0xff]   ;;  %v6992_v61 = vrot.slane %v11990_v46, 2 }
 0x198   : > { %v9981_v57 = vpop.f32.mrf.mxu0  ;;  %3974 = vst.msk [vmem:[#allocation2] sm:$0xff] %vm687_vm9, %v3942_v44  ;;  %v3945_v48 = vadd.f32 %v10013_v42, %v3557_v16  ;;  %v3558_v8 = vld [vmem:[#allocation2 + $0x20] sm:$0xff]  ;;  %v2959_v44 = vld [vmem:[#allocation2 + $0x90] sm:$0xff]  ;;  %v6444_v16 = vshrl.u32 %v10592_v13, 16  ;;  %v6447_v42 = vshll.u32 %v10592_v13, 16  ;;  %v6453_v1 = vshrl.u32 %v10594_v23, 16 }
 0x199   : > { %3481 = vst.msk [vmem:[#allocation2 + $0x40] sm:$0xff] %vm687_vm9, %v3449_v12  ;;  %v3452_v53 = vadd.f32 %v9981_v57, %v2952_v49  ;;  %v3818_v20 = vpop.f32.mrf.mxu1  ;;  %v6437_v12 = vrot.slane %v6435_v5, 1  ;;  %v11983_v57 = vld [vmem:[%s10744_s28 + $0x14] sm:$0xff]  }
 0x19a   : > { %v3349_v14 = vpop.f32.mrf.mxu0  ;;  %3977 = vst.msk [vmem:[#allocation2 + $0x18] sm:$0xff] %vm687_vm9, %v3945_v48  ;;  %v3943_v29 = vadd.f32 %v3818_v20, %v3555_v4  ;;  %10199 = vmatmul.mubr.msk.bf16.gmra.mxu1 %vm471_vm1, %v5898_v22  ;;  %v3561_v6 = vld [vmem:[#allocation2 + $0x38] sm:$0xff]  ;;  %v6456_v4 = vshll.u32 %v10594_v23, 16 }
 0x19b   : > { %3484 = vst.msk [vmem:[#allocation2 + $0x58] sm:$0xff] %vm687_vm9, %v3452_v53  ;;  %v3450_v32 = vadd.f32 %v3349_v14, %v2950_v9  ;;  %v10016_v34 = vpop.f32.mrf.mxu1  ;;  %10244 = vmatprep.mubr.msk.bf16.mxu1 %vm10672_vm4, %v10671_v17  ;;  %v10596_v5 = vld [vmem:[%s10744_s28 + $0x54] sm:$0xff]  }
 0x19c   : > { %v9984_v58 = vpop.f32.mrf.mxu0  ;;  %10211 = vmatmul.mubr.msk.bf16.vlgmr.msra.gmra.mxu0 %vm471_vm1, %v6397_v37  ;;  %3975 = vst.msk [vmem:[#allocation2 + $0x8] sm:$0xff] %vm687_vm9, %v3943_v29  ;;  %v3948_v33 = vadd.f32 %v10016_v34, %v3560_v19  ;;  %v3559_v63 = vld [vmem:[#allocation2 + $0x28] sm:$0xff]  ;;  %v6989_v37 = vsel %vm2583_vm6, %v6987_v21, %v6988_v50  ;;  %v6446_v19 = vrot.slane %v6444_v16, 1  ;;  %v6449_v34 = vrot.slane %v6447_v42, 2  ;;  %v10598_v21 = vld [vmem:[%s10744_s28 + $0x5c] sm:$0xff]  }
 0x19d   : > { %3482 = vst.msk [vmem:[#allocation2 + $0x48] sm:$0xff] %vm687_vm9, %v3450_v32  ;;  %v3455_v41 = vadd.f32 %v9984_v58, %v2955_v35  ;;  %10283 = vmatpush3.bf16.msra.mxu0 %v11741_v51  ;;  %10214 = vmatprep.mubr.msk.bf16.mxu0 %vm471_vm1, %v6406_v18  ;;  %v3831_v22 = vpop.f32.mrf.mxu1  ;;  %v6432_v18 = vor.u32 %v6431_v52, %v6428_v45  ;;  %v6990_v58 = vrot.slane %v11983_v57, 2  ;;  %v2963_v52 = vld [vmem:[#allocation2 + $0xb0] sm:$0xff] }
 0x19e   : > { %v3362_v11 = vpop.f32.mrf.mxu0  ;;  %10288 = vmatprep.subr.bf16.mxu0 %v11943_v31  ;;  %3980 = vst.msk [vmem:[#allocation2 + $0x30] sm:$0xff] %vm687_vm9, %v3948_v33  ;;  %v3946_v43 = vadd.f32 %v3831_v22, %v3558_v8  ;;  %v3564_v15 = vld [vmem:[#allocation2 + $0x50] sm:$0xff]  ;;  %v11996_v32 = vor.u32 %v6440_v26, %v6437_v12  ;;  %v2958_v8 = vld [vmem:[#allocation2 + $0x88] sm:$0xff]  ;;  %v6462_v12 = vshrl.u32 %v10596_v5, 16  ;;  %v6465_v26 = vshll.u32 %v10596_v5, 16 }
 0x19f   : > { %3487 = vst.msk [vmem:[#allocation2 + $0x70] sm:$0xff] %vm687_vm9, %v3455_v41  ;;  %v3453_v39 = vadd.f32 %v3362_v11, %v2953_v30  ;;  %v10017_v54 = vpop.f32.mrf.mxu1  ;;  %v2960_v41 = vld [vmem:[#allocation2 + $0x98] sm:$0xff]  ;;  %v6433_v11 = vsel %vm1968_vm5, %v11962_v56, %v6432_v18 }
 0x1a0   : > { %v9985_v55 = vpop.f32.mrf.mxu0  ;;  %3978 = vst.msk [vmem:[#allocation2 + $0x20] sm:$0xff] %vm687_vm9, %v3946_v43  ;;  %v3949_v60 = vadd.f32 %v10017_v54, %v3561_v6  ;;  %v3562_v25 = vld [vmem:[#allocation2 + $0x40] sm:$0xff]  ;;  %v6991_v43 = vsel %vm2583_vm6, %v6988_v50, %v6990_v58  ;;  %v6993_v54 = vsel %vm2583_vm6, %v6990_v58, %v6992_v61  ;;  %v2962_v58 = vld [vmem:[#allocation2 + $0xa8] sm:$0xff] }
 0x1a1   : > { %3485 = vst.msk [vmem:[#allocation2 + $0x60] sm:$0xff] %vm687_vm9, %v3453_v39  ;;  %v3456_v0 = vadd.f32 %v9985_v55, %v2956_v36  ;;  %v3834_v7 = vpop.f32.mrf.mxu1  ;;  %v6442_v36 = vsel %vm1968_vm5, %v6432_v18, %v11996_v32  ;;  %v6455_v55 = vrot.slane %v6453_v1, 1  ;;  %v6464_v1 = vrot.slane %v6462_v12, 1 }
 0x1a2   : > { %v3365_v59 = vpop.f32.mrf.mxu0  ;;  %3981 = vst.msk [vmem:[#allocation2 + $0x38] sm:$0xff] %vm687_vm9, %v3949_v60  ;;  %v3947_v9 = vadd.f32 %v3834_v7, %v3559_v63  ;;  %10245 = vmatmul.mubr.msk.bf16.vlgmr.msra.gmra.mxu1 %vm471_vm1, %v10582_v38  ;;  %v3565_v33 = vld [vmem:[#allocation2 + $0x58] sm:$0xff]  ;;  %v6474_v7 = vshll.u32 %v10598_v21, 16 }
 0x1a3   : > { %3488 = vst.msk [vmem:[#allocation2 + $0x78] sm:$0xff] %vm687_vm9, %v3456_v0  ;;  %v3454_v49 = vadd.f32 %v3365_v59, %v2954_v24  ;;  %v10020_v3 = vpop.f32.mrf.mxu1  ;;  %10249 = vmatpush3.bf16.msra.mxu1 %v11741_v51  ;;  %10250 = vmatprep.mubr.msk.bf16.mxu1 %vm471_vm1, %v6989_v37  ;;  %v12022_v0 = vld [vmem:[%s10744_s28 + $0x24] sm:$0xff]   ;;  %v6450_v24 = vor.u32 %v6449_v34, %v6446_v19  ;;  %v12029_v59 = vld [vmem:[%s10744_s28 + $0x2c] sm:$0xff]  }
 0x1a4   : > { %v9988_v53 = vpop.f32.mrf.mxu0  ;;  %10215 = vmatmul.mubr.msk.bf16.gmra.mxu0 %vm471_vm1, %v6415_v10  ;;  %3979 = vst.msk [vmem:[#allocation2 + $0x28] sm:$0xff] %vm687_vm9, %v3947_v9  ;;  %v3952_v20 = vadd.f32 %v10020_v3, %v3564_v15  ;;  %10322 = vmatprep.subr.bf16.mxu1 %v10671_v17  ;;  %v6458_v10 = vrot.slane %v6456_v4, 2  ;;  %v3563_v38 = vld [vmem:[#allocation2 + $0x48] sm:$0xff]  ;;  %v6994_v37 = vrot.slane %v12022_v0, 2  ;;  %v2964_v9 = vld [vmem:[#allocation2 + $0xb8] sm:$0xff]  ;;  %v6996_v15 = vrot.slane %v12029_v59, 2 }
 0x1a5   : > { %3486 = vst.msk [vmem:[#allocation2 + $0x68] sm:$0xff] %vm687_vm9, %v3454_v49  ;;  %v3459_v14 = vadd.f32 %v9988_v53, %v2959_v44  ;;  %10218 = vmatprep.mubr.msk.bf16.mxu0 %vm471_vm1, %v6424_v62  ;;  %v3847_v29 = vpop.f32.mrf.mxu1  ;;  %v12032_v62 = vand.u32 %v9387_v28, %v10719_v2  ;;  %v2961_v49 = vld [vmem:[#allocation2 + $0xa0] sm:$0xff]  ;;  %v6471_v2 = vshrl.u32 %v10598_v21, 16  ;;  %v6451_v18 = vsel %vm1968_vm5, %v11996_v32, %v6450_v24  ;;  %v2967_v28 = vld [vmem:[#allocation2 + $0xd0] sm:$0xff] }
 0x1a6   : > { %v3378_v48 = vpop.f32.mrf.mxu0  ;;  %3984 = vst.msk [vmem:[#allocation2 + $0x50] sm:$0xff] %vm687_vm9, %v3952_v20  ;;  %v3950_v51 = vadd.f32 %v3847_v29, %v3562_v25  ;;  %v3568_v23 = vld [vmem:[#allocation2 + $0x70] sm:$0xff]  ;;  %v12038_v63 = vor.u32 %v6458_v10, %v6455_v55  ;;  %v10600_v3 = vld [vmem:[%s10744_s28 + $0x64] sm:$0xff]   ;;  %v6467_v4 = vrot.slane %v6465_v26, 2 }
 0x1a7   : > { %3491 = vst.msk [vmem:[#allocation2 + $0x90] sm:$0xff] %vm687_vm9, %v3459_v14  ;;  %v3457_v35 = vadd.f32 %v3378_v48, %v2957_v27  ;;  %v10021_v39 = vpop.f32.mrf.mxu1  ;;  %v6473_v29 = vrot.slane %v6471_v2, 1  ;;  %v10604_v2 = vld [vmem:[%s10744_s28 + $0x74] sm:$0xff]  }
 0x1a8   : > { %v9989_v40 = vpop.f32.mrf.mxu0  ;;  %3982 = vst.msk [vmem:[#allocation2 + $0x40] sm:$0xff] %vm687_vm9, %v3950_v51  ;;  %v3953_v56 = vadd.f32 %v10021_v39, %v3565_v33  ;;  %v3566_v16 = vld [vmem:[#allocation2 + $0x60] sm:$0xff]  ;;  %v6460_v32 = vsel %vm1968_vm5, %v6450_v24, %v12038_v63  ;;  %v6995_v51 = vsel %vm2583_vm6, %v6992_v61, %v6994_v37  ;;  %v6997_v39 = vsel %vm2583_vm6, %v6994_v37, %v6996_v15 }
 0x1a9   : > { %3489 = vst.msk [vmem:[#allocation2 + $0x80] sm:$0xff] %vm687_vm9, %v3457_v35  ;;  %v3460_v30 = vadd.f32 %v9989_v40, %v2960_v41  ;;  %v3850_v45 = vpop.f32.mrf.mxu1  ;;  %v6476_v41 = vrot.slane %v6474_v7, 2  ;;  %v10602_v40 = vld [vmem:[%s10744_s28 + $0x6c] sm:$0xff]   ;;  %v6468_v55 = vor.u32 %v6467_v4, %v6464_v1 }
 0x1aa   : > { %v3381_v22 = vpop.f32.mrf.mxu0  ;;  %3985 = vst.msk [vmem:[#allocation2 + $0x58] sm:$0xff] %vm687_vm9, %v3953_v56  ;;  %v3951_v47 = vadd.f32 %v3850_v45, %v3563_v38  ;;  %10251 = vmatmul.mubr.msk.bf16.vlgmr.msra.gmra.mxu1 %vm471_vm1, %v6991_v43  ;;  %v3569_v20 = vld [vmem:[#allocation2 + $0x78] sm:$0xff]  ;;  %v2965_v56 = vld [vmem:[#allocation2 + $0xc0] sm:$0xff]  ;;  %v6489_v0 = vshrl.u32 %v10602_v40, 16  ;;  %v6492_v38 = vshll.u32 %v10602_v40, 16  ;;  %v2971_v4 = vld [vmem:[#allocation2 + $0xf0] sm:$0xff] }
 0x1ab   : > { %3492 = vst.msk [vmem:[#allocation2 + $0x98] sm:$0xff] %vm687_vm9, %v3460_v30  ;;  %v3458_v13 = vadd.f32 %v3381_v22, %v2958_v8  ;;  %v10024_v60 = vpop.f32.mrf.mxu1  ;;  %10323 = vmatpush3.bf16.msra.mxu1 %v11943_v31  ;;  %10254 = vmatprep.mubr.msk.bf16.mxu1 %vm471_vm1, %v6993_v54  ;;  %v12061_v30 = vld [vmem:[%s10744_s28 + $0x34] sm:$0xff]   ;;  %v12068_v8 = vld [vmem:[%s10744_s28 + $0x3c] sm:$0xff]   ;;  %v6480_v22 = vshrl.u32 %v10600_v3, 16  ;;  %v12074_v43 = vor.u32 %v6476_v41, %v6473_v29  ;;  %v6501_v29 = vshll.u32 %v10604_v2, 16 }
 0x1ac   : > { %v9992_v6 = vpop.f32.mrf.mxu0  ;;  %10219 = vmatmul.mubr.msk.bf16.gmra.mxu0 %vm471_vm1, %v6433_v11  ;;  %3983 = vst.msk [vmem:[#allocation2 + $0x48] sm:$0xff] %vm687_vm9, %v3951_v47  ;;  %v3956_v44 = vadd.f32 %v10024_v60, %v3568_v23  ;;  %10328 = vmatprep.subr.bf16.mxu1 %v12032_v62  ;;  %v3567_v11 = vld [vmem:[#allocation2 + $0x68] sm:$0xff]  ;;  %v2968_v47 = vld [vmem:[#allocation2 + $0xd8] sm:$0xff]  ;;  %v7000_v12 = vrot.slane %v12068_v8, 2 }
 0x1ad   : > { %3490 = vst.msk [vmem:[#allocation2 + $0x88] sm:$0xff] %vm687_vm9, %v3458_v13  ;;  %v3463_v50 = vadd.f32 %v9992_v6, %v2963_v52  ;;  %10222 = vmatprep.mubr.msk.bf16.mxu0 %vm471_vm1, %v6442_v36  ;;  %v3863_v42 = vpop.f32.mrf.mxu1  ;;  %v6483_v36 = vshll.u32 %v10600_v3, 16  ;;  %v6998_v6 = vrot.slane %v12061_v30, 2  ;;  %v6482_v26 = vrot.slane %v6480_v22, 1 }
 0x1ae   : > { %v3394_v57 = vpop.f32.mrf.mxu0  ;;  %3988 = vst.msk [vmem:[#allocation2 + $0x70] sm:$0xff] %vm687_vm9, %v3956_v44  ;;  %v3954_v27 = vadd.f32 %v3863_v42, %v3566_v16  ;;  %v3572_v10 = vld [vmem:[#allocation2 + $0x90] sm:$0xff]  ;;  %v6478_v16 = vsel %vm1968_vm5, %v6468_v55, %v12074_v43  ;;  %v6491_v42 = vrot.slane %v6489_v0, 1 }
 0x1af   : > { %3495 = vst.msk [vmem:[#allocation2 + $0xb0] sm:$0xff] %vm687_vm9, %v3463_v50  ;;  %v3461_v53 = vadd.f32 %v3394_v57, %v2961_v49  ;;  %v10025_v35 = vpop.f32.mrf.mxu1  ;;  %v6485_v23 = vrot.slane %v6483_v36, 2  ;;  %v6469_v57 = vsel %vm1968_vm5, %v12038_v63, %v6468_v55  ;;  %v6999_v63 = vsel %vm2583_vm6, %v6996_v15, %v6998_v6  ;;  %v2972_v36 = vld [vmem:[#allocation2 + $0xf8] sm:$0x7] }
 0x1b0   : > { %v9993_v14 = vpop.f32.mrf.mxu0  ;;  %3986 = vst.msk [vmem:[#allocation2 + $0x60] sm:$0xff] %vm687_vm9, %v3954_v27  ;;  %v3957_v19 = vadd.f32 %v10025_v35, %v3569_v20  ;;  %v3570_v54 = vld [vmem:[#allocation2 + $0x80] sm:$0xff]  ;;  %v7001_v35 = vsel %vm2583_vm6, %v6998_v6, %v7000_v12  ;;  %v6498_v15 = vshrl.u32 %v10604_v2, 16 }
 0x1b1   : > { %3493 = vst.msk [vmem:[#allocation2 + $0xa0] sm:$0xff] %vm687_vm9, %v3461_v53  ;;  %v3464_v48 = vadd.f32 %v9993_v14, %v2964_v9  ;;  %v3866_v5 = vpop.f32.mrf.mxu1  ;;  %v2966_v53 = vld [vmem:[#allocation2 + $0xc8] sm:$0xff]  ;;  %v6494_v9 = vrot.slane %v6492_v38, 2  ;;  %v10606_v14 = vld [vmem:[%s10744_s28 + $0x7c] ss:$0 sps:$4 sm:$0xff]  }
 0x1b2   : > { %v3397_v25 = vpop.f32.mrf.mxu0  ;;  %3989 = vst.msk [vmem:[#allocation2 + $0x78] sm:$0xff] %vm687_vm9, %v3957_v19  ;;  %v3955_v46 = vadd.f32 %v3866_v5, %v3567_v11  ;;  %10255 = vmatmul.mubr.msk.bf16.gmra.mxu1 %vm471_vm1, %v6995_v51  ;;  %v3573_v7 = vld [vmem:[#allocation2 + $0x98] sm:$0xff]  ;;  %v10599_v27 = vld [vmem:[%s10744_s28 + $0x44] sm:$0xff]   ;;  %v6507_v30 = vshrl.u32 %v10606_v14, 16  ;;  %v6510_v11 = vshll.u32 %v10606_v14, 16 }
 0x1b3   : > { %3496 = vst.msk [vmem:[#allocation2 + $0xb8] sm:$0xff] %vm687_vm9, %v3464_v48  ;;  %v3462_v34 = vadd.f32 %v3397_v25, %v2962_v58  ;;  %v10028_v21 = vpop.f32.mrf.mxu1  ;;  %10258 = vmatprep.mubr.msk.bf16.mxu1 %vm471_vm1, %v6997_v39  ;;  %v6486_v58 = vor.u32 %v6485_v23, %v6482_v26  ;;  %v12100_v25 = vld [vmem:[%s10744_s28 + $0x4c] sm:$0xff]   ;;  %v2969_v19 = vld [vmem:[#allocation2 + $0xe0] sm:$0xff]  ;;  %v6495_v51 = vor.u32 %v6494_v9, %v6491_v42  ;;  %v10603_v26 = vld [vmem:[%s10744_s28 + $0x54] sm:$0xff]  }
 0x1b4   : > { %v9996_v33 = vpop.f32.mrf.mxu0  ;;  %10223 = vmatmul.mubr.msk.bf16.gmra.mxu0 %vm471_vm1, %v6451_v18  ;;  %3987 = vst.msk [vmem:[#allocation2 + $0x68] sm:$0xff] %vm687_vm9, %v3955_v46  ;;  %v3960_v45 = vadd.f32 %v10028_v21, %v3572_v10  ;;  %v3571_v48 = vld [vmem:[#allocation2 + $0x88] sm:$0xff]  ;;  %v7004_v55 = vrot.slane %v12100_v25, 2  ;;  %v12124_v2 = vld [vmem:[%s10744_s28 + $0x5c] sm:$0xff]   ;;  %v7006_v42 = vrot.slane %v10603_v26, 2 }
 0x1b5   : > { %3494 = vst.msk [vmem:[#allocation2 + $0xa8] sm:$0xff] %vm687_vm9, %v3462_v34  ;;  %v3467_v61 = vadd.f32 %v9996_v33, %v2967_v28  ;;  %10226 = vmatprep.mubr.msk.bf16.mxu0 %vm471_vm1, %v6460_v32  ;;  %v3879_v24 = vpop.f32.mrf.mxu1  ;;  %v7002_v33 = vrot.slane %v10599_v27, 2  ;;  %v6496_v6 = vsel %vm1968_vm5, %v6486_v58, %v6495_v51  ;;  %v10613_v25 = vld [vmem:[%s10744_s28 + $0xc] sm:$0xff]  }
 0x1b6   : > { %v3410_v13 = vpop.f32.mrf.mxu0  ;;  %3992 = vst.msk [vmem:[#allocation2 + $0x90] sm:$0xff] %vm687_vm9, %v3960_v45  ;;  %v3958_v60 = vadd.f32 %v3879_v24, %v3570_v54  ;;  %v3576_v41 = vld [vmem:[#allocation2 + $0xb0] sm:$0xff]  ;;  %v2970_v45 = vld [vmem:[#allocation2 + $0xe8] sm:$0xff]  ;;  %v6509_v54 = vrot.slane %v6507_v30, 1 }
 0x1b7   : > { %3499 = vst.msk [vmem:[#allocation2 + $0xd0] sm:$0xff] %vm687_vm9, %v3467_v61  ;;  %v3465_v52 = vadd.f32 %v3410_v13, %v2965_v56  ;;  %v10029_v44 = vpop.f32.mrf.mxu1  ;;  %v6487_v61 = vsel %vm1968_vm5, %v12074_v43, %v6486_v58  ;;  %v6500_v56 = vrot.slane %v6498_v15, 1  ;;  %v6503_v13 = vrot.slane %v6501_v29, 2  ;;  %v10607_v29 = vld [vmem:[%s10744_s28 + $0x64] sm:$0xff]   ;;  %v12149_v30 = vld [vmem:[%s10744_s28 + $0x6c] sm:$0xff]  }
 0x1b8   : > { %v9997_v50 = vpop.f32.mrf.mxu0  ;;  %3990 = vst.msk [vmem:[#allocation2 + $0x80] sm:$0xff] %vm687_vm9, %v3958_v60  ;;  %v3961_v18 = vadd.f32 %v10029_v44, %v3573_v7  ;;  %v3574_v39 = vld [vmem:[#allocation2 + $0xa0] sm:$0xff]  ;;  %v6512_v43 = vrot.slane %v6510_v11, 2  ;;  %v7007_v15 = vsel %vm2583_vm6, %v7004_v55, %v7006_v42 }
 0x1b9   : > { %3497 = vst.msk [vmem:[#allocation2 + $0xc0] sm:$0xff] %vm687_vm9, %v3465_v52  ;;  %v3468_v49 = vadd.f32 %v9997_v50, %v2968_v47  ;;  %v3882_v1 = vpop.f32.mrf.mxu1  ;;  %v7003_v50 = vsel %vm2583_vm6, %v7000_v12, %v7002_v33  ;;  %v6504_v8 = vor.u32 %v6503_v13, %v6500_v56  ;;  %v7010_v56 = vrot.slane %v10607_v29, 2  ;;  %v4062_v29 = vld [vmem:[#allocation2 + $0x38] sm:$0xff] }
 0x1ba   : > { %v3413_v37 = vpop.f32.mrf.mxu0  ;;  %3993 = vst.msk [vmem:[#allocation2 + $0x98] sm:$0xff] %vm687_vm9, %v3961_v18  ;;  %v3959_v32 = vadd.f32 %v3882_v1, %v3571_v48  ;;  %10259 = vmatmul.mubr.msk.bf16.gmra.mxu1 %vm471_vm1, %v6999_v63  ;;  %v3577_v0 = vld [vmem:[#allocation2 + $0xb8] sm:$0xff]  ;;  %v10612_v48 = vld [vmem:[%s10744_s28 + $0x4] sm:$0xfc]  }
 0x1bb   : > { %3500 = vst.msk [vmem:[#allocation2 + $0xd8] sm:$0xff] %vm687_vm9, %v3468_v49  ;;  %v3466_v3 = vadd.f32 %v3413_v37, %v2966_v53  ;;  %v10032_v40 = vpop.f32.mrf.mxu1  ;;  %10262 = vmatprep.mubr.msk.bf16.mxu1 %vm471_vm1, %v7001_v35  ;;  %v12130_v37 = vor.u32 %v6512_v43, %v6509_v54  ;;  %v6505_v27 = vsel %vm1968_vm5, %v6495_v51, %v6504_v8 }
 0x1bc   : > { %v10000_v20 = vpop.f32.mrf.mxu0  ;;  %10227 = vmatmul.mubr.msk.bf16.gmra.mxu0 %vm471_vm1, %v6469_v57  ;;  %3991 = vst.msk [vmem:[#allocation2 + $0x88] sm:$0xff] %vm687_vm9, %v3959_v32  ;;  %v3964_v5 = vadd.f32 %v10032_v40, %v3576_v41  ;;  %v3575_v23 = vld [vmem:[#allocation2 + $0xa8] sm:$0xff]  ;;  %v7005_v57 = vsel %vm2583_vm6, %v7002_v33, %v7004_v55  ;;  %v7494_v33 = vshll.u32 %v10612_v48, 16  ;;  %v7502_v55 = vshll.u32 %v10613_v25, 16 }
 0x1bd   : > { %3498 = vst.msk [vmem:[#allocation2 + $0xc8] sm:$0xff] %vm687_vm9, %v3466_v3  ;;  %v3471_v59 = vadd.f32 %v10000_v20, %v2971_v4  ;;  %10230 = vmatprep.mubr.msk.bf16.mxu0 %vm471_vm1, %v6478_v16  ;;  %v3895_v22 = vpop.f32.mrf.mxu1  ;;  %v7008_v3 = vrot.slane %v12124_v2, 2  ;;  %v6514_v58 = vsel %vm1968_vm5, %v6504_v8, %v12130_v37 }
 0x1be   : > { %v3426_v34 = vpop.f32.mrf.mxu0  ;;  %3996 = vst.msk [vmem:[#allocation2 + $0xb0] sm:$0xff] %vm687_vm9, %v3964_v5  ;;  %v3962_v10 = vadd.f32 %v3895_v22, %v3574_v39  ;;  %v3580_v44 = vld [vmem:[#allocation2 + $0xd0] sm:$0xff] }
 0x1bf   : > { %3503 = vst.msk [vmem:[#allocation2 + $0xf0] sm:$0xff] %vm687_vm9, %v3471_v59  ;;  %v3469_v28 = vadd.f32 %v3426_v34, %v2969_v19  ;;  %v10033_v38 = vpop.f32.mrf.mxu1  ;;  %v4057_v19 = vld [vmem:[#allocation2 + $0x10] sm:$0xff]  ;;  %v7009_v51 = vsel %vm2583_vm6, %v7006_v42, %v7008_v3 }
 0x1c0   : > { %v10001_v46 = vpop.f32.mrf.mxu0  ;;  %3994 = vst.msk [vmem:[#allocation2 + $0xa0] sm:$0xff] %vm687_vm9, %v3962_v10  ;;  %v3965_v24 = vadd.f32 %v10033_v38, %v3577_v0  ;;  %v3578_v9 = vld [vmem:[#allocation2 + $0xc0] sm:$0xff]  ;;  %v4058_v38 = vld [vmem:[#allocation2 + $0x18] sm:$0xff] }
 0x1c1   : > { %3501 = vst.msk [vmem:[#allocation2 + $0xe0] sm:$0xff] %vm687_vm9, %v3469_v28  ;;  %v3472_v21 = vadd.f32 %v10001_v46, %v2972_v36  ;;  %v3898_v60 = vpop.f32.mrf.mxu1  ;;  %v7491_v28 = vshrl.u32 %v10612_v48, 16  ;;  %v4055_v36 = vld [vmem:[#allocation2] sm:$0xff] }
 0x1c2   : > { %v3429_v52 = vpop.f32.mrf.mxu0  ;;  %3997 = vst.msk [vmem:[#allocation2 + $0xb8] sm:$0xff] %vm687_vm9, %v3965_v24  ;;  %v3963_v7 = vadd.f32 %v3898_v60, %v3575_v23  ;;  %10263 = vmatmul.mubr.msk.bf16.gmra.mxu1 %vm471_vm1, %v7003_v50  ;;  %v3581_v4 = vld [vmem:[#allocation2 + $0xd8] sm:$0xff]  ;;  %v7496_v24 = vrot.slane %v7494_v33, 3  ;;  %v4056_v23 = vld [vmem:[#allocation2 + $0x8] sm:$0xff] }
 0x1c3   : > { %3504 = vst.msk [vmem:[#allocation2 + $0xf8] sm:$0x7] %vm2435_vm15, %v3472_v21  ;;  %v3470_v47 = vadd.f32 %v3429_v52, %v2970_v45  ;;  %v10036_v12 = vpop.f32.mrf.mxu1  ;;  %10266 = vmatprep.mubr.msk.bf16.mxu1 %vm471_vm1, %v7005_v57  ;;  %v7012_v52 = vrot.slane %v12149_v30, 2  ;;  %v7493_v43 = vrot.slane %v7491_v28, 2  ;;  %v7504_v57 = vrot.slane %v7502_v55, 3  ;;  %v4060_v33 = vld [vmem:[#allocation2 + $0x28] sm:$0xff] }
 0x1c4   : > { %v4045_v49 = vpop.f32.mrf.mxu0  ;;  %10231 = vmatmul.mubr.msk.bf16.gmra.mxu0 %vm471_vm1, %v6487_v61  ;;  %3995 = vst.msk [vmem:[#allocation2 + $0xa8] sm:$0xff] %vm687_vm9, %v3963_v7  ;;  %v3968_v16 = vadd.f32 %v10036_v12, %v3580_v44  ;;  %v3579_v41 = vld [vmem:[#allocation2 + $0xc8] sm:$0xff]  ;;  %v7499_v61 = vshrl.u32 %v10613_v25, 16  ;;  %v10615_v7 = vld [vmem:[%s10744_s28 + $0x1c] sm:$0xff]   ;;  %v7011_v12 = vsel %vm2583_vm6, %v7008_v3, %v7010_v56 }
 0x1c5   : > { %3502 = vst.msk [vmem:[#allocation2 + $0xe8] sm:$0xff] %vm687_vm9, %v3470_v47  ;;  %10234 = vmatprep.mubr.msk.bf16.mxu0 %vm471_vm1, %v6496_v6  ;;  %v3911_v14 = vpop.f32.mrf.mxu1  ;;  %v10614_v47 = vld [vmem:[%s10744_s28 + $0x14] sm:$0xff]   ;;  %v7520_v25 = vshll.u32 %v10615_v7, 16 }
 0x1c6   : > { %v10046_v53 = vpop.f32.mrf.mxu0  ;;  %4000 = vst.msk [vmem:[#allocation2 + $0xd0] sm:$0xff] %vm687_vm9, %v3968_v16  ;;  %v3966_v63 = vadd.f32 %v3911_v14, %v3578_v9  ;;  %v3584_v39 = vld [vmem:[#allocation2 + $0xf0] sm:$0xff]  ;;  %v7508_v3 = vshrl.u32 %v10614_v47, 16  ;;  %v7511_v48 = vshll.u32 %v10614_v47, 16  ;;  %v4063_v47 = vld [vmem:[#allocation2 + $0x40] sm:$0xff] }
 0x1c7   : > { %v10037_v20 = vpop.f32.mrf.mxu1  ;;  %v10609_v53 = vld [vmem:[%s10744_s28 + $0x74] sm:$0xff]  }
 0x1c8   : > { %v4048_v18 = vpop.f32.mrf.mxu0  ;;  %3998 = vst.msk [vmem:[#allocation2 + $0xc0] sm:$0xff] %vm687_vm9, %v3966_v63  ;;  %v3969_v59 = vadd.f32 %v10037_v20, %v3581_v4  ;;  %v3582_v13 = vld [vmem:[#allocation2 + $0xe0] sm:$0xff]  ;;  %v4061_v9 = vld [vmem:[#allocation2 + $0x30] sm:$0xff]  ;;  %v12175_v63 = vld [vmem:[%s10744_s28 + $0x7c] ss:$0 sps:$4 sm:$0xff]   ;;  %v7497_v20 = vor.u32 %v7496_v24, %v7493_v43 }
 0x1c9   : > { %v3914_v40 = vpop.f32.mrf.mxu1  ;;  %v7013_v18 = vsel %vm2583_vm6, %v7010_v56, %v7012_v52 }
 0x1ca   : > { %v4006_v1 = vld [vmem:[#allocation2 + $0xfa] sm:$0x3f]  ;;  %v10047_v35 = vpop.f32.mrf.mxu0  ;;  %4001 = vst.msk [vmem:[#allocation2 + $0xd8] sm:$0xff] %vm687_vm9, %v3969_v59  ;;  %v3967_v11 = vadd.f32 %v3914_v40, %v3579_v41  ;;  %10267 = vmatmul.mubr.msk.bf16.gmra.mxu1 %vm471_vm1, %v7007_v15  ;;  %v3585_v50 = vld [vmem:[#allocation2 + $0xf8] sm:$0x3]  ;;  %v7014_v59 = vrot.slane %v10609_v53, 2 }
 0x1cb   : > { %v4051_v32 = vadd.f32 %v4045_v49, %v4006_v1  ;;  %v10040_v22 = vpop.f32.mrf.mxu1  ;;  %10270 = vmatprep.mubr.msk.bf16.mxu1 %vm471_vm1, %v7009_v51  ;;  %v7501_v49 = vrot.slane %v7499_v61, 2  ;;  %v10610_v40 = vld [vmem:[%s10894_s10] sm:$0x3f]   ;;  %v10620_v61 = vld [vmem:[%s10744_s28 + $0x2c] sm:$0xff]  }
 0x1cc   : > { %v10052_v34 = vpop.f32.mrf.mxu0  ;;  %10235 = vmatmul.mubr.msk.bf16.gmra.mxu0 %vm471_vm1, %v6505_v27  ;;  %3999 = vst.msk [vmem:[#allocation2 + $0xc8] sm:$0xff] %vm687_vm9, %v3967_v11  ;;  %v3972_v10 = vadd.f32 %v10040_v22, %v3584_v39  ;;  %v3583_v16 = vld [vmem:[#allocation2 + $0xe8] sm:$0xff]  ;;  %v7510_v11 = vrot.slane %v7508_v3, 2 }
 0x1cd   : > { %4052 = vst.msk [vmem:[#allocation2 + $0xfa] sm:$0x3f] %vm1772_vm14, %v4051_v32  ;;  %v4557_v5 = vadd.f32 %v10052_v34, %v4057_v19  ;;  %10238 = vmatprep.mubr.msk.bf16.mxu0 %vm471_vm1, %v6514_v58  ;;  %v3927_v0 = vpop.f32.mrf.mxu1  ;;  %v12182_v35 = vor.u32 %v7504_v57, %v7501_v49  ;;  %v7517_v58 = vshrl.u32 %v10615_v7, 16  ;;  %v7016_v19 = vrot.slane %v12175_v63, 2  ;;  %v10617_v34 = vld [vmem:[%s10744_s28 + $0x24] sm:$0xff]  }
 0x1ce   : > { %v4428_v46 = vpop.f32.mrf.mxu0  ;;  %4004 = vst.msk [vmem:[#allocation2 + $0xf0] sm:$0xff] %vm687_vm9, %v3972_v10  ;;  %v3970_v6 = vadd.f32 %v3927_v0, %v3582_v13  ;;  %v7015_v10 = vsel %vm2583_vm6, %v7012_v52, %v7014_v59  ;;  %v4065_v13 = vld [vmem:[#allocation2 + $0x50] sm:$0xff] }
 0x1cf   : > { %4589 = vst.msk [vmem:[#allocation2 + $0x10] sm:$0xff] %vm687_vm9, %v4557_v5  ;;  %v4555_v21 = vadd.f32 %v4428_v46, %v4055_v36  ;;  %v10041_v26 = vpop.f32.mrf.mxu1  ;;  %v7513_v5 = vrot.slane %v7511_v48, 3  ;;  %v7506_v22 = vsel %vm3085_vm7, %v7497_v20, %v12182_v35  ;;  %v7519_v36 = vrot.slane %v7517_v58, 2 }
 0x1d0   : > { %v10053_v45 = vpop.f32.mrf.mxu0  ;;  %4002 = vst.msk [vmem:[#allocation2 + $0xe0] sm:$0xff] %vm687_vm9, %v3970_v6  ;;  %v3973_v8 = vadd.f32 %v10041_v26, %v3585_v50  ;;  %v7522_v46 = vrot.slane %v7520_v25, 3  ;;  %v7529_v6 = vshll.u32 %v10617_v34, 16  ;;  %v12223_v25 = vld [vmem:[%s10744_s28 + $0x4] sm:$0xf8]  }
 0x1d1   : > { %4587 = vst.msk [vmem:[#allocation2] sm:$0xff] %vm687_vm9, %v4555_v21  ;;  %v4558_v54 = vadd.f32 %v10053_v45, %v4058_v38  ;;  %v3930_v42 = vpop.f32.mrf.mxu1  ;;  %v7017_v38 = vsel %vm2583_vm6, %v7014_v59, %v7016_v19  ;;  %v7526_v45 = vshrl.u32 %v10617_v34, 16  ;;  %v7514_v30 = vor.u32 %v7513_v5, %v7510_v11  ;;  %v4069_v59 = vld [vmem:[#allocation2 + $0x70] sm:$0xff] }
 0x1d2   : > { %v4431_v60 = vpop.f32.mrf.mxu0  ;;  %4005 = vst.msk [vmem:[#allocation2 + $0xf8] sm:$0x3] %vm1820_vm13, %v3973_v8  ;;  %v3971_v27 = vadd.f32 %v3930_v42, %v3583_v16  ;;  %10271 = vmatmul.mubr.msk.bf16.gmra.mxu1 %vm471_vm1, %v7011_v12  ;;  %v12206_v26 = vor.u32 %v7522_v46, %v7519_v36  ;;  %v4066_v8 = vld [vmem:[#allocation2 + $0x58] sm:$0xff]  ;;  %v7531_v53 = vrot.slane %v7529_v6, 3 }
 0x1d3   : > { %4590 = vst.msk [vmem:[#allocation2 + $0x18] sm:$0xff] %vm687_vm9, %v4558_v54  ;;  %v4556_v44 = vadd.f32 %v4431_v60, %v4056_v23  ;;  %v4658_v1 = vpop.f32.mrf.mxu1  ;;  %10274 = vmatprep.mubr.msk.bf16.mxu1 %vm471_vm1, %v7013_v18  ;;  %v7535_v23 = vshrl.u32 %v10620_v61, 16  ;;  %v7538_v60 = vshll.u32 %v10620_v61, 16  ;;  %v7528_v12 = vrot.slane %v7526_v45, 2 }
 0x1d4   : > { %v10056_v14 = vpop.f32.mrf.mxu0  ;;  %10239 = vmatmul.mubr.msk.bf16.gmra.mxu0 %vm471_vm1, %v12130_v37  ;;  %v4059_v37 = vld [vmem:[#allocation2 + $0x20] sm:$0xff]  ;;  %4003 = vst.msk [vmem:[#allocation2 + $0xe8] sm:$0xff] %vm687_vm9, %v3971_v27  ;;  %v7524_v48 = vsel %vm3085_vm7, %v7514_v30, %v12206_v26 }
 0x1d5   : > { %4588 = vst.msk [vmem:[#allocation2 + $0x8] sm:$0xff] %vm687_vm9, %v4556_v44  ;;  %v4561_v2 = vadd.f32 %v10056_v14, %v4061_v9  ;;  %10284 = vmatprep.mubr.msk.bf16.mxu0 %vm10672_vm4, %v10671_v17  ;;  %v10086_v15 = vpop.f32.mrf.mxu1  ;;  %v7515_v9 = vsel %vm3085_vm7, %v12182_v35, %v7514_v30  ;;  %v10622_v14 = vld [vmem:[%s10744_s28 + $0x34] sm:$0xff]  }
 0x1d6   : > { %v4444_v4 = vpop.f32.mrf.mxu0  ;;  %v4670_v52 = vld [vmem:[#allocation2 + $0x10] sm:$0xff]  ;;  %v7547_v11 = vshll.u32 %v10622_v14, 16 }
 0x1d7   : > { %4593 = vst.msk [vmem:[#allocation2 + $0x30] sm:$0xff] %vm687_vm9, %v4561_v2  ;;  %v4559_v32 = vadd.f32 %v4444_v4, %v4059_v37  ;;  %v4661_v28 = vpop.f32.mrf.mxu1  ;;  %v4064_v2 = vld [vmem:[#allocation2 + $0x48] sm:$0xff]  ;;  %v7540_v37 = vrot.slane %v7538_v60, 3  ;;  %v10624_v4 = vld [vmem:[%s10744_s28 + $0x3c] sm:$0xff]  }
 0x1d8   : > { %v10057_v41 = vpop.f32.mrf.mxu0  ;;  %v4668_v57 = vld [vmem:[#allocation2] sm:$0xff]  ;;  %v7553_v36 = vshrl.u32 %v10624_v4, 16  ;;  %v7556_v46 = vshll.u32 %v10624_v4, 16  ;;  %v7549_v30 = vrot.slane %v7547_v11, 3 }
 0x1d9   : > { %4591 = vst.msk [vmem:[#allocation2 + $0x20] sm:$0xff] %vm687_vm9, %v4559_v32  ;;  %v4562_v51 = vadd.f32 %v10057_v41, %v4062_v29  ;;  %v4619_v21 = vld [vmem:[#allocation2 + $0xf9] sm:$0x7f]  ;;  %v10087_v56 = vpop.f32.mrf.mxu1  ;;  %v7532_v29 = vor.u32 %v7531_v53, %v7528_v12  ;;  %v12227_v41 = vld [vmem:[%s10744_s28 + $0xc] sm:$0xff]  }
 0x1da   : > { %v4447_v39 = vpop.f32.mrf.mxu0  ;;  %v4664_v54 = vadd.f32 %v4658_v1, %v4619_v21  ;;  %10275 = vmatmul.mubr.msk.bf16.gmra.mxu1 %vm471_vm1, %v7015_v10  ;;  %v4671_v18 = vld [vmem:[#allocation2 + $0x18] sm:$0xff]  ;;  %v7537_v1 = vrot.slane %v7535_v23, 2  ;;  %v7555_v23 = vrot.slane %v7553_v36, 2  ;;  %v7558_v60 = vrot.slane %v7556_v46, 3  ;;  %v4073_v12 = vld [vmem:[#allocation2 + $0x90] sm:$0xff]  ;;  %v4072_v46 = vld [vmem:[#allocation2 + $0x88] sm:$0xff] }
 0x1db   : > { %4594 = vst.msk [vmem:[#allocation2 + $0x38] sm:$0xff] %vm687_vm9, %v4562_v51  ;;  %v4560_v55 = vadd.f32 %v4447_v39, %v4060_v33  ;;  %v10092_v24 = vpop.f32.mrf.mxu1  ;;  %10278 = vmatprep.mubr.msk.bf16.mxu1 %vm471_vm1, %v7017_v38  ;;  %v7544_v51 = vshrl.u32 %v10622_v14, 16  ;;  %v4067_v33 = vld [vmem:[#allocation2 + $0x60] sm:$0xff]  ;;  %v7533_v56 = vsel %vm3085_vm7, %v12206_v26, %v7532_v29 }
 0x1dc   : > { %v10060_v0 = vpop.f32.mrf.mxu0  ;;  %10285 = vmatmul.mubr.msk.bf16.vlgmr.msra.gmra.mxu0 %vm471_vm1, %v10610_v40  ;;  %4665 = vst.msk [vmem:[#allocation2 + $0xf9] sm:$0x7f] %vm1269_vm11, %v4664_v54  ;;  %v5021_v49 = vadd.f32 %v10092_v24, %v4670_v52  ;;  %v4669_v35 = vld [vmem:[#allocation2 + $0x8] sm:$0xff]  ;;  %v10616_v54 = vld [vmem:[%s10894_s10] sm:$0x7f]   ;;  %v12269_v4 = vor.u32 %v7558_v60, %v7555_v23 }
 0x1dd   : > { %4592 = vst.msk [vmem:[#allocation2 + $0x28] sm:$0xff] %vm687_vm9, %v4560_v55  ;;  %v4565_v43 = vadd.f32 %v10060_v0, %v4065_v13  ;;  %10289 = vmatpush3.bf16.msra.mxu0 %v11943_v31  ;;  %10290 = vmatprep.mubr.msk.bf16.mxu0 %vm471_vm1, %v7506_v22  ;;  %v4893_v7 = vpop.f32.mrf.mxu1  ;;  %v12236_v22 = vor.u32 %v7540_v37, %v7537_v1  ;;  %v8105_v13 = vrot.slane %v12223_v25, 3  ;;  %v8106_v0 = vrot.slane %v12227_v41, 3  ;;  %v10626_v38 = vld [vmem:[%s10744_s28 + $0x44] sm:$0xff]  }
 0x1de   : > { %v4460_v50 = vpop.f32.mrf.mxu0  ;;  %10362 = vmatprep.subr.bf16.mxu0 %v10671_v17  ;;  %5052 = vst.msk [vmem:[#allocation2 + $0x10] sm:$0xff] %vm687_vm9, %v5021_v49  ;;  %v5019_v16 = vadd.f32 %v4893_v7, %v4668_v57  ;;  %v4674_v5 = vld [vmem:[#allocation2 + $0x30] sm:$0xff]  ;;  %v7565_v14 = vshll.u32 %v10626_v38, 16  ;;  %v4071_v1 = vld [vmem:[#allocation2 + $0x80] sm:$0xff] }
 0x1df   : > { %4597 = vst.msk [vmem:[#allocation2 + $0x50] sm:$0xff] %vm687_vm9, %v4565_v43  ;;  %v4563_v31 = vadd.f32 %v4460_v50, %v4063_v47  ;;  %v10093_v27 = vpop.f32.mrf.mxu1  ;;  %v7546_v43 = vrot.slane %v7544_v51, 2  ;;  %v4068_v47 = vld [vmem:[#allocation2 + $0x68] sm:$0xff]  ;;  %v7542_v26 = vsel %vm3085_vm7, %v7532_v29, %v12236_v22  ;;  %v12256_v7 = vld [vmem:[%s10744_s28 + $0x14] sm:$0xff]   ;;  %v4075_v23 = vld [vmem:[#allocation2 + $0xa0] sm:$0xff] }
 0x1e0   : > { %v10061_v44 = vpop.f32.mrf.mxu0  ;;  %5050 = vst.msk [vmem:[#allocation2] sm:$0xff] %vm687_vm9, %v5019_v16  ;;  %v5022_v20 = vadd.f32 %v10093_v27, %v4671_v18  ;;  %v4672_v63 = vld [vmem:[#allocation2 + $0x20] sm:$0xff]  ;;  %v10628_v49 = vld [vmem:[%s10744_s28 + $0x4c] sm:$0xff]   ;;  %v8107_v16 = vsel %vm3698_vm8, %v8105_v13, %v8106_v0  ;;  %v4074_v29 = vld [vmem:[#allocation2 + $0x98] sm:$0xff]  ;;  %v7567_v11 = vrot.slane %v7565_v14, 3 }
 0x1e1   : > { %4595 = vst.msk [vmem:[#allocation2 + $0x40] sm:$0xff] %vm687_vm9, %v4563_v31  ;;  %v4566_v42 = vadd.f32 %v10061_v44, %v4066_v8  ;;  %v4896_v32 = vpop.f32.mrf.mxu1  ;;  %v12291_v13 = vld [vmem:[%s10744_s28 + $0x24] sm:$0xff]  }
 0x1e2   : > { %v4463_v3 = vpop.f32.mrf.mxu0  ;;  %5053 = vst.msk [vmem:[#allocation2 + $0x18] sm:$0xff] %vm687_vm9, %v5022_v20  ;;  %v5020_v40 = vadd.f32 %v4896_v32, %v4669_v35  ;;  %10279 = vmatmul.mubr.msk.bf16.gmra.mxu1 %vm471_vm1, %v7016_v19  ;;  %v4070_v19 = vld [vmem:[#allocation2 + $0x78] sm:$0xff]  ;;  %v7571_v20 = vshrl.u32 %v10628_v49, 16  ;;  %v8108_v32 = vrot.slane %v12256_v7, 3 }
 0x1e3   : > { %4598 = vst.msk [vmem:[#allocation2 + $0x58] sm:$0xff] %vm687_vm9, %v4566_v42  ;;  %v4564_v58 = vadd.f32 %v4463_v3, %v4064_v2  ;;  %v10096_v28 = vpop.f32.mrf.mxu1  ;;  %10324 = vmatprep.mubr.msk.bf16.mxu1 %vm10672_vm4, %v10671_v17  ;;  %v4675_v52 = vld [vmem:[#allocation2 + $0x38] sm:$0xff]  ;;  %v7550_v2 = vor.u32 %v7549_v30, %v7546_v43 }
 0x1e4   : > { %v10064_v15 = vpop.f32.mrf.mxu0  ;;  %10291 = vmatmul.mubr.msk.bf16.vlgmr.msra.gmra.mxu0 %vm471_vm1, %v7515_v9  ;;  %5051 = vst.msk [vmem:[#allocation2 + $0x8] sm:$0xff] %vm687_vm9, %v5020_v40  ;;  %v5025_v61 = vadd.f32 %v10096_v28, %v4674_v5  ;;  %v4673_v8 = vld [vmem:[#allocation2 + $0x28] sm:$0xff]  ;;  %v12263_v42 = vld [vmem:[%s10744_s28 + $0x1c] sm:$0xff]   ;;  %v7562_v9 = vshrl.u32 %v10626_v38, 16 }
 0x1e5   : > { %4596 = vst.msk [vmem:[#allocation2 + $0x48] sm:$0xff] %vm687_vm9, %v4564_v58  ;;  %v4569_v34 = vadd.f32 %v10064_v15, %v4069_v59  ;;  %10294 = vmatprep.mubr.msk.bf16.mxu0 %vm471_vm1, %v7524_v48  ;;  %10363 = vmatpush3.bf16.msra.mxu0 %v12032_v62  ;;  %v4909_v10 = vpop.f32.mrf.mxu1  ;;  %v7574_v58 = vshll.u32 %v10628_v49, 16  ;;  %v7551_v28 = vsel %vm3085_vm7, %v12236_v22, %v7550_v2 }
 0x1e6   : > { %v4476_v39 = vpop.f32.mrf.mxu0  ;;  %5056 = vst.msk [vmem:[#allocation2 + $0x30] sm:$0xff] %vm687_vm9, %v5025_v61  ;;  %v5023_v45 = vadd.f32 %v4909_v10, %v4672_v63  ;;  %v4678_v3 = vld [vmem:[#allocation2 + $0x50] sm:$0xff]  ;;  %v7564_v51 = vrot.slane %v7562_v9, 2  ;;  %v7573_v63 = vrot.slane %v7571_v20, 2  ;;  %v8109_v22 = vsel %vm3698_vm8, %v8106_v0, %v8108_v32 }
 0x1e7   : > { %4601 = vst.msk [vmem:[#allocation2 + $0x70] sm:$0xff] %vm687_vm9, %v4569_v34  ;;  %v4567_v55 = vadd.f32 %v4476_v39, %v4067_v33  ;;  %v10097_v24 = vpop.f32.mrf.mxu1  ;;  %v8110_v34 = vrot.slane %v12263_v42, 3  ;;  %v10630_v33 = vld [vmem:[%s10744_s28 + $0x54] sm:$0xff]   ;;  %v7576_v10 = vrot.slane %v7574_v58, 3  ;;  %v4076_v58 = vld [vmem:[#allocation2 + $0xa8] sm:$0xff] }
 0x1e8   : > { %v10065_v21 = vpop.f32.mrf.mxu0  ;;  %5054 = vst.msk [vmem:[#allocation2 + $0x20] sm:$0xff] %vm687_vm9, %v5023_v45  ;;  %v5026_v31 = vadd.f32 %v10097_v24, %v4675_v52  ;;  %v4676_v59 = vld [vmem:[#allocation2 + $0x40] sm:$0xff]  ;;  %v7568_v30 = vor.u32 %v7567_v11, %v7564_v51  ;;  %v12298_v52 = vld [vmem:[%s10744_s28 + $0x2c] sm:$0xff]   ;;  %v7580_v24 = vshrl.u32 %v10630_v33, 16  ;;  %v12325_v51 = vld [vmem:[%s10744_s28 + $0x34] sm:$0xff]  }
 0x1e9   : > { %4599 = vst.msk [vmem:[#allocation2 + $0x60] sm:$0xff] %vm687_vm9, %v4567_v55  ;;  %v4570_v6 = vadd.f32 %v10065_v21, %v4070_v19  ;;  %v4912_v44 = vpop.f32.mrf.mxu1  ;;  %v7560_v55 = vsel %vm3085_vm7, %v7550_v2, %v12269_v4  ;;  %v10632_v19 = vld [vmem:[%s10744_s28 + $0x5c] sm:$0xff]   ;;  %v8111_v43 = vsel %vm3698_vm8, %v8108_v32, %v8110_v34  ;;  %v12304_v49 = vor.u32 %v7576_v10, %v7573_v63 }
 0x1ea   : > { %v4479_v50 = vpop.f32.mrf.mxu0  ;;  %5057 = vst.msk [vmem:[#allocation2 + $0x38] sm:$0xff] %vm687_vm9, %v5026_v31  ;;  %v5024_v18 = vadd.f32 %v4912_v44, %v4673_v8  ;;  %10325 = vmatmul.mubr.msk.bf16.vlgmr.msra.gmra.mxu1 %vm471_vm1, %v10616_v54  ;;  %v4679_v39 = vld [vmem:[#allocation2 + $0x58] sm:$0xff]  ;;  %v7589_v31 = vshrl.u32 %v10632_v19, 16  ;;  %v8112_v44 = vrot.slane %v12291_v13, 3  ;;  %v7569_v14 = vsel %vm3085_vm7, %v12269_v4, %v7568_v30  ;;  %v4079_v10 = vld [vmem:[#allocation2 + $0xc0] sm:$0xff] }
 0x1eb   : > { %4602 = vst.msk [vmem:[#allocation2 + $0x78] sm:$0xff] %vm687_vm9, %v4570_v6  ;;  %v4568_v57 = vadd.f32 %v4479_v50, %v4068_v47  ;;  %v10100_v48 = vpop.f32.mrf.mxu1  ;;  %10329 = vmatpush3.bf16.msra.mxu1 %v12032_v62  ;;  %10330 = vmatprep.mubr.msk.bf16.mxu1 %vm471_vm1, %v8107_v16  ;;  %v4077_v6 = vld [vmem:[#allocation2 + $0xb0] sm:$0xff]  ;;  %v7583_v47 = vshll.u32 %v10630_v33, 16  ;;  %v4078_v16 = vld [vmem:[#allocation2 + $0xb8] sm:$0xff]  ;;  %v7578_v4 = vsel %vm3085_vm7, %v7568_v30, %v12304_v49 }
 0x1ec   : > { %v10068_v53 = vpop.f32.mrf.mxu0  ;;  %10295 = vmatmul.mubr.msk.bf16.gmra.mxu0 %vm471_vm1, %v7533_v56  ;;  %5055 = vst.msk [vmem:[#allocation2 + $0x28] sm:$0xff] %vm687_vm9, %v5024_v18  ;;  %v5029_v25 = vadd.f32 %v10100_v48, %v4678_v3  ;;  %v4677_v38 = vld [vmem:[#allocation2 + $0x48] sm:$0xff]  ;;  %v8114_v18 = vrot.slane %v12298_v52, 3  ;;  %v7582_v48 = vrot.slane %v7580_v24, 2 }
 0x1ed   : > { %4600 = vst.msk [vmem:[#allocation2 + $0x68] sm:$0xff] %vm687_vm9, %v4568_v57  ;;  %v4573_v27 = vadd.f32 %v10068_v53, %v4073_v12  ;;  %10298 = vmatprep.mubr.msk.bf16.mxu0 %vm471_vm1, %v7542_v26  ;;  %v4925_v15 = vpop.f32.mrf.mxu1  ;;  %v7592_v57 = vshll.u32 %v10632_v19, 16 }
 0x1ee   : > { %v4492_v37 = vpop.f32.mrf.mxu0  ;;  %5060 = vst.msk [vmem:[#allocation2 + $0x50] sm:$0xff] %vm687_vm9, %v5029_v25  ;;  %v5027_v62 = vadd.f32 %v4925_v15, %v4676_v59  ;;  %v4682_v50 = vld [vmem:[#allocation2 + $0x70] sm:$0xff]  ;;  %v8115_v33 = vsel %vm3698_vm8, %v8112_v44, %v8114_v18 }
 0x1ef   : > { %4605 = vst.msk [vmem:[#allocation2 + $0x90] sm:$0xff] %vm687_vm9, %v4573_v27  ;;  %v4571_v35 = vadd.f32 %v4492_v37, %v4071_v1  ;;  %v10101_v36 = vpop.f32.mrf.mxu1  ;;  %v10634_v27 = vld [vmem:[%s10744_s28 + $0x64] sm:$0xff]   ;;  %v7585_v1 = vrot.slane %v7583_v47, 3  ;;  %v7594_v32 = vrot.slane %v7592_v57, 3  ;;  %v10636_v59 = vld [vmem:[%s10744_s28 + $0x6c] sm:$0xff]  }
 0x1f0   : > { %v10069_v40 = vpop.f32.mrf.mxu0  ;;  %5058 = vst.msk [vmem:[#allocation2 + $0x40] sm:$0xff] %vm687_vm9, %v5027_v62  ;;  %v5030_v21 = vadd.f32 %v10101_v36, %v4679_v39  ;;  %v4680_v12 = vld [vmem:[#allocation2 + $0x60] sm:$0xff]  ;;  %v7598_v36 = vshrl.u32 %v10634_v27, 16  ;;  %v4080_v57 = vld [vmem:[#allocation2 + $0xc8] sm:$0xff] }
 0x1f1   : > { %4603 = vst.msk [vmem:[#allocation2 + $0x80] sm:$0xff] %vm687_vm9, %v4571_v35  ;;  %v4574_v5 = vadd.f32 %v10069_v40, %v4074_v29  ;;  %v4928_v45 = vpop.f32.mrf.mxu1  ;;  %v7591_v35 = vrot.slane %v7589_v31, 2  ;;  %v8113_v40 = vsel %vm3698_vm8, %v8110_v34, %v8112_v44  ;;  %v12332_v39 = vld [vmem:[%s10744_s28 + $0x3c] sm:$0xff]  }
 0x1f2   : > { %v4495_v61 = vpop.f32.mrf.mxu0  ;;  %5061 = vst.msk [vmem:[#allocation2 + $0x58] sm:$0xff] %vm687_vm9, %v5030_v21  ;;  %v5028_v41 = vadd.f32 %v4928_v45, %v4677_v38  ;;  %10331 = vmatmul.mubr.msk.bf16.vlgmr.msra.gmra.mxu1 %vm471_vm1, %v8109_v22  ;;  %v4683_v37 = vld [vmem:[#allocation2 + $0x78] sm:$0xff]  ;;  %v7610_v22 = vshll.u32 %v10636_v59, 16  ;;  %v8116_v45 = vrot.slane %v12325_v51, 3 }
 0x1f3   : > { %4606 = vst.msk [vmem:[#allocation2 + $0x98] sm:$0xff] %vm687_vm9, %v4574_v5  ;;  %v4572_v56 = vadd.f32 %v4495_v61, %v4072_v46  ;;  %v10104_v26 = vpop.f32.mrf.mxu1  ;;  %10334 = vmatprep.mubr.msk.bf16.mxu1 %vm471_vm1, %v8111_v43  ;;  %v4081_v5 = vld [vmem:[#allocation2 + $0xd0] sm:$0xff]  ;;  %v7601_v46 = vshll.u32 %v10634_v27, 16  ;;  %v7586_v61 = vor.u32 %v7585_v1, %v7582_v48  ;;  %v12338_v21 = vor.u32 %v7594_v32, %v7591_v35  ;;  %v4082_v43 = vld [vmem:[#allocation2 + $0xd8] sm:$0xff]  ;;  %v4083_v32 = vld [vmem:[#allocation2 + $0xe0] sm:$0xff] }
 0x1f4   : > { %v10072_v54 = vpop.f32.mrf.mxu0  ;;  %10299 = vmatmul.mubr.msk.bf16.gmra.mxu0 %vm471_vm1, %v7551_v28  ;;  %5059 = vst.msk [vmem:[#allocation2 + $0x48] sm:$0xff] %vm687_vm9, %v5028_v41  ;;  %v5033_v7 = vadd.f32 %v10104_v26, %v4682_v50  ;;  %v4681_v11 = vld [vmem:[#allocation2 + $0x68] sm:$0xff]  ;;  %v8118_v41 = vrot.slane %v12332_v39, 3 }
 0x1f5   : > { %4604 = vst.msk [vmem:[#allocation2 + $0x88] sm:$0xff] %vm687_vm9, %v4572_v56  ;;  %v4577_v0 = vadd.f32 %v10072_v54, %v4077_v6  ;;  %10302 = vmatprep.mubr.msk.bf16.mxu0 %vm471_vm1, %v7560_v55  ;;  %v4941_v53 = vpop.f32.mrf.mxu1  ;;  %v7607_v56 = vshrl.u32 %v10636_v59, 16  ;;  %v7603_v24 = vrot.slane %v7601_v46, 3  ;;  %v7587_v26 = vsel %vm3085_vm7, %v12304_v49, %v7586_v61 }
 0x1f6   : > { %v4508_v60 = vpop.f32.mrf.mxu0  ;;  %5064 = vst.msk [vmem:[#allocation2 + $0x70] sm:$0xff] %vm687_vm9, %v5033_v7  ;;  %v5031_v2 = vadd.f32 %v4941_v53, %v4680_v12  ;;  %v4686_v55 = vld [vmem:[#allocation2 + $0x90] sm:$0xff]  ;;  %v7612_v12 = vrot.slane %v7610_v22, 3  ;;  %v10640_v53 = vld [vmem:[%s10744_s28 + $0x7c] ss:$0 sps:$4 sm:$0xff]   ;;  %v8117_v49 = vsel %vm3698_vm8, %v8114_v18, %v8116_v45  ;;  %v8119_v1 = vsel %vm3698_vm8, %v8116_v45, %v8118_v41 }
 0x1f7   : > { %4609 = vst.msk [vmem:[#allocation2 + $0xb0] sm:$0xff] %vm687_vm9, %v4577_v0  ;;  %v4575_v8 = vadd.f32 %v4508_v60, %v4075_v23  ;;  %v10105_v20 = vpop.f32.mrf.mxu1  ;;  %v7600_v0 = vrot.slane %v7598_v36, 2  ;;  %v10638_v23 = vld [vmem:[%s10744_s28 + $0x74] sm:$0xff]   ;;  %v7609_v44 = vrot.slane %v7607_v56, 2  ;;  %v4084_v56 = vld [vmem:[#allocation2 + $0xe8] sm:$0xff] }
 0x1f8   : > { %v10073_v9 = vpop.f32.mrf.mxu0  ;;  %5062 = vst.msk [vmem:[#allocation2 + $0x60] sm:$0xff] %vm687_vm9, %v5031_v2  ;;  %v5034_v15 = vadd.f32 %v10105_v20, %v4683_v37  ;;  %v4684_v6 = vld [vmem:[#allocation2 + $0x80] sm:$0xff]  ;;  %v12364_v20 = vld [vmem:[%s10744_s28 + $0x4c] sm:$0xff]   ;;  %v7616_v18 = vshrl.u32 %v10638_v23, 16 }
 0x1f9   : > { %4607 = vst.msk [vmem:[#allocation2 + $0xa0] sm:$0xff] %vm687_vm9, %v4575_v8  ;;  %v4578_v3 = vadd.f32 %v10073_v9, %v4078_v16  ;;  %v4944_v62 = vpop.f32.mrf.mxu1  ;;  %v7596_v8 = vsel %vm3085_vm7, %v7586_v61, %v12338_v21  ;;  %v7604_v37 = vor.u32 %v7603_v24, %v7600_v0 }
 0x1fa   : > { %v4511_v25 = vpop.f32.mrf.mxu0  ;;  %5065 = vst.msk [vmem:[#allocation2 + $0x78] sm:$0xff] %vm687_vm9, %v5034_v15  ;;  %v5032_v42 = vadd.f32 %v4944_v62, %v4681_v11  ;;  %10335 = vmatmul.mubr.msk.bf16.gmra.mxu1 %vm471_vm1, %v8113_v40  ;;  %v4687_v60 = vld [vmem:[#allocation2 + $0x98] sm:$0xff]  ;;  %v7613_v15 = vor.u32 %v7612_v12, %v7609_v44  ;;  %v7628_v40 = vshll.u32 %v10640_v53, 16 }
 0x1fb   : > { %4610 = vst.msk [vmem:[#allocation2 + $0xb8] sm:$0xff] %vm687_vm9, %v4578_v3  ;;  %v4576_v29 = vadd.f32 %v4511_v25, %v4076_v58  ;;  %v10108_v63 = vpop.f32.mrf.mxu1  ;;  %10338 = vmatprep.mubr.msk.bf16.mxu1 %vm471_vm1, %v8115_v33  ;;  %v4085_v3 = vld [vmem:[#allocation2 + $0xf0] sm:$0xff]  ;;  %v7619_v25 = vshll.u32 %v10638_v23, 16  ;;  %v4086_v33 = vld [vmem:[#allocation2 + $0xf8] sm:$0x1]  ;;  %v7605_v46 = vsel %vm3085_vm7, %v12338_v21, %v7604_v37 }
 0x1fc   : > { %v10076_v28 = vpop.f32.mrf.mxu0  ;;  %10303 = vmatmul.mubr.msk.bf16.gmra.mxu0 %vm471_vm1, %v7569_v14  ;;  %5063 = vst.msk [vmem:[#allocation2 + $0x68] sm:$0xff] %vm687_vm9, %v5032_v42  ;;  %v5037_v13 = vadd.f32 %v10108_v63, %v4686_v55  ;;  %v10633_v14 = vld [vmem:[%s10744_s28 + $0x44] sm:$0xff]   ;;  %v8122_v42 = vrot.slane %v12364_v20, 3  ;;  %v7618_v55 = vrot.slane %v7616_v18, 2  ;;  %v7630_v21 = vrot.slane %v7628_v40, 3  ;;  %v5132_v18 = vld [vmem:[#allocation2 + $0x10] sm:$0xff] }
 0x1fd   : > { %4608 = vst.msk [vmem:[#allocation2 + $0xa8] sm:$0xff] %vm687_vm9, %v4576_v29  ;;  %v4581_v34 = vadd.f32 %v10076_v28, %v4081_v5  ;;  %10306 = vmatprep.mubr.msk.bf16.mxu0 %vm471_vm1, %v7578_v4  ;;  %v4957_v54 = vpop.f32.mrf.mxu1  ;;  %v4685_v27 = vld [vmem:[#allocation2 + $0x88] sm:$0xff]  ;;  %v7625_v29 = vshrl.u32 %v10640_v53, 16  ;;  %v8120_v62 = vrot.slane %v10633_v14, 3  ;;  %v7621_v63 = vrot.slane %v7619_v25, 3  ;;  %v5130_v40 = vld [vmem:[#allocation2] sm:$0xff] }
 0x1fe   : > { %v4524_v19 = vpop.f32.mrf.mxu0  ;;  %5068 = vst.msk [vmem:[#allocation2 + $0x90] sm:$0xff] %vm687_vm9, %v5037_v13  ;;  %v5035_v47 = vadd.f32 %v4957_v54, %v4684_v6  ;;  %v4690_v4 = vld [vmem:[#allocation2 + $0xb0] sm:$0xff]  ;;  %v7614_v13 = vsel %vm3085_vm7, %v7604_v37, %v7613_v15  ;;  %v10641_v20 = vld [vmem:[%s10744_s28 + $0x64] sm:$0xff]  }
 0x1ff   : > { %4613 = vst.msk [vmem:[#allocation2 + $0xd0] sm:$0xff] %vm687_vm9, %v4581_v34  ;;  %v4579_v38 = vadd.f32 %v4524_v19, %v4079_v10  ;;  %v10109_v31 = vpop.f32.mrf.mxu1  ;;  %v8121_v54 = vsel %vm3698_vm8, %v8118_v41, %v8120_v62  ;;  %v7622_v39 = vor.u32 %v7621_v63, %v7618_v55  ;;  %v5131_v63 = vld [vmem:[#allocation2 + $0x8] sm:$0xff] }
 0x200   : > { %v10077_v30 = vpop.f32.mrf.mxu0  ;;  %5066 = vst.msk [vmem:[#allocation2 + $0x80] sm:$0xff] %vm687_vm9, %v5035_v47  ;;  %v5038_v16 = vadd.f32 %v10109_v31, %v4687_v60  ;;  %v4688_v5 = vld [vmem:[#allocation2 + $0xa0] sm:$0xff]  ;;  %v8123_v47 = vsel %vm3698_vm8, %v8120_v62, %v8122_v42 }
 0x201   : > { %4611 = vst.msk [vmem:[#allocation2 + $0xc0] sm:$0xff] %vm687_vm9, %v4579_v38  ;;  %v4582_v50 = vadd.f32 %v10077_v30, %v4082_v43  ;;  %v4960_v2 = vpop.f32.mrf.mxu1  ;;  %v7627_v38 = vrot.slane %v7625_v29, 2  ;;  %v10637_v43 = vld [vmem:[%s10744_s28 + $0x54] sm:$0xff]  }
 0x202   : > { %v4527_v7 = vpop.f32.mrf.mxu0  ;;  %5069 = vst.msk [vmem:[#allocation2 + $0x98] sm:$0xff] %vm687_vm9, %v5038_v16  ;;  %v5036_v58 = vadd.f32 %v4960_v2, %v4685_v27  ;;  %10339 = vmatmul.mubr.msk.bf16.gmra.mxu1 %vm471_vm1, %v8117_v49  ;;  %v4691_v10 = vld [vmem:[#allocation2 + $0xb8] sm:$0xff] }
 0x203   : > { %4614 = vst.msk [vmem:[#allocation2 + $0xd8] sm:$0xff] %vm687_vm9, %v4582_v50  ;;  %v4580_v9 = vadd.f32 %v4527_v7, %v4080_v57  ;;  %v10112_v35 = vpop.f32.mrf.mxu1  ;;  %10342 = vmatprep.mubr.msk.bf16.mxu1 %vm471_vm1, %v8119_v1  ;;  %v12388_v50 = vld [vmem:[%s10744_s28 + $0x5c] sm:$0xff]   ;;  %v12394_v31 = vor.u32 %v7630_v21, %v7627_v38  ;;  %v8124_v7 = vrot.slane %v10637_v43, 3  ;;  %v5136_v21 = vld [vmem:[#allocation2 + $0x30] sm:$0xff] }
 0x204   : > { %v10080_v48 = vpop.f32.mrf.mxu0  ;;  %10307 = vmatmul.mubr.msk.bf16.gmra.mxu0 %vm471_vm1, %v7587_v26  ;;  %5067 = vst.msk [vmem:[#allocation2 + $0x88] sm:$0xff] %vm687_vm9, %v5036_v58  ;;  %v5041_v51 = vadd.f32 %v10112_v35, %v4690_v4  ;;  %v4689_v30 = vld [vmem:[#allocation2 + $0xa8] sm:$0xff]  ;;  %v8126_v53 = vrot.slane %v12388_v50, 3 }
 0x205   : > { %4612 = vst.msk [vmem:[#allocation2 + $0xc8] sm:$0xff] %vm687_vm9, %v4580_v9  ;;  %v4585_v52 = vadd.f32 %v10080_v48, %v4085_v3  ;;  %10310 = vmatprep.mubr.msk.bf16.mxu0 %vm471_vm1, %v7596_v8  ;;  %v4973_v28 = vpop.f32.mrf.mxu1  ;;  %v7623_v9 = vsel %vm3085_vm7, %v7613_v15, %v7622_v39  ;;  %v7632_v3 = vsel %vm3085_vm7, %v7622_v39, %v12394_v31  ;;  %v12409_v35 = vld [vmem:[%s10744_s28 + $0x6c] sm:$0xff]  }
 0x206   : > { %v4540_v59 = vpop.f32.mrf.mxu0  ;;  %5072 = vst.msk [vmem:[#allocation2 + $0xb0] sm:$0xff] %vm687_vm9, %v5041_v51  ;;  %v5039_v34 = vadd.f32 %v4973_v28, %v4688_v5  ;;  %v4694_v23 = vld [vmem:[#allocation2 + $0xd0] sm:$0xff]  ;;  %v8125_v37 = vsel %vm3698_vm8, %v8122_v42, %v8124_v7  ;;  %v8127_v4 = vsel %vm3698_vm8, %v8124_v7, %v8126_v53  ;;  %v8128_v5 = vrot.slane %v10641_v20, 3  ;;  %v5138_v20 = vld [vmem:[#allocation2 + $0x40] sm:$0xff] }
 0x207   : > { %4617 = vst.msk [vmem:[#allocation2 + $0xf0] sm:$0xff] %vm687_vm9, %v4585_v52  ;;  %v4583_v11 = vadd.f32 %v4540_v59, %v4083_v32  ;;  %v10113_v19 = vpop.f32.mrf.mxu1  ;;  %v8130_v42 = vrot.slane %v12409_v35, 3  ;;  %v5141_v35 = vld [vmem:[#allocation2 + $0x58] sm:$0xff] }
 0x208   : > { %v10081_v36 = vpop.f32.mrf.mxu0  ;;  %5070 = vst.msk [vmem:[#allocation2 + $0xa0] sm:$0xff] %vm687_vm9, %v5039_v34  ;;  %v5042_v45 = vadd.f32 %v10113_v19, %v4691_v10  ;;  %v4692_v8 = vld [vmem:[#allocation2 + $0xc0] sm:$0xff] }
 0x209   : > { %4615 = vst.msk [vmem:[#allocation2 + $0xe0] sm:$0xff] %vm687_vm9, %v4583_v11  ;;  %v4586_v61 = vadd.f32 %v10081_v36, %v4086_v33  ;;  %v4976_v0 = vpop.f32.mrf.mxu1  ;;  %v5133_v36 = vld [vmem:[#allocation2 + $0x18] sm:$0xff] }
 0x20a   : > { %v4543_v22 = vpop.f32.mrf.mxu0  ;;  %5073 = vst.msk [vmem:[#allocation2 + $0xb8] sm:$0xff] %vm687_vm9, %v5042_v45  ;;  %v5040_v26 = vadd.f32 %v4976_v0, %v4689_v30  ;;  %10343 = vmatmul.mubr.msk.bf16.gmra.mxu1 %vm471_vm1, %v8121_v54  ;;  %v4695_v14 = vld [vmem:[#allocation2 + $0xd8] sm:$0xff] }
 0x20b   : > { %4618 = vst.msk [vmem:[#allocation2 + $0xf8] sm:$0x1] %vm1317_vm12, %v4586_v61  ;;  %v4584_v6 = vadd.f32 %v4543_v22, %v4084_v56  ;;  %v10116_v41 = vpop.f32.mrf.mxu1  ;;  %10346 = vmatprep.mubr.msk.bf16.mxu1 %vm471_vm1, %v8123_v47  ;;  %v8129_v56 = vsel %vm3698_vm8, %v8126_v53, %v8128_v5  ;;  %v10643_v22 = vld [vmem:[%s10744_s28 + $0x74] sm:$0xff]   ;;  %v12429_v54 = vld [vmem:[%s10744_s28 + $0x7c] ss:$0 sps:$4 sm:$0xff]   ;;  %s9458_s28 = sshll.u32 %s12728_s15, 7 }
 0x20c   : > { %v5120_v24 = vpop.f32.mrf.mxu0  ;;  %10311 = vmatmul.mubr.msk.bf16.gmra.mxu0 %vm471_vm1, %v7605_v46  ;;  %5071 = vst.msk [vmem:[#allocation2 + $0xa8] sm:$0xff] %vm687_vm9, %v5040_v26  ;;  %v5045_v57 = vadd.f32 %v10116_v41, %v4694_v23  ;;  %v4693_v58 = vld [vmem:[#allocation2 + $0xc8] sm:$0xff]  ;;  %v8132_v26 = vrot.slane %v10643_v22, 3  ;;  %v5137_v41 = vld [vmem:[#allocation2 + $0x38] sm:$0xff]  ;;  %s12598_s15 = scalar_lea.vmem %s12722_s4, %s9458_s28 }
 0x20d   : > { %4616 = vst.msk [vmem:[#allocation2 + $0xe8] sm:$0xff] %vm687_vm9, %v4584_v6  ;;  %10314 = vmatprep.mubr.msk.bf16.mxu0 %vm471_vm1, %v7614_v13  ;;  %v4989_v44 = vpop.f32.mrf.mxu1  ;;  %v8131_v6 = vsel %vm3698_vm8, %v8128_v5, %v8130_v42 }
 0x20e   : > { %v10126_v60 = vpop.f32.mrf.mxu0  ;;  %5076 = vst.msk [vmem:[#allocation2 + $0xd0] sm:$0xff] %vm687_vm9, %v5045_v57  ;;  %v5043_v16 = vadd.f32 %v4989_v44, %v4692_v8  ;;  %v4698_v15 = vld [vmem:[#allocation2 + $0xf0] sm:$0xff] }
 0x20f   : > { %v10117_v27 = vpop.f32.mrf.mxu1 }
 0x210   : > { %v5123_v12 = vpop.f32.mrf.mxu0  ;;  %5074 = vst.msk [vmem:[#allocation2 + $0xc0] sm:$0xff] %vm687_vm9, %v5043_v16  ;;  %v5046_v1 = vadd.f32 %v10117_v27, %v4695_v14  ;;  %v4696_v28 = vld [vmem:[#allocation2 + $0xe0] sm:$0xff]  ;;  %v5140_v27 = vld [vmem:[#allocation2 + $0x50] sm:$0xff] }
 0x211   : > { %v4992_v52 = vpop.f32.mrf.mxu1  ;;  %v5135_v12 = vld [vmem:[#allocation2 + $0x28] sm:$0xff] }
 0x212   : > { %v5081_v49 = vld [vmem:[#allocation2 + $0xf8] sm:$0xff]  ;;  %v10127_v2 = vpop.f32.mrf.mxu0  ;;  %5077 = vst.msk [vmem:[#allocation2 + $0xd8] sm:$0xff] %vm687_vm9, %v5046_v1  ;;  %v5044_v32 = vadd.f32 %v4992_v52, %v4693_v58  ;;  %10347 = vmatmul.mubr.msk.bf16.gmra.mxu1 %vm471_vm1, %v8125_v37 }
 0x213   : > { %v5126_v48 = vadd.f32 %v5120_v24, %v5081_v49  ;;  %v10120_v29 = vpop.f32.mrf.mxu1  ;;  %10350 = vmatprep.mubr.msk.bf16.mxu1 %vm471_vm1, %v8127_v4  ;;  %v5134_v24 = vld [vmem:[#allocation2 + $0x20] sm:$0xff]  ;;  %v8133_v49 = vsel %vm3698_vm8, %v8130_v42, %v8132_v26 }
 0x214   : > { %v10132_v25 = vpop.f32.mrf.mxu0  ;;  %10315 = vmatmul.mubr.msk.bf16.gmra.mxu0 %vm471_vm1, %v7623_v9  ;;  %5075 = vst.msk [vmem:[#allocation2 + $0xc8] sm:$0xff] %vm687_vm9, %v5044_v32  ;;  %v5049_v11 = vadd.f32 %v10120_v29, %v4698_v15  ;;  %v4697_v13 = vld [vmem:[#allocation2 + $0xe8] sm:$0xff] }
 0x215   : > { %5127 = vst.msk [vmem:[#allocation2 + $0xf8] sm:$0xff] %vm687_vm9, %v5126_v48  ;;  %v5610_v59 = vadd.f32 %v10132_v25, %v5132_v18  ;;  %10318 = vmatprep.mubr.msk.bf16.mxu0 %vm471_vm1, %v7632_v3  ;;  %v5005_v33 = vpop.f32.mrf.mxu1 }
 0x216   : > { %v5482_v51 = vpop.f32.mrf.mxu0  ;;  %5080 = vst.msk [vmem:[#allocation2 + $0xf0] sm:$0xff] %vm687_vm9, %v5049_v11  ;;  %v5047_v34 = vadd.f32 %v5005_v33, %v4696_v28 }
 0x217   : > { %5641 = vst.msk [vmem:[#allocation2 + $0x10] sm:$0xff] %vm687_vm9, %v5610_v59  ;;  %v5608_v62 = vadd.f32 %v5482_v51, %v5130_v40  ;;  %v10121_v55 = vpop.f32.mrf.mxu1  ;;  %v5139_v51 = vld [vmem:[#allocation2 + $0x48] sm:$0xff] }
 0x218   : > { %v10133_v46 = vpop.f32.mrf.mxu0  ;;  %5078 = vst.msk [vmem:[#allocation2 + $0xe0] sm:$0xff] %vm687_vm9, %v5047_v34 }
 0x219   : > { %5639 = vst.msk [vmem:[#allocation2] sm:$0xff] %vm687_vm9, %v5608_v62  ;;  %v5611_v61 = vadd.f32 %v10133_v46, %v5133_v36  ;;  %v5008_v38 = vpop.f32.mrf.mxu1  ;;  %v5144_v36 = vld [vmem:[#allocation2 + $0x70] sm:$0xff] }
 0x21a   : > { %v5485_v10 = vpop.f32.mrf.mxu0  ;;  %v5048_v43 = vadd.f32 %v5008_v38, %v4697_v13  ;;  %10351 = vmatmul.mubr.msk.bf16.gmra.mxu1 %vm471_vm1, %v8129_v56  ;;  %v5145_v38 = vld [vmem:[#allocation2 + $0x78] sm:$0xff] }
 0x21b   : > { %5642 = vst.msk [vmem:[#allocation2 + $0x18] sm:$0xff] %vm687_vm9, %v5611_v61  ;;  %v5609_v19 = vadd.f32 %v5485_v10, %v5131_v63  ;;  %v5716_v0 = vpop.f32.mrf.mxu1  ;;  %10354 = vmatprep.mubr.msk.bf16.mxu1 %vm471_vm1, %v8131_v6  ;;  %v5142_v63 = vld [vmem:[#allocation2 + $0x60] sm:$0xff] }
 0x21c   : > { %v10136_v45 = vpop.f32.mrf.mxu0  ;;  %10319 = vmatmul.mubr.msk.bf16.gmra.mxu0 %vm471_vm1, %v12394_v31  ;;  %5079 = vst.msk [vmem:[#allocation2 + $0xe8] sm:$0xff] %vm687_vm9, %v5048_v43  ;;  %v10644_v31 = vld [vmem:[%s10894_s10] sm:$0x7f]   ;;  %v5671_v8 = vld [vmem:[#allocation2 + $0xff] sm:$0x1] }
 0x21d   : > { %5640 = vst.msk [vmem:[#allocation2 + $0x8] sm:$0xff] %vm687_vm9, %v5609_v19  ;;  %v5614_v30 = vadd.f32 %v10136_v45, %v5136_v21  ;;  %10364 = vmatprep.mubr.msk.bf16.mxu0 %vm10672_vm4, %v10671_v17  ;;  %v5670_v39 = vld [vmem:[#allocation2 + $0xf7] sm:$0xff]  ;;  %v10166_v23 = vpop.f32.mrf.mxu1  ;;  %v8134_v17 = vrot.slane %v12429_v54, 3 }
 0x21e   : > { %v5498_v47 = vpop.f32.mrf.mxu0  ;;  %v5723_v57 = vadd.f32 %v5716_v0, %v5670_v39  ;;  %v5731_v1 = vld [vmem:[#allocation2 + $0x10] sm:$0xff] }
 0x21f   : > { %5645 = vst.msk [vmem:[#allocation2 + $0x30] sm:$0xff] %vm687_vm9, %v5614_v30  ;;  %v5612_v50 = vadd.f32 %v5498_v47, %v5134_v24  ;;  %v5719_v44 = vpop.f32.mrf.mxu1  ;;  %v8135_v3 = vsel %vm3698_vm8, %v8132_v26, %v8134_v17  ;;  %v5143_v30 = vld [vmem:[#allocation2 + $0x68] sm:$0xff]  ;;  %v5148_v39 = vld [vmem:[#allocation2 + $0x90] sm:$0xff] }
 0x220   : > { %v10137_v60 = vpop.f32.mrf.mxu0  ;;  %5725 = vst.msk [vmem:[#allocation2 + $0xf7] sm:$0xff] %vm687_vm9, %v5723_v57  ;;  %v5724_v16 = vadd.f32 %v5719_v44, %v5671_v8  ;;  %v5729_v25 = vld [vmem:[#allocation2] sm:$0xff] }
 0x221   : > { %5643 = vst.msk [vmem:[#allocation2 + $0x20] sm:$0xff] %vm687_vm9, %v5612_v50  ;;  %v5615_v7 = vadd.f32 %v10137_v60, %v5137_v41  ;;  %v10167_v14 = vpop.f32.mrf.mxu1  ;;  %v5146_v57 = vld [vmem:[#allocation2 + $0x80] sm:$0xff] }
 0x222   : > { %v5501_v53 = vpop.f32.mrf.mxu0  ;;  %5726 = vst.msk [vmem:[#allocation2 + $0xff] sm:$0x1] %vm1317_vm12, %v5724_v16  ;;  %10355 = vmatmul.mubr.msk.bf16.gmra.mxu1 %vm471_vm1, %v8133_v49  ;;  %v5732_v29 = vld [vmem:[#allocation2 + $0x18] sm:$0xff] }
 0x223   : > { %5646 = vst.msk [vmem:[#allocation2 + $0x38] sm:$0xff] %vm687_vm9, %v5615_v7  ;;  %v5613_v9 = vadd.f32 %v5501_v53, %v5135_v12  ;;  %v10172_v37 = vpop.f32.mrf.mxu1  ;;  %10358 = vmatprep.mubr.msk.bf16.mxu1 %vm471_vm1, %v8135_v3  ;;  %v5149_v16 = vld [vmem:[#allocation2 + $0x98] sm:$0xff]  ;;  %v5147_v3 = vld [vmem:[#allocation2 + $0x88] sm:$0xff] }
 0x224   : > { %v10140_v2 = vpop.f32.mrf.mxu0  ;;  %10365 = vmatmul.mubr.msk.bf16.vlgmr.msra.gmra.mxu0 %vm471_vm1, %v10644_v31  ;;  %v6113_v52 = vadd.f32 %v10172_v37, %v5731_v1  ;;  %v5730_v28 = vld [vmem:[#allocation2 + $0x8] sm:$0xff] }
 0x225   : > { %5644 = vst.msk [vmem:[#allocation2 + $0x28] sm:$0xff] %vm687_vm9, %v5613_v9  ;;  %v5618_v48 = vadd.f32 %v10140_v2, %v5140_v27  ;;  %v5985_v4 = vpop.f32.mrf.mxu1 }
 0x226   : > { %v5514_v58 = vpop.f32.mrf.mxu0  ;;  %6144 = vst.msk [vmem:[#allocation2 + $0x10] sm:$0xff] %vm687_vm9, %v6113_v52  ;;  %v6111_v59 = vadd.f32 %v5985_v4, %v5729_v25  ;;  %v5735_v61 = vld [vmem:[#allocation2 + $0x30] sm:$0xff] }
 0x227   : > { %5649 = vst.msk [vmem:[#allocation2 + $0x50] sm:$0xff] %vm687_vm9, %v5618_v48  ;;  %v5616_v18 = vadd.f32 %v5514_v58, %v5138_v20  ;;  %v10173_v40 = vpop.f32.mrf.mxu1  ;;  %v5152_v52 = vld [vmem:[#allocation2 + $0xb0] sm:$0xff] }
 0x228   : > { %v10141_v32 = vpop.f32.mrf.mxu0  ;;  %6142 = vst.msk [vmem:[#allocation2] sm:$0xff] %vm687_vm9, %v6111_v59  ;;  %v6114_v62 = vadd.f32 %v10173_v40, %v5732_v29  ;;  %v5733_v22 = vld [vmem:[#allocation2 + $0x20] sm:$0xff] }
 0x229   : > { %5647 = vst.msk [vmem:[#allocation2 + $0x40] sm:$0xff] %vm687_vm9, %v5616_v18  ;;  %v5619_v15 = vadd.f32 %v10141_v32, %v5141_v35  ;;  %v5988_v33 = vpop.f32.mrf.mxu1  ;;  %v5150_v59 = vld [vmem:[#allocation2 + $0xa0] sm:$0xff] }
 0x22a   : > { %v5517_v11 = vpop.f32.mrf.mxu0  ;;  %6145 = vst.msk [vmem:[#allocation2 + $0x18] sm:$0xff] %vm687_vm9, %v6114_v62  ;;  %v6112_v42 = vadd.f32 %v5988_v33, %v5730_v28  ;;  %10359 = vmatmul.mubr.msk.bf16.gmra.mxu1 %vm471_vm1, %v8134_v17  ;;  %v5736_v54 = vld [vmem:[#allocation2 + $0x38] sm:$0xff] }
 0x22b   : > { %5650 = vst.msk [vmem:[#allocation2 + $0x58] sm:$0xff] %vm687_vm9, %v5619_v15  ;;  %v5617_v5 = vadd.f32 %v5517_v11, %v5139_v51  ;;  %v10176_v55 = vpop.f32.mrf.mxu1  ;;  %v5153_v62 = vld [vmem:[#allocation2 + $0xb8] sm:$0xff] }
 0x22c   : > { %v10144_v46 = vpop.f32.mrf.mxu0  ;;  %6143 = vst.msk [vmem:[#allocation2 + $0x8] sm:$0xff] %vm687_vm9, %v6112_v42  ;;  %v6117_v19 = vadd.f32 %v10176_v55, %v5735_v61  ;;  %v5734_v50 = vld [vmem:[#allocation2 + $0x28] sm:$0xff] }
 0x22d   : > { %5648 = vst.msk [vmem:[#allocation2 + $0x48] sm:$0xff] %vm687_vm9, %v5617_v5  ;;  %v5622_v34 = vadd.f32 %v10144_v46, %v5144_v36  ;;  %v6001_v13 = vpop.f32.mrf.mxu1  ;;  %v5151_v42 = vld [vmem:[#allocation2 + $0xa8] sm:$0xff] }
 0x22e   : > { %v5530_v10 = vpop.f32.mrf.mxu0  ;;  %6148 = vst.msk [vmem:[#allocation2 + $0x30] sm:$0xff] %vm687_vm9, %v6117_v19  ;;  %v6115_v45 = vadd.f32 %v6001_v13, %v5733_v22  ;;  %v5739_v31 = vld [vmem:[#allocation2 + $0x50] sm:$0xff] }
 0x22f   : > { %5653 = vst.msk [vmem:[#allocation2 + $0x70] sm:$0xff] %vm687_vm9, %v5622_v34  ;;  %v5620_v56 = vadd.f32 %v5530_v10, %v5142_v63  ;;  %v10177_v43 = vpop.f32.mrf.mxu1  ;;  %v5156_v19 = vld [vmem:[#allocation2 + $0xd0] sm:$0xff] }
 0x230   : > { %v10145_v21 = vpop.f32.mrf.mxu0  ;;  %6146 = vst.msk [vmem:[#allocation2 + $0x20] sm:$0xff] %vm687_vm9, %v6115_v45  ;;  %v6118_v24 = vadd.f32 %v10177_v43, %v5736_v54  ;;  %v5737_v12 = vld [vmem:[#allocation2 + $0x40] sm:$0xff] }
 0x231   : > { %5651 = vst.msk [vmem:[#allocation2 + $0x60] sm:$0xff] %vm687_vm9, %v5620_v56  ;;  %v5623_v6 = vadd.f32 %v10145_v21, %v5145_v38  ;;  %v6004_v26 = vpop.f32.mrf.mxu1  ;;  %v5154_v45 = vld [vmem:[#allocation2 + $0xc0] sm:$0xff] }
 0x232   : > { %v5533_v0 = vpop.f32.mrf.mxu0  ;;  %6149 = vst.msk [vmem:[#allocation2 + $0x38] sm:$0xff] %vm687_vm9, %v6118_v24  ;;  %v6116_v41 = vadd.f32 %v6004_v26, %v5734_v50  ;;  %v5740_v27 = vld [vmem:[#allocation2 + $0x58] sm:$0xff] }
 0x233   : > { %5654 = vst.msk [vmem:[#allocation2 + $0x78] sm:$0xff] %vm687_vm9, %v5623_v6  ;;  %v5621_v47 = vadd.f32 %v5533_v0, %v5143_v30  ;;  %v10180_v17 = vpop.f32.mrf.mxu1  ;;  %v5157_v24 = vld [vmem:[#allocation2 + $0xd8] sm:$0xff] }
 0x234   : > { %v10148_v23 = vpop.f32.mrf.mxu0  ;;  %6147 = vst.msk [vmem:[#allocation2 + $0x28] sm:$0xff] %vm687_vm9, %v6116_v41  ;;  %v6121_v8 = vadd.f32 %v10180_v17, %v5739_v31  ;;  %v5738_v20 = vld [vmem:[#allocation2 + $0x48] sm:$0xff] }
 0x235   : > { %5652 = vst.msk [vmem:[#allocation2 + $0x68] sm:$0xff] %vm687_vm9, %v5621_v47  ;;  %v5626_v60 = vadd.f32 %v10148_v23, %v5148_v39  ;;  %v6017_v53 = vpop.f32.mrf.mxu1  ;;  %v5155_v41 = vld [vmem:[#allocation2 + $0xc8] sm:$0xff] }
 0x236   : > { %v5546_v7 = vpop.f32.mrf.mxu0  ;;  %6152 = vst.msk [vmem:[#allocation2 + $0x50] sm:$0xff] %vm687_vm9, %v6121_v8  ;;  %v6119_v49 = vadd.f32 %v6017_v53, %v5737_v12  ;;  %v5743_v35 = vld [vmem:[#allocation2 + $0x70] sm:$0xff] }
 0x237   : > { %5657 = vst.msk [vmem:[#allocation2 + $0x90] sm:$0xff] %vm687_vm9, %v5626_v60  ;;  %v5624_v44 = vadd.f32 %v5546_v7, %v5146_v57  ;;  %v10181_v2 = vpop.f32.mrf.mxu1  ;;  %v5160_v8 = vld [vmem:[#allocation2 + $0xf0] sm:$0x7f] }
 0x238   : > { %v10149_v9 = vpop.f32.mrf.mxu0  ;;  %6150 = vst.msk [vmem:[#allocation2 + $0x40] sm:$0xff] %vm687_vm9, %v6119_v49  ;;  %v6122_v1 = vadd.f32 %v10181_v2, %v5740_v27  ;;  %v5741_v51 = vld [vmem:[#allocation2 + $0x60] sm:$0xff] }
 0x239   : > { %5655 = vst.msk [vmem:[#allocation2 + $0x80] sm:$0xff] %vm687_vm9, %v5624_v44  ;;  %v5627_v14 = vadd.f32 %v10149_v9, %v5149_v16  ;;  %v6020_v58 = vpop.f32.mrf.mxu1  ;;  %v5158_v49 = vld [vmem:[#allocation2 + $0xe0] sm:$0xff] }
 0x23a   : > { %v5549_v48 = vpop.f32.mrf.mxu0  ;;  %6153 = vst.msk [vmem:[#allocation2 + $0x58] sm:$0xff] %vm687_vm9, %v6122_v1  ;;  %v6120_v25 = vadd.f32 %v6020_v58, %v5738_v20  ;;  %v5744_v36 = vld [vmem:[#allocation2 + $0x78] sm:$0xff] }
 0x23b   : > { %5658 = vst.msk [vmem:[#allocation2 + $0x98] sm:$0xff] %vm687_vm9, %v5627_v14  ;;  %v5625_v37 = vadd.f32 %v5549_v48, %v5147_v3  ;;  %v10184_v32 = vpop.f32.mrf.mxu1 }
 0x23c   : > { %v10152_v18 = vpop.f32.mrf.mxu0  ;;  %6151 = vst.msk [vmem:[#allocation2 + $0x48] sm:$0xff] %vm687_vm9, %v6120_v25  ;;  %v6125_v29 = vadd.f32 %v10184_v32, %v5743_v35  ;;  %v5742_v63 = vld [vmem:[#allocation2 + $0x68] sm:$0xff] }
 0x23d   : > { %5656 = vst.msk [vmem:[#allocation2 + $0x88] sm:$0xff] %vm687_vm9, %v5625_v37  ;;  %v5630_v4 = vadd.f32 %v10152_v18, %v5152_v52  ;;  %v6033_v11 = vpop.f32.mrf.mxu1  ;;  %v5159_v52 = vld [vmem:[#allocation2 + $0xe8] sm:$0xff] }
 0x23e   : > { %v5562_v15 = vpop.f32.mrf.mxu0  ;;  %6156 = vst.msk [vmem:[#allocation2 + $0x70] sm:$0xff] %vm687_vm9, %v6125_v29  ;;  %v6123_v28 = vadd.f32 %v6033_v11, %v5741_v51  ;;  %v5747_v38 = vld [vmem:[#allocation2 + $0x90] sm:$0xff] }
 0x23f   : > { %5661 = vst.msk [vmem:[#allocation2 + $0xb0] sm:$0xff] %vm687_vm9, %v5630_v4  ;;  %v5628_v40 = vadd.f32 %v5562_v15, %v5150_v59  ;;  %v10185_v46 = vpop.f32.mrf.mxu1 }
 0x240   : > { %v10153_v5 = vpop.f32.mrf.mxu0  ;;  %6154 = vst.msk [vmem:[#allocation2 + $0x60] sm:$0xff] %vm687_vm9, %v6123_v28  ;;  %v6126_v61 = vadd.f32 %v10185_v46, %v5744_v36  ;;  %v5745_v30 = vld [vmem:[#allocation2 + $0x80] sm:$0xff]  ;;  %v6174_v36 = vld [vmem:[#allocation2 + $0xfe] sm:$0x3] }
 0x241   : > { %5659 = vst.msk [vmem:[#allocation2 + $0xa0] sm:$0xff] %vm687_vm9, %v5628_v40  ;;  %v5631_v33 = vadd.f32 %v10153_v5, %v5153_v62  ;;  %v6036_v10 = vpop.f32.mrf.mxu1 }
 0x242   : > { %v5565_v34 = vpop.f32.mrf.mxu0  ;;  %6157 = vst.msk [vmem:[#allocation2 + $0x78] sm:$0xff] %vm687_vm9, %v6126_v61  ;;  %v6124_v22 = vadd.f32 %v6036_v10, %v5742_v63  ;;  %v5748_v39 = vld [vmem:[#allocation2 + $0x98] sm:$0xff] }
 0x243   : > { %5662 = vst.msk [vmem:[#allocation2 + $0xb8] sm:$0xff] %vm687_vm9, %v5631_v33  ;;  %v5629_v55 = vadd.f32 %v5565_v34, %v5151_v42  ;;  %v10188_v21 = vpop.f32.mrf.mxu1 }
 0x244   : > { %v10156_v56 = vpop.f32.mrf.mxu0  ;;  %6155 = vst.msk [vmem:[#allocation2 + $0x68] sm:$0xff] %vm687_vm9, %v6124_v22  ;;  %v6129_v54 = vadd.f32 %v10188_v21, %v5747_v38  ;;  %v5746_v57 = vld [vmem:[#allocation2 + $0x88] sm:$0xff]  ;;  %v6234_v22 = vld [vmem:[#allocation2 + $0x10] sm:$0xff] }
 0x245   : > { %5660 = vst.msk [vmem:[#allocation2 + $0xa8] sm:$0xff] %vm687_vm9, %v5629_v55  ;;  %v5634_v13 = vadd.f32 %v10156_v56, %v5156_v19  ;;  %v6049_v0 = vpop.f32.mrf.mxu1 }
 0x246   : > { %v5578_v6 = vpop.f32.mrf.mxu0  ;;  %6160 = vst.msk [vmem:[#allocation2 + $0x90] sm:$0xff] %vm687_vm9, %v6129_v54  ;;  %v6127_v50 = vadd.f32 %v6049_v0, %v5745_v30  ;;  %v5751_v16 = vld [vmem:[#allocation2 + $0xb0] sm:$0xff]  ;;  %v6232_v54 = vld [vmem:[#allocation2] sm:$0xff] }
 0x247   : > { %5665 = vst.msk [vmem:[#allocation2 + $0xd0] sm:$0xff] %vm687_vm9, %v5634_v13  ;;  %v5632_v43 = vadd.f32 %v5578_v6, %v5154_v45  ;;  %v10189_v23 = vpop.f32.mrf.mxu1 }
 0x248   : > { %v10157_v47 = vpop.f32.mrf.mxu0  ;;  %6158 = vst.msk [vmem:[#allocation2 + $0x80] sm:$0xff] %vm687_vm9, %v6127_v50  ;;  %v6130_v31 = vadd.f32 %v10189_v23, %v5748_v39  ;;  %v5749_v3 = vld [vmem:[#allocation2 + $0xa0] sm:$0xff]  ;;  %v6235_v50 = vld [vmem:[#allocation2 + $0x18] sm:$0xff] }
 0x249   : > { %5663 = vst.msk [vmem:[#allocation2 + $0xc0] sm:$0xff] %vm687_vm9, %v5632_v43  ;;  %v5635_v26 = vadd.f32 %v10157_v47, %v5157_v24  ;;  %v6052_v7 = vpop.f32.mrf.mxu1 }
 0x24a   : > { %v5581_v60 = vpop.f32.mrf.mxu0  ;;  %6161 = vst.msk [vmem:[#allocation2 + $0x98] sm:$0xff] %vm687_vm9, %v6130_v31  ;;  %v6128_v12 = vadd.f32 %v6052_v7, %v5746_v57  ;;  %v5752_v20 = vld [vmem:[#allocation2 + $0xb8] sm:$0xff] }
 0x24b   : > { %5666 = vst.msk [vmem:[#allocation2 + $0xd8] sm:$0xff] %vm687_vm9, %v5635_v26  ;;  %v5633_v17 = vadd.f32 %v5581_v60, %v5155_v41  ;;  %v10192_v9 = vpop.f32.mrf.mxu1  ;;  %v6233_v60 = vld [vmem:[#allocation2 + $0x8] sm:$0xff] }
 0x24c   : > { %v10160_v44 = vpop.f32.mrf.mxu0  ;;  %6159 = vst.msk [vmem:[#allocation2 + $0x88] sm:$0xff] %vm687_vm9, %v6128_v12  ;;  %v6133_v27 = vadd.f32 %v10192_v9, %v5751_v16  ;;  %v5750_v35 = vld [vmem:[#allocation2 + $0xa8] sm:$0xff]  ;;  %v6236_v9 = vld [vmem:[#allocation2 + $0x20] sm:$0xff] }
 0x24d   : > { %5664 = vst.msk [vmem:[#allocation2 + $0xc8] sm:$0xff] %vm687_vm9, %v5633_v17  ;;  %v5638_v53 = vadd.f32 %v10160_v44, %v5160_v8  ;;  %v6065_v48 = vpop.f32.mrf.mxu1  ;;  %v6238_v8 = vld [vmem:[#allocation2 + $0x30] sm:$0xff] }
 0x24e   : > { %v5594_v14 = vpop.f32.mrf.mxu0  ;;  %6164 = vst.msk [vmem:[#allocation2 + $0xb0] sm:$0xff] %vm687_vm9, %v6133_v27  ;;  %v6131_v37 = vadd.f32 %v6065_v48, %v5749_v3  ;;  %v5755_v29 = vld [vmem:[#allocation2 + $0xd0] sm:$0xff]  ;;  %v6239_v3 = vld [vmem:[#allocation2 + $0x38] sm:$0xff] }
 0x24f   : > { %5669 = vst.msk [vmem:[#allocation2 + $0xf0] sm:$0x7f] %vm1269_vm11, %v5638_v53  ;;  %v5636_v2 = vadd.f32 %v5594_v14, %v5158_v49  ;;  %v10193_v58 = vpop.f32.mrf.mxu1 }
 0x250   : > { %v10161_v1 = vpop.f32.mrf.mxu0  ;;  %6162 = vst.msk [vmem:[#allocation2 + $0xa0] sm:$0xff] %vm687_vm9, %v6131_v37  ;;  %v6134_v25 = vadd.f32 %v10193_v58, %v5752_v20  ;;  %v5753_v28 = vld [vmem:[#allocation2 + $0xc0] sm:$0xff] }
 0x251   : > { %5667 = vst.msk [vmem:[#allocation2 + $0xe0] sm:$0xff] %vm687_vm9, %v5636_v2  ;;  %v6068_v32 = vpop.f32.mrf.mxu1 }
 0x252   : > { %v5597_v18 = vpop.f32.mrf.mxu0  ;;  %6165 = vst.msk [vmem:[#allocation2 + $0xb8] sm:$0xff] %vm687_vm9, %v6134_v25  ;;  %v6132_v15 = vadd.f32 %v6068_v32, %v5750_v35  ;;  %v5756_v61 = vld [vmem:[#allocation2 + $0xd8] sm:$0xff]  ;;  %v6242_v32 = vld [vmem:[#allocation2 + $0x50] sm:$0xff] }
 0x253   : > { %v5637_v4 = vadd.f32 %v5597_v18, %v5159_v52  ;;  %v10196_v40 = vpop.f32.mrf.mxu1  ;;  %v6237_v52 = vld [vmem:[#allocation2 + $0x28] sm:$0xff] }
 0x254   : > { %v6219_v59 = vpop.f32.mrf.mxu0  ;;  %6163 = vst.msk [vmem:[#allocation2 + $0xa8] sm:$0xff] %vm687_vm9, %v6132_v15  ;;  %v6137_v62 = vadd.f32 %v10196_v40, %v5755_v29  ;;  %v5754_v19 = vld [vmem:[#allocation2 + $0xc8] sm:$0xff] }
 0x255   : > { %5668 = vst.msk [vmem:[#allocation2 + $0xe8] sm:$0xff] %vm687_vm9, %v5637_v4  ;;  %v6081_v33 = vpop.f32.mrf.mxu1 }
 0x256   : > { %v6173_v51 = vld [vmem:[#allocation2 + $0xf6] sm:$0xff]  ;;  %v10206_v11 = vpop.f32.mrf.mxu0  ;;  %6168 = vst.msk [vmem:[#allocation2 + $0xd0] sm:$0xff] %vm687_vm9, %v6137_v62  ;;  %v6135_v42 = vadd.f32 %v6081_v33, %v5753_v28  ;;  %v5759_v45 = vld [vmem:[#allocation2 + $0xf0] sm:$0x3f] }
 0x257   : > { %v6226_v5 = vadd.f32 %v6219_v59, %v6173_v51  ;;  %v10197_v55 = vpop.f32.mrf.mxu1  ;;  %v6240_v51 = vld [vmem:[#allocation2 + $0x40] sm:$0xff] }
 0x258   : > { %v6222_v46 = vpop.f32.mrf.mxu0  ;;  %6166 = vst.msk [vmem:[#allocation2 + $0xc0] sm:$0xff] %vm687_vm9, %v6135_v42  ;;  %v6138_v10 = vadd.f32 %v10197_v55, %v5756_v61  ;;  %v5757_v24 = vld [vmem:[#allocation2 + $0xe0] sm:$0xff] }
 0x259   : > { %6228 = vst.msk [vmem:[#allocation2 + $0xf6] sm:$0xff] %vm687_vm9, %v6226_v5  ;;  %v6227_v34 = vadd.f32 %v6222_v46, %v6174_v36  ;;  %v6084_v56 = vpop.f32.mrf.mxu1  ;;  %v6243_v36 = vld [vmem:[#allocation2 + $0x58] sm:$0xff] }
 0x25a   : > { %v10207_v63 = vpop.f32.mrf.mxu0  ;;  %6169 = vst.msk [vmem:[#allocation2 + $0xd8] sm:$0xff] %vm687_vm9, %v6138_v10  ;;  %v6136_v38 = vadd.f32 %v6084_v56, %v5754_v19 }
 0x25b   : > { %6229 = vst.msk [vmem:[#allocation2 + $0xfe] sm:$0x3] %vm1820_vm13, %v6227_v34  ;;  %v10200_v6 = vpop.f32.mrf.mxu1  ;;  %v6241_v63 = vld [vmem:[#allocation2 + $0x48] sm:$0xff] }
 0x25c   : > { %v10212_v13 = vpop.f32.mrf.mxu0  ;;  %6167 = vst.msk [vmem:[#allocation2 + $0xc8] sm:$0xff] %vm687_vm9, %v6136_v38  ;;  %v6141_v30 = vadd.f32 %v10200_v6, %v5759_v45  ;;  %v5758_v57 = vld [vmem:[#allocation2 + $0xe8] sm:$0xff]  ;;  %v6246_v38 = vld [vmem:[#allocation2 + $0x70] sm:$0xff] }
 0x25d   : > { %v6728_v21 = vadd.f32 %v10212_v13, %v6234_v22  ;;  %v6097_v47 = vpop.f32.mrf.mxu1 }
 0x25e   : > { %v6600_v43 = vpop.f32.mrf.mxu0  ;;  %6172 = vst.msk [vmem:[#allocation2 + $0xf0] sm:$0x3f] %vm1772_vm14, %v6141_v30  ;;  %v6139_v39 = vadd.f32 %v6097_v47, %v5757_v24  ;;  %v6244_v30 = vld [vmem:[#allocation2 + $0x60] sm:$0xff] }
 0x25f   : > { %6759 = vst.msk [vmem:[#allocation2 + $0x10] sm:$0xff] %vm687_vm9, %v6728_v21  ;;  %v6726_v0 = vadd.f32 %v6600_v43, %v6232_v54  ;;  %v10201_v41 = vpop.f32.mrf.mxu1 }
 0x260   : > { %v10213_v26 = vpop.f32.mrf.mxu0  ;;  %6170 = vst.msk [vmem:[#allocation2 + $0xe0] sm:$0xff] %vm687_vm9, %v6139_v39  ;;  %v6247_v39 = vld [vmem:[#allocation2 + $0x78] sm:$0xff] }
 0x261   : > { %6757 = vst.msk [vmem:[#allocation2] sm:$0xff] %vm687_vm9, %v6726_v0  ;;  %v6729_v23 = vadd.f32 %v10213_v26, %v6235_v50  ;;  %v6100_v7 = vpop.f32.mrf.mxu1 }
 0x262   : > { %v6603_v31 = vpop.f32.mrf.mxu0  ;;  %v6140_v12 = vadd.f32 %v6100_v7, %v5758_v57  ;;  %v6789_v20 = vld [vmem:[#allocation2 + $0xfd] sm:$0x7]  ;;  %v6245_v57 = vld [vmem:[#allocation2 + $0x68] sm:$0xff] }
 0x263   : > { %6760 = vst.msk [vmem:[#allocation2 + $0x18] sm:$0xff] %vm687_vm9, %v6729_v23  ;;  %v6727_v17 = vadd.f32 %v6603_v31, %v6233_v60  ;;  %v6834_v16 = vpop.f32.mrf.mxu1 }
 0x264   : > { %v10216_v44 = vpop.f32.mrf.mxu0  ;;  %6171 = vst.msk [vmem:[#allocation2 + $0xe8] sm:$0xff] %vm687_vm9, %v6140_v12 }
 0x265   : > { %6758 = vst.msk [vmem:[#allocation2 + $0x8] sm:$0xff] %vm687_vm9, %v6727_v17  ;;  %v6732_v53 = vadd.f32 %v10216_v44, %v6238_v8  ;;  %v6788_v27 = vld [vmem:[#allocation2 + $0xf5] sm:$0xff]  ;;  %v10246_v2 = vpop.f32.mrf.mxu1 }
 0x266   : > { %v6616_v49 = vpop.f32.mrf.mxu0  ;;  %v6841_v1 = vadd.f32 %v6834_v16, %v6788_v27  ;;  %v6849_v29 = vld [vmem:[#allocation2 + $0x10] sm:$0xff] }
 0x267   : > { %6763 = vst.msk [vmem:[#allocation2 + $0x30] sm:$0xff] %vm687_vm9, %v6732_v53  ;;  %v6730_v14 = vadd.f32 %v6616_v49, %v6236_v9  ;;  %v6837_v58 = vpop.f32.mrf.mxu1  ;;  %v6250_v16 = vld [vmem:[#allocation2 + $0x90] sm:$0xff] }
 0x268   : > { %v10217_v48 = vpop.f32.mrf.mxu0  ;;  %6843 = vst.msk [vmem:[#allocation2 + $0xf5] sm:$0xff] %vm687_vm9, %v6841_v1  ;;  %v6842_v25 = vadd.f32 %v6837_v58, %v6789_v20  ;;  %v6847_v28 = vld [vmem:[#allocation2] sm:$0xff] }
 0x269   : > { %6761 = vst.msk [vmem:[#allocation2 + $0x20] sm:$0xff] %vm687_vm9, %v6730_v14  ;;  %v6733_v37 = vadd.f32 %v10217_v48, %v6239_v3  ;;  %v10247_v35 = vpop.f32.mrf.mxu1  ;;  %v6248_v3 = vld [vmem:[#allocation2 + $0x80] sm:$0xff] }
 0x26a   : > { %v6619_v18 = vpop.f32.mrf.mxu0  ;;  %6844 = vst.msk [vmem:[#allocation2 + $0xfd] sm:$0x7] %vm2435_vm15, %v6842_v25  ;;  %v6850_v61 = vld [vmem:[#allocation2 + $0x18] sm:$0xff] }
 0x26b   : > { %6764 = vst.msk [vmem:[#allocation2 + $0x38] sm:$0xff] %vm687_vm9, %v6733_v37  ;;  %v6731_v4 = vadd.f32 %v6619_v18, %v6237_v52  ;;  %v10252_v40 = vpop.f32.mrf.mxu1  ;;  %v6251_v52 = vld [vmem:[#allocation2 + $0x98] sm:$0xff] }
 0x26c   : > { %v10220_v59 = vpop.f32.mrf.mxu0  ;;  %v7231_v62 = vadd.f32 %v10252_v40, %v6849_v29  ;;  %v6848_v22 = vld [vmem:[#allocation2 + $0x8] sm:$0xff] }
 0x26d   : > { %6762 = vst.msk [vmem:[#allocation2 + $0x28] sm:$0xff] %vm687_vm9, %v6731_v4  ;;  %v6736_v15 = vadd.f32 %v10220_v59, %v6242_v32  ;;  %v7103_v33 = vpop.f32.mrf.mxu1  ;;  %v6249_v59 = vld [vmem:[#allocation2 + $0x88] sm:$0xff] }
 0x26e   : > { %v6632_v11 = vpop.f32.mrf.mxu0  ;;  %7262 = vst.msk [vmem:[#allocation2 + $0x10] sm:$0xff] %vm687_vm9, %v7231_v62  ;;  %v7229_v42 = vadd.f32 %v7103_v33, %v6847_v28  ;;  %v6853_v54 = vld [vmem:[#allocation2 + $0x30] sm:$0xff] }
 0x26f   : > { %6767 = vst.msk [vmem:[#allocation2 + $0x50] sm:$0xff] %vm687_vm9, %v6736_v15  ;;  %v6734_v5 = vadd.f32 %v6632_v11, %v6240_v51  ;;  %v10253_v55 = vpop.f32.mrf.mxu1  ;;  %v6254_v62 = vld [vmem:[#allocation2 + $0xb0] sm:$0xff] }
 0x270   : > { %v10221_v46 = vpop.f32.mrf.mxu0  ;;  %7260 = vst.msk [vmem:[#allocation2] sm:$0xff] %vm687_vm9, %v7229_v42  ;;  %v7232_v19 = vadd.f32 %v10253_v55, %v6850_v61  ;;  %v6851_v50 = vld [vmem:[#allocation2 + $0x20] sm:$0xff] }
 0x271   : > { %6765 = vst.msk [vmem:[#allocation2 + $0x40] sm:$0xff] %vm687_vm9, %v6734_v5  ;;  %v6737_v34 = vadd.f32 %v10221_v46, %v6243_v36  ;;  %v7106_v13 = vpop.f32.mrf.mxu1  ;;  %v6252_v42 = vld [vmem:[#allocation2 + $0xa0] sm:$0xff] }
 0x272   : > { %v6635_v10 = vpop.f32.mrf.mxu0  ;;  %7263 = vst.msk [vmem:[#allocation2 + $0x18] sm:$0xff] %vm687_vm9, %v7232_v19  ;;  %v7230_v45 = vadd.f32 %v7106_v13, %v6848_v22  ;;  %v6854_v31 = vld [vmem:[#allocation2 + $0x38] sm:$0xff] }
 0x273   : > { %6768 = vst.msk [vmem:[#allocation2 + $0x58] sm:$0xff] %vm687_vm9, %v6737_v34  ;;  %v6735_v56 = vadd.f32 %v6635_v10, %v6241_v63  ;;  %v10256_v43 = vpop.f32.mrf.mxu1  ;;  %v6255_v19 = vld [vmem:[#allocation2 + $0xb8] sm:$0xff] }
 0x274   : > { %v10224_v21 = vpop.f32.mrf.mxu0  ;;  %7261 = vst.msk [vmem:[#allocation2 + $0x8] sm:$0xff] %vm687_vm9, %v7230_v45  ;;  %v7235_v24 = vadd.f32 %v10256_v43, %v6853_v54  ;;  %v6852_v12 = vld [vmem:[#allocation2 + $0x28] sm:$0xff] }
 0x275   : > { %6766 = vst.msk [vmem:[#allocation2 + $0x48] sm:$0xff] %vm687_vm9, %v6735_v56  ;;  %v6740_v6 = vadd.f32 %v10224_v21, %v6246_v38  ;;  %v7119_v26 = vpop.f32.mrf.mxu1  ;;  %v6253_v45 = vld [vmem:[#allocation2 + $0xa8] sm:$0xff] }
 0x276   : > { %v6648_v0 = vpop.f32.mrf.mxu0  ;;  %7266 = vst.msk [vmem:[#allocation2 + $0x30] sm:$0xff] %vm687_vm9, %v7235_v24  ;;  %v7233_v41 = vadd.f32 %v7119_v26, %v6851_v50  ;;  %v6857_v27 = vld [vmem:[#allocation2 + $0x50] sm:$0xff] }
 0x277   : > { %6771 = vst.msk [vmem:[#allocation2 + $0x70] sm:$0xff] %vm687_vm9, %v6740_v6  ;;  %v6738_v47 = vadd.f32 %v6648_v0, %v6244_v30  ;;  %v10257_v17 = vpop.f32.mrf.mxu1  ;;  %v6258_v24 = vld [vmem:[#allocation2 + $0xd0] sm:$0xff] }
 0x278   : > { %v10225_v23 = vpop.f32.mrf.mxu0  ;;  %7264 = vst.msk [vmem:[#allocation2 + $0x20] sm:$0xff] %vm687_vm9, %v7233_v41  ;;  %v7236_v8 = vadd.f32 %v10257_v17, %v6854_v31  ;;  %v6855_v20 = vld [vmem:[#allocation2 + $0x40] sm:$0xff] }
 0x279   : > { %6769 = vst.msk [vmem:[#allocation2 + $0x60] sm:$0xff] %vm687_vm9, %v6738_v47  ;;  %v6741_v60 = vadd.f32 %v10225_v23, %v6247_v39  ;;  %v7122_v53 = vpop.f32.mrf.mxu1  ;;  %v6256_v41 = vld [vmem:[#allocation2 + $0xc0] sm:$0xff] }
 0x27a   : > { %v6651_v7 = vpop.f32.mrf.mxu0  ;;  %7267 = vst.msk [vmem:[#allocation2 + $0x38] sm:$0xff] %vm687_vm9, %v7236_v8  ;;  %v7234_v49 = vadd.f32 %v7122_v53, %v6852_v12  ;;  %v6858_v35 = vld [vmem:[#allocation2 + $0x58] sm:$0xff] }
 0x27b   : > { %6772 = vst.msk [vmem:[#allocation2 + $0x78] sm:$0xff] %vm687_vm9, %v6741_v60  ;;  %v6739_v44 = vadd.f32 %v6651_v7, %v6245_v57  ;;  %v10260_v2 = vpop.f32.mrf.mxu1  ;;  %v6259_v8 = vld [vmem:[#allocation2 + $0xd8] sm:$0xff] }
 0x27c   : > { %v10228_v9 = vpop.f32.mrf.mxu0  ;;  %7265 = vst.msk [vmem:[#allocation2 + $0x28] sm:$0xff] %vm687_vm9, %v7234_v49  ;;  %v7239_v1 = vadd.f32 %v10260_v2, %v6857_v27  ;;  %v6856_v51 = vld [vmem:[#allocation2 + $0x48] sm:$0xff] }
 0x27d   : > { %6770 = vst.msk [vmem:[#allocation2 + $0x68] sm:$0xff] %vm687_vm9, %v6739_v44  ;;  %v6744_v14 = vadd.f32 %v10228_v9, %v6250_v16  ;;  %v7135_v58 = vpop.f32.mrf.mxu1  ;;  %v6257_v49 = vld [vmem:[#allocation2 + $0xc8] sm:$0xff] }
 0x27e   : > { %v6664_v48 = vpop.f32.mrf.mxu0  ;;  %7270 = vst.msk [vmem:[#allocation2 + $0x50] sm:$0xff] %vm687_vm9, %v7239_v1  ;;  %v7237_v25 = vadd.f32 %v7135_v58, %v6855_v20  ;;  %v6861_v36 = vld [vmem:[#allocation2 + $0x70] sm:$0xff] }
 0x27f   : > { %6775 = vst.msk [vmem:[#allocation2 + $0x90] sm:$0xff] %vm687_vm9, %v6744_v14  ;;  %v6742_v37 = vadd.f32 %v6664_v48, %v6248_v3  ;;  %v10261_v32 = vpop.f32.mrf.mxu1  ;;  %v6262_v1 = vld [vmem:[#allocation2 + $0xf0] sm:$0x1f] }
 0x280   : > { %v10229_v18 = vpop.f32.mrf.mxu0  ;;  %7268 = vst.msk [vmem:[#allocation2 + $0x40] sm:$0xff] %vm687_vm9, %v7237_v25  ;;  %v7240_v29 = vadd.f32 %v10261_v32, %v6858_v35  ;;  %v6859_v63 = vld [vmem:[#allocation2 + $0x60] sm:$0xff] }
 0x281   : > { %6773 = vst.msk [vmem:[#allocation2 + $0x80] sm:$0xff] %vm687_vm9, %v6742_v37  ;;  %v6745_v4 = vadd.f32 %v10229_v18, %v6251_v52  ;;  %v7138_v11 = vpop.f32.mrf.mxu1  ;;  %v6260_v25 = vld [vmem:[#allocation2 + $0xe0] sm:$0xff] }
 0x282   : > { %v6667_v15 = vpop.f32.mrf.mxu0  ;;  %7271 = vst.msk [vmem:[#allocation2 + $0x58] sm:$0xff] %vm687_vm9, %v7240_v29  ;;  %v7238_v28 = vadd.f32 %v7138_v11, %v6856_v51  ;;  %v6862_v38 = vld [vmem:[#allocation2 + $0x78] sm:$0xff] }
 0x283   : > { %6776 = vst.msk [vmem:[#allocation2 + $0x98] sm:$0xff] %vm687_vm9, %v6745_v4  ;;  %v6743_v40 = vadd.f32 %v6667_v15, %v6249_v59  ;;  %v10264_v46 = vpop.f32.mrf.mxu1 }
 0x284   : > { %v10232_v5 = vpop.f32.mrf.mxu0  ;;  %7269 = vst.msk [vmem:[#allocation2 + $0x48] sm:$0xff] %vm687_vm9, %v7238_v28  ;;  %v7243_v61 = vadd.f32 %v10264_v46, %v6861_v36  ;;  %v6860_v30 = vld [vmem:[#allocation2 + $0x68] sm:$0xff] }
 0x285   : > { %6774 = vst.msk [vmem:[#allocation2 + $0x88] sm:$0xff] %vm687_vm9, %v6743_v40  ;;  %v6748_v33 = vadd.f32 %v10232_v5, %v6254_v62  ;;  %v7151_v10 = vpop.f32.mrf.mxu1  ;;  %v6261_v62 = vld [vmem:[#allocation2 + $0xe8] sm:$0xff] }
 0x286   : > { %v6680_v34 = vpop.f32.mrf.mxu0  ;;  %7274 = vst.msk [vmem:[#allocation2 + $0x70] sm:$0xff] %vm687_vm9, %v7243_v61  ;;  %v7241_v22 = vadd.f32 %v7151_v10, %v6859_v63  ;;  %v6865_v39 = vld [vmem:[#allocation2 + $0x90] sm:$0xff] }
 0x287   : > { %6779 = vst.msk [vmem:[#allocation2 + $0xb0] sm:$0xff] %vm687_vm9, %v6748_v33  ;;  %v6746_v55 = vadd.f32 %v6680_v34, %v6252_v42  ;;  %v10265_v21 = vpop.f32.mrf.mxu1 }
 0x288   : > { %v10233_v56 = vpop.f32.mrf.mxu0  ;;  %7272 = vst.msk [vmem:[#allocation2 + $0x60] sm:$0xff] %vm687_vm9, %v7241_v22  ;;  %v7244_v54 = vadd.f32 %v10265_v21, %v6862_v38  ;;  %v6863_v57 = vld [vmem:[#allocation2 + $0x80] sm:$0xff]  ;;  %v7292_v38 = vld [vmem:[#allocation2 + $0xfc] sm:$0xf] }
 0x289   : > { %6777 = vst.msk [vmem:[#allocation2 + $0xa0] sm:$0xff] %vm687_vm9, %v6746_v55  ;;  %v6749_v13 = vadd.f32 %v10233_v56, %v6255_v19  ;;  %v7154_v0 = vpop.f32.mrf.mxu1 }
 0x28a   : > { %v6683_v6 = vpop.f32.mrf.mxu0  ;;  %7275 = vst.msk [vmem:[#allocation2 + $0x78] sm:$0xff] %vm687_vm9, %v7244_v54  ;;  %v7242_v50 = vadd.f32 %v7154_v0, %v6860_v30  ;;  %v6866_v16 = vld [vmem:[#allocation2 + $0x98] sm:$0xff] }
 0x28b   : > { %6780 = vst.msk [vmem:[#allocation2 + $0xb8] sm:$0xff] %vm687_vm9, %v6749_v13  ;;  %v6747_v43 = vadd.f32 %v6683_v6, %v6253_v45  ;;  %v10268_v23 = vpop.f32.mrf.mxu1 }
 0x28c   : > { %v10236_v47 = vpop.f32.mrf.mxu0  ;;  %7273 = vst.msk [vmem:[#allocation2 + $0x68] sm:$0xff] %vm687_vm9, %v7242_v50  ;;  %v7247_v31 = vadd.f32 %v10268_v23, %v6865_v39  ;;  %v6864_v3 = vld [vmem:[#allocation2 + $0x88] sm:$0xff]  ;;  %v7352_v50 = vld [vmem:[#allocation2 + $0x10] sm:$0xff] }
 0x28d   : > { %6778 = vst.msk [vmem:[#allocation2 + $0xa8] sm:$0xff] %vm687_vm9, %v6747_v43  ;;  %v6752_v26 = vadd.f32 %v10236_v47, %v6258_v24  ;;  %v7167_v7 = vpop.f32.mrf.mxu1 }
 0x28e   : > { %v6696_v60 = vpop.f32.mrf.mxu0  ;;  %7278 = vst.msk [vmem:[#allocation2 + $0x90] sm:$0xff] %vm687_vm9, %v7247_v31  ;;  %v7245_v12 = vadd.f32 %v7167_v7, %v6863_v57  ;;  %v6869_v52 = vld [vmem:[#allocation2 + $0xb0] sm:$0xff]  ;;  %v7350_v31 = vld [vmem:[#allocation2] sm:$0xff] }
 0x28f   : > { %6783 = vst.msk [vmem:[#allocation2 + $0xd0] sm:$0xff] %vm687_vm9, %v6752_v26  ;;  %v6750_v17 = vadd.f32 %v6696_v60, %v6256_v41  ;;  %v10269_v9 = vpop.f32.mrf.mxu1 }
 0x290   : > { %v10237_v44 = vpop.f32.mrf.mxu0  ;;  %7276 = vst.msk [vmem:[#allocation2 + $0x80] sm:$0xff] %vm687_vm9, %v7245_v12  ;;  %v7248_v27 = vadd.f32 %v10269_v9, %v6866_v16  ;;  %v6867_v59 = vld [vmem:[#allocation2 + $0xa0] sm:$0xff]  ;;  %v7353_v12 = vld [vmem:[#allocation2 + $0x18] sm:$0xff] }
 0x291   : > { %6781 = vst.msk [vmem:[#allocation2 + $0xc0] sm:$0xff] %vm687_vm9, %v6750_v17  ;;  %v6753_v53 = vadd.f32 %v10237_v44, %v6259_v8  ;;  %v7170_v48 = vpop.f32.mrf.mxu1 }
 0x292   : > { %v6699_v14 = vpop.f32.mrf.mxu0  ;;  %7279 = vst.msk [vmem:[#allocation2 + $0x98] sm:$0xff] %vm687_vm9, %v7248_v27  ;;  %v7246_v20 = vadd.f32 %v7170_v48, %v6864_v3  ;;  %v6870_v51 = vld [vmem:[#allocation2 + $0xb8] sm:$0xff] }
 0x293   : > { %6784 = vst.msk [vmem:[#allocation2 + $0xd8] sm:$0xff] %vm687_vm9, %v6753_v53  ;;  %v6751_v2 = vadd.f32 %v6699_v14, %v6257_v49  ;;  %v10272_v18 = vpop.f32.mrf.mxu1  ;;  %v7351_v14 = vld [vmem:[#allocation2 + $0x8] sm:$0xff] }
 0x294   : > { %v10240_v37 = vpop.f32.mrf.mxu0  ;;  %7277 = vst.msk [vmem:[#allocation2 + $0x88] sm:$0xff] %vm687_vm9, %v7246_v20  ;;  %v7251_v35 = vadd.f32 %v10272_v18, %v6869_v52  ;;  %v6868_v36 = vld [vmem:[#allocation2 + $0xa8] sm:$0xff]  ;;  %v7354_v18 = vld [vmem:[#allocation2 + $0x20] sm:$0xff] }
 0x295   : > { %6782 = vst.msk [vmem:[#allocation2 + $0xc8] sm:$0xff] %vm687_vm9, %v6751_v2  ;;  %v6756_v58 = vadd.f32 %v10240_v37, %v6262_v1  ;;  %v7183_v15 = vpop.f32.mrf.mxu1  ;;  %v7356_v1 = vld [vmem:[#allocation2 + $0x30] sm:$0xff] }
 0x296   : > { %v6712_v4 = vpop.f32.mrf.mxu0  ;;  %7282 = vst.msk [vmem:[#allocation2 + $0xb0] sm:$0xff] %vm687_vm9, %v7251_v35  ;;  %v7249_v40 = vadd.f32 %v7183_v15, %v6867_v59  ;;  %v6873_v61 = vld [vmem:[#allocation2 + $0xd0] sm:$0xff]  ;;  %v7357_v59 = vld [vmem:[#allocation2 + $0x38] sm:$0xff] }
 0x297   : > { %6787 = vst.msk [vmem:[#allocation2 + $0xf0] sm:$0x1f] %vm2387_vm0, %v6756_v58  ;;  %v6754_v32 = vadd.f32 %v6712_v4, %v6260_v25  ;;  %v10273_v11 = vpop.f32.mrf.mxu1 }
 0x298   : > { %v10241_v29 = vpop.f32.mrf.mxu0  ;;  %7280 = vst.msk [vmem:[#allocation2 + $0xa0] sm:$0xff] %vm687_vm9, %v7249_v40  ;;  %v7252_v28 = vadd.f32 %v10273_v11, %v6870_v51  ;;  %v6871_v22 = vld [vmem:[#allocation2 + $0xc0] sm:$0xff] }
 0x299   : > { %6785 = vst.msk [vmem:[#allocation2 + $0xe0] sm:$0xff] %vm687_vm9, %v6754_v32  ;;  %v7186_v46 = vpop.f32.mrf.mxu1 }
 0x29a   : > { %v6715_v5 = vpop.f32.mrf.mxu0  ;;  %7283 = vst.msk [vmem:[#allocation2 + $0xb8] sm:$0xff] %vm687_vm9, %v7252_v28  ;;  %v7250_v34 = vadd.f32 %v7186_v46, %v6868_v36  ;;  %v6874_v54 = vld [vmem:[#allocation2 + $0xd8] sm:$0xff]  ;;  %v7360_v46 = vld [vmem:[#allocation2 + $0x50] sm:$0xff] }
 0x29b   : > { %v6755_v33 = vadd.f32 %v6715_v5, %v6261_v62  ;;  %v10276_v55 = vpop.f32.mrf.mxu1  ;;  %v7355_v62 = vld [vmem:[#allocation2 + $0x28] sm:$0xff] }
 0x29c   : > { %v7337_v42 = vpop.f32.mrf.mxu0  ;;  %7281 = vst.msk [vmem:[#allocation2 + $0xa8] sm:$0xff] %vm687_vm9, %v7250_v34  ;;  %v7255_v19 = vadd.f32 %v10276_v55, %v6873_v61  ;;  %v6872_v24 = vld [vmem:[#allocation2 + $0xc8] sm:$0xff] }
 0x29d   : > { %6786 = vst.msk [vmem:[#allocation2 + $0xe8] sm:$0xff] %vm687_vm9, %v6755_v33  ;;  %v7199_v13 = vpop.f32.mrf.mxu1 }
 0x29e   : > { %v7291_v63 = vld [vmem:[#allocation2 + $0xf4] sm:$0xff]  ;;  %v10286_v10 = vpop.f32.mrf.mxu0  ;;  %7286 = vst.msk [vmem:[#allocation2 + $0xd0] sm:$0xff] %vm687_vm9, %v7255_v19  ;;  %v7253_v45 = vadd.f32 %v7199_v13, %v6871_v22  ;;  %v6877_v41 = vld [vmem:[#allocation2 + $0xf0] sm:$0xf] }
 0x29f   : > { %v7344_v56 = vadd.f32 %v7337_v42, %v7291_v63  ;;  %v10277_v43 = vpop.f32.mrf.mxu1  ;;  %v7358_v63 = vld [vmem:[#allocation2 + $0x40] sm:$0xff] }
 0x2a0   : > { %v7340_v21 = vpop.f32.mrf.mxu0  ;;  %7284 = vst.msk [vmem:[#allocation2 + $0xc0] sm:$0xff] %vm687_vm9, %v7253_v45  ;;  %v7256_v0 = vadd.f32 %v10277_v43, %v6874_v54  ;;  %v6875_v8 = vld [vmem:[#allocation2 + $0xe0] sm:$0xff] }
 0x2a1   : > { %7346 = vst.msk [vmem:[#allocation2 + $0xf4] sm:$0xff] %vm687_vm9, %v7344_v56  ;;  %v7345_v6 = vadd.f32 %v7340_v21, %v7292_v38  ;;  %v7202_v47 = vpop.f32.mrf.mxu1  ;;  %v7361_v38 = vld [vmem:[#allocation2 + $0x58] sm:$0xff] }
 0x2a2   : > { %v10287_v30 = vpop.f32.mrf.mxu0  ;;  %7287 = vst.msk [vmem:[#allocation2 + $0xd8] sm:$0xff] %vm687_vm9, %v7256_v0  ;;  %v7254_v39 = vadd.f32 %v7202_v47, %v6872_v24 }
 0x2a3   : > { %7347 = vst.msk [vmem:[#allocation2 + $0xfc] sm:$0xf] %vm2890_vm10, %v7345_v6  ;;  %v10280_v60 = vpop.f32.mrf.mxu1  ;;  %v7359_v30 = vld [vmem:[#allocation2 + $0x48] sm:$0xff] }
 0x2a4   : > { %v10292_v26 = vpop.f32.mrf.mxu0  ;;  %7285 = vst.msk [vmem:[#allocation2 + $0xc8] sm:$0xff] %vm687_vm9, %v7254_v39  ;;  %v7259_v57 = vadd.f32 %v10280_v60, %v6877_v41  ;;  %v6876_v3 = vld [vmem:[#allocation2 + $0xe8] sm:$0xff]  ;;  %v7364_v39 = vld [vmem:[#allocation2 + $0x70] sm:$0xff] }
 0x2a5   : > { %v7846_v23 = vadd.f32 %v10292_v26, %v7352_v50  ;;  %v7215_v44 = vpop.f32.mrf.mxu1 }
 0x2a6   : > { %v7718_v17 = vpop.f32.mrf.mxu0  ;;  %7290 = vst.msk [vmem:[#allocation2 + $0xf0] sm:$0xf] %vm2890_vm10, %v7259_v57  ;;  %v7257_v16 = vadd.f32 %v7215_v44, %v6875_v8  ;;  %v7362_v57 = vld [vmem:[#allocation2 + $0x60] sm:$0xff] }
 0x2a7   : > { %7877 = vst.msk [vmem:[#allocation2 + $0x10] sm:$0xff] %vm687_vm9, %v7846_v23  ;;  %v7844_v7 = vadd.f32 %v7718_v17, %v7350_v31  ;;  %v10281_v49 = vpop.f32.mrf.mxu1 }
 0x2a8   : > { %v10293_v53 = vpop.f32.mrf.mxu0  ;;  %7288 = vst.msk [vmem:[#allocation2 + $0xe0] sm:$0xff] %vm687_vm9, %v7257_v16 }
 0x2a9   : > { %7875 = vst.msk [vmem:[#allocation2] sm:$0xff] %vm687_vm9, %v7844_v7  ;;  %v7847_v9 = vadd.f32 %v10293_v53, %v7353_v12  ;;  %v7218_v48 = vpop.f32.mrf.mxu1 }
 0x2aa   : > { %v7721_v27 = vpop.f32.mrf.mxu0  ;;  %v7258_v20 = vadd.f32 %v7218_v48, %v6876_v3  ;;  %v7907_v51 = vld [vmem:[#allocation2 + $0xfb] sm:$0x1f] }
 0x2ab   : > { %7878 = vst.msk [vmem:[#allocation2 + $0x18] sm:$0xff] %vm687_vm9, %v7847_v9  ;;  %v7845_v2 = vadd.f32 %v7721_v27, %v7351_v14  ;;  %v7952_v52 = vpop.f32.mrf.mxu1  ;;  %v7365_v9 = vld [vmem:[#allocation2 + $0x78] sm:$0xff] }
 0x2ac   : > { %v10296_v37 = vpop.f32.mrf.mxu0  ;;  %7289 = vst.msk [vmem:[#allocation2 + $0xe8] sm:$0xff] %vm687_vm9, %v7258_v20 }
 0x2ad   : > { %7876 = vst.msk [vmem:[#allocation2 + $0x8] sm:$0xff] %vm687_vm9, %v7845_v2  ;;  %v7850_v58 = vadd.f32 %v10296_v37, %v7356_v1  ;;  %v7906_v35 = vld [vmem:[#allocation2 + $0xf3] sm:$0xff]  ;;  %v10326_v32 = vpop.f32.mrf.mxu1 }
 0x2ae   : > { %v7734_v25 = vpop.f32.mrf.mxu0  ;;  %v7959_v29 = vadd.f32 %v7952_v52, %v7906_v35  ;;  %v7967_v61 = vld [vmem:[#allocation2 + $0x10] sm:$0xff] }
 0x2af   : > { %7881 = vst.msk [vmem:[#allocation2 + $0x30] sm:$0xff] %vm687_vm9, %v7850_v58  ;;  %v7848_v4 = vadd.f32 %v7734_v25, %v7354_v18  ;;  %v7955_v11 = vpop.f32.mrf.mxu1  ;;  %v7363_v18 = vld [vmem:[#allocation2 + $0x68] sm:$0xff] }
 0x2b0   : > { %v10297_v15 = vpop.f32.mrf.mxu0  ;;  %7961 = vst.msk [vmem:[#allocation2 + $0xf3] sm:$0xff] %vm687_vm9, %v7959_v29  ;;  %v7960_v28 = vadd.f32 %v7955_v11, %v7907_v51  ;;  %v7965_v22 = vld [vmem:[#allocation2] sm:$0xff]  ;;  %v7368_v11 = vld [vmem:[#allocation2 + $0x90] sm:$0xff] }
 0x2b1   : > { %7879 = vst.msk [vmem:[#allocation2 + $0x20] sm:$0xff] %vm687_vm9, %v7848_v4  ;;  %v7851_v40 = vadd.f32 %v10297_v15, %v7357_v59  ;;  %v10327_v36 = vpop.f32.mrf.mxu1 }
 0x2b2   : > { %v7737_v5 = vpop.f32.mrf.mxu0  ;;  %7962 = vst.msk [vmem:[#allocation2 + $0xfb] sm:$0x1f] %vm2387_vm0, %v7960_v28  ;;  %v7968_v54 = vld [vmem:[#allocation2 + $0x18] sm:$0xff] }
 0x2b3   : > { %7882 = vst.msk [vmem:[#allocation2 + $0x38] sm:$0xff] %vm687_vm9, %v7851_v40  ;;  %v7849_v33 = vadd.f32 %v7737_v5, %v7355_v62  ;;  %v10332_v55 = vpop.f32.mrf.mxu1 }
 0x2b4   : > { %v10300_v42 = vpop.f32.mrf.mxu0  ;;  %v8349_v19 = vadd.f32 %v10332_v55, %v7967_v61  ;;  %v7966_v50 = vld [vmem:[#allocation2 + $0x8] sm:$0xff]  ;;  %v7366_v55 = vld [vmem:[#allocation2 + $0x80] sm:$0xff] }
 0x2b5   : > { %7880 = vst.msk [vmem:[#allocation2 + $0x28] sm:$0xff] %vm687_vm9, %v7849_v33  ;;  %v7854_v34 = vadd.f32 %v10300_v42, %v7360_v46  ;;  %v8221_v13 = vpop.f32.mrf.mxu1 }
 0x2b6   : > { %v7750_v10 = vpop.f32.mrf.mxu0  ;;  %8380 = vst.msk [vmem:[#allocation2 + $0x10] sm:$0xff] %vm687_vm9, %v8349_v19  ;;  %v8347_v45 = vadd.f32 %v8221_v13, %v7965_v22  ;;  %v7971_v31 = vld [vmem:[#allocation2 + $0x30] sm:$0xff] }
 0x2b7   : > { %7885 = vst.msk [vmem:[#allocation2 + $0x50] sm:$0xff] %vm687_vm9, %v7854_v34  ;;  %v7852_v56 = vadd.f32 %v7750_v10, %v7358_v63  ;;  %v10333_v43 = vpop.f32.mrf.mxu1 }
 0x2b8   : > { %v10301_v21 = vpop.f32.mrf.mxu0  ;;  %8378 = vst.msk [vmem:[#allocation2] sm:$0xff] %vm687_vm9, %v8347_v45  ;;  %v8350_v24 = vadd.f32 %v10333_v43, %v7968_v54  ;;  %v7969_v53 = vld [vmem:[#allocation2 + $0x20] sm:$0xff] }
 0x2b9   : > { %7883 = vst.msk [vmem:[#allocation2 + $0x40] sm:$0xff] %vm687_vm9, %v7852_v56  ;;  %v7855_v6 = vadd.f32 %v10301_v21, %v7361_v38  ;;  %v8224_v26 = vpop.f32.mrf.mxu1 }
 0x2ba   : > { %v7753_v0 = vpop.f32.mrf.mxu0  ;;  %8381 = vst.msk [vmem:[#allocation2 + $0x18] sm:$0xff] %vm687_vm9, %v8350_v24  ;;  %v8348_v41 = vadd.f32 %v8224_v26, %v7966_v50  ;;  %v7972_v48 = vld [vmem:[#allocation2 + $0x38] sm:$0xff] }
 0x2bb   : > { %7886 = vst.msk [vmem:[#allocation2 + $0x58] sm:$0xff] %vm687_vm9, %v7855_v6  ;;  %v7853_v47 = vadd.f32 %v7753_v0, %v7359_v30  ;;  %v10336_v17 = vpop.f32.mrf.mxu1  ;;  %v7369_v6 = vld [vmem:[#allocation2 + $0x98] sm:$0xff] }
 0x2bc   : > { %v10304_v23 = vpop.f32.mrf.mxu0  ;;  %8379 = vst.msk [vmem:[#allocation2 + $0x8] sm:$0xff] %vm687_vm9, %v8348_v41  ;;  %v8353_v8 = vadd.f32 %v10336_v17, %v7971_v31  ;;  %v7970_v35 = vld [vmem:[#allocation2 + $0x28] sm:$0xff] }
 0x2bd   : > { %7884 = vst.msk [vmem:[#allocation2 + $0x48] sm:$0xff] %vm687_vm9, %v7853_v47  ;;  %v7858_v60 = vadd.f32 %v10304_v23, %v7364_v39  ;;  %v8468_v12 = vld [vmem:[#allocation2 + $0x10] sm:$0xff]  ;;  %v8237_v16 = vpop.f32.mrf.mxu1  ;;  %v7367_v23 = vld [vmem:[#allocation2 + $0x88] sm:$0xff] }
 0x2be   : > { %v7766_v7 = vpop.f32.mrf.mxu0  ;;  %vm8500_vm1 = vcmp.ge.f32.partialorder %v8468_v12, 0.0  ;;  %v8532_v14 = vmul.f32 0.1, %v8468_v12  ;;  %8384 = vst.msk [vmem:[#allocation2 + $0x30] sm:$0xff] %vm687_vm9, %v8353_v8  ;;  %v8351_v27 = vadd.f32 %v8237_v16, %v7969_v53  ;;  %v7975_v28 = vld [vmem:[#allocation2 + $0x50] sm:$0xff] }
 0x2bf   : > { %7889 = vst.msk [vmem:[#allocation2 + $0x70] sm:$0xff] %vm687_vm9, %v7858_v60  ;;  %v7856_v44 = vadd.f32 %v7766_v7, %v7362_v57  ;;  %v8466_v3 = vld [vmem:[#allocation2] sm:$0xff]  ;;  %v10337_v1 = vpop.f32.mrf.mxu1  ;;  %v7372_v53 = vld [vmem:[#allocation2 + $0xb0] sm:$0xff] }
 0x2c0   : > { %v10305_v49 = vpop.f32.mrf.mxu0  ;;  %v8564_v20 = vsel %vm8500_vm1, %v8468_v12, %v8532_v14  ;;  %vm8498_vm2 = vcmp.ge.f32.partialorder %v8466_v3, 0.0  ;;  %v8530_v58 = vmul.f32 0.1, %v8466_v3  ;;  %8382 = vst.msk [vmem:[#allocation2 + $0x20] sm:$0xff] %vm687_vm9, %v8351_v27  ;;  %v8354_v52 = vadd.f32 %v10337_v1, %v7972_v48  ;;  %v7973_v19 = vld [vmem:[#allocation2 + $0x40] sm:$0xff] }
 0x2c1   : > { %7887 = vst.msk [vmem:[#allocation2 + $0x60] sm:$0xff] %vm687_vm9, %v7856_v44  ;;  %v7859_v2 = vadd.f32 %v10305_v49, %v7365_v9  ;;  %v9461_v25 = vpack.c.bf16 %v8564_v20, %v8564_v20  ;;  %v8469_v4 = vld [vmem:[#allocation2 + $0x18] sm:$0xff]  ;;  %v8240_v32 = vpop.f32.mrf.mxu1 }
 0x2c2   : > { %v7769_v37 = vpop.f32.mrf.mxu0  ;;  %v8562_v29 = vsel %vm8498_vm2, %v8466_v3, %v8530_v58  ;;  %vm8501_vm3 = vcmp.ge.f32.partialorder %v8469_v4, 0.0  ;;  %v8533_v40 = vmul.f32 0.1, %v8469_v4  ;;  %8385 = vst.msk [vmem:[#allocation2 + $0x38] sm:$0xff] %vm687_vm9, %v8354_v52  ;;  %v8352_v51 = vadd.f32 %v8240_v32, %v7970_v35  ;;  %v7976_v30 = vld [vmem:[#allocation2 + $0x58] sm:$0xff] }
 0x2c3   : > { %7890 = vst.msk [vmem:[#allocation2 + $0x78] sm:$0xff] %vm687_vm9, %v7859_v2  ;;  %v7857_v59 = vadd.f32 %v7769_v37, %v7363_v18  ;;  %v9459_v62 = vpack.c.bf16 %v8562_v29, %v8562_v29  ;;  %v8467_v5 = vld [vmem:[#allocation2 + $0x8] sm:$0xff]  ;;  %v10340_v33 = vpop.f32.mrf.mxu1  ;;  %v7370_v37 = vld [vmem:[#allocation2 + $0xa0] sm:$0xff] }
 0x2c4   : > { %v10308_v15 = vpop.f32.mrf.mxu0  ;;  %8724 = vst.msk [vmem:[%s12598_s15 + $0x8] sm:$0xf] %vm2890_vm10, %v9461_v25  ;;  %v8565_v42 = vsel %vm8501_vm3, %v8469_v4, %v8533_v40  ;;  %vm8499_vm4 = vcmp.ge.f32.partialorder %v8467_v5, 0.0  ;;  %v8531_v34 = vmul.f32 0.1, %v8467_v5  ;;  %v8357_v61 = vadd.f32 %v10340_v33, %v7975_v28  ;;  %v7974_v31 = vld [vmem:[#allocation2 + $0x48] sm:$0xff] }
 0x2c5   : > { %7888 = vst.msk [vmem:[#allocation2 + $0x68] sm:$0xff] %vm687_vm9, %v7857_v59  ;;  %v7862_v36 = vadd.f32 %v10308_v15, %v7368_v11  ;;  %8383 = vst.msk [vmem:[#allocation2 + $0x28] sm:$0xff] %vm687_vm9, %v8352_v51  ;;  %v9462_v63 = vpack.c.bf16 %v8565_v42, %v8565_v42  ;;  %v8472_v10 = vld [vmem:[#allocation2 + $0x30] sm:$0xff]  ;;  %v8253_v56 = vpop.f32.mrf.mxu1  ;;  %v7373_v15 = vld [vmem:[#allocation2 + $0xb8] sm:$0xff] }
 0x2c6   : > { %v7782_v46 = vpop.f32.mrf.mxu0  ;;  %8722 = vst.msk [vmem:[%s12598_s15] sm:$0xf] %vm2890_vm10, %v9459_v62  ;;  %v8563_v38 = vsel %vm8499_vm4, %v8467_v5, %v8531_v34  ;;  %vm8504_vm5 = vcmp.ge.f32.partialorder %v8472_v10, 0.0  ;;  %v8536_v21 = vmul.f32 0.1, %v8472_v10  ;;  %v8355_v45 = vadd.f32 %v8253_v56, %v7973_v19  ;;  %v7979_v49 = vld [vmem:[#allocation2 + $0x70] sm:$0xff] }
 0x2c7   : > { %7893 = vst.msk [vmem:[#allocation2 + $0x90] sm:$0xff] %vm687_vm9, %v7862_v36  ;;  %v7860_v22 = vadd.f32 %v7782_v46, %v7366_v55  ;;  %8388 = vst.msk [vmem:[#allocation2 + $0x50] sm:$0xff] %vm687_vm9, %v8357_v61  ;;  %v9460_v54 = vpack.c.bf16 %v8563_v38, %v8563_v38  ;;  %v8470_v43 = vld [vmem:[#allocation2 + $0x20] sm:$0xff]  ;;  %v10341_v0 = vpop.f32.mrf.mxu1  ;;  %v7371_v46 = vld [vmem:[#allocation2 + $0xa8] sm:$0xff] }
 0x2c8   : > { %v10309_v13 = vpop.f32.mrf.mxu0  ;;  %8725 = vst.msk [vmem:[%s12598_s15 + $0xc] sm:$0xf] %vm2890_vm10, %v9462_v63  ;;  %v8568_v50 = vsel %vm8504_vm5, %v8472_v10, %v8536_v21  ;;  %vm8502_vm6 = vcmp.ge.f32.partialorder %v8470_v43, 0.0  ;;  %v8534_v26 = vmul.f32 0.1, %v8470_v43  ;;  %v8358_v39 = vadd.f32 %v10341_v0, %v7976_v30  ;;  %v7977_v52 = vld [vmem:[#allocation2 + $0x60] sm:$0xff] }
 0x2c9   : > { %7891 = vst.msk [vmem:[#allocation2 + $0x80] sm:$0xff] %vm687_vm9, %v7860_v22  ;;  %v7863_v24 = vadd.f32 %v10309_v13, %v7369_v6  ;;  %8386 = vst.msk [vmem:[#allocation2 + $0x40] sm:$0xff] %vm687_vm9, %v8355_v45  ;;  %v9465_v41 = vpack.c.bf16 %v8568_v50, %v8568_v50  ;;  %v8473_v60 = vld [vmem:[#allocation2 + $0x38] sm:$0xff]  ;;  %v8256_v17 = vpop.f32.mrf.mxu1  ;;  %v7376_v13 = vld [vmem:[#allocation2 + $0xd0] sm:$0xff] }
 0x2ca   : > { %v7785_v47 = vpop.f32.mrf.mxu0  ;;  %8723 = vst.msk [vmem:[%s12598_s15 + $0x4] sm:$0xf] %vm2890_vm10, %v9460_v54  ;;  %v8566_v8 = vsel %vm8502_vm6, %v8470_v43, %v8534_v26  ;;  %vm8505_vm7 = vcmp.ge.f32.partialorder %v8473_v60, 0.0  ;;  %v8537_v44 = vmul.f32 0.1, %v8473_v60  ;;  %v8356_v12 = vadd.f32 %v8256_v17, %v7974_v31  ;;  %v7980_v51 = vld [vmem:[#allocation2 + $0x78] sm:$0xff] }
 0x2cb   : > { %7894 = vst.msk [vmem:[#allocation2 + $0x98] sm:$0xff] %vm687_vm9, %v7863_v24  ;;  %v7861_v57 = vadd.f32 %v7785_v47, %v7367_v23  ;;  %8389 = vst.msk [vmem:[#allocation2 + $0x58] sm:$0xff] %vm687_vm9, %v8358_v39  ;;  %v9463_v16 = vpack.c.bf16 %v8566_v8, %v8566_v8  ;;  %v10344_v14 = vpop.f32.mrf.mxu1  ;;  %v7374_v47 = vld [vmem:[#allocation2 + $0xc0] sm:$0xff] }
 0x2cc   : > { %v10312_v7 = vpop.f32.mrf.mxu0  ;;  %8728 = vst.msk [vmem:[%s12598_s15 + $0x18] sm:$0xf] %vm2890_vm10, %v9465_v41  ;;  %v8471_v9 = vld [vmem:[#allocation2 + $0x28] sm:$0xff]  ;;  %v8569_v3 = vsel %vm8505_vm7, %v8473_v60, %v8537_v44  ;;  %v8361_v1 = vadd.f32 %v10344_v14, %v7979_v49 }
 0x2cd   : > { %7892 = vst.msk [vmem:[#allocation2 + $0x88] sm:$0xff] %vm687_vm9, %v7861_v57  ;;  %v7866_v27 = vadd.f32 %v10312_v7, %v7372_v53  ;;  %vm8503_vm8 = vcmp.ge.f32.partialorder %v8471_v9, 0.0  ;;  %v8535_v48 = vmul.f32 0.1, %v8471_v9  ;;  %8387 = vst.msk [vmem:[#allocation2 + $0x48] sm:$0xff] %vm687_vm9, %v8356_v12  ;;  %v9466_v20 = vpack.c.bf16 %v8569_v3, %v8569_v3  ;;  %v8269_v18 = vpop.f32.mrf.mxu1  ;;  %v7978_v61 = vld [vmem:[#allocation2 + $0x68] sm:$0xff] }
 0x2ce   : > { %v7798_v2 = vpop.f32.mrf.mxu0  ;;  %8726 = vst.msk [vmem:[%s12598_s15 + $0x10] sm:$0xf] %vm2890_vm10, %v9463_v16  ;;  %v8476_v58 = vld [vmem:[#allocation2 + $0x50] sm:$0xff]  ;;  %v8359_v59 = vadd.f32 %v8269_v18, %v7977_v52  ;;  %v7377_v7 = vld [vmem:[#allocation2 + $0xd8] sm:$0xff] }
 0x2cf   : > { %7897 = vst.msk [vmem:[#allocation2 + $0xb0] sm:$0xff] %vm687_vm9, %v7866_v27  ;;  %v7864_v25 = vadd.f32 %v7798_v2, %v7370_v37  ;;  %v8567_v35 = vsel %vm8503_vm8, %v8471_v9, %v8535_v48  ;;  %vm8508_vm11 = vcmp.ge.f32.partialorder %v8476_v58, 0.0  ;;  %v8540_v32 = vmul.f32 0.1, %v8476_v58  ;;  %8392 = vst.msk [vmem:[#allocation2 + $0x70] sm:$0xff] %vm687_vm9, %v8361_v1  ;;  %v10345_v11 = vpop.f32.mrf.mxu1  ;;  %v7983_v45 = vld [vmem:[#allocation2 + $0x90] sm:$0xff] }
 0x2d0   : > { %v10313_v4 = vpop.f32.mrf.mxu0  ;;  %8729 = vst.msk [vmem:[%s12598_s15 + $0x1c] sm:$0xf] %vm2890_vm10, %v9466_v20  ;;  %v9464_v29 = vpack.c.bf16 %v8567_v35, %v8567_v35  ;;  %v8474_v40 = vld [vmem:[#allocation2 + $0x40] sm:$0xff]  ;;  %v8362_v36 = vadd.f32 %v10345_v11, %v7980_v51  ;;  %v7375_v2 = vld [vmem:[#allocation2 + $0xc8] sm:$0xff] }
 0x2d1   : > { %7895 = vst.msk [vmem:[#allocation2 + $0xa0] sm:$0xff] %vm687_vm9, %v7864_v25  ;;  %v7867_v62 = vadd.f32 %v10313_v4, %v7373_v15  ;;  %v8572_v28 = vsel %vm8508_vm11, %v8476_v58, %v8540_v32  ;;  %vm8506_vm12 = vcmp.ge.f32.partialorder %v8474_v40, 0.0  ;;  %v8538_v33 = vmul.f32 0.1, %v8474_v40  ;;  %8390 = vst.msk [vmem:[#allocation2 + $0x60] sm:$0xff] %vm687_vm9, %v8359_v59  ;;  %v8272_v55 = vpop.f32.mrf.mxu1  ;;  %v7981_v39 = vld [vmem:[#allocation2 + $0x80] sm:$0xff] }
 0x2d2   : > { %v7801_v5 = vpop.f32.mrf.mxu0  ;;  %8727 = vst.msk [vmem:[%s12598_s15 + $0x14] sm:$0xf] %vm2890_vm10, %v9464_v29  ;;  %v9469_v42 = vpack.c.bf16 %v8572_v28, %v8572_v28  ;;  %v8477_v34 = vld [vmem:[#allocation2 + $0x58] sm:$0xff]  ;;  %v8360_v22 = vadd.f32 %v8272_v55, %v7978_v61  ;;  %v7380_v4 = vld [vmem:[#allocation2 + $0xf0] sm:$0x7] }
 0x2d3   : > { %7898 = vst.msk [vmem:[#allocation2 + $0xb8] sm:$0xff] %vm687_vm9, %v7867_v62  ;;  %v7865_v63 = vadd.f32 %v7801_v5, %v7371_v46  ;;  %v8570_v19 = vsel %vm8506_vm12, %v8474_v40, %v8538_v33  ;;  %vm8509_vm0 = vcmp.ge.f32.partialorder %v8477_v34, 0.0  ;;  %v8541_v56 = vmul.f32 0.1, %v8477_v34  ;;  %8393 = vst.msk [vmem:[#allocation2 + $0x78] sm:$0xff] %vm687_vm9, %v8362_v36  ;;  %v10348_v6 = vpop.f32.mrf.mxu1  ;;  %v7984_v12 = vld [vmem:[#allocation2 + $0x98] sm:$0xff] }
 0x2d4   : > { %v10316_v10 = vpop.f32.mrf.mxu0  ;;  %8732 = vst.msk [vmem:[%s12598_s15 + $0x28] sm:$0xf] %vm2890_vm10, %v9469_v42  ;;  %v9467_v38 = vpack.c.bf16 %v8570_v19, %v8570_v19  ;;  %v8475_v21 = vld [vmem:[#allocation2 + $0x48] sm:$0xff]  ;;  %v8365_v24 = vadd.f32 %v10348_v6, %v7983_v45  ;;  %v7378_v5 = vld [vmem:[#allocation2 + $0xe0] sm:$0xff] }
 0x2d5   : > { %7896 = vst.msk [vmem:[#allocation2 + $0xa8] sm:$0xff] %vm687_vm9, %v7865_v63  ;;  %v7870_v54 = vadd.f32 %v10316_v10, %v7376_v13  ;;  %v8573_v30 = vsel %vm8509_vm0, %v8477_v34, %v8541_v56  ;;  %vm8507_vm1 = vcmp.ge.f32.partialorder %v8475_v21, 0.0  ;;  %v8539_v0 = vmul.f32 0.1, %v8475_v21  ;;  %8391 = vst.msk [vmem:[#allocation2 + $0x68] sm:$0xff] %vm687_vm9, %v8360_v22  ;;  %v8285_v23 = vpop.f32.mrf.mxu1  ;;  %v7982_v1 = vld [vmem:[#allocation2 + $0x88] sm:$0xff] }
 0x2d6   : > { %v7814_v43 = vpop.f32.mrf.mxu0  ;;  %8730 = vst.msk [vmem:[%s12598_s15 + $0x20] sm:$0xf] %vm2890_vm10, %v9467_v38  ;;  %v9470_v50 = vpack.c.bf16 %v8573_v30, %v8573_v30  ;;  %v8480_v26 = vld [vmem:[#allocation2 + $0x70] sm:$0xff]  ;;  %v8363_v57 = vadd.f32 %v8285_v23, %v7981_v39  ;;  %v7379_v6 = vld [vmem:[#allocation2 + $0xe8] sm:$0xff] }
 0x2d7   : > { %7901 = vst.msk [vmem:[#allocation2 + $0xd0] sm:$0xff] %vm687_vm9, %v7870_v54  ;;  %v7868_v41 = vadd.f32 %v7814_v43, %v7374_v47  ;;  %v8571_v31 = vsel %vm8507_vm1, %v8475_v21, %v8539_v0  ;;  %vm8512_vm2 = vcmp.ge.f32.partialorder %v8480_v26, 0.0  ;;  %v8544_v17 = vmul.f32 0.1, %v8480_v26  ;;  %8396 = vst.msk [vmem:[#allocation2 + $0x90] sm:$0xff] %vm687_vm9, %v8365_v24  ;;  %v10349_v53 = vpop.f32.mrf.mxu1  ;;  %v7987_v59 = vld [vmem:[#allocation2 + $0xb0] sm:$0xff] }
 0x2d8   : > { %v10317_v60 = vpop.f32.mrf.mxu0  ;;  %8733 = vst.msk [vmem:[%s12598_s15 + $0x2c] sm:$0xf] %vm2890_vm10, %v9470_v50  ;;  %v9468_v8 = vpack.c.bf16 %v8571_v31, %v8571_v31  ;;  %v8478_v44 = vld [vmem:[#allocation2 + $0x60] sm:$0xff]  ;;  %v8366_v27 = vadd.f32 %v10349_v53, %v7984_v12 }
 0x2d9   : > { %7899 = vst.msk [vmem:[#allocation2 + $0xc0] sm:$0xff] %vm687_vm9, %v7868_v41  ;;  %v7871_v16 = vadd.f32 %v10317_v60, %v7377_v7  ;;  %v8576_v49 = vsel %vm8512_vm2, %v8480_v26, %v8544_v17  ;;  %vm8510_vm3 = vcmp.ge.f32.partialorder %v8478_v44, 0.0  ;;  %v8542_v14 = vmul.f32 0.1, %v8478_v44  ;;  %8394 = vst.msk [vmem:[#allocation2 + $0x80] sm:$0xff] %vm687_vm9, %v8363_v57  ;;  %v8288_v37 = vpop.f32.mrf.mxu1  ;;  %v7985_v36 = vld [vmem:[#allocation2 + $0xa0] sm:$0xff] }
 0x2da   : > { %v7817_v9 = vpop.f32.mrf.mxu0  ;;  %8731 = vst.msk [vmem:[%s12598_s15 + $0x24] sm:$0xf] %vm2890_vm10, %v9468_v8  ;;  %v9473_v3 = vpack.c.bf16 %v8576_v49, %v8576_v49  ;;  %v8481_v48 = vld [vmem:[#allocation2 + $0x78] sm:$0xff]  ;;  %v8364_v25 = vadd.f32 %v8288_v37, %v7982_v1 }
 0x2db   : > { %7902 = vst.msk [vmem:[#allocation2 + $0xd8] sm:$0xff] %vm687_vm9, %v7871_v16  ;;  %v7869_v20 = vadd.f32 %v7817_v9, %v7375_v2  ;;  %v8574_v52 = vsel %vm8510_vm3, %v8478_v44, %v8542_v14  ;;  %vm8513_vm4 = vcmp.ge.f32.partialorder %v8481_v48, 0.0  ;;  %v8545_v18 = vmul.f32 0.1, %v8481_v48  ;;  %8397 = vst.msk [vmem:[#allocation2 + $0x98] sm:$0xff] %vm687_vm9, %v8366_v27  ;;  %v10352_v15 = vpop.f32.mrf.mxu1  ;;  %v7988_v56 = vld [vmem:[#allocation2 + $0xb8] sm:$0xff] }
 0x2dc   : > { %v10320_v58 = vpop.f32.mrf.mxu0  ;;  %8736 = vst.msk [vmem:[%s12598_s15 + $0x38] sm:$0xf] %vm2890_vm10, %v9473_v3  ;;  %v9471_v35 = vpack.c.bf16 %v8574_v52, %v8574_v52  ;;  %v8479_v32 = vld [vmem:[#allocation2 + $0x68] sm:$0xff]  ;;  %v8369_v62 = vadd.f32 %v10352_v15, %v7987_v59 }
 0x2dd   : > { %7900 = vst.msk [vmem:[#allocation2 + $0xc8] sm:$0xff] %vm687_vm9, %v7869_v20  ;;  %v7874_v29 = vadd.f32 %v10320_v58, %v7380_v4  ;;  %v8577_v51 = vsel %vm8513_vm4, %v8481_v48, %v8545_v18  ;;  %vm8511_vm5 = vcmp.ge.f32.partialorder %v8479_v32, 0.0  ;;  %v8543_v11 = vmul.f32 0.1, %v8479_v32  ;;  %8395 = vst.msk [vmem:[#allocation2 + $0x88] sm:$0xff] %vm687_vm9, %v8364_v25  ;;  %v8301_v46 = vpop.f32.mrf.mxu1  ;;  %v7986_v30 = vld [vmem:[#allocation2 + $0xa8] sm:$0xff] }
 0x2de   : > { %v7830_v40 = vpop.f32.mrf.mxu0  ;;  %8734 = vst.msk [vmem:[%s12598_s15 + $0x30] sm:$0xf] %vm2890_vm10, %v9471_v35  ;;  %v9474_v28 = vpack.c.bf16 %v8577_v51, %v8577_v51  ;;  %v8484_v33 = vld [vmem:[#allocation2 + $0x90] sm:$0xff]  ;;  %v8367_v63 = vadd.f32 %v8301_v46, %v7985_v36  ;;  %v8410_v48 = vld [vmem:[#allocation2 + $0xfa] sm:$0x3f] }
 0x2df   : > { %7905 = vst.msk [vmem:[#allocation2 + $0xf0] sm:$0x7] %vm2435_vm15, %v7874_v29  ;;  %v7872_v42 = vadd.f32 %v7830_v40, %v7378_v5  ;;  %v8575_v61 = vsel %vm8511_vm5, %v8479_v32, %v8543_v11  ;;  %vm8516_vm6 = vcmp.ge.f32.partialorder %v8484_v33, 0.0  ;;  %v8548_v55 = vmul.f32 0.1, %v8484_v33  ;;  %v10353_v22 = vpop.f32.mrf.mxu1  ;;  %v7991_v60 = vld [vmem:[#allocation2 + $0xd0] sm:$0xff] }
 0x2e0   : > { %v10321_v34 = vpop.f32.mrf.mxu0  ;;  %8400 = vst.msk [vmem:[#allocation2 + $0xb0] sm:$0xff] %vm687_vm9, %v8369_v62  ;;  %v9472_v10 = vpack.c.bf16 %v8575_v61, %v8575_v61  ;;  %v8482_v19 = vld [vmem:[#allocation2 + $0x80] sm:$0xff]  ;;  %8398 = vst.msk [vmem:[#allocation2 + $0xa0] sm:$0xff] %vm687_vm9, %v8367_v63  ;;  %v8370_v45 = vadd.f32 %v10353_v22, %v7988_v56 }
 0x2e1   : > { %8737 = vst.msk [vmem:[%s12598_s15 + $0x3c] sm:$0xf] %vm2890_vm10, %v9474_v28  ;;  %v8580_v38 = vsel %vm8516_vm6, %v8484_v33, %v8548_v55  ;;  %vm8514_vm15 = vcmp.ge.f32.partialorder %v8482_v19, 0.0  ;;  %v8546_v21 = vmul.f32 0.1, %v8482_v19  ;;  %v8304_v0 = vpop.f32.mrf.mxu1  ;;  %v7989_v9 = vld [vmem:[#allocation2 + $0xc0] sm:$0xff] }
 0x2e2   : > { %7903 = vst.msk [vmem:[#allocation2 + $0xe0] sm:$0xff] %vm687_vm9, %v7872_v42  ;;  %v7833_v13 = vpop.f32.mrf.mxu0  ;;  %v9477_v54 = vpack.c.bf16 %v8580_v38, %v8580_v38  ;;  %v8485_v43 = vld [vmem:[#allocation2 + $0x98] sm:$0xff]  ;;  %8401 = vst.msk [vmem:[#allocation2 + $0xb8] sm:$0xff] %vm687_vm9, %v8370_v45  ;;  %v8368_v39 = vadd.f32 %v8304_v0, %v7986_v30 }
 0x2e3   : > { %8735 = vst.msk [vmem:[%s12598_s15 + $0x34] sm:$0xf] %vm2890_vm10, %v9472_v10  ;;  %v7873_v24 = vadd.f32 %v7833_v13, %v7379_v6  ;;  %v8578_v50 = vsel %vm8514_vm15, %v8482_v19, %v8546_v21  ;;  %vm8517_vm7 = vcmp.ge.f32.partialorder %v8485_v43, 0.0  ;;  %v8549_v26 = vmul.f32 0.1, %v8485_v43  ;;  %v10356_v31 = vpop.f32.mrf.mxu1  ;;  %v7992_v20 = vld [vmem:[#allocation2 + $0xd8] sm:$0xff] }
 0x2e4   : > { %v8455_v47 = vpop.f32.mrf.mxu0  ;;  %8740 = vst.msk [vmem:[%s12598_s15 + $0x48] sm:$0xf] %vm2890_vm10, %v9477_v54  ;;  %v9475_v23 = vpack.c.bf16 %v8578_v50, %v8578_v50  ;;  %v8483_v41 = vld [vmem:[#allocation2 + $0x88] sm:$0xff]  ;;  %v8373_v8 = vadd.f32 %v10356_v31, %v7991_v60 }
 0x2e5   : > { %7904 = vst.msk [vmem:[#allocation2 + $0xe8] sm:$0xff] %vm687_vm9, %v7873_v24  ;;  %v8581_v57 = vsel %vm8517_vm7, %v8485_v43, %v8549_v26  ;;  %vm8515_vm8 = vcmp.ge.f32.partialorder %v8483_v41, 0.0  ;;  %v8547_v7 = vmul.f32 0.1, %v8483_v41  ;;  %8399 = vst.msk [vmem:[#allocation2 + $0xa8] sm:$0xff] %vm687_vm9, %v8368_v39  ;;  %v8317_v49 = vpop.f32.mrf.mxu1  ;;  %v7990_v15 = vld [vmem:[#allocation2 + $0xc8] sm:$0xff] }
 0x2e6   : > { %v10366_v17 = vpop.f32.mrf.mxu0  ;;  %v8409_v44 = vld [vmem:[#allocation2 + $0xf2] sm:$0xff]  ;;  %8738 = vst.msk [vmem:[%s12598_s15 + $0x40] sm:$0xf] %vm2890_vm10, %v9475_v23  ;;  %v9478_v12 = vpack.c.bf16 %v8581_v57, %v8581_v57  ;;  %v8371_v3 = vadd.f32 %v8317_v49, %v7989_v9  ;;  %v7995_v28 = vld [vmem:[#allocation2 + $0xf0] sm:$0x3] }
 0x2e7   : > { %v8488_v53 = vld [vmem:[#allocation2 + $0xb0] sm:$0xff]  ;;  %v8462_v16 = vadd.f32 %v8455_v47, %v8409_v44  ;;  %v8579_v27 = vsel %vm8515_vm8, %v8483_v41, %v8547_v7  ;;  %8404 = vst.msk [vmem:[#allocation2 + $0xd0] sm:$0xff] %vm687_vm9, %v8373_v8  ;;  %v8486_v37 = vld [vmem:[#allocation2 + $0xa0] sm:$0xff]  ;;  %v10357_v58 = vpop.f32.mrf.mxu1 }
 0x2e8   : > { %v8458_v14 = vpop.f32.mrf.mxu0  ;;  %vm8520_vm11 = vcmp.ge.f32.partialorder %v8488_v53, 0.0  ;;  %v8552_v2 = vmul.f32 0.1, %v8488_v53  ;;  %8741 = vst.msk [vmem:[%s12598_s15 + $0x4c] sm:$0xf] %vm2890_vm10, %v9478_v12  ;;  %v9476_v1 = vpack.c.bf16 %v8579_v27, %v8579_v27  ;;  %vm8518_vm12 = vcmp.ge.f32.partialorder %v8486_v37, 0.0 }
 0x2e9   : > { %8464 = vst.msk [vmem:[#allocation2 + $0xf2] sm:$0xff] %vm687_vm9, %v8462_v16  ;;  %v8463_v52 = vadd.f32 %v8458_v14, %v8410_v48  ;;  %v8550_v4 = vmul.f32 0.1, %v8486_v37  ;;  %8402 = vst.msk [vmem:[#allocation2 + $0xc0] sm:$0xff] %vm687_vm9, %v8371_v3  ;;  %v8374_v35 = vadd.f32 %v10357_v58, %v7992_v20  ;;  %v8489_v59 = vld [vmem:[#allocation2 + $0xb8] sm:$0xff]  ;;  %v8320_v29 = vpop.f32.mrf.mxu1  ;;  %v7993_v55 = vld [vmem:[#allocation2 + $0xe0] sm:$0xff] }
 0x2ea   : > { %v10367_v18 = vpop.f32.mrf.mxu0  ;;  %v8584_v25 = vsel %vm8520_vm11, %v8488_v53, %v8552_v2  ;;  %8739 = vst.msk [vmem:[%s12598_s15 + $0x44] sm:$0xf] %vm2890_vm10, %v9476_v1  ;;  %vm8521_vm0 = vcmp.ge.f32.partialorder %v8489_v59, 0.0  ;;  %v8553_v51 = vmul.f32 0.1, %v8489_v59  ;;  %v8372_v11 = vadd.f32 %v8320_v29, %v7990_v15 }
 0x2eb   : > { %v9481_v32 = vpack.c.bf16 %v8584_v25, %v8584_v25  ;;  %8465 = vst.msk [vmem:[#allocation2 + $0xfa] sm:$0x3f] %vm1772_vm14, %v8463_v52  ;;  %v8582_v40 = vsel %vm8518_vm12, %v8486_v37, %v8550_v4  ;;  %v10360_v33 = vpop.f32.mrf.mxu1 }
 0x2ec   : > { %8405 = vst.msk [vmem:[#allocation2 + $0xd8] sm:$0xff] %vm687_vm9, %v8374_v35  ;;  %v9479_v62 = vpack.c.bf16 %v8582_v40, %v8582_v40  ;;  %v8487_v5 = vld [vmem:[#allocation2 + $0xa8] sm:$0xff]  ;;  %v8585_v36 = vsel %vm8521_vm0, %v8489_v59, %v8553_v51  ;;  %8403 = vst.msk [vmem:[#allocation2 + $0xc8] sm:$0xff] %vm687_vm9, %v8372_v11  ;;  %v8377_v42 = vadd.f32 %v10360_v33, %v7995_v28 }
 0x2ed   : > { %8744 = vst.msk [vmem:[%s12598_s15 + $0x58] sm:$0xf] %vm2890_vm10, %v9481_v32  ;;  %vm8519_vm1 = vcmp.ge.f32.partialorder %v8487_v5, 0.0  ;;  %v8551_v46 = vmul.f32 0.1, %v8487_v5  ;;  %v9482_v34 = vpack.c.bf16 %v8585_v36, %v8585_v36  ;;  %v8333_v63 = vpop.f32.mrf.mxu1  ;;  %v7994_v0 = vld [vmem:[#allocation2 + $0xe8] sm:$0xff] }
 0x2ee   : > { %8742 = vst.msk [vmem:[%s12598_s15 + $0x50] sm:$0xf] %vm2890_vm10, %v9479_v62  ;;  %v8492_v61 = vld [vmem:[#allocation2 + $0xd0] sm:$0xff]  ;;  %v8375_v56 = vadd.f32 %v8333_v63, %v7993_v55 }
 0x2ef   : > { %v8583_v10 = vsel %vm8519_vm1, %v8487_v5, %v8551_v46  ;;  %vm8524_vm14 = vcmp.ge.f32.partialorder %v8492_v61, 0.0  ;;  %v8556_v19 = vmul.f32 0.1, %v8492_v61  ;;  %8408 = vst.msk [vmem:[#allocation2 + $0xf0] sm:$0x3] %vm1820_vm13, %v8377_v42  ;;  %v10361_v38 = vpop.f32.mrf.mxu1 }
 0x2f0   : > { %8745 = vst.msk [vmem:[%s12598_s15 + $0x5c] sm:$0xf] %vm2890_vm10, %v9482_v34  ;;  %v9480_v22 = vpack.c.bf16 %v8583_v10, %v8583_v10  ;;  %v8490_v13 = vld [vmem:[#allocation2 + $0xc0] sm:$0xff] }
 0x2f1   : > { %v8588_v21 = vsel %vm8524_vm14, %v8492_v61, %v8556_v19  ;;  %vm8522_vm2 = vcmp.ge.f32.partialorder %v8490_v13, 0.0  ;;  %v8554_v45 = vmul.f32 0.1, %v8490_v13  ;;  %8406 = vst.msk [vmem:[#allocation2 + $0xe0] sm:$0xff] %vm687_vm9, %v8375_v56  ;;  %v8336_v24 = vpop.f32.mrf.mxu1 }
 0x2f2   : > { %v8497_v6 = vld [vmem:[#allocation2 + $0xf8] sm:$0xff]  ;;  %8743 = vst.msk [vmem:[%s12598_s15 + $0x54] sm:$0xf] %vm2890_vm10, %v9480_v22  ;;  %v9485_v54 = vpack.c.bf16 %v8588_v21, %v8588_v21  ;;  %v8376_v26 = vadd.f32 %v8336_v24, %v7994_v0 }
 0x2f3   : > { %v8493_v43 = vld [vmem:[#allocation2 + $0xd8] sm:$0xff]  ;;  %vm8529_vm3 = vcmp.ge.f32.partialorder %v8497_v6, 0.0  ;;  %v8561_v30 = vmul.f32 0.1, %v8497_v6  ;;  %v8586_v47 = vsel %vm8522_vm2, %v8490_v13, %v8554_v45  ;;  %v8491_v41 = vld [vmem:[#allocation2 + $0xc8] sm:$0xff] }
 0x2f4   : > { %vm8525_vm13 = vcmp.ge.f32.partialorder %v8493_v43, 0.0  ;;  %v8557_v50 = vmul.f32 0.1, %v8493_v43  ;;  %8748 = vst.msk [vmem:[%s12598_s15 + $0x68] sm:$0xf] %vm2890_vm10, %v9485_v54  ;;  %v9483_v39 = vpack.c.bf16 %v8586_v47, %v8586_v47  ;;  %vm8523_vm4 = vcmp.ge.f32.partialorder %v8491_v41, 0.0 }
 0x2f5   : > { %v8593_v23 = vsel %vm8529_vm3, %v8497_v6, %v8561_v30  ;;  %v8555_v17 = vmul.f32 0.1, %v8491_v41  ;;  %8407 = vst.msk [vmem:[#allocation2 + $0xe8] sm:$0xff] %vm687_vm9, %v8376_v26 }
 0x2f6   : > { %v8589_v60 = vsel %vm8525_vm13, %v8493_v43, %v8557_v50  ;;  %v9490_v31 = vpack.c.bf16 %v8593_v23, %v8593_v23  ;;  %8746 = vst.msk [vmem:[%s12598_s15 + $0x60] sm:$0xf] %vm2890_vm10, %v9483_v39  ;;  %v8496_v7 = vld [vmem:[#allocation2 + $0xf0] sm:$0xff] }
 0x2f7   : > { %v9486_v57 = vpack.c.bf16 %v8589_v60, %v8589_v60  ;;  %v8587_v8 = vsel %vm8523_vm4, %v8491_v41, %v8555_v17  ;;  %vm8528_vm5 = vcmp.ge.f32.partialorder %v8496_v7, 0.0  ;;  %v8560_v44 = vmul.f32 0.1, %v8496_v7 }
 0x2f8   : > { %8753 = vst.msk [vmem:[%s12598_s15 + $0x7c] sm:$0xf] %vm2890_vm10, %v9490_v31  ;;  %v9484_v12 = vpack.c.bf16 %v8587_v8, %v8587_v8  ;;  %v8494_v53 = vld [vmem:[#allocation2 + $0xe0] sm:$0xff] }
 0x2f9   : > { %8749 = vst.msk [vmem:[%s12598_s15 + $0x6c] sm:$0xf] %vm2890_vm10, %v9486_v57  ;;  %v8592_v16 = vsel %vm8528_vm5, %v8496_v7, %v8560_v44  ;;  %vm8526_vm6 = vcmp.ge.f32.partialorder %v8494_v53, 0.0  ;;  %v8558_v9 = vmul.f32 0.1, %v8494_v53 }
 0x2fa   : > { %8747 = vst.msk [vmem:[%s12598_s15 + $0x64] sm:$0xf] %vm2890_vm10, %v9484_v12  ;;  %v9489_v49 = vpack.c.bf16 %v8592_v16, %v8592_v16 }
 0x2fb   : > { %v8590_v14 = vsel %vm8526_vm6, %v8494_v53, %v8558_v9 }
 0x2fc   : > { %8752 = vst.msk [vmem:[%s12598_s15 + $0x78] sm:$0xf] %vm2890_vm10, %v9489_v49  ;;  %v9487_v27 = vpack.c.bf16 %v8590_v14, %v8590_v14  ;;  %v8495_v2 = vld [vmem:[#allocation2 + $0xe8] sm:$0xff] }
 0x2fd   : > { %vm8527_vm9 = vcmp.ge.f32.partialorder %v8495_v2, 0.0  ;;  %v8559_v3 = vmul.f32 0.1, %v8495_v2 }
 0x2fe   : > { %8750 = vst.msk [vmem:[%s12598_s15 + $0x70] sm:$0xf] %vm2890_vm10, %v9487_v27 }
 0x2ff   : > { %v8591_v48 = vsel %vm8527_vm9, %v8495_v2, %v8559_v3 }
 0x300   : > { %v9488_v1 = vpack.c.bf16 %v8591_v48, %v8591_v48 }
 0x302   : > { %8751 = vst.msk [vmem:[%s12598_s15 + $0x74] sm:$0xf] %vm2890_vm10, %v9488_v1 }
 0x303 PF: > { %s14_s17 = sadd.s32 1, %s10668_s17   ;;  %s12723_s15 = smov %s10664_s16 }
 0x304   : > { %p11_p5 = scmp.ge.s32.totalorder %s14_s17, 6   ;;  %s12724_s16 = smov %s12726_s18 }
 0x306   :  { %13 = sbr.rel (!%p11_p5) target bundleno = 2 (0x2), region = 89 }

</bundles_post_ra>
